<compile_context>
chip_gen: v7x
topology: tpu7x:2x2x1
jax: 0.10.0
libtpu: 0.0.40
codegen_flags: <defaults>
</compile_context>

<pallas_src>
import functools

import jax
import jax.numpy as jnp
from jax.experimental import pallas as pl
from jax.experimental.pallas import tpu as pltpu

LANE = 128   # padded embedding width (lane-dense outputs)
TILE = 256   # row / column / K tile for the (N, N) kernels (multiple of 128)


# ----------------------------------------------------------------------------
# Small helpers
# ----------------------------------------------------------------------------
def _round_up(n, m):
    return ((n + m - 1) // m) * m


def _pad2(x, rows, cols):
    r, c = x.shape
    return jnp.pad(x, ((0, rows - r), (0, cols - c)))


# ----------------------------------------------------------------------------
# Kernel 1: fused modality projection + row L2-normalization  (bf16 output)
# ----------------------------------------------------------------------------
def _proj_norm_kernel(x_ref, w_ref, b_ref, o_ref):
    y = jnp.dot(x_ref[...], w_ref[...], preferred_element_type=jnp.float32) + b_ref[...]
    norm = jnp.sqrt(jnp.sum(y * y, axis=-1, keepdims=True))
    o_ref[...] = (y / jnp.maximum(norm, 1e-12)).astype(o_ref.dtype)


def pallas_project_normalize(x_pad, w_pad, b_pad, tile=TILE):
    n_rows, feat = x_pad.shape
    dp = w_pad.shape[1]
    return pl.pallas_call(
        _proj_norm_kernel,
        grid=(n_rows // tile,),
        in_specs=[
            pl.BlockSpec((tile, feat), lambda i: (i, 0)),
            pl.BlockSpec((feat, dp), lambda i: (0, 0)),
            pl.BlockSpec((1, dp), lambda i: (0, 0)),
        ],
        out_specs=pl.BlockSpec((tile, dp), lambda i: (i, 0)),
        out_shape=jax.ShapeDtypeStruct((n_rows, dp), jnp.bfloat16),
        compiler_params=pltpu.CompilerParams(dimension_semantics=("parallel",)),
        cost_estimate=pl.CostEstimate(
            flops=2 * n_rows * feat * dp, transcendentals=n_rows,
            bytes_accessed=n_rows * feat * 4 + feat * dp * 4 + n_rows * dp * 2),
    )(x_pad, w_pad, b_pad)


# ----------------------------------------------------------------------------
# Kernel 2: cosine similarity  sim[m] = xn[m] @ xn[m]^T  for both modalities
#           in one batched pallas_call (leading squeezed grid axis)
# ----------------------------------------------------------------------------
def _cosine_sim_kernel(a_ref, b_ref, o_ref):
    o_ref[...] = jax.lax.dot_general(
        a_ref[...], b_ref[...], (((1,), (1,)), ((), ())),
        preferred_element_type=jnp.float32,
    ).astype(o_ref.dtype)


def pallas_cosine_sim_batched(xn_stack, tile=TILE):
    m, n, dp = xn_stack.shape
    return pl.pallas_call(
        _cosine_sim_kernel,
        grid=(m, n // tile, n // tile),
        in_specs=[
            pl.BlockSpec((None, tile, dp), lambda b, i, j: (b, i, 0)),
            pl.BlockSpec((None, tile, dp), lambda b, i, j: (b, j, 0)),
        ],
        out_specs=pl.BlockSpec((None, tile, tile), lambda b, i, j: (b, i, j)),
        out_shape=jax.ShapeDtypeStruct((m, n, n), jnp.bfloat16),
        compiler_params=pltpu.CompilerParams(
            dimension_semantics=("parallel", "parallel", "parallel")),
        cost_estimate=pl.CostEstimate(
            flops=2 * m * n * n * dp, transcendentals=0,
            bytes_accessed=2 * m * (n // tile) * n * dp * 2 + m * n * n * 2),
    )(xn_stack, xn_stack)


# ----------------------------------------------------------------------------
# Kernel 3: item-item graph propagation (image + text) fused with attention gate
#   acc_img = image_adj @ E ; acc_txt = text_adj @ E      (K-last reduction)
#   a_m = sum(tanh([img;txt] @ W1 + b1) * w2, -1)          (no (N,D)@(D,1) matmul)
#   h   = softmax([a_img, a_txt]) gated blend
# ----------------------------------------------------------------------------
def _ii_att_fuse_kernel(iadj_ref, tadj_ref, item_ref, w1_ref, b1_ref, w2_ref,
                        h_ref, acc_img, acc_txt):
    k = pl.program_id(1)

    @pl.when(k == 0)
    def _():
        acc_img[...] = jnp.zeros_like(acc_img)
        acc_txt[...] = jnp.zeros_like(acc_txt)

    item = item_ref[...]
    acc_img[...] += jnp.dot(iadj_ref[...], item, preferred_element_type=jnp.float32)
    acc_txt[...] += jnp.dot(tadj_ref[...], item, preferred_element_type=jnp.float32)

    @pl.when(k == pl.num_programs(1) - 1)
    def _():
        img = acc_img[...]
        txt = acc_txt[...]
        tm = img.shape[0]
        stacked = jnp.concatenate([img, txt], axis=0)            # one shared DxD matmul
        q = jnp.tanh(
            jnp.dot(stacked, w1_ref[...], preferred_element_type=jnp.float32)
            + b1_ref[...])
        scores = jnp.sum(q * w2_ref[...], axis=-1, keepdims=True)  # VPU mul + XLU reduce
        a_img = scores[:tm]
        a_txt = scores[tm:]
        m = jnp.maximum(a_img, a_txt)
        e_img = jnp.exp(a_img - m)
        e_txt = jnp.exp(a_txt - m)
        inv = 1.0 / (e_img + e_txt)
        h_ref[...] = (e_img * inv) * img + (e_txt * inv) * txt


def pallas_item_graph_attention(image_adj_pad, text_adj_pad, item_pad,
                                w1_pad, b1_pad, w2row_pad, tile=TILE):
    n, dp = item_pad.shape
    return pl.pallas_call(
        _ii_att_fuse_kernel,
        grid=(n // tile, n // tile),
        in_specs=[
            pl.BlockSpec((tile, tile), lambda i, k: (i, k)),
            pl.BlockSpec((tile, tile), lambda i, k: (i, k)),
            pl.BlockSpec((tile, dp), lambda i, k: (k, 0)),
            pl.BlockSpec((dp, dp), lambda i, k: (0, 0)),
            pl.BlockSpec((1, dp), lambda i, k: (0, 0)),
            pl.BlockSpec((1, dp), lambda i, k: (0, 0)),
        ],
        out_specs=pl.BlockSpec((tile, dp), lambda i, k: (i, 0)),
        out_shape=jax.ShapeDtypeStruct((n, dp), jnp.float32),
        scratch_shapes=[pltpu.VMEM((tile, dp), jnp.float32),
                        pltpu.VMEM((tile, dp), jnp.float32)],
        compiler_params=pltpu.CompilerParams(
            dimension_semantics=("parallel", "arbitrary")),
        cost_estimate=pl.CostEstimate(
            flops=4 * n * n * dp + 4 * n * dp * dp,
            transcendentals=2 * n * dp + 4 * n,
            bytes_accessed=2 * n * n * 2 + (n // tile) * n * dp * 2 + n * dp * 4),
    )(image_adj_pad, text_adj_pad, item_pad, w1_pad, b1_pad, w2row_pad)


# ----------------------------------------------------------------------------
# Kernel 4: one user-item GCN hop  y = A_norm @ x  with fused layer-sum update;
#           the running sum is updated in place (input_output_aliases)
# ----------------------------------------------------------------------------
def _gcn_layer_kernel(adj_ref, x_ref, s_ref, y_ref, snew_ref, acc_ref):
    k = pl.program_id(1)

    @pl.when(k == 0)
    def _():
        acc_ref[...] = jnp.zeros_like(acc_ref)

    acc_ref[...] += jnp.dot(adj_ref[...], x_ref[...],
                            preferred_element_type=jnp.float32)

    @pl.when(k == pl.num_programs(1) - 1)
    def _():
        y = acc_ref[...]
        y_ref[...] = y.astype(y_ref.dtype)          # bf16 feed for the next layer
        snew_ref[...] = s_ref[...] + y              # running sum of layer outputs


def pallas_gcn_layer(adj_pad, x_pad_bf16, sum_pad, tile=TILE):
    n, dp = x_pad_bf16.shape
    return pl.pallas_call(
        _gcn_layer_kernel,
        grid=(n // tile, n // tile),
        in_specs=[
            pl.BlockSpec((tile, tile), lambda i, k: (i, k)),
            pl.BlockSpec((tile, dp), lambda i, k: (k, 0)),
            pl.BlockSpec((tile, dp), lambda i, k: (i, 0)),
        ],
        out_specs=(pl.BlockSpec((tile, dp), lambda i, k: (i, 0)),
                   pl.BlockSpec((tile, dp), lambda i, k: (i, 0))),
        out_shape=(jax.ShapeDtypeStruct((n, dp), jnp.bfloat16),
                   jax.ShapeDtypeStruct((n, dp), jnp.float32)),
        scratch_shapes=[pltpu.VMEM((tile, dp), jnp.float32)],
        input_output_aliases={2: 1},                 # running sum updated in place
        compiler_params=pltpu.CompilerParams(
            dimension_semantics=("parallel", "arbitrary")),
        cost_estimate=pl.CostEstimate(
            flops=2 * n * n * dp, transcendentals=0,
            bytes_accessed=n * n * 2 + (n // tile) * n * dp * 2 + n * dp * 10),
    )(adj_pad, x_pad_bf16, sum_pad)


# ----------------------------------------------------------------------------
# Kernel 5: layer-mean + residual add of L2-normalized h  (fused finalize)
#   users rows of h_full are zero -> norm clamps to eps -> no residual for users
# ----------------------------------------------------------------------------
def _mean_residual_kernel(s_ref, h_ref, o_ref, *, inv_layers):
    h = h_ref[...]
    norm = jnp.sqrt(jnp.sum(h * h, axis=-1, keepdims=True))
    o_ref[...] = s_ref[...] * inv_layers + h / jnp.maximum(norm, 1e-12)


def pallas_mean_residual(sum_pad, h_full_pad, n_layers, tile=TILE):
    n, dp = sum_pad.shape
    return pl.pallas_call(
        functools.partial(_mean_residual_kernel,
                          inv_layers=1.0 / float(n_layers + 1)),
        grid=(n // tile,),
        in_specs=[pl.BlockSpec((tile, dp), lambda i: (i, 0)),
                  pl.BlockSpec((tile, dp), lambda i: (i, 0))],
        out_specs=pl.BlockSpec((tile, dp), lambda i: (i, 0)),
        out_shape=jax.ShapeDtypeStruct((n, dp), jnp.float32),
        compiler_params=pltpu.CompilerParams(dimension_semantics=("parallel",)),
    )(sum_pad, h_full_pad)


# ----------------------------------------------------------------------------
# Plain-JAX glue (graph construction only: top-k, scatter, degree norm)
# ----------------------------------------------------------------------------
def knn_sym_norm_adj(sim, topk):
    """Dense equivalent of build_knn_normalized_graph(..., is_sparse=True, 'sym')."""
    vals, inds = jax.lax.top_k(sim, topk)
    n = sim.shape[0]
    adj = jnp.zeros_like(sim).at[jnp.arange(n)[:, None], inds].set(vals)
    rowsum = jnp.sum(adj, axis=-1)
    d = jnp.where(rowsum > 0, rowsum ** -0.5, 0.0)   # inf -> 0 as in the module
    return adj * d[:, None] * d[None, :]


def build_ui_norm_adj(edge_index, num_nodes):
    """Dense equivalent of GCNConv's deg^-1/2 message passing on the symmetric UI graph."""
    row, col = edge_index[0], edge_index[1]
    deg = jnp.zeros((num_nodes,), jnp.float32).at[row].add(1.0)
    d = jnp.where(deg > 0, deg ** -0.5, 0.0)
    norm = d[row] * d[col]
    return jnp.zeros((num_nodes, num_nodes), jnp.float32).at[col, row].add(norm)


# ----------------------------------------------------------------------------
# MICRO.forward(build_item_graph=True)
# ----------------------------------------------------------------------------
def micro_forward(params, ui_adj, image_original_adj, text_original_adj,
                  num_user, num_item, topk, lambda_coeff, n_ui_layers,
                  n_ii_layer, tile=TILE):
    dim_e = params["item_emb"].shape[1]
    assert dim_e <= LANE
    dp = LANE
    np_item = _round_up(num_item, tile)
    nn_nodes = num_user + num_item
    np_nodes = _round_up(nn_nodes, tile)

    # --- modality projection + L2 normalize (fused), bf16 output for the MXU ---
    v_feat_p = _round_up(params["v_feat"].shape[1], LANE)
    t_feat_p = _round_up(params["t_feat"].shape[1], LANE)
    v_pad = _pad2(params["v_feat"], np_item, v_feat_p)
    t_pad = _pad2(params["t_feat"], np_item, t_feat_p)
    iw = _pad2(params["image_trs_w"], v_feat_p, dp)
    ib = _pad2(params["image_trs_b"], 1, dp)
    tw = _pad2(params["text_trs_w"], t_feat_p, dp)
    tb = _pad2(params["text_trs_b"], 1, dp)
    img_n = pallas_project_normalize(v_pad, iw, ib, tile)
    txt_n = pallas_project_normalize(t_pad, tw, tb, tile)

    # --- build_sim (one batched Pallas call) + knn-normalized graph (JAX glue) ---
    sims = pallas_cosine_sim_batched(jnp.stack([img_n, txt_n], axis=0), tile)
    image_sim = sims[0, :num_item, :num_item].astype(jnp.float32)
    text_sim = sims[1, :num_item, :num_item].astype(jnp.float32)
    image_adj = ((1.0 - lambda_coeff) * knn_sym_norm_adj(image_sim, topk)
                 + lambda_coeff * image_original_adj)
    text_adj = ((1.0 - lambda_coeff) * knn_sym_norm_adj(text_sim, topk)
                + lambda_coeff * text_original_adj)

    # NOTE: the PyTorch n_ii_layer loop never carries its loop variable, so for any
    # n_ii_layer >= 1 it collapses to a single adj @ item_embedding hop.
    del n_ii_layer

    # --- item-item propagation + attention gating (fused, tiled, bf16 MXU operands) ---
    item_pad = _pad2(params["item_emb"], np_item, dp).astype(jnp.bfloat16)
    iadj_pad = _pad2(image_adj, np_item, np_item).astype(jnp.bfloat16)
    tadj_pad = _pad2(text_adj, np_item, np_item).astype(jnp.bfloat16)
    w1_pad = _pad2(params["q_w1"], dp, dp)
    b1_pad = _pad2(params["q_b1"], 1, dp)
    w2row = _pad2(params["q_w2"].T, 1, dp)
    h_pad = pallas_item_graph_attention(iadj_pad, tadj_pad, item_pad,
                                        w1_pad, b1_pad, w2row, tile)

    # --- user-item GCN layers (tiled, bf16 adjacency, fused in-place layer-sum) ---
    ego = jnp.concatenate([params["user_emb"], params["item_emb"]], axis=0)
    ego_pad = _pad2(ego, np_nodes, dp)
    adj_pad = _pad2(ui_adj, np_nodes, np_nodes).astype(jnp.bfloat16)
    x = ego_pad.astype(jnp.bfloat16)
    s = ego_pad
    for _ in range(n_ui_layers):
        x, s = pallas_gcn_layer(adj_pad, x, s, tile)

    # --- layer-mean + residual add of normalized h (users get zero residual) ---
    h_full = jnp.zeros((np_nodes, dp), jnp.float32)
    h_full = h_full.at[num_user:num_user + num_item].set(h_pad[:num_item])
    result_pad = pallas_mean_residual(s, h_full, n_ui_layers, tile)
    return result_pad[:nn_nodes, :dim_e]


# ----------------------------------------------------------------------------
# Driver
# ----------------------------------------------------------------------------
if __name__ == "__main__":
    num_user, num_item = 128, 384           # padded node count = 512 -> multi-tile grids
    dim_E = 64
    v_dim, t_dim = 128, 96
    n_layer = 2                             # user-item GCN layers
    ii_topk = 8
    mm_layers = 1
    lambda_coeff = 0.9

    key = jax.random.PRNGKey(0)
    ks = jax.random.split(key, 10)

    def xavier(k, shape):
        bound = (6.0 / (shape[0] + shape[1])) ** 0.5
        return jax.random.uniform(k, shape, jnp.float32, -bound, bound)

    params = {
        "user_emb": xavier(ks[0], (num_user, dim_E)),
        "item_emb": xavier(ks[1], (num_item, dim_E)),
        "v_feat": jax.random.normal(ks[2], (num_item, v_dim), jnp.float32),
        "t_feat": jax.random.normal(ks[3], (num_item, t_dim), jnp.float32),
        "image_trs_w": xavier(ks[4], (v_dim, dim_E)),
        "image_trs_b": jnp.zeros((1, dim_E), jnp.float32),
        "text_trs_w": xavier(ks[5], (t_dim, dim_E)),
        "text_trs_b": jnp.zeros((1, dim_E), jnp.float32),
        "q_w1": xavier(ks[6], (dim_E, dim_E)),
        "q_b1": jnp.zeros((1, dim_E), jnp.float32),
        "q_w2": xavier(ks[7], (dim_E, 1)),
    }

    # Deterministic user-item interactions; item node ids offset by num_user,
    # then the edge set is symmetrized exactly as in MICRO.__init__.
    edges = []
    for u in range(num_user):
        for j in (u % num_item, (u + 3) % num_item, (u + 7) % num_item):
            edges.append((u, num_user + j))
    e = jnp.array(edges, jnp.int32).T                       # (2, E)
    edge_index = jnp.concatenate([e, e[::-1]], axis=1)      # (2, 2E) symmetric

    num_nodes = num_user + num_item
    ui_adj = build_ui_norm_adj(edge_index, num_nodes)

    # "Original" modality graphs built in __init__ from the raw (pre-projection)
    # features — init-time glue, plain JAX.
    def _cosine_sim_ref(x):
        xn = x / jnp.maximum(jnp.linalg.norm(x, axis=-1, keepdims=True), 1e-12)
        return xn @ xn.T

    image_original_adj = knn_sym_norm_adj(_cosine_sim_ref(params["v_feat"]), ii_topk)
    text_original_adj = knn_sym_norm_adj(_cosine_sim_ref(params["t_feat"]), ii_topk)

    fwd = jax.jit(functools.partial(
        micro_forward, num_user=num_user, num_item=num_item, topk=ii_topk,
        lambda_coeff=lambda_coeff, n_ui_layers=n_layer, n_ii_layer=mm_layers))
    result = fwd(params, ui_adj, image_original_adj, text_original_adj)
    jax.block_until_ready(result)

    assert result.shape == (num_user + num_item, dim_E)
    assert bool(jnp.all(jnp.isfinite(result)))
    print("KERNEL_OK")
</pallas_src>

<mosaic_0001>
module attributes {stable_mosaic.version = 11 : i64} {
  func.func @_proj_norm_kernel(%arg0: i32, %arg1: memref<256x128xf32, #tpu.memory_space<vmem>>, %arg2: memref<128x128xf32, #tpu.memory_space<vmem>>, %arg3: memref<1x128xf32, #tpu.memory_space<vmem>>, %arg4: memref<256x128xbf16, #tpu.memory_space<vmem>>) attributes {dimension_semantics = [#tpu.dimension_semantics<parallel>], iteration_bounds = array<i64: 2>, scalar_prefetch = 0 : i64, scratch_operands = 0 : i64, tpu.core_type = #tpu.core_type<tc>, window_params = [{transform_indices = @transform_0, window_bounds = array<i64: 256, 128>}, {pipeline_mode = #tpu.pipeline_mode<synchronous>, transform_indices = @transform_1, window_bounds = array<i64: 128, 128>}, {pipeline_mode = #tpu.pipeline_mode<synchronous>, transform_indices = @transform_2, window_bounds = array<i64: 1, 128>}, {transform_indices = @transform_3, window_bounds = array<i64: 256, 128>}]} {
    %c0 = arith.constant 0 : index
    %c0_0 = arith.constant 0 : index
    %0 = vector.load %arg1[%c0, %c0_0] : memref<256x128xf32, #tpu.memory_space<vmem>>, vector<256x128xf32>
    %c0_1 = arith.constant 0 : index
    %c0_2 = arith.constant 0 : index
    %1 = vector.load %arg2[%c0_1, %c0_2] : memref<128x128xf32, #tpu.memory_space<vmem>>, vector<128x128xf32>
    %cst = arith.constant dense<0.000000e+00> : vector<256x128xf32>
    %2 = tpu.matmul %0, %1, %cst {dimension_numbers = #tpu.dot_dimension_numbers<[1], [0], [0], [1], [0, 0, 1, 1], [], []>} : vector<256x128xf32>, vector<128x128xf32>, vector<256x128xf32> -> vector<256x128xf32>
    %c0_3 = arith.constant 0 : index
    %c0_4 = arith.constant 0 : index
    %3 = vector.load %arg3[%c0_3, %c0_4] : memref<1x128xf32, #tpu.memory_space<vmem>>, vector<1x128xf32>
    %4 = vector.broadcast %3 : vector<1x128xf32> to vector<256x128xf32>
    %5 = arith.addf %2, %4 : vector<256x128xf32>
    %6 = arith.mulf %5, %5 : vector<256x128xf32>
    %cst_5 = arith.constant dense<0.000000e+00> : vector<256xf32>
    %7 = vector.multi_reduction <add>, %6, %cst_5 [1] : vector<256x128xf32> to vector<256xf32>
    %8 = vector.shape_cast %7 : vector<256xf32> to vector<256x1xf32>
    %9 = math.sqrt %8 : vector<256x1xf32>
    %cst_6 = arith.constant 9.99999996E-13 : f32
    %10 = vector.broadcast %cst_6 : f32 to vector<256x1xf32>
    %11 = arith.maximumf %9, %10 : vector<256x1xf32>
    %12 = vector.broadcast %11 : vector<256x1xf32> to vector<256x128xf32>
    %13 = arith.divf %5, %12 : vector<256x128xf32>
    %14 = arith.truncf %13 : vector<256x128xf32> to vector<256x128xbf16>
    %c0_7 = arith.constant 0 : index
    %c0_8 = arith.constant 0 : index
    %15 = vector.load %arg4[%c0_7, %c0_8] : memref<256x128xbf16, #tpu.memory_space<vmem>>, vector<256x128xbf16>
    tpu.vector_store %arg4[%c0_7, %c0_8], %14 {strides = array<i32>} : memref<256x128xbf16, #tpu.memory_space<vmem>>, vector<256x128xbf16>,
    return
  }
  func.func @transform_0(%arg0: i32) -> (i32, i32) {
    %c0_i32 = arith.constant 0 : i32
    %c0_i32_0 = arith.constant 0 : i32
    return %arg0, %c0_i32 : i32, i32
  }
  func.func @transform_1(%arg0: i32) -> (i32, i32) {
    %c0_i32 = arith.constant 0 : i32
    %c0_i32_0 = arith.constant 0 : i32
    %c0_i32_1 = arith.constant 0 : i32
    return %c0_i32, %c0_i32_0 : i32, i32
  }
  func.func @transform_2(%arg0: i32) -> (i32, i32) {
    %c0_i32 = arith.constant 0 : i32
    %c0_i32_0 = arith.constant 0 : i32
    %c0_i32_1 = arith.constant 0 : i32
    return %c0_i32, %c0_i32_0 : i32, i32
  }
  func.func @transform_3(%arg0: i32) -> (i32, i32) {
    %c0_i32 = arith.constant 0 : i32
    %c0_i32_0 = arith.constant 0 : i32
    return %arg0, %c0_i32 : i32, i32
  }
}

module attributes {stable_mosaic.version = 11 : i64} {
  func.func @_cosine_sim_kernel(%arg0: i32, %arg1: i32, %arg2: i32, %arg3: memref<1x256x128xbf16, #tpu.memory_space<vmem>>, %arg4: memref<1x256x128xbf16, #tpu.memory_space<vmem>>, %arg5: memref<1x256x256xbf16, #tpu.memory_space<vmem>>) attributes {dimension_semantics = [#tpu.dimension_semantics<parallel>, #tpu.dimension_semantics<parallel>, #tpu.dimension_semantics<parallel>], iteration_bounds = array<i64: 2, 2, 2>, scalar_prefetch = 0 : i64, scratch_operands = 0 : i64, tpu.core_type = #tpu.core_type<tc>, window_params = [{transform_indices = @transform_0, window_bounds = array<i64: 1, 256, 128>}, {transform_indices = @transform_1, window_bounds = array<i64: 1, 256, 128>}, {transform_indices = @transform_2, window_bounds = array<i64: 1, 256, 256>}]} {
    %c0 = arith.constant 0 : index
    %c0_0 = arith.constant 0 : index
    %c0_1 = arith.constant 0 : index
    %0 = vector.load %arg3[%c0, %c0_0, %c0_1] : memref<1x256x128xbf16, #tpu.memory_space<vmem>>, vector<1x256x128xbf16>
    %1 = vector.shape_cast %0 : vector<1x256x128xbf16> to vector<256x128xbf16>
    %c0_2 = arith.constant 0 : index
    %c0_3 = arith.constant 0 : index
    %c0_4 = arith.constant 0 : index
    %2 = vector.load %arg4[%c0_2, %c0_3, %c0_4] : memref<1x256x128xbf16, #tpu.memory_space<vmem>>, vector<1x256x128xbf16>
    %3 = vector.shape_cast %2 : vector<1x256x128xbf16> to vector<256x128xbf16>
    %cst = arith.constant dense<0.000000e+00> : vector<256x256xf32>
    %4 = tpu.matmul %1, %3, %cst {dimension_numbers = #tpu.dot_dimension_numbers<[1], [1], [0], [0], [0, 0, 1, 0], [], []>} : vector<256x128xbf16>, vector<256x128xbf16>, vector<256x256xf32> -> vector<256x256xf32>
    %5 = arith.truncf %4 : vector<256x256xf32> to vector<256x256xbf16>
    %c0_5 = arith.constant 0 : index
    %c0_6 = arith.constant 0 : index
    %c0_7 = arith.constant 0 : index
    %6 = vector.load %arg5[%c0_5, %c0_6, %c0_7] : memref<1x256x256xbf16, #tpu.memory_space<vmem>>, vector<1x256x256xbf16>
    %7 = vector.shape_cast %6 : vector<1x256x256xbf16> to vector<256x256xbf16>
    %8 = vector.shape_cast %5 : vector<256x256xbf16> to vector<1x256x256xbf16>
    tpu.vector_store %arg5[%c0_5, %c0_6, %c0_7], %8 {strides = array<i32>} : memref<1x256x256xbf16, #tpu.memory_space<vmem>>, vector<1x256x256xbf16>,
    return
  }
  func.func @transform_0(%arg0: i32, %arg1: i32, %arg2: i32) -> (i32, i32, i32) {
    %c0_i32 = arith.constant 0 : i32
    %c0_i32_0 = arith.constant 0 : i32
    return %arg0, %arg1, %c0_i32 : i32, i32, i32
  }
  func.func @transform_1(%arg0: i32, %arg1: i32, %arg2: i32) -> (i32, i32, i32) {
    %c0_i32 = arith.constant 0 : i32
    %c0_i32_0 = arith.constant 0 : i32
    return %arg0, %arg2, %c0_i32 : i32, i32, i32
  }
  func.func @transform_2(%arg0: i32, %arg1: i32, %arg2: i32) -> (i32, i32, i32) {
    %c0_i32 = arith.constant 0 : i32
    return %arg0, %arg1, %arg2 : i32, i32, i32
  }
}

module attributes {stable_mosaic.version = 11 : i64} {
  func.func @_ii_att_fuse_kernel(%arg0: i32, %arg1: i32, %arg2: memref<256x256xbf16, #tpu.memory_space<vmem>>, %arg3: memref<256x256xbf16, #tpu.memory_space<vmem>>, %arg4: memref<256x128xbf16, #tpu.memory_space<vmem>>, %arg5: memref<128x128xf32, #tpu.memory_space<vmem>>, %arg6: memref<1x128xf32, #tpu.memory_space<vmem>>, %arg7: memref<1x128xf32, #tpu.memory_space<vmem>>, %arg8: memref<256x128xf32, #tpu.memory_space<vmem>>, %arg9: memref<256x128xf32, #tpu.memory_space<vmem>>, %arg10: memref<256x128xf32, #tpu.memory_space<vmem>>) attributes {dimension_semantics = [#tpu.dimension_semantics<parallel>, #tpu.dimension_semantics<arbitrary>], iteration_bounds = array<i64: 2, 2>, scalar_prefetch = 0 : i64, scratch_operands = 2 : i64, tpu.core_type = #tpu.core_type<tc>, window_params = [{transform_indices = @transform_0, window_bounds = array<i64: 256, 256>}, {transform_indices = @transform_1, window_bounds = array<i64: 256, 256>}, {transform_indices = @transform_2, window_bounds = array<i64: 256, 128>}, {pipeline_mode = #tpu.pipeline_mode<synchronous>, transform_indices = @transform_3, window_bounds = array<i64: 128, 128>}, {pipeline_mode = #tpu.pipeline_mode<synchronous>, transform_indices = @transform_4, window_bounds = array<i64: 1, 128>}, {pipeline_mode = #tpu.pipeline_mode<synchronous>, transform_indices = @transform_5, window_bounds = array<i64: 1, 128>}, {transform_indices = @transform_6, window_bounds = array<i64: 256, 128>}]} {
    %c0_i32 = arith.constant 0 : i32
    %0 = arith.cmpi eq, %arg1, %c0_i32 : i32
    %1 = arith.extui %0 : i1 to i32
    %c0_i32_0 = arith.constant 0 : i32
    %2 = arith.cmpi ne, %1, %c0_i32_0 : i32
    scf.if %2 {
      %cst_16 = arith.constant 0.000000e+00 : f32
      %17 = vector.broadcast %cst_16 : f32 to vector<256x128xf32>
      %c0_17 = arith.constant 0 : index
      %c0_18 = arith.constant 0 : index
      %18 = vector.load %arg9[%c0_17, %c0_18] : memref<256x128xf32, #tpu.memory_space<vmem>>, vector<256x128xf32>
      tpu.vector_store %arg9[%c0_17, %c0_18], %17 {strides = array<i32>} : memref<256x128xf32, #tpu.memory_space<vmem>>, vector<256x128xf32>,
      %cst_19 = arith.constant 0.000000e+00 : f32
      %19 = vector.broadcast %cst_19 : f32 to vector<256x128xf32>
      %c0_20 = arith.constant 0 : index
      %c0_21 = arith.constant 0 : index
      %20 = vector.load %arg10[%c0_20, %c0_21] : memref<256x128xf32, #tpu.memory_space<vmem>>, vector<256x128xf32>
      tpu.vector_store %arg10[%c0_20, %c0_21], %19 {strides = array<i32>} : memref<256x128xf32, #tpu.memory_space<vmem>>, vector<256x128xf32>,
    } else {
    }
    %c0 = arith.constant 0 : index
    %c0_1 = arith.constant 0 : index
    %3 = vector.load %arg4[%c0, %c0_1] : memref<256x128xbf16, #tpu.memory_space<vmem>>, vector<256x128xbf16>
    %c0_2 = arith.constant 0 : index
    %c0_3 = arith.constant 0 : index
    %4 = vector.load %arg9[%c0_2, %c0_3] : memref<256x128xf32, #tpu.memory_space<vmem>>, vector<256x128xf32>
    %c0_4 = arith.constant 0 : index
    %c0_5 = arith.constant 0 : index
    %5 = vector.load %arg2[%c0_4, %c0_5] : memref<256x256xbf16, #tpu.memory_space<vmem>>, vector<256x256xbf16>
    %cst = arith.constant dense<0.000000e+00> : vector<256x128xf32>
    %6 = tpu.matmul %5, %3, %cst {dimension_numbers = #tpu.dot_dimension_numbers<[1], [0], [0], [1], [0, 0, 1, 1], [], []>} : vector<256x256xbf16>, vector<256x128xbf16>, vector<256x128xf32> -> vector<256x128xf32>
    %7 = arith.addf %4, %6 : vector<256x128xf32>
    %c0_6 = arith.constant 0 : index
    %c0_7 = arith.constant 0 : index
    %8 = vector.load %arg9[%c0_6, %c0_7] : memref<256x128xf32, #tpu.memory_space<vmem>>, vector<256x128xf32>
    tpu.vector_store %arg9[%c0_6, %c0_7], %7 {strides = array<i32>} : memref<256x128xf32, #tpu.memory_space<vmem>>, vector<256x128xf32>,
    %c0_8 = arith.constant 0 : index
    %c0_9 = arith.constant 0 : index
    %9 = vector.load %arg10[%c0_8, %c0_9] : memref<256x128xf32, #tpu.memory_space<vmem>>, vector<256x128xf32>
    %c0_10 = arith.constant 0 : index
    %c0_11 = arith.constant 0 : index
    %10 = vector.load %arg3[%c0_10, %c0_11] : memref<256x256xbf16, #tpu.memory_space<vmem>>, vector<256x256xbf16>
    %cst_12 = arith.constant dense<0.000000e+00> : vector<256x128xf32>
    %11 = tpu.matmul %10, %3, %cst_12 {dimension_numbers = #tpu.dot_dimension_numbers<[1], [0], [0], [1], [0, 0, 1, 1], [], []>} : vector<256x256xbf16>, vector<256x128xbf16>, vector<256x128xf32> -> vector<256x128xf32>
    %12 = arith.addf %9, %11 : vector<256x128xf32>
    %c0_13 = arith.constant 0 : index
    %c0_14 = arith.constant 0 : index
    %13 = vector.load %arg10[%c0_13, %c0_14] : memref<256x128xf32, #tpu.memory_space<vmem>>, vector<256x128xf32>
    tpu.vector_store %arg10[%c0_13, %c0_14], %12 {strides = array<i32>} : memref<256x128xf32, #tpu.memory_space<vmem>>, vector<256x128xf32>,
    %c1_i32 = arith.constant 1 : i32
    %14 = arith.cmpi eq, %arg1, %c1_i32 : i32
    %15 = arith.extui %14 : i1 to i32
    %c0_i32_15 = arith.constant 0 : i32
    %16 = arith.cmpi ne, %15, %c0_i32_15 : i32
    scf.if %16 {
      %c0_16 = arith.constant 0 : index
      %c0_17 = arith.constant 0 : index
      %17 = vector.load %arg9[%c0_16, %c0_17] : memref<256x128xf32, #tpu.memory_space<vmem>>, vector<256x128xf32>
      %c0_18 = arith.constant 0 : index
      %c0_19 = arith.constant 0 : index
      %18 = vector.load %arg10[%c0_18, %c0_19] : memref<256x128xf32, #tpu.memory_space<vmem>>, vector<256x128xf32>
      %19 = tpu.concatenate %17, %18 in 0 : vector<256x128xf32>, vector<256x128xf32> -> vector<512x128xf32>
      %c0_20 = arith.constant 0 : index
      %c0_21 = arith.constant 0 : index
      %20 = vector.load %arg5[%c0_20, %c0_21] : memref<128x128xf32, #tpu.memory_space<vmem>>, vector<128x128xf32>
      %cst_22 = arith.constant dense<0.000000e+00> : vector<512x128xf32>
      %21 = tpu.matmul %19, %20, %cst_22 {dimension_numbers = #tpu.dot_dimension_numbers<[1], [0], [0], [1], [0, 0, 1, 1], [], []>} : vector<512x128xf32>, vector<128x128xf32>, vector<512x128xf32> -> vector<512x128xf32>
      %c0_23 = arith.constant 0 : index
      %c0_24 = arith.constant 0 : index
      %22 = vector.load %arg6[%c0_23, %c0_24] : memref<1x128xf32, #tpu.memory_space<vmem>>, vector<1x128xf32>
      %23 = vector.broadcast %22 : vector<1x128xf32> to vector<512x128xf32>
      %24 = arith.addf %21, %23 : vector<512x128xf32>
      %25 = math.tanh %24 : vector<512x128xf32>
      %c0_25 = arith.constant 0 : index
      %c0_26 = arith.constant 0 : index
      %26 = vector.load %arg7[%c0_25, %c0_26] : memref<1x128xf32, #tpu.memory_space<vmem>>, vector<1x128xf32>
      %27 = vector.broadcast %26 : vector<1x128xf32> to vector<512x128xf32>
      %28 = arith.mulf %25, %27 : vector<512x128xf32>
      %cst_27 = arith.constant dense<0.000000e+00> : vector<512xf32>
      %29 = vector.multi_reduction <add>, %28, %cst_27 [1] : vector<512x128xf32> to vector<512xf32>
      %30 = vector.shape_cast %29 : vector<512xf32> to vector<512x1xf32>
      %31 = vector.extract_strided_slice %30 {offsets = [0, 0], sizes = [256, 1], strides = [1, 1]} : vector<512x1xf32> to vector<256x1xf32>
      %32 = vector.extract_strided_slice %30 {offsets = [256, 0], sizes = [256, 1], strides = [1, 1]} : vector<512x1xf32> to vector<256x1xf32>
      %33 = arith.maximumf %31, %32 : vector<256x1xf32>
      %34 = arith.subf %31, %33 : vector<256x1xf32>
      %35 = math.exp %34 : vector<256x1xf32>
      %36 = arith.subf %32, %33 : vector<256x1xf32>
      %37 = math.exp %36 : vector<256x1xf32>
      %38 = arith.addf %35, %37 : vector<256x1xf32>
      %cst_28 = arith.constant 1.000000e+00 : f32
      %39 = vector.broadcast %cst_28 : f32 to vector<256x1xf32>
      %40 = arith.divf %39, %38 : vector<256x1xf32>
      %41 = arith.mulf %35, %40 : vector<256x1xf32>
      %42 = vector.broadcast %41 : vector<256x1xf32> to vector<256x128xf32>
      %43 = arith.mulf %42, %17 : vector<256x128xf32>
      %44 = arith.mulf %37, %40 : vector<256x1xf32>
      %45 = vector.broadcast %44 : vector<256x1xf32> to vector<256x128xf32>
      %46 = arith.mulf %45, %18 : vector<256x128xf32>
      %47 = arith.addf %43, %46 : vector<256x128xf32>
      %c0_29 = arith.constant 0 : index
      %c0_30 = arith.constant 0 : index
      %48 = vector.load %arg8[%c0_29, %c0_30] : memref<256x128xf32, #tpu.memory_space<vmem>>, vector<256x128xf32>
      tpu.vector_store %arg8[%c0_29, %c0_30], %47 {strides = array<i32>} : memref<256x128xf32, #tpu.memory_space<vmem>>, vector<256x128xf32>,
    } else {
    }
    return
  }
  func.func @transform_0(%arg0: i32, %arg1: i32) -> (i32, i32) {
    %c0_i32 = arith.constant 0 : i32
    return %arg0, %arg1 : i32, i32
  }
  func.func @transform_1(%arg0: i32, %arg1: i32) -> (i32, i32) {
    %c0_i32 = arith.constant 0 : i32
    return %arg0, %arg1 : i32, i32
  }
  func.func @transform_2(%arg0: i32, %arg1: i32) -> (i32, i32) {
    %c0_i32 = arith.constant 0 : i32
    %c0_i32_0 = arith.constant 0 : i32
    return %arg1, %c0_i32 : i32, i32
  }
  func.func @transform_3(%arg0: i32, %arg1: i32) -> (i32, i32) {
    %c0_i32 = arith.constant 0 : i32
    %c0_i32_0 = arith.constant 0 : i32
    %c0_i32_1 = arith.constant 0 : i32
    return %c0_i32, %c0_i32_0 : i32, i32
  }
  func.func @transform_4(%arg0: i32, %arg1: i32) -> (i32, i32) {
    %c0_i32 = arith.constant 0 : i32
    %c0_i32_0 = arith.constant 0 : i32
    %c0_i32_1 = arith.constant 0 : i32
    return %c0_i32, %c0_i32_0 : i32, i32
  }
  func.func @transform_5(%arg0: i32, %arg1: i32) -> (i32, i32) {
    %c0_i32 = arith.constant 0 : i32
    %c0_i32_0 = arith.constant 0 : i32
    %c0_i32_1 = arith.constant 0 : i32
    return %c0_i32, %c0_i32_0 : i32, i32
  }
  func.func @transform_6(%arg0: i32, %arg1: i32) -> (i32, i32) {
    %c0_i32 = arith.constant 0 : i32
    %c0_i32_0 = arith.constant 0 : i32
    return %arg0, %c0_i32 : i32, i32
  }
}

module attributes {stable_mosaic.version = 11 : i64} {
  func.func @_gcn_layer_kernel(%arg0: i32, %arg1: i32, %arg2: memref<256x256xbf16, #tpu.memory_space<vmem>>, %arg3: memref<256x128xbf16, #tpu.memory_space<vmem>>, %arg4: memref<256x128xf32, #tpu.memory_space<vmem>>, %arg5: memref<256x128xbf16, #tpu.memory_space<vmem>>, %arg6: memref<256x128xf32, #tpu.memory_space<vmem>>, %arg7: memref<256x128xf32, #tpu.memory_space<vmem>>) attributes {dimension_semantics = [#tpu.dimension_semantics<parallel>, #tpu.dimension_semantics<arbitrary>], iteration_bounds = array<i64: 2, 2>, scalar_prefetch = 0 : i64, scratch_operands = 1 : i64, tpu.core_type = #tpu.core_type<tc>, window_params = [{transform_indices = @transform_0, window_bounds = array<i64: 256, 256>}, {transform_indices = @transform_1, window_bounds = array<i64: 256, 128>}, {transform_indices = @transform_2, window_bounds = array<i64: 256, 128>}, {transform_indices = @transform_3, window_bounds = array<i64: 256, 128>}, {transform_indices = @transform_4, window_bounds = array<i64: 256, 128>}]} {
    %c0_i32 = arith.constant 0 : i32
    %0 = arith.cmpi eq, %arg1, %c0_i32 : i32
    %1 = arith.extui %0 : i1 to i32
    %c0_i32_0 = arith.constant 0 : i32
    %2 = arith.cmpi ne, %1, %c0_i32_0 : i32
    scf.if %2 {
      %cst_9 = arith.constant 0.000000e+00 : f32
      %12 = vector.broadcast %cst_9 : f32 to vector<256x128xf32>
      %c0_10 = arith.constant 0 : index
      %c0_11 = arith.constant 0 : index
      %13 = vector.load %arg7[%c0_10, %c0_11] : memref<256x128xf32, #tpu.memory_space<vmem>>, vector<256x128xf32>
      tpu.vector_store %arg7[%c0_10, %c0_11], %12 {strides = array<i32>} : memref<256x128xf32, #tpu.memory_space<vmem>>, vector<256x128xf32>,
    } else {
    }
    %c0 = arith.constant 0 : index
    %c0_1 = arith.constant 0 : index
    %3 = vector.load %arg7[%c0, %c0_1] : memref<256x128xf32, #tpu.memory_space<vmem>>, vector<256x128xf32>
    %c0_2 = arith.constant 0 : index
    %c0_3 = arith.constant 0 : index
    %4 = vector.load %arg2[%c0_2, %c0_3] : memref<256x256xbf16, #tpu.memory_space<vmem>>, vector<256x256xbf16>
    %c0_4 = arith.constant 0 : index
    %c0_5 = arith.constant 0 : index
    %5 = vector.load %arg3[%c0_4, %c0_5] : memref<256x128xbf16, #tpu.memory_space<vmem>>, vector<256x128xbf16>
    %cst = arith.constant dense<0.000000e+00> : vector<256x128xf32>
    %6 = tpu.matmul %4, %5, %cst {dimension_numbers = #tpu.dot_dimension_numbers<[1], [0], [0], [1], [0, 0, 1, 1], [], []>} : vector<256x256xbf16>, vector<256x128xbf16>, vector<256x128xf32> -> vector<256x128xf32>
    %7 = arith.addf %3, %6 : vector<256x128xf32>
    %c0_6 = arith.constant 0 : index
    %c0_7 = arith.constant 0 : index
    %8 = vector.load %arg7[%c0_6, %c0_7] : memref<256x128xf32, #tpu.memory_space<vmem>>, vector<256x128xf32>
    tpu.vector_store %arg7[%c0_6, %c0_7], %7 {strides = array<i32>} : memref<256x128xf32, #tpu.memory_space<vmem>>, vector<256x128xf32>,
    %c1_i32 = arith.constant 1 : i32
    %9 = arith.cmpi eq, %arg1, %c1_i32 : i32
    %10 = arith.extui %9 : i1 to i32
    %c0_i32_8 = arith.constant 0 : i32
    %11 = arith.cmpi ne, %10, %c0_i32_8 : i32
    scf.if %11 {
      %c0_9 = arith.constant 0 : index
      %c0_10 = arith.constant 0 : index
      %12 = vector.load %arg7[%c0_9, %c0_10] : memref<256x128xf32, #tpu.memory_space<vmem>>, vector<256x128xf32>
      %13 = arith.truncf %12 : vector<256x128xf32> to vector<256x128xbf16>
      %c0_11 = arith.constant 0 : index
      %c0_12 = arith.constant 0 : index
      %14 = vector.load %arg5[%c0_11, %c0_12] : memref<256x128xbf16, #tpu.memory_space<vmem>>, vector<256x128xbf16>
      tpu.vector_store %arg5[%c0_11, %c0_12], %13 {strides = array<i32>} : memref<256x128xbf16, #tpu.memory_space<vmem>>, vector<256x128xbf16>,
      %c0_13 = arith.constant 0 : index
      %c0_14 = arith.constant 0 : index
      %15 = vector.load %arg4[%c0_13, %c0_14] : memref<256x128xf32, #tpu.memory_space<vmem>>, vector<256x128xf32>
      %16 = arith.addf %15, %12 : vector<256x128xf32>
      %c0_15 = arith.constant 0 : index
      %c0_16 = arith.constant 0 : index
      %17 = vector.load %arg6[%c0_15, %c0_16] : memref<256x128xf32, #tpu.memory_space<vmem>>, vector<256x128xf32>
      tpu.vector_store %arg6[%c0_15, %c0_16], %16 {strides = array<i32>} : memref<256x128xf32, #tpu.memory_space<vmem>>, vector<256x128xf32>,
    } else {
    }
    return
  }
  func.func @transform_0(%arg0: i32, %arg1: i32) -> (i32, i32) {
    %c0_i32 = arith.constant 0 : i32
    return %arg0, %arg1 : i32, i32
  }
  func.func @transform_1(%arg0: i32, %arg1: i32) -> (i32, i32) {
    %c0_i32 = arith.constant 0 : i32
    %c0_i32_0 = arith.constant 0 : i32
    return %arg1, %c0_i32 : i32, i32
  }
  func.func @transform_2(%arg0: i32, %arg1: i32) -> (i32, i32) {
    %c0_i32 = arith.constant 0 : i32
    %c0_i32_0 = arith.constant 0 : i32
    return %arg0, %c0_i32 : i32, i32
  }
  func.func @transform_3(%arg0: i32, %arg1: i32) -> (i32, i32) {
    %c0_i32 = arith.constant 0 : i32
    %c0_i32_0 = arith.constant 0 : i32
    return %arg0, %c0_i32 : i32, i32
  }
  func.func @transform_4(%arg0: i32, %arg1: i32) -> (i32, i32) {
    %c0_i32 = arith.constant 0 : i32
    %c0_i32_0 = arith.constant 0 : i32
    return %arg0, %c0_i32 : i32, i32
  }
}

module attributes {stable_mosaic.version = 11 : i64} {
  func.func @_gcn_layer_kernel(%arg0: i32, %arg1: i32, %arg2: memref<256x256xbf16, #tpu.memory_space<vmem>>, %arg3: memref<256x128xbf16, #tpu.memory_space<vmem>>, %arg4: memref<256x128xf32, #tpu.memory_space<vmem>>, %arg5: memref<256x128xbf16, #tpu.memory_space<vmem>>, %arg6: memref<256x128xf32, #tpu.memory_space<vmem>>, %arg7: memref<256x128xf32, #tpu.memory_space<vmem>>) attributes {dimension_semantics = [#tpu.dimension_semantics<parallel>, #tpu.dimension_semantics<arbitrary>], iteration_bounds = array<i64: 2, 2>, scalar_prefetch = 0 : i64, scratch_operands = 1 : i64, tpu.core_type = #tpu.core_type<tc>, window_params = [{transform_indices = @transform_0, window_bounds = array<i64: 256, 256>}, {transform_indices = @transform_1, window_bounds = array<i64: 256, 128>}, {transform_indices = @transform_2, window_bounds = array<i64: 256, 128>}, {transform_indices = @transform_3, window_bounds = array<i64: 256, 128>}, {transform_indices = @transform_4, window_bounds = array<i64: 256, 128>}]} {
    %c0_i32 = arith.constant 0 : i32
    %0 = arith.cmpi eq, %arg1, %c0_i32 : i32
    %1 = arith.extui %0 : i1 to i32
    %c0_i32_0 = arith.constant 0 : i32
    %2 = arith.cmpi ne, %1, %c0_i32_0 : i32
    scf.if %2 {
      %cst_9 = arith.constant 0.000000e+00 : f32
      %12 = vector.broadcast %cst_9 : f32 to vector<256x128xf32>
      %c0_10 = arith.constant 0 : index
      %c0_11 = arith.constant 0 : index
      %13 = vector.load %arg7[%c0_10, %c0_11] : memref<256x128xf32, #tpu.memory_space<vmem>>, vector<256x128xf32>
      tpu.vector_store %arg7[%c0_10, %c0_11], %12 {strides = array<i32>} : memref<256x128xf32, #tpu.memory_space<vmem>>, vector<256x128xf32>,
    } else {
    }
    %c0 = arith.constant 0 : index
    %c0_1 = arith.constant 0 : index
    %3 = vector.load %arg7[%c0, %c0_1] : memref<256x128xf32, #tpu.memory_space<vmem>>, vector<256x128xf32>
    %c0_2 = arith.constant 0 : index
    %c0_3 = arith.constant 0 : index
    %4 = vector.load %arg2[%c0_2, %c0_3] : memref<256x256xbf16, #tpu.memory_space<vmem>>, vector<256x256xbf16>
    %c0_4 = arith.constant 0 : index
    %c0_5 = arith.constant 0 : index
    %5 = vector.load %arg3[%c0_4, %c0_5] : memref<256x128xbf16, #tpu.memory_space<vmem>>, vector<256x128xbf16>
    %cst = arith.constant dense<0.000000e+00> : vector<256x128xf32>
    %6 = tpu.matmul %4, %5, %cst {dimension_numbers = #tpu.dot_dimension_numbers<[1], [0], [0], [1], [0, 0, 1, 1], [], []>} : vector<256x256xbf16>, vector<256x128xbf16>, vector<256x128xf32> -> vector<256x128xf32>
    %7 = arith.addf %3, %6 : vector<256x128xf32>
    %c0_6 = arith.constant 0 : index
    %c0_7 = arith.constant 0 : index
    %8 = vector.load %arg7[%c0_6, %c0_7] : memref<256x128xf32, #tpu.memory_space<vmem>>, vector<256x128xf32>
    tpu.vector_store %arg7[%c0_6, %c0_7], %7 {strides = array<i32>} : memref<256x128xf32, #tpu.memory_space<vmem>>, vector<256x128xf32>,
    %c1_i32 = arith.constant 1 : i32
    %9 = arith.cmpi eq, %arg1, %c1_i32 : i32
    %10 = arith.extui %9 : i1 to i32
    %c0_i32_8 = arith.constant 0 : i32
    %11 = arith.cmpi ne, %10, %c0_i32_8 : i32
    scf.if %11 {
      %c0_9 = arith.constant 0 : index
      %c0_10 = arith.constant 0 : index
      %12 = vector.load %arg7[%c0_9, %c0_10] : memref<256x128xf32, #tpu.memory_space<vmem>>, vector<256x128xf32>
      %13 = arith.truncf %12 : vector<256x128xf32> to vector<256x128xbf16>
      %c0_11 = arith.constant 0 : index
      %c0_12 = arith.constant 0 : index
      %14 = vector.load %arg5[%c0_11, %c0_12] : memref<256x128xbf16, #tpu.memory_space<vmem>>, vector<256x128xbf16>
      tpu.vector_store %arg5[%c0_11, %c0_12], %13 {strides = array<i32>} : memref<256x128xbf16, #tpu.memory_space<vmem>>, vector<256x128xbf16>,
      %c0_13 = arith.constant 0 : index
      %c0_14 = arith.constant 0 : index
      %15 = vector.load %arg4[%c0_13, %c0_14] : memref<256x128xf32, #tpu.memory_space<vmem>>, vector<256x128xf32>
      %16 = arith.addf %15, %12 : vector<256x128xf32>
      %c0_15 = arith.constant 0 : index
      %c0_16 = arith.constant 0 : index
      %17 = vector.load %arg6[%c0_15, %c0_16] : memref<256x128xf32, #tpu.memory_space<vmem>>, vector<256x128xf32>
      tpu.vector_store %arg6[%c0_15, %c0_16], %16 {strides = array<i32>} : memref<256x128xf32, #tpu.memory_space<vmem>>, vector<256x128xf32>,
    } else {
    }
    return
  }
  func.func @transform_0(%arg0: i32, %arg1: i32) -> (i32, i32) {
    %c0_i32 = arith.constant 0 : i32
    return %arg0, %arg1 : i32, i32
  }
  func.func @transform_1(%arg0: i32, %arg1: i32) -> (i32, i32) {
    %c0_i32 = arith.constant 0 : i32
    %c0_i32_0 = arith.constant 0 : i32
    return %arg1, %c0_i32 : i32, i32
  }
  func.func @transform_2(%arg0: i32, %arg1: i32) -> (i32, i32) {
    %c0_i32 = arith.constant 0 : i32
    %c0_i32_0 = arith.constant 0 : i32
    return %arg0, %c0_i32 : i32, i32
  }
  func.func @transform_3(%arg0: i32, %arg1: i32) -> (i32, i32) {
    %c0_i32 = arith.constant 0 : i32
    %c0_i32_0 = arith.constant 0 : i32
    return %arg0, %c0_i32 : i32, i32
  }
  func.func @transform_4(%arg0: i32, %arg1: i32) -> (i32, i32) {
    %c0_i32 = arith.constant 0 : i32
    %c0_i32_0 = arith.constant 0 : i32
    return %arg0, %c0_i32 : i32, i32
  }
}

module attributes {stable_mosaic.version = 11 : i64} {
  func.func @_mean_residual_kernel(%arg0: i32, %arg1: memref<256x128xf32, #tpu.memory_space<vmem>>, %arg2: memref<256x128xf32, #tpu.memory_space<vmem>>, %arg3: memref<256x128xf32, #tpu.memory_space<vmem>>) attributes {dimension_semantics = [#tpu.dimension_semantics<parallel>], iteration_bounds = array<i64: 2>, scalar_prefetch = 0 : i64, scratch_operands = 0 : i64, tpu.core_type = #tpu.core_type<tc>, window_params = [{transform_indices = @transform_0, window_bounds = array<i64: 256, 128>}, {transform_indices = @transform_1, window_bounds = array<i64: 256, 128>}, {transform_indices = @transform_2, window_bounds = array<i64: 256, 128>}]} {
    %c0 = arith.constant 0 : index
    %c0_0 = arith.constant 0 : index
    %0 = vector.load %arg2[%c0, %c0_0] : memref<256x128xf32, #tpu.memory_space<vmem>>, vector<256x128xf32>
    %1 = arith.mulf %0, %0 : vector<256x128xf32>
    %cst = arith.constant dense<0.000000e+00> : vector<256xf32>
    %2 = vector.multi_reduction <add>, %1, %cst [1] : vector<256x128xf32> to vector<256xf32>
    %3 = vector.shape_cast %2 : vector<256xf32> to vector<256x1xf32>
    %4 = math.sqrt %3 : vector<256x1xf32>
    %c0_1 = arith.constant 0 : index
    %c0_2 = arith.constant 0 : index
    %5 = vector.load %arg1[%c0_1, %c0_2] : memref<256x128xf32, #tpu.memory_space<vmem>>, vector<256x128xf32>
    %cst_3 = arith.constant 0.333333343 : f32
    %6 = vector.broadcast %cst_3 : f32 to vector<256x128xf32>
    %7 = arith.mulf %5, %6 : vector<256x128xf32>
    %cst_4 = arith.constant 9.99999996E-13 : f32
    %8 = vector.broadcast %cst_4 : f32 to vector<256x1xf32>
    %9 = arith.maximumf %4, %8 : vector<256x1xf32>
    %10 = vector.broadcast %9 : vector<256x1xf32> to vector<256x128xf32>
    %11 = arith.divf %0, %10 : vector<256x128xf32>
    %12 = arith.addf %7, %11 : vector<256x128xf32>
    %c0_5 = arith.constant 0 : index
    %c0_6 = arith.constant 0 : index
    %13 = vector.load %arg3[%c0_5, %c0_6] : memref<256x128xf32, #tpu.memory_space<vmem>>, vector<256x128xf32>
    tpu.vector_store %arg3[%c0_5, %c0_6], %12 {strides = array<i32>} : memref<256x128xf32, #tpu.memory_space<vmem>>, vector<256x128xf32>,
    return
  }
  func.func @transform_0(%arg0: i32) -> (i32, i32) {
    %c0_i32 = arith.constant 0 : i32
    %c0_i32_0 = arith.constant 0 : i32
    return %arg0, %c0_i32 : i32, i32
  }
  func.func @transform_1(%arg0: i32) -> (i32, i32) {
    %c0_i32 = arith.constant 0 : i32
    %c0_i32_0 = arith.constant 0 : i32
    return %arg0, %c0_i32 : i32, i32
  }
  func.func @transform_2(%arg0: i32) -> (i32, i32) {
    %c0_i32 = arith.constant 0 : i32
    %c0_i32_0 = arith.constant 0 : i32
    return %arg0, %c0_i32 : i32, i32
  }
}

</mosaic_0001>

<bundles_post_ra>
// kernel: micro_forward.8
= control target key start
LH: loop header
LB: loop body
LE: loop exit
PB: predicated region body
PF: predicated region fallthrough
CT: control target
= control target key end

     0   :  { %s1597_s12 = smov 0   ;;  %s2229_s0 = inlined_call_operand.vmem [shape: f32[512,128], index: 0, kind: input, shape index: {}]   ;;  %s2230_s1 = inlined_call_operand.vmem [shape: f32[128,128], index: 1, kind: input, shape index: {}]   ;;  %s2231_s2 = inlined_call_operand.vmem [shape: f32[1,128], index: 2, kind: input, shape index: {}]   ;;  %s2232_s3 = inlined_call_operand.vmem [shape: bf16[512,128], index: 3, kind: output, shape index: {}]  }
   0x1 LB: > { %s1086_s13 = sadd.s32 4294967295, %s1575_s12   ;;  %p1090_p0 = scmp.ge.s32.totalorder %s1575_s12, 1  ;;  %s1575_s12 = sphi %s1597_s12, %s13_s12  }
   0x2   : > { %p138_p1 = scmp.lt.s32.totalorder %s1575_s12, 3 }
   0x4   : > { %p139_p2 = pnand %p1090_p0, %p138_p1 }
   0x5   : > { %v206_v0 = vld [vmem:[%s2230_s1] sm:$0xff] (!%p139_p2)  ;;  %v207_v1 = vld [vmem:[%s2230_s1 + $0x8] sm:$0xff] (!%p139_p2)  ;;  %v208_v2 = vld [vmem:[%s2230_s1 + $0x10] sm:$0xff] (!%p139_p2)  ;;  %s1091_s20 = sshll.u32 (!%p139_p2), %s1086_s13, 5 }
   0x6   : > { %142 = sbr.rel (%p139_p2) target bundleno = 511 (0x1ff), region = 32  ;;  %v1385_v3 = vpack.c.bf16 (!%p139_p2), %v207_v1, %v206_v0  ;;  %v209_v4 = vld [vmem:[%s2230_s1 + $0x18] sm:$0xff] (!%p139_p2)  ;;  %p163_p3 = scmp.lt.s32.totalorder (!%p139_p2), %s1091_s20, 63  ;;  %v210_v6 = vld [vmem:[%s2230_s1 + $0x20] sm:$0xff] (!%p139_p2)  ;;  %v211_v7 = vld [vmem:[%s2230_s1 + $0x28] sm:$0xff] (!%p139_p2) }
   0x7   : > { %v1389_v5 = vpack.c.bf16 (!%p139_p2), %v209_v4, %v208_v2  ;;  %v1393_v8 = vpack.c.bf16 (!%p139_p2), %v211_v7, %v210_v6  ;;  %v212_v9 = vld [vmem:[%s2230_s1 + $0x30] sm:$0xff] (!%p139_p2)  ;;  %v213_v10 = vld [vmem:[%s2230_s1 + $0x38] sm:$0xff] (!%p139_p2)  ;;  %v214_v14 = vld [vmem:[%s2230_s1 + $0x40] sm:$0xff] (!%p139_p2) }
   0x8   : > { %1386 = vmatprep.subr.bf16.mxu0 (!%p139_p2), %v1385_v3  ;;  %1417 = vmatprep.subr.bf16.mxu1 (!%p139_p2), %v1385_v3  ;;  %v1397_v13 = vpack.c.bf16 (!%p139_p2), %v213_v10, %v212_v9  ;;  %v215_v15 = vld [vmem:[%s2230_s1 + $0x48] sm:$0xff] (!%p139_p2)  ;;  %v216_v17 = vld [vmem:[%s2230_s1 + $0x50] sm:$0xff] (!%p139_p2)  ;;  %v217_v18 = vld [vmem:[%s2230_s1 + $0x58] sm:$0xff] (!%p139_p2) }
   0x9   : > { %1388 = vmatpush3.bf16.msra.mxu0 (!%p139_p2), %v1385_v3  ;;  %1425 = vmatpush3.bf16.msra.mxu1 (!%p139_p2), %v1385_v3  ;;  %v1401_v16 = vpack.c.bf16 (!%p139_p2), %v215_v15, %v214_v14  ;;  %v1405_v19 = vpack.c.bf16 (!%p139_p2), %v217_v18, %v216_v17  ;;  %v218_v20 = vld [vmem:[%s2230_s1 + $0x60] sm:$0xff] (!%p139_p2)  ;;  %v219_v21 = vld [vmem:[%s2230_s1 + $0x68] sm:$0xff] (!%p139_p2)  ;;  %v220_v23 = vld [vmem:[%s2230_s1 + $0x70] sm:$0xff] (!%p139_p2) }
   0xa   : > { %1390 = vmatprep.subr.bf16.mxu0 (!%p139_p2), %v1389_v5  ;;  %1418 = vmatprep.subr.bf16.mxu1 (!%p139_p2), %v1389_v5  ;;  %v1409_v22 = vpack.c.bf16 (!%p139_p2), %v219_v21, %v218_v20  ;;  %v221_v24 = vld [vmem:[%s2230_s1 + $0x78] sm:$0xff] (!%p139_p2)  ;;  %v1696_v56 = vld [vmem:[%s2231_s2] ss:$0 sm:$0xff] (!%p139_p2) }
   0xb   : > { %v1413_v25 = vpack.c.bf16 (!%p139_p2), %v221_v24, %v220_v23 }
   0xd   : > { %s2234_s20 = smov (!%p163_p3, %s1091_s20), 63  ;;  %1392 = vmatpush3.bf16.msra.mxu0 %v1389_v5  ;;  %1426 = vmatpush3.bf16.msra.mxu1 %v1389_v5 }
   0xe   : > { %s1092_s27 = sshll.u32 %s2234_s20, 3  ;;  %1394 = vmatprep.subr.bf16.mxu0 %v1393_v8  ;;  %1419 = vmatprep.subr.bf16.mxu1 %v1393_v8  ;;  %s1094_s28 = sshll.u32 %s2234_s20, 2 }
   0xf   : > { %s1635_s7 = scalar_lea.vmem %s2229_s0, %s1092_s27  ;;  %s1973_s30 = scalar_lea.vmem %s2232_s3, %s1094_s28 }
  0x10   : > { %v174_v11 = vld [vmem:[%s1635_s7] sm:$0xff]  ;;  %v175_v26 = vld [vmem:[%s1635_s7 + $0x8] sm:$0xff]  ;;  %v176_v28 = vld [vmem:[%s1635_s7 + $0x10] sm:$0xff] }
  0x11   : > { %v190_v12 = vld [vmem:[%s1635_s7 + $0x80] sm:$0xff]  ;;  %1337 = vmatprep.mubr.f32.mxu0 %v174_v11  ;;  %1396 = vmatpush3.bf16.msra.mxu0 %v1393_v8  ;;  %v191_v27 = vld [vmem:[%s1635_s7 + $0x88] sm:$0xff]  ;;  %v192_v29 = vld [vmem:[%s1635_s7 + $0x90] sm:$0xff] }
  0x12   : > { %1361 = vmatprep.mubr.f32.mxu1 %v190_v12  ;;  %1427 = vmatpush3.bf16.msra.mxu1 %v1393_v8  ;;  %v177_v30 = vld [vmem:[%s1635_s7 + $0x18] sm:$0xff]  ;;  %v178_v32 = vld [vmem:[%s1635_s7 + $0x20] sm:$0xff]  ;;  %v179_v34 = vld [vmem:[%s1635_s7 + $0x28] sm:$0xff] }
  0x13   : > { %1398 = vmatprep.subr.bf16.mxu0 %v1397_v13  ;;  %1420 = vmatprep.subr.bf16.mxu1 %v1397_v13  ;;  %v193_v31 = vld [vmem:[%s1635_s7 + $0x98] sm:$0xff]  ;;  %v194_v33 = vld [vmem:[%s1635_s7 + $0xa0] sm:$0xff]  ;;  %v195_v35 = vld [vmem:[%s1635_s7 + $0xa8] sm:$0xff] }
  0x14   : > { %v180_v36 = vld [vmem:[%s1635_s7 + $0x30] sm:$0xff]  ;;  %v181_v38 = vld [vmem:[%s1635_s7 + $0x38] sm:$0xff]  ;;  %v182_v40 = vld [vmem:[%s1635_s7 + $0x40] sm:$0xff] }
  0x15   : > { %1400 = vmatpush3.bf16.msra.mxu0 %v1397_v13  ;;  %v196_v37 = vld [vmem:[%s1635_s7 + $0xb0] sm:$0xff]  ;;  %v197_v39 = vld [vmem:[%s1635_s7 + $0xb8] sm:$0xff]  ;;  %v198_v41 = vld [vmem:[%s1635_s7 + $0xc0] sm:$0xff] }
  0x16   : > { %1428 = vmatpush3.bf16.msra.mxu1 %v1397_v13  ;;  %1402 = vmatprep.subr.bf16.mxu0 %v1401_v16  ;;  %v183_v42 = vld [vmem:[%s1635_s7 + $0x48] sm:$0xff]  ;;  %v184_v44 = vld [vmem:[%s1635_s7 + $0x50] sm:$0xff]  ;;  %v185_v46 = vld [vmem:[%s1635_s7 + $0x58] sm:$0xff] }
  0x17   : > { %1421 = vmatprep.subr.bf16.mxu1 %v1401_v16  ;;  %v199_v43 = vld [vmem:[%s1635_s7 + $0xc8] sm:$0xff]  ;;  %v200_v45 = vld [vmem:[%s1635_s7 + $0xd0] sm:$0xff]  ;;  %v201_v47 = vld [vmem:[%s1635_s7 + $0xd8] sm:$0xff] }
  0x18   : > { %v186_v48 = vld [vmem:[%s1635_s7 + $0x60] sm:$0xff]  ;;  %v187_v50 = vld [vmem:[%s1635_s7 + $0x68] sm:$0xff]  ;;  %v188_v52 = vld [vmem:[%s1635_s7 + $0x70] sm:$0xff] }
  0x19   : > { %1404 = vmatpush3.bf16.msra.mxu0 %v1401_v16  ;;  %v202_v49 = vld [vmem:[%s1635_s7 + $0xe0] sm:$0xff]  ;;  %v203_v51 = vld [vmem:[%s1635_s7 + $0xe8] sm:$0xff]  ;;  %v204_v53 = vld [vmem:[%s1635_s7 + $0xf0] sm:$0xff] }
  0x1a   : > { %1429 = vmatpush3.bf16.msra.mxu1 %v1401_v16  ;;  %1406 = vmatprep.subr.bf16.mxu0 %v1405_v19  ;;  %v189_v54 = vld [vmem:[%s1635_s7 + $0x78] sm:$0xff] }
  0x1b   : > { %1422 = vmatprep.subr.bf16.mxu1 %v1405_v19  ;;  %v205_v55 = vld [vmem:[%s1635_s7 + $0xf8] sm:$0xff] }
  0x1d   : > { %1408 = vmatpush3.bf16.msra.mxu0 %v1405_v19 }
  0x1e   : > { %1430 = vmatpush3.bf16.msra.mxu1 %v1405_v19  ;;  %1410 = vmatprep.subr.bf16.mxu0 %v1409_v22 }
  0x1f   : > { %1423 = vmatprep.subr.bf16.mxu1 %v1409_v22 }
  0x21   : > { %1412 = vmatpush3.bf16.msra.mxu0 %v1409_v22 }
  0x22   : > { %1431 = vmatpush3.bf16.msra.mxu1 %v1409_v22  ;;  %1414 = vmatprep.subr.bf16.mxu0 %v1413_v25 }
  0x23   : > { %1424 = vmatprep.subr.bf16.mxu1 %v1413_v25 }
  0x25   : > { %1416 = vmatpush3.bf16.msra.mxu0 %v1413_v25 }
  0x26   : > { %1432 = vmatpush3.bf16.msra.mxu1 %v1413_v25 }
  0x28   : > { %1338 = vmatmul.mubr.f32.vlgmr.msra.gmra.mrb[0].mxu0 %v175_v26 }
  0x29   : > { %1362 = vmatmul.mubr.f32.vlgmr.msra.gmra.mrb[0].mxu1 %v191_v27  ;;  %1340 = vmatprep.mubr.f32.mxu0 %v176_v28 }
  0x2a   : > { %1364 = vmatprep.mubr.f32.mxu1 %v192_v29 }
  0x2c   : > { %1341 = vmatmul.mubr.f32.gmra.mrb[2].mxu0 %v177_v30 }
  0x2d   : > { %1365 = vmatmul.mubr.f32.gmra.mrb[2].mxu1 %v193_v31  ;;  %1343 = vmatprep.mubr.f32.mxu0 %v178_v32 }
  0x2e   : > { %1367 = vmatprep.mubr.f32.mxu1 %v194_v33 }
  0x30   : > { %1344 = vmatmul.mubr.f32.gmra.mrb[4].mxu0 %v179_v34 }
  0x31   : > { %1368 = vmatmul.mubr.f32.gmra.mrb[4].mxu1 %v195_v35  ;;  %1346 = vmatprep.mubr.f32.mxu0 %v180_v36 }
  0x32   : > { %1370 = vmatprep.mubr.f32.mxu1 %v196_v37 }
  0x34   : > { %1347 = vmatmul.mubr.f32.gmra.mrb[6].mxu0 %v181_v38 }
  0x35   : > { %1371 = vmatmul.mubr.f32.gmra.mrb[6].mxu1 %v197_v39  ;;  %1349 = vmatprep.mubr.f32.mxu0 %v182_v40 }
  0x36   : > { %1373 = vmatprep.mubr.f32.mxu1 %v198_v41 }
  0x38   : > { %1350 = vmatmul.mubr.f32.gmra.mrb[8].mxu0 %v183_v42 }
  0x39   : > { %1374 = vmatmul.mubr.f32.gmra.mrb[8].mxu1 %v199_v43  ;;  %1352 = vmatprep.mubr.f32.mxu0 %v184_v44 }
  0x3a   : > { %1376 = vmatprep.mubr.f32.mxu1 %v200_v45 }
  0x3c   : > { %1353 = vmatmul.mubr.f32.gmra.mrb[10].mxu0 %v185_v46 }
  0x3d   : > { %1377 = vmatmul.mubr.f32.gmra.mrb[10].mxu1 %v201_v47  ;;  %1355 = vmatprep.mubr.f32.mxu0 %v186_v48 }
  0x3e   : > { %1379 = vmatprep.mubr.f32.mxu1 %v202_v49 }
  0x40   : > { %1356 = vmatmul.mubr.f32.gmra.mrb[12].mxu0 %v187_v50 }
  0x41   : > { %1380 = vmatmul.mubr.f32.gmra.mrb[12].mxu1 %v203_v51  ;;  %1358 = vmatprep.mubr.f32.mxu0 %v188_v52 }
  0x42   : > { %1382 = vmatprep.mubr.f32.mxu1 %v204_v53 }
  0x44   : > { %1359 = vmatmul.mubr.f32.gmra.mrb[14].mxu0 %v189_v54 }
  0x45   : > { %1383 = vmatmul.mubr.f32.gmra.mrb[14].mxu1 %v205_v55 }
  0xfb   : > { %v1339_v57 = vpop.f32.mrb[0].mxu0 }
  0xfc   : > { %v1363_v58 = vpop.f32.mrb[0].mxu1  ;;  %v1699_v59 = vadd.f32 %v1339_v57, %v1696_v56  ;;  %v295_v61 = vpop.f32.mrb[1].mxu0 }
  0xfd   : > { %v1702_v60 = vadd.f32 %v1363_v58, %v1696_v56  ;;  %v375_v62 = vpop.f32.mrb[1].mxu1  ;;  %v1705_v63 = vadd.f32 %v1696_v56, %v295_v61 }
  0xfe   : > { %v455_v1 = vmul.f32 %v1699_v59, %v1699_v59  ;;  %v1718_v8 = vadd.f32 %v1696_v56, %v375_v62 }
  0xff   : > { %v471_v0 = vmul.f32 %v1702_v60, %v1702_v60  ;;  %v1342_v2 = vpop.f32.mrb[2].mxu0  ;;  %v454_v10 = vmul.f32 %v1705_v63, %v1705_v63 }
 0x100   : > { %v1366_v3 = vpop.f32.mrb[2].mxu1  ;;  %v1712_v4 = vadd.f32 %v1342_v2, %v1696_v56  ;;  %488 = vadd.xlane.f32.xlu0 %v455_v1  ;;  %v305_v5 = vpop.f32.mrb[3].mxu0  ;;  %v470_v18 = vmul.f32 %v1718_v8, %v1718_v8 }
 0x101   : > { %520 = vadd.xlane.f32.xlu1 %v471_v0  ;;  %v1715_v6 = vadd.f32 %v1366_v3, %v1696_v56  ;;  %v385_v7 = vpop.f32.mrb[3].mxu1  ;;  %v1727_v16 = vadd.f32 %v1696_v56, %v305_v5 }
 0x102   : > { %v457_v9 = vmul.f32 %v1712_v4, %v1712_v4  ;;  %v1730_v17 = vadd.f32 %v1696_v56, %v385_v7 }
 0x103   : > { %v1345_v11 = vpop.f32.mrb[4].mxu0  ;;  %v473_v13 = vmul.f32 %v1715_v6, %v1715_v6  ;;  %v456_v25 = vmul.f32 %v1727_v16, %v1727_v16 }
 0x104   : > { %v1369_v12 = vpop.f32.mrb[4].mxu1  ;;  %486 = vadd.xlane.f32.xlu0 %v454_v10  ;;  %v315_v14 = vpop.f32.mrb[5].mxu0  ;;  %v1735_v21 = vadd.f32 %v1345_v11, %v1696_v56  ;;  %v472_v26 = vmul.f32 %v1730_v17, %v1730_v17 }
 0x105   : > { %492 = vadd.xlane.f32.xlu1 %v457_v9  ;;  %v395_v15 = vpop.f32.mrb[5].mxu1  ;;  %v1738_v22 = vadd.f32 %v1696_v56, %v315_v14  ;;  %v1745_v27 = vadd.f32 %v1369_v12, %v1696_v56 }
 0x106   : > { %v1748_v30 = vadd.f32 %v1696_v56, %v395_v15  ;;  %v459_v31 = vmul.f32 %v1735_v21, %v1735_v21 }
 0x107   : > { %v1348_v19 = vpop.f32.mrb[6].mxu0  ;;  %v458_v32 = vmul.f32 %v1738_v22, %v1738_v22  ;;  %v475_v35 = vmul.f32 %v1745_v27, %v1745_v27 }
 0x108   : > { %v1372_v20 = vpop.f32.mrb[6].mxu1  ;;  %518 = vadd.xlane.f32.xlu0 %v470_v18  ;;  %v325_v23 = vpop.f32.mrb[7].mxu0  ;;  %v1757_v38 = vadd.f32 %v1348_v19, %v1696_v56  ;;  %v474_v40 = vmul.f32 %v1748_v30, %v1748_v30 }
 0x109   : > { %524 = vadd.xlane.f32.xlu1 %v473_v13  ;;  %v405_v24 = vpop.f32.mrb[7].mxu1  ;;  %v1760_v39 = vadd.f32 %v1696_v56, %v325_v23  ;;  %v1765_v43 = vadd.f32 %v1372_v20, %v1696_v56 }
 0x10a   : > { %v1768_v46 = vadd.f32 %v1696_v56, %v405_v24  ;;  %v461_v47 = vmul.f32 %v1757_v38, %v1757_v38 }
 0x10b   : > { %v1351_v28 = vpop.f32.mrb[8].mxu0  ;;  %v460_v48 = vmul.f32 %v1760_v39, %v1760_v39  ;;  %v477_v51 = vmul.f32 %v1765_v43, %v1765_v43 }
 0x10c   : > { %v1375_v29 = vpop.f32.mrb[8].mxu1  ;;  %522 = vadd.xlane.f32.xlu0 %v472_v26  ;;  %v335_v33 = vpop.f32.mrb[9].mxu0  ;;  %v1777_v54 = vadd.f32 %v1351_v28, %v1696_v56  ;;  %v476_v57 = vmul.f32 %v1768_v46, %v1768_v46 }
 0x10d   : > { %490 = vadd.xlane.f32.xlu1 %v456_v25  ;;  %v415_v34 = vpop.f32.mrb[9].mxu1  ;;  %v1780_v55 = vadd.f32 %v1696_v56, %v335_v33  ;;  %v1785_v62 = vadd.f32 %v1375_v29, %v1696_v56 }
 0x10e   : > { %v1788_v0 = vadd.f32 %v1696_v56, %v415_v34  ;;  %v463_v1 = vmul.f32 %v1777_v54, %v1777_v54 }
 0x10f   : > { %v1354_v36 = vpop.f32.mrb[10].mxu0  ;;  %v462_v2 = vmul.f32 %v1780_v55, %v1780_v55  ;;  %v479_v3 = vmul.f32 %v1785_v62, %v1785_v62 }
 0x110   : > { %v1378_v37 = vpop.f32.mrb[10].mxu1  ;;  %494 = vadd.xlane.f32.xlu0 %v458_v32  ;;  %v345_v41 = vpop.f32.mrb[11].mxu0  ;;  %v1797_v5 = vadd.f32 %v1354_v36, %v1696_v56  ;;  %v478_v9 = vmul.f32 %v1788_v0, %v1788_v0 }
 0x111   : > { %496 = vadd.xlane.f32.xlu1 %v459_v31  ;;  %v425_v42 = vpop.f32.mrb[11].mxu1  ;;  %v1800_v7 = vadd.f32 %v1696_v56, %v345_v41  ;;  %v1805_v10 = vadd.f32 %v1378_v37, %v1696_v56 }
 0x112   : > { %v1808_v11 = vadd.f32 %v1696_v56, %v425_v42  ;;  %v465_v12 = vmul.f32 %v1797_v5, %v1797_v5 }
 0x113   : > { %v1357_v44 = vpop.f32.mrb[12].mxu0  ;;  %v464_v13 = vmul.f32 %v1800_v7, %v1800_v7  ;;  %v481_v14 = vmul.f32 %v1805_v10, %v1805_v10 }
 0x114   : > { %v1381_v45 = vpop.f32.mrb[12].mxu1  ;;  %526 = vadd.xlane.f32.xlu0 %v474_v40  ;;  %v355_v49 = vpop.f32.mrb[13].mxu0  ;;  %v1817_v15 = vadd.f32 %v1357_v44, %v1696_v56  ;;  %v480_v19 = vmul.f32 %v1808_v11, %v1808_v11 }
 0x115   : > { %528 = vadd.xlane.f32.xlu1 %v475_v35  ;;  %v435_v50 = vpop.f32.mrb[13].mxu1  ;;  %v1820_v18 = vadd.f32 %v1696_v56, %v355_v49  ;;  %v1825_v20 = vadd.f32 %v1381_v45, %v1696_v56 }
 0x116   : > { %v1828_v23 = vadd.f32 %v1696_v56, %v435_v50  ;;  %v467_v24 = vmul.f32 %v1817_v15, %v1817_v15 }
 0x117   : > { %v1360_v52 = vpop.f32.mrb[14].mxu0  ;;  %v466_v25 = vmul.f32 %v1820_v18, %v1820_v18  ;;  %v483_v26 = vmul.f32 %v1825_v20, %v1825_v20 }
 0x118   : > { %v1384_v53 = vpop.f32.mrb[14].mxu1  ;;  %498 = vadd.xlane.f32.xlu0 %v460_v48  ;;  %v365_v58 = vpop.f32.mrb[15].mxu0  ;;  %v1837_v28 = vadd.f32 %v1360_v52, %v1696_v56  ;;  %v482_v31 = vmul.f32 %v1828_v23, %v1828_v23 }
 0x119   : > { %500 = vadd.xlane.f32.xlu1 %v461_v47  ;;  %v445_v61 = vpop.f32.mrb[15].mxu1  ;;  %v1840_v29 = vadd.f32 %v1696_v56, %v365_v58  ;;  %v1845_v32 = vadd.f32 %v1384_v53, %v1696_v56 }
 0x11a   : > { %v1848_v33 = vadd.f32 %v1696_v56, %v445_v61  ;;  %v469_v34 = vmul.f32 %v1837_v28, %v1837_v28 }
 0x11b   : > { %v468_v35 = vmul.f32 %v1840_v29, %v1840_v29  ;;  %v485_v36 = vmul.f32 %v1845_v32, %v1845_v32 }
 0x11c   : > { %530 = vadd.xlane.f32.xlu0 %v476_v57  ;;  %v484_v37 = vmul.f32 %v1848_v33, %v1848_v33 }
 0x11d   : > { %532 = vadd.xlane.f32.xlu1 %v477_v51 }
 0x120   : > { %502 = vadd.xlane.f32.xlu0 %v462_v2 }
 0x121   : > { %504 = vadd.xlane.f32.xlu1 %v463_v1 }
 0x124   : > { %534 = vadd.xlane.f32.xlu0 %v478_v9 }
 0x125   : > { %536 = vadd.xlane.f32.xlu1 %v479_v3 }
 0x128   : > { %506 = vadd.xlane.f32.xlu0 %v464_v13 }
 0x129   : > { %508 = vadd.xlane.f32.xlu1 %v465_v12 }
 0x12c   : > { %538 = vadd.xlane.f32.xlu0 %v480_v19 }
 0x12d   : > { %540 = vadd.xlane.f32.xlu1 %v481_v14 }
 0x130   : > { %510 = vadd.xlane.f32.xlu0 %v466_v25 }
 0x131   : > { %512 = vadd.xlane.f32.xlu1 %v467_v24 }
 0x134   : > { %542 = vadd.xlane.f32.xlu0 %v482_v31 }
 0x135   : > { %544 = vadd.xlane.f32.xlu1 %v483_v26 }
 0x138   : > { %514 = vadd.xlane.f32.xlu0 %v468_v35 }
 0x139   : > { %516 = vadd.xlane.f32.xlu1 %v469_v34 }
 0x13c   : > { %546 = vadd.xlane.f32.xlu0 %v484_v37 }
 0x13d   : > { %548 = vadd.xlane.f32.xlu1 %v485_v36 }
 0x18d   : > { %v489_v41 = vpop.xlane.xlu0 %488 }
 0x18e   : > { %v521_v40 = vpop.xlane.xlu1 %520  ;;  %vm559_vm2 = vcmp.eq.f32.partialorder %v489_v41, inf  ;;  %vm561_vm3 = vcmp.eq.f32.partialorder %v489_v41, 0.0  ;;  %v562_v51 = vand.u32 2147483648, %v489_v41 }
 0x18f   : > { %1441 = vrsqrt.f32 %v521_v40  ;;  %vm671_vm0 = vcmp.eq.f32.partialorder %v521_v40, inf  ;;  %vm673_vm1 = vcmp.eq.f32.partialorder %v521_v40, 0.0  ;;  %v674_v48 = vand.u32 2147483648, %v521_v40 }
 0x190   : > { %1443 = vrsqrt.f32 %v489_v41 }
 0x191   : > { %v487_v42 = vpop.xlane.xlu0 %486 }
 0x192   : > { %v493_v56 = vpop.xlane.xlu1 %492  ;;  %vm552_vm6 = vcmp.eq.f32.partialorder %v487_v42, inf  ;;  %vm554_vm7 = vcmp.eq.f32.partialorder %v487_v42, 0.0  ;;  %v555_v1 = vand.u32 2147483648, %v487_v42 }
 0x193   : > { %1445 = vrsqrt.f32 %v493_v56  ;;  %vm573_vm4 = vcmp.eq.f32.partialorder %v493_v56, inf  ;;  %vm575_vm5 = vcmp.eq.f32.partialorder %v493_v56, 0.0  ;;  %v576_v58 = vand.u32 2147483648, %v493_v56 }
 0x194   : > { %1447 = vrsqrt.f32 %v487_v42 }
 0x195   : > { %v1860_v45 = vpop.xlane.xlu0 %518 }
 0x196   : > { %v1858_v44 = vpop.xlane.xlu1 %524  ;;  %vm664_vm10 = vcmp.eq.f32.partialorder %v1860_v45, inf  ;;  %vm666_vm11 = vcmp.eq.f32.partialorder %v1860_v45, 0.0  ;;  %v667_v36 = vand.u32 2147483648, %v1860_v45 }
 0x197   : > { %1449 = vrsqrt.f32 %v1858_v44  ;;  %vm685_vm8 = vcmp.eq.f32.partialorder %v1858_v44, inf  ;;  %vm687_vm9 = vcmp.eq.f32.partialorder %v1858_v44, 0.0  ;;  %v688_v24 = vand.u32 2147483648, %v1858_v44 }
 0x198   : > { %1451 = vrsqrt.f32 %v1860_v45 }
 0x199   : > { %v1442_v47 = vpop.eup %1441  ;;  %v1866_v53 = vpop.xlane.xlu0 %522 }
 0x19a   : > { %v1444_v49 = vpop.eup %1443  ;;  %v670_v50 = vmul.f32 %v1442_v47, %v521_v40  ;;  %v1864_v52 = vpop.xlane.xlu1 %490  ;;  %vm678_vm14 = vcmp.eq.f32.partialorder %v1866_v53, inf  ;;  %vm680_vm15 = vcmp.eq.f32.partialorder %v1866_v53, 0.0 }
 0x19b   : > { %v558_v57 = vmul.f32 %v1444_v49, %v489_v41  ;;  %1453 = vrsqrt.f32 %v1864_v52  ;;  %vm566_vm12 = vcmp.eq.f32.partialorder %v1864_v52, inf  ;;  %vm568_vm13 = vcmp.eq.f32.partialorder %v1864_v52, 0.0 }
 0x19c   : > { %v672_v61 = vsel %vm671_vm0, %v521_v40, %v670_v50  ;;  %1455 = vrsqrt.f32 %v1866_v53  ;;  %v569_v50 = vand.u32 2147483648, %v1864_v52 }
 0x19d   : > { %v1446_v2 = vpop.eup %1445  ;;  %v675_v3 = vsel %vm673_vm1, %v674_v48, %v672_v61  ;;  %v560_v9 = vsel %vm559_vm2, %v489_v41, %v558_v57  ;;  %v1879_v26 = vpop.xlane.xlu0 %494 }
 0x19e   : > { %v1448_v12 = vpop.eup %1447  ;;  %v791_v13 = vmax.f32 %v675_v3, 1e-12  ;;  %v563_v14 = vsel %vm561_vm3, %v562_v51, %v560_v9  ;;  %v572_v19 = vmul.f32 %v1446_v2, %v493_v56  ;;  %v1877_v25 = vpop.xlane.xlu1 %496  ;;  %vm580_vm2 = vcmp.eq.f32.partialorder %v1879_v26, inf }
 0x19f   : > { %v775_v31 = vmax.f32 %v563_v14, 1e-12  ;;  %v551_v34 = vmul.f32 %v1448_v12, %v487_v42  ;;  %1457 = vrsqrt.f32 %v1877_v25  ;;  %vm587_vm0 = vcmp.eq.f32.partialorder %v1877_v25, inf }
 0x1a0   : > { %v574_v35 = vsel %vm573_vm4, %v493_v56, %v572_v19  ;;  %1459 = vrcp.f32 %v791_v13  ;;  %vm589_vm1 = vcmp.eq.f32.partialorder %v1877_v25, 0.0  ;;  %vm582_vm3 = vcmp.eq.f32.partialorder %v1879_v26, 0.0 }
 0x1a1   : > { %v1450_v37 = vpop.eup %1449  ;;  %v577_v40 = vsel %vm575_vm5, %v576_v58, %v574_v35  ;;  %v553_v41 = vsel %vm552_vm6, %v487_v42, %v551_v34  ;;  %1461 = vrsqrt.f32 %v1879_v26  ;;  %v1896_v57 = vpop.xlane.xlu0 %526  ;;  %v590_v35 = vand.u32 2147483648, %v1877_v25 }
 0x1a2   : > { %v1452_v47 = vpop.eup %1451  ;;  %v556_v48 = vsel %vm554_vm7, %v555_v1, %v553_v41  ;;  %v684_v49 = vmul.f32 %v1450_v37, %v1858_v44  ;;  %v1894_v51 = vpop.xlane.xlu1 %528  ;;  %1463 = vrcp.f32 %v775_v31  ;;  %v777_v61 = vmax.f32 %v577_v40, 1e-12 }
 0x1a3   : > { %v774_v56 = vmax.f32 %v556_v48, 1e-12  ;;  %v663_v58 = vmul.f32 %v1452_v47, %v1860_v45  ;;  %v681_v1 = vand.u32 2147483648, %v1866_v53  ;;  %vm699_vm4 = vcmp.eq.f32.partialorder %v1894_v51, inf }
 0x1a4   : > { %v686_v42 = vsel %vm685_vm8, %v1858_v44, %v684_v49  ;;  %vm701_vm5 = vcmp.eq.f32.partialorder %v1894_v51, 0.0  ;;  %vm692_vm6 = vcmp.eq.f32.partialorder %v1896_v57, inf  ;;  %vm694_vm7 = vcmp.eq.f32.partialorder %v1896_v57, 0.0 }
 0x1a5   : > { %v1454_v2 = vpop.eup %1453  ;;  %1465 = vrcp.f32 %v774_v56  ;;  %v689_v3 = vsel %vm687_vm9, %v688_v24, %v686_v42  ;;  %v665_v9 = vsel %vm664_vm10, %v1860_v45, %v663_v58  ;;  %v1918_v44 = vpop.xlane.xlu0 %498  ;;  %v583_v58 = vand.u32 2147483648, %v1879_v26 }
 0x1a6   : > { %v1456_v12 = vpop.eup %1455  ;;  %v668_v13 = vsel %vm666_vm11, %v667_v36, %v665_v9  ;;  %v565_v14 = vmul.f32 %v1454_v2, %v1864_v52  ;;  %1467 = vrsqrt.f32 %v1894_v51  ;;  %v1916_v19 = vpop.xlane.xlu1 %500  ;;  %v793_v24 = vmax.f32 %v689_v3, 1e-12 }
 0x1a7   : > { %v790_v31 = vmax.f32 %v668_v13, 1e-12  ;;  %v677_v34 = vmul.f32 %v1456_v12, %v1866_v53  ;;  %1469 = vrsqrt.f32 %v1896_v57  ;;  %v702_v42 = vand.u32 2147483648, %v1894_v51 }
 0x1a8   : > { %1471 = vrcp.f32 %v777_v61  ;;  %v567_v45 = vsel %vm566_vm12, %v1864_v52, %v565_v14  ;;  %v695_v12 = vand.u32 2147483648, %v1896_v57  ;;  %vm601_vm8 = vcmp.eq.f32.partialorder %v1916_v19, inf }
 0x1a9   : > { %v1458_v36 = vpop.eup %1457  ;;  %1473 = vrcp.f32 %v790_v31  ;;  %v570_v37 = vsel %vm568_vm13, %v569_v50, %v567_v45  ;;  %v679_v40 = vsel %vm678_vm14, %v1866_v53, %v677_v34  ;;  %v1939_v56 = vpop.xlane.xlu0 %530  ;;  %vm603_vm9 = vcmp.eq.f32.partialorder %v1916_v19, 0.0 }
 0x1aa   : > { %v776_v41 = vmax.f32 %v570_v37, 1e-12  ;;  %v682_v47 = vsel %vm680_vm15, %v681_v1, %v679_v40  ;;  %v586_v48 = vmul.f32 %v1458_v36, %v1877_v25  ;;  %1475 = vrsqrt.f32 %v1916_v19  ;;  %v1937_v49 = vpop.xlane.xlu1 %532  ;;  %v1460_v52 = vpop.eup %1459 }
 0x1ab   : > { %1477 = vrcp.f32 %v793_v24  ;;  %v792_v50 = vmax.f32 %v682_v47, 1e-12  ;;  %v1462_v61 = vpop.eup %1461  ;;  %v841_v24 = vmul.f32 %v1460_v52, %v1702_v60  ;;  %vm594_vm10 = vcmp.eq.f32.partialorder %v1918_v44, inf }
 0x1ac   : > { %1479 = vrcp.f32 %v776_v41  ;;  %v588_v53 = vsel %vm587_vm0, %v1877_v25, %v586_v48  ;;  %v1464_v1 = vpop.eup %1463  ;;  %v579_v3 = vmul.f32 %v1462_v61, %v1879_v26  ;;  %vm596_vm11 = vcmp.eq.f32.partialorder %v1918_v44, 0.0 }
 0x1ad   : > { %1481 = vrcp.f32 %v792_v50  ;;  %v591_v2 = vsel %vm589_vm1, %v590_v35, %v588_v53  ;;  %v1964_v31 = vpop.xlane.xlu0 %502  ;;  %v809_v45 = vmul.f32 %v1464_v1, %v1699_v59  ;;  %v597_v50 = vand.u32 2147483648, %v1918_v44 }
 0x1ae   : > { %v779_v9 = vmax.f32 %v591_v2, 1e-12  ;;  %1483 = vrsqrt.f32 %v1918_v44  ;;  %v1956_v13 = vpop.xlane.xlu1 %504  ;;  %v581_v25 = vsel %vm580_vm2, %v1879_v26, %v579_v3  ;;  %v604_v26 = vand.u32 2147483648, %v1916_v19 }
 0x1af   : > { %v1466_v14 = vpop.eup %1465  ;;  %1485 = vrsqrt.f32 %v1937_v49  ;;  %v584_v36 = vsel %vm582_vm3, %v583_v58, %v581_v25  ;;  %vm713_vm12 = vcmp.eq.f32.partialorder %v1937_v49, inf  ;;  %vm715_vm13 = vcmp.eq.f32.partialorder %v1937_v49, 0.0 }
 0x1b0   : > { %v1468_v34 = vpop.eup %1467  ;;  %v807_v35 = vmul.f32 %v1466_v14, %v1705_v63  ;;  %1487 = vrcp.f32 %v779_v9  ;;  %v778_v37 = vmax.f32 %v584_v36, 1e-12  ;;  %vm706_vm14 = vcmp.eq.f32.partialorder %v1939_v56, inf }
 0x1b1   : > { %v1470_v60 = vpop.eup %1469  ;;  %v698_v40 = vmul.f32 %v1468_v34, %v1894_v51  ;;  %1489 = vrsqrt.f32 %v1939_v56  ;;  %vm708_vm15 = vcmp.eq.f32.partialorder %v1939_v56, 0.0  ;;  %vm615_vm0 = vcmp.eq.f32.partialorder %v1956_v13, inf }
 0x1b2   : > { %v1472_v59 = vpop.eup %1471  ;;  %v1165_v63 = vpack.c.bf16 %v809_v45, %v807_v35  ;;  %v691_v41 = vmul.f32 %v1470_v60, %v1896_v57  ;;  %v1981_v47 = vpop.xlane.xlu1 %536  ;;  %1491 = vrcp.f32 %v778_v37  ;;  %vm617_vm1 = vcmp.eq.f32.partialorder %v1956_v13, 0.0 }
 0x1b3   : > { %v1474_v48 = vpop.eup %1473  ;;  %v700_v52 = vsel %vm699_vm4, %v1894_v51, %v698_v40  ;;  %1493 = vrsqrt.f32 %v1956_v13  ;;  %vm608_vm2 = vcmp.eq.f32.partialorder %v1964_v31, inf  ;;  %vm610_vm3 = vcmp.eq.f32.partialorder %v1964_v31, 0.0 }
 0x1b4   : > { %v1476_v58 = vpop.eup %1475  ;;  %1166 = vst [vmem:[%s1973_s30] sm:$0xff] %v1165_v63   ;;  %v839_v61 = vmul.f32 %v1474_v48, %v1718_v8  ;;  %v703_v53 = vsel %vm701_vm5, %v702_v42, %v700_v52  ;;  %v693_v1 = vsel %vm692_vm6, %v1896_v57, %v691_v41  ;;  %v2000_v8 = vpop.xlane.xlu0 %534  ;;  %v813_v42 = vmul.f32 %v1472_v59, %v1712_v4 }
 0x1b5   : > { %v1478_v2 = vpop.eup %1477  ;;  %v795_v3 = vmax.f32 %v703_v53, 1e-12  ;;  %v696_v9 = vsel %vm694_vm7, %v695_v12, %v693_v1  ;;  %v600_v14 = vmul.f32 %v1476_v58, %v1916_v19  ;;  %1495 = vrsqrt.f32 %v1964_v31 }
 0x1b6   : > { %v1480_v51 = vpop.eup %1479  ;;  %v1205_v25 = vpack.c.bf16 %v841_v24, %v839_v61  ;;  %v794_v34 = vmax.f32 %v696_v9, 1e-12  ;;  %v845_v36 = vmul.f32 %v1478_v2, %v1715_v6  ;;  %v2014_v60 = vpop.xlane.xlu1 %508  ;;  %v716_v63 = vand.u32 2147483648, %v1937_v49 }
 0x1b7   : > { %v1482_v45 = vpop.eup %1481  ;;  %v811_v35 = vmul.f32 %v1480_v51, %v1727_v16  ;;  %1497 = vrcp.f32 %v795_v3  ;;  %v602_v57 = vsel %vm601_vm8, %v1916_v19, %v600_v14  ;;  %vm727_vm4 = vcmp.eq.f32.partialorder %v1981_v47, inf }
 0x1b8   : > { %v1484_v12 = vpop.eup %1483  ;;  %1249 = vst [vmem:[%s1973_s30 + $0x40] sm:$0xff] %v1205_v25   ;;  %v843_v4 = vmul.f32 %v1482_v45, %v1730_v17  ;;  %1499 = vrcp.f32 %v794_v34  ;;  %v605_v24 = vsel %vm603_vm9, %v604_v26, %v602_v57  ;;  %v709_v26 = vand.u32 2147483648, %v1939_v56  ;;  %v2027_v52 = vpop.xlane.xlu0 %506 }
 0x1b9   : > { %v1486_v16 = vpop.eup %1485  ;;  %v1170_v37 = vpack.c.bf16 %v813_v42, %v811_v35  ;;  %v781_v40 = vmax.f32 %v605_v24, 1e-12  ;;  %v593_v59 = vmul.f32 %v1484_v12, %v1918_v44  ;;  %1501 = vrsqrt.f32 %v1981_v47 }
 0x1ba   : > { %v1488_v41 = vpop.eup %1487  ;;  %v1210_v6 = vpack.c.bf16 %v845_v36, %v843_v4  ;;  %v712_v48 = vmul.f32 %v1486_v16, %v1937_v49  ;;  %v2046_v51 = vpop.xlane.xlu1 %540  ;;  %v618_v25 = vand.u32 2147483648, %v1956_v13  ;;  %v611_v16 = vand.u32 2147483648, %v1964_v31 }
 0x1bb   : > { %v1490_v17 = vpop.eup %1489  ;;  %1242 = vst [vmem:[%s1973_s30 + $0x8] sm:$0xff] %v1170_v37   ;;  %1503 = vrcp.f32 %v781_v40  ;;  %v595_v19 = vsel %vm594_vm10, %v1918_v44, %v593_v59  ;;  %v817_v58 = vmul.f32 %v1488_v41, %v1735_v21  ;;  %vm729_vm5 = vcmp.eq.f32.partialorder %v1981_v47, 0.0 }
 0x1bc   : > { %1250 = vst [vmem:[%s1973_s30 + $0x48] sm:$0xff] %v1210_v6   ;;  %v598_v61 = vsel %vm596_vm11, %v597_v50, %v595_v19  ;;  %v714_v53 = vsel %vm713_vm12, %v1937_v49, %v712_v48  ;;  %v705_v1 = vmul.f32 %v1490_v17, %v1939_v56  ;;  %v1492_v2 = vpop.eup %1491  ;;  %1505 = vrsqrt.f32 %v2000_v8 }
 0x1bd   : > { %v780_v3 = vmax.f32 %v598_v61, 1e-12  ;;  %v717_v9 = vsel %vm715_vm13, %v716_v63, %v714_v53  ;;  %v1494_v14 = vpop.eup %1493  ;;  %v815_v21 = vmul.f32 %v1492_v2, %v1738_v22  ;;  %v730_v17 = vand.u32 2147483648, %v1981_v47 }
 0x1be   : > { %v797_v44 = vmax.f32 %v717_v9, 1e-12  ;;  %v707_v50 = vsel %vm706_vm14, %v1939_v56, %v705_v1  ;;  %v614_v42 = vmul.f32 %v1494_v14, %v1956_v13  ;;  %v2059_v56 = vpop.xlane.xlu0 %538  ;;  %vm720_vm6 = vcmp.eq.f32.partialorder %v2000_v8, inf }
 0x1bf   : > { %1507 = vrcp.f32 %v780_v3  ;;  %v710_v49 = vsel %vm708_vm15, %v709_v26, %v707_v50  ;;  %v1496_v34 = vpop.eup %1495  ;;  %v1175_v22 = vpack.c.bf16 %v817_v58, %v815_v21  ;;  %vm722_vm7 = vcmp.eq.f32.partialorder %v2000_v8, 0.0 }
 0x1c0   : > { %1509 = vrcp.f32 %v797_v44  ;;  %v796_v45 = vmax.f32 %v710_v49, 1e-12  ;;  %v616_v57 = vsel %vm615_vm0, %v1956_v13, %v614_v42  ;;  %v607_v12 = vmul.f32 %v1496_v34, %v1964_v31 }
 0x1c1   : > { %v1498_v35 = vpop.eup %1497  ;;  %1511 = vrsqrt.f32 %v2014_v60  ;;  %1243 = vst [vmem:[%s1973_s30 + $0x10] sm:$0xff] %v1175_v22   ;;  %v619_v24 = vsel %vm617_vm1, %v618_v25, %v616_v57  ;;  %v723_v26 = vand.u32 2147483648, %v2000_v8  ;;  %vm629_vm8 = vcmp.eq.f32.partialorder %v2014_v60, inf }
 0x1c2   : > { %v1500_v36 = vpop.eup %1499  ;;  %v849_v4 = vmul.f32 %v1498_v35, %v1745_v27  ;;  %1513 = vrcp.f32 %v796_v45  ;;  %v783_v40 = vmax.f32 %v619_v24, 1e-12  ;;  %v609_v59 = vsel %vm608_vm2, %v1964_v31, %v607_v12  ;;  %v2071_v27 = vpop.xlane.xlu1 %512 }
 0x1c3   : > { %v847_v37 = vmul.f32 %v1500_v36, %v1748_v30  ;;  %1515 = vrsqrt.f32 %v2027_v52  ;;  %v1502_v63 = vpop.eup %1501  ;;  %v612_v41 = vsel %vm610_vm3, %v611_v16, %v609_v59  ;;  %v2082_v58 = vpop.xlane.xlu0 %510  ;;  %vm631_vm9 = vcmp.eq.f32.partialorder %v2014_v60, 0.0 }
 0x1c4   : > { %1517 = vrcp.f32 %v783_v40  ;;  %v782_v48 = vmax.f32 %v612_v41, 1e-12  ;;  %v726_v30 = vmul.f32 %v1502_v63, %v1981_v47  ;;  %v632_v9 = vand.u32 2147483648, %v2014_v60 }
 0x1c5   : > { %v1504_v13 = vpop.eup %1503  ;;  %v1215_v6 = vpack.c.bf16 %v849_v4, %v847_v37  ;;  %1519 = vrsqrt.f32 %v2046_v51  ;;  %vm622_vm10 = vcmp.eq.f32.partialorder %v2027_v52, inf  ;;  %vm624_vm11 = vcmp.eq.f32.partialorder %v2027_v52, 0.0 }
 0x1c6   : > { %v1506_v31 = vpop.eup %1505  ;;  %1521 = vrcp.f32 %v782_v48  ;;  %v728_v19 = vsel %vm727_vm4, %v1981_v47, %v726_v30  ;;  %v821_v61 = vmul.f32 %v1504_v13, %v1757_v38  ;;  %v2098_v47 = vpop.xlane.xlu1 %544  ;;  %vm741_vm12 = vcmp.eq.f32.partialorder %v2046_v51, inf }
 0x1c7   : > { %1251 = vst [vmem:[%s1973_s30 + $0x50] sm:$0xff] %v1215_v6   ;;  %v731_v53 = vsel %vm729_vm5, %v730_v17, %v728_v19  ;;  %v719_v1 = vmul.f32 %v1506_v31, %v2000_v8  ;;  %1523 = vrsqrt.f32 %v2059_v56  ;;  %vm743_vm13 = vcmp.eq.f32.partialorder %v2046_v51, 0.0 }
 0x1c8   : > { %v799_v3 = vmax.f32 %v731_v53, 1e-12  ;;  %1525 = vrsqrt.f32 %v2071_v27  ;;  %v744_v12 = vand.u32 2147483648, %v2046_v51  ;;  %vm734_vm14 = vcmp.eq.f32.partialorder %v2059_v56, inf }
 0x1c9   : > { %v1508_v2 = vpop.eup %1507  ;;  %v721_v38 = vsel %vm720_vm6, %v2000_v8, %v719_v1  ;;  %vm736_vm15 = vcmp.eq.f32.partialorder %v2059_v56, 0.0  ;;  %v737_v13 = vand.u32 2147483648, %v2059_v56  ;;  %vm643_vm0 = vcmp.eq.f32.partialorder %v2071_v27, inf }
 0x1ca   : > { %v1510_v14 = vpop.eup %1509  ;;  %v819_v21 = vmul.f32 %v1508_v2, %v1760_v39  ;;  %1527 = vrcp.f32 %v799_v3  ;;  %v724_v49 = vsel %vm722_vm7, %v723_v26, %v721_v38  ;;  %v625_v39 = vand.u32 2147483648, %v2027_v52  ;;  %v2127_v59 = vpop.xlane.xlu1 %516 }
 0x1cb   : > { %v1512_v44 = vpop.eup %1511  ;;  %v853_v50 = vmul.f32 %v1510_v14, %v1765_v43  ;;  %v798_v34 = vmax.f32 %v724_v49, 1e-12  ;;  %1529 = vrsqrt.f32 %v2082_v58  ;;  %v2110_v43 = vpop.xlane.xlu0 %542  ;;  %vm645_vm1 = vcmp.eq.f32.partialorder %v2071_v27, 0.0 }
 0x1cc   : > { %v1514_v42 = vpop.eup %1513  ;;  %v1180_v25 = vpack.c.bf16 %v821_v61, %v819_v21  ;;  %v628_v22 = vmul.f32 %v1512_v44, %v2014_v60  ;;  %1531 = vrsqrt.f32 %v2098_v47  ;;  %v646_v31 = vand.u32 2147483648, %v2071_v27 }
 0x1cd   : > { %v1516_v45 = vpop.eup %1515  ;;  %v851_v35 = vmul.f32 %v1514_v42, %v1768_v46  ;;  %1533 = vrcp.f32 %v798_v34  ;;  %vm636_vm2 = vcmp.eq.f32.partialorder %v2082_v58, inf  ;;  %vm638_vm3 = vcmp.eq.f32.partialorder %v2082_v58, 0.0 }
 0x1ce   : > { %1244 = vst [vmem:[%s1973_s30 + $0x18] sm:$0xff] %v1180_v25   ;;  %v630_v8 = vsel %vm629_vm8, %v2014_v60, %v628_v22  ;;  %v621_v57 = vmul.f32 %v1516_v45, %v2027_v52  ;;  %v1518_v46 = vpop.eup %1517  ;;  %1535 = vrsqrt.f32 %v2110_v43  ;;  %vm755_vm4 = vcmp.eq.f32.partialorder %v2098_v47, inf  ;;  %v2172_v34 = vpop.xlane.xlu1 %548 }
 0x1cf   : > { %v1220_v36 = vpack.c.bf16 %v853_v50, %v851_v35  ;;  %v633_v4 = vsel %vm631_vm9, %v632_v9, %v630_v8  ;;  %v1520_v24 = vpop.eup %1519  ;;  %v825_v16 = vmul.f32 %v1518_v46, %v1777_v54  ;;  %v2143_v19 = vpop.xlane.xlu0 %514  ;;  %vm757_vm5 = vcmp.eq.f32.partialorder %v2098_v47, 0.0 }
 0x1d0   : > { %v785_v37 = vmax.f32 %v633_v4, 1e-12  ;;  %v623_v40 = vsel %vm622_vm10, %v2027_v52, %v621_v57  ;;  %v1522_v63 = vpop.eup %1521  ;;  %v740_v41 = vmul.f32 %v1520_v24, %v2046_v51  ;;  %vm748_vm6 = vcmp.eq.f32.partialorder %v2110_v43, inf }
 0x1d1   : > { %1252 = vst [vmem:[%s1973_s30 + $0x58] sm:$0xff] %v1220_v36   ;;  %v626_v60 = vsel %vm624_vm11, %v625_v39, %v623_v40  ;;  %v1524_v54 = vpop.eup %1523  ;;  %v823_v6 = vmul.f32 %v1522_v63, %v1780_v55  ;;  %v751_v4 = vand.u32 2147483648, %v2110_v43  ;;  %vm750_vm7 = vcmp.eq.f32.partialorder %v2110_v43, 0.0 }
 0x1d2   : > { %1537 = vrcp.f32 %v785_v37  ;;  %v784_v48 = vmax.f32 %v626_v60, 1e-12  ;;  %v1526_v30 = vpop.eup %1525  ;;  %v742_v52 = vsel %vm741_vm12, %v2046_v51, %v740_v41  ;;  %v733_v17 = vmul.f32 %v1524_v54, %v2059_v56 }
 0x1d3   : > { %1539 = vrsqrt.f32 %v2127_v59  ;;  %v1185_v26 = vpack.c.bf16 %v825_v16, %v823_v6  ;;  %v745_v55 = vsel %vm743_vm13, %v744_v12, %v742_v52  ;;  %v642_v61 = vmul.f32 %v1526_v30, %v2071_v27  ;;  %v2182_v24 = vpop.xlane.xlu0 %546 }
 0x1d4   : > { %1541 = vrcp.f32 %v784_v48  ;;  %v1528_v53 = vpop.eup %1527  ;;  %v801_v1 = vmax.f32 %v745_v55, 1e-12  ;;  %v735_v2 = vsel %vm734_vm14, %v2059_v56, %v733_v17  ;;  %vm657_vm8 = vcmp.eq.f32.partialorder %v2127_v59, inf }
 0x1d5   : > { %v1530_v3 = vpop.eup %1529  ;;  %1245 = vst [vmem:[%s1973_s30 + $0x20] sm:$0xff] %v1185_v26   ;;  %v857_v9 = vmul.f32 %v1528_v53, %v1785_v62  ;;  %v738_v51 = vsel %vm736_vm15, %v737_v13, %v735_v2  ;;  %v644_v14 = vsel %vm643_vm0, %v2071_v27, %v642_v61  ;;  %1543 = vrsqrt.f32 %v2143_v19 }
 0x1d6   : > { %v1532_v21 = vpop.eup %1531  ;;  %1545 = vrcp.f32 %v801_v1  ;;  %v800_v38 = vmax.f32 %v738_v51, 1e-12  ;;  %v647_v44 = vsel %vm645_vm1, %v646_v31, %v644_v14  ;;  %v635_v50 = vmul.f32 %v1530_v3, %v2082_v58 }
 0x1d7   : > { %v1534_v49 = vpop.eup %1533  ;;  %v787_v39 = vmax.f32 %v647_v44, 1e-12  ;;  %v639_v62 = vand.u32 2147483648, %v2082_v58  ;;  %v754_v56 = vmul.f32 %v1532_v21, %v2098_v47  ;;  %v758_v27 = vand.u32 2147483648, %v2098_v47 }
 0x1d8   : > { %v855_v42 = vmul.f32 %v1534_v49, %v1788_v0  ;;  %1547 = vrcp.f32 %v800_v38  ;;  %v637_v25 = vsel %vm636_vm2, %v2082_v58, %v635_v50  ;;  %v1536_v22 = vpop.eup %1535  ;;  %v660_v13 = vand.u32 2147483648, %v2127_v59 }
 0x1d9   : > { %1549 = vrcp.f32 %v787_v39  ;;  %v640_v45 = vsel %vm638_vm3, %v639_v62, %v637_v25  ;;  %v756_v35 = vsel %vm755_vm4, %v2098_v47, %v754_v56  ;;  %v747_v12 = vmul.f32 %v1536_v22, %v2110_v43 }
 0x1da   : > { %v1225_v0 = vpack.c.bf16 %v857_v9, %v855_v42  ;;  %v786_v8 = vmax.f32 %v640_v45, 1e-12  ;;  %v759_v57 = vsel %vm757_vm5, %v758_v27, %v756_v35  ;;  %1551 = vrsqrt.f32 %v2172_v34 }
 0x1db   : > { %v803_v36 = vmax.f32 %v759_v57, 1e-12  ;;  %v749_v47 = vsel %vm748_vm6, %v2110_v43, %v747_v12  ;;  %vm659_vm9 = vcmp.eq.f32.partialorder %v2127_v59, 0.0  ;;  %vm650_vm10 = vcmp.eq.f32.partialorder %v2143_v19, inf }
 0x1dc   : > { %v1538_v46 = vpop.eup %1537  ;;  %1253 = vst [vmem:[%s1973_s30 + $0x60] sm:$0xff] %v1225_v0   ;;  %1553 = vrcp.f32 %v786_v8  ;;  %v752_v40 = vsel %vm750_vm7, %v751_v4, %v749_v47  ;;  %v653_v17 = vand.u32 2147483648, %v2143_v19  ;;  %vm652_vm11 = vcmp.eq.f32.partialorder %v2143_v19, 0.0 }
 0x1dd   : > { %v1540_v58 = vpop.eup %1539  ;;  %v829_v16 = vmul.f32 %v1538_v46, %v1797_v5  ;;  %1555 = vrcp.f32 %v803_v36  ;;  %v802_v41 = vmax.f32 %v752_v40, 1e-12  ;;  %vm769_vm12 = vcmp.eq.f32.partialorder %v2172_v34, inf }
 0x1de   : > { %v1542_v37 = vpop.eup %1541  ;;  %v656_v63 = vmul.f32 %v1540_v58, %v2127_v59  ;;  %1557 = vrsqrt.f32 %v2182_v24  ;;  %vm771_vm13 = vcmp.eq.f32.partialorder %v2172_v34, 0.0  ;;  %vm762_vm14 = vcmp.eq.f32.partialorder %v2182_v24, inf }
 0x1df   : > { %v827_v60 = vmul.f32 %v1542_v37, %v1800_v7  ;;  %v1544_v5 = vpop.eup %1543  ;;  %1559 = vrcp.f32 %v802_v41  ;;  %vm764_vm15 = vcmp.eq.f32.partialorder %v2182_v24, 0.0 }
 0x1e0   : > { %v658_v54 = vsel %vm657_vm8, %v2127_v59, %v656_v63  ;;  %v1546_v43 = vpop.eup %1545  ;;  %v649_v30 = vmul.f32 %v1544_v5, %v2143_v19 }
 0x1e1   : > { %v1190_v6 = vpack.c.bf16 %v829_v16, %v827_v60  ;;  %v661_v48 = vsel %vm659_vm9, %v660_v13, %v658_v54  ;;  %v861_v52 = vmul.f32 %v1546_v43, %v1805_v10 }
 0x1e2   : > { %v789_v7 = vmax.f32 %v661_v48, 1e-12  ;;  %v1548_v31 = vpop.eup %1547  ;;  %v651_v26 = vsel %vm650_vm10, %v2143_v19, %v649_v30 }
 0x1e3   : > { %1246 = vst [vmem:[%s1973_s30 + $0x28] sm:$0xff] %v1190_v6   ;;  %v1550_v59 = vpop.eup %1549  ;;  %v859_v55 = vmul.f32 %v1548_v31, %v1808_v11  ;;  %v654_v61 = vsel %vm652_vm11, %v653_v17, %v651_v26  ;;  %v772_v11 = vand.u32 2147483648, %v2172_v34 }
 0x1e4   : > { %1561 = vrcp.f32 %v789_v7  ;;  %v788_v53 = vmax.f32 %v654_v61, 1e-12  ;;  %v1552_v1 = vpop.eup %1551  ;;  %v833_v2 = vmul.f32 %v1550_v59, %v1817_v15 }
 0x1e5   : > { %v1230_v10 = vpack.c.bf16 %v861_v52, %v859_v55  ;;  %v768_v9 = vmul.f32 %v1552_v1, %v2172_v34 }
 0x1e6   : > { %v1554_v3 = vpop.eup %1553  ;;  %1563 = vrcp.f32 %v788_v53 }
 0x1e7   : > { %v1556_v51 = vpop.eup %1555  ;;  %1254 = vst [vmem:[%s1973_s30 + $0x68] sm:$0xff] %v1230_v10   ;;  %v831_v14 = vmul.f32 %v1554_v3, %v1820_v18  ;;  %v770_v21 = vsel %vm769_vm12, %v2172_v34, %v768_v9  ;;  %v765_v18 = vand.u32 2147483648, %v2182_v24 }
 0x1e8   : > { %v1558_v19 = vpop.eup %1557  ;;  %v865_v15 = vmul.f32 %v1556_v51, %v1825_v20  ;;  %v773_v44 = vsel %vm771_vm13, %v772_v11, %v770_v21 }
 0x1e9   : > { %v1195_v38 = vpack.c.bf16 %v833_v2, %v831_v14  ;;  %v761_v50 = vmul.f32 %v1558_v19, %v2182_v24  ;;  %v1560_v49 = vpop.eup %1559  ;;  %v805_v39 = vmax.f32 %v773_v44, 1e-12 }
 0x1ea   : > { %v863_v62 = vmul.f32 %v1560_v49, %v1828_v23 }
 0x1eb   : > { %1247 = vst [vmem:[%s1973_s30 + $0x30] sm:$0xff] %v1195_v38   ;;  %v763_v56 = vsel %vm762_vm14, %v2182_v24, %v761_v50  ;;  %1565 = vrcp.f32 %v805_v39 }
 0x1ec   : > { %v766_v20 = vsel %vm764_vm15, %v765_v18, %v763_v56  ;;  %v1235_v25 = vpack.c.bf16 %v865_v15, %v863_v62 }
 0x1ed   : > { %v804_v27 = vmax.f32 %v766_v20, 1e-12 }
 0x1ee   : > { %v1562_v42 = vpop.eup %1561  ;;  %1255 = vst [vmem:[%s1973_s30 + $0x70] sm:$0xff] %v1235_v25  }
 0x1ef   : > { %v837_v34 = vmul.f32 %v1562_v42, %v1837_v28  ;;  %1567 = vrcp.f32 %v804_v27 }
 0x1f0   : > { %v1564_v22 = vpop.eup %1563 }
 0x1f1   : > { %v835_v45 = vmul.f32 %v1564_v22, %v1840_v29 }
 0x1f3   : > { %v1200_v35 = vpack.c.bf16 %v837_v34, %v835_v45 }
 0x1f5   : > { %1248 = vst [vmem:[%s1973_s30 + $0x38] sm:$0xff] %v1200_v35   ;;  %v1566_v23 = vpop.eup %1565 }
 0x1f6   : > { %v869_v0 = vmul.f32 %v1566_v23, %v1845_v32 }
 0x1f9   : > { %v1568_v8 = vpop.eup %1567 }
 0x1fa   : > { %v867_v57 = vmul.f32 %v1568_v8, %v1848_v33 }
 0x1fc   : > { %v1240_v12 = vpack.c.bf16 %v869_v0, %v867_v57 }
 0x1fe   : > { %1256 = vst [vmem:[%s1973_s30 + $0x78] sm:$0xff] %v1240_v12  }
 0x1ff PF: > { %s13_s12 = sadd.s32 1, %s1575_s12  }
 0x200   : > { %p10_p4 = scmp.ge.s32.totalorder %s13_s12, 4  }
 0x202   :  { %12 = sbr.rel (!%p10_p4) target bundleno = 1 (0x1), region = 62 }

// kernel: micro_forward.9
= control target key start
LH: loop header
LB: loop body
LE: loop exit
PB: predicated region body
PF: predicated region fallthrough
CT: control target
= control target key end

     0   :  { %s1529_s9 = smov 0   ;;  %s1531_s10 = smov 0   ;;  %s1786_s0 = inlined_call_operand.vmem [shape: bf16[2,512,128], index: 0, kind: input, shape index: {}, may-alias: {0,1}]   ;;  %s1787_s1 = inlined_call_operand.vmem [shape: bf16[2,512,128], index: 1, kind: input, shape index: {}, may-alias: {0,1}]   ;;  %s1788_s2 = inlined_call_operand.vmem [shape: bf16[2,512,512], index: 2, kind: output, shape index: {}]  }
   0x1   :  { %s1533_s11 = smov 0   ;;  %s1535_s12 = smov 0  }
   0x2   :  { %s1537_s13 = smov 0   ;;  %s1539_s14 = smov 0  }
   0x3   :  { %s1541_s15 = smov 0   ;;  %s1543_s16 = smov 0  }
   0x4   :  { %s1545_s17 = smov 0  }
   0x5 LB: > { %s24_s18 = sadd.s32 1, %s1500_s14  ;;  %s27_s19 = sadd.s32 1, %s1504_s15  ;;  %s1512_s17 = sphi %s1545_s17, %s12_s17   ;;  %s1508_s16 = sphi %s1543_s16, %s1797_s16   ;;  %s1504_s15 = sphi %s1541_s15, %s1796_s15   ;;  %s1500_s14 = sphi %s1539_s14, %s1795_s14   ;;  %s1496_s13 = sphi %s1537_s13, %s1794_s13   ;;  %s1492_s12 = sphi %s1535_s12, %s1793_s12   ;;  %s1488_s11 = sphi %s1533_s11, %s1792_s11   ;;  %s1484_s10 = sphi %s1531_s10, %s1791_s10   ;;  %s1480_s9 = sphi %s1529_s9, %s1790_s9  }
   0x6   : > { %p25_p0 = scmp.ge.s32.totalorder %s24_s18, 2  ;;  %s1157_s20 = sadd.s32 4294967295, %s1512_s17  }
   0x7   : > { %s31_s21 = sadd.s32 1, %s1508_s16  ;;  %p108_p1 = scmp.ne.s32.totalorder %s1484_s10, %s1480_s9 }
   0x8   : > { %s1799_s18 = smov (%p25_p0, %s24_s18), 0  ;;  %s1801_s19 = smov (!%p25_p0, %s27_s19), %s1504_s15 }
   0x9   : > { %p29_p2 = scmp.ge.s32.totalorder %s1801_s19, 2  ;;  %p109_p3 = scmp.eq.s32.totalorder %s1157_s20, 7 }
   0xa   : > { %p1161_p4 = scmp.ge.s32.totalorder %s1512_s17, 1  ;;  %p159_p5 = scmp.lt.s32.totalorder %s1512_s17, 9 }
   0xb   : > { %s1803_s19 = smov (%p29_p2, %s1801_s19), 0  ;;  %s1805_s21 = smov (!%p29_p2, %s31_s21), %s1508_s16 }
   0xc   : > { %p1588_p6 = por %p109_p3, %p108_p1  ;;  %p33_p7 = scmp.ge.s32.totalorder %s1805_s21, 2 }
   0xd   : > { %p160_p8 = pnand %p1161_p4, %p159_p5  ;;  %s92_s23 = ssub.s32 %s1504_s15, %s1803_s19 }
   0xe   : > { %s1807_s21 = smov (%p33_p7, %s1805_s21), 0  ;;  %s94_s24 = ssub.s32 %s1500_s14, %s1799_s18 }
   0xf   : > { %s91_s25 = ssub.s32 %s1508_s16, %s1807_s21  ;;  %s98_s28 = sadd.s32 1, %s1484_s10 }
  0x10   : > { %s93_s26 = sor.u32 %s92_s23, %s91_s25  ;;  %163 = sbr.rel (%p160_p8) target bundleno = 377 (0x179), region = 28 }
  0x11   : > { %s95_s27 = sor.u32 %s94_s24, %s93_s26  ;;  %p194_p10 = scmp.lt.s32.totalorder (!%p160_p8), %s1496_s13, 1 }
  0x12   : > { %p96_p9 = scmp.eq.s32.totalorder %s95_s27, 0  ;;  %s1166_s30 = sshll.u32 (!%p160_p8), %s1488_s11, 5 }
  0x13   : > { %p206_p11 = scmp.lt.s32.totalorder (!%p160_p8), %s1166_s30, 63  ;;  %s1163_s5 = sshll.u32 (!%p160_p8), %s1492_s12, 5 }
  0x14   : > { %s1602_s29 = scalar_select %p96_p9, %s1484_s10, %s98_s28  }
  0x15   : > { %p196_p12 = scmp.lt.s32.totalorder (!%p160_p8), %s1163_s5, 63 }
  0x17   : > { %s195_s3 = scalar_select %p194_p10, %s1496_s13, 1 }
  0x18   : > { %s1809_s30 = smov (!%p206_p11, %s1166_s30), 63  ;;  %s1811_s5 = smov (!%p196_p12, %s1163_s5), 63 }
  0x19   : > { %s1164_s4 = sshll.u32 %s195_s3, 6 }
  0x1a   : > { %s209_s6 = sadd.s32 %s1164_s4, %s1809_s30  ;;  %s199_s24 = sadd.s32 %s1164_s4, %s1811_s5 }
  0x1b   : > { %s1168_s7 = sshll.u32 %s209_s6, 2  ;;  %s1165_s25 = sshll.u32 %s199_s24, 2 }
  0x1c   : > { %s1611_s23 = scalar_lea.vmem %s1787_s1, %s1168_s7  ;;  %s1621_s28 = scalar_lea.vmem %s1786_s0, %s1165_s25 }
  0x1d   : > { %v1410_v0 = vld [vmem:[%s1611_s23 + $0x40] sm:$0xff]   ;;  %v1412_v2 = vld [vmem:[%s1611_s23 + $0x48] sm:$0xff]   ;;  %v1414_v4 = vld [vmem:[%s1611_s23 + $0x50] sm:$0xff]   ;;  %s190_s30 = sand.u32 1, %s1480_s9   ;;  %s1235_s9 = sshll.u32 (%p1588_p6), %s1488_s11, 1 }
  0x1e   : > { %v1411_v1 = vld [vmem:[%s1611_s23] sm:$0xff]   ;;  %1274 = vmatprep.subr.bf16.mxu0 %v1410_v0  ;;  %1322 = vmatprep.subr.bf16.mxu1 %v1410_v0  ;;  %v1413_v3 = vld [vmem:[%s1611_s23 + $0x8] sm:$0xff]   ;;  %v1415_v5 = vld [vmem:[%s1611_s23 + $0x10] sm:$0xff]   ;;  %s1162_s3 = sshll.u32 %s190_s30, 8  ;;  %s1273_s5 = sshll.u32 (%p1588_p6), %s1492_s12, 7 }
  0x1f   : > { %1275 = vmatpush3.bf16.xpose.msra.mxu0 %v1411_v1  ;;  %1330 = vmatpush3.bf16.xpose.msra.mxu1 %v1411_v1  ;;  %v1416_v6 = vld [vmem:[%s1611_s23 + $0x58] sm:$0xff]   ;;  %v1426_v7 = vld [vmem:[%s1621_s28] sm:$0xff]   ;;  %v1420_v12 = vld [vmem:[%s1611_s23 + $0x68] sm:$0xff]   ;;  %s1651_s4 = scalar_lea.vmem [#allocation2], %s1162_s3  ;;  %s899_s22 = sadd.s32 (%p1588_p6), %s1273_s5, %s1235_s9 }
  0x20   : > { %1276 = vmatprep.subr.bf16.mxu0 %v1412_v2  ;;  %1323 = vmatprep.subr.bf16.mxu1 %v1412_v2  ;;  %v1427_v8 = vld [vmem:[%s1621_s28 + $0x40] sm:$0xff]   ;;  %v1417_v9 = vld [vmem:[%s1611_s23 + $0x18] sm:$0xff]   ;;  %v1421_v13 = vld [vmem:[%s1611_s23 + $0x28] sm:$0xff]   ;;  %s1237_s6 = sshll.u32 (%p1588_p6), %s1496_s13, 8 }
  0x21   : > { %1290 = vmatprep.mubr.bf16.mxu0 %v1426_v7  ;;  %1306 = vmatprep.mubr.bf16.mxu1 %v1427_v8  ;;  %v1418_v10 = vld [vmem:[%s1611_s23 + $0x60] sm:$0xff]   ;;  %v1422_v14 = vld [vmem:[%s1611_s23 + $0x70] sm:$0xff]   ;;  %v1424_v16 = vld [vmem:[%s1611_s23 + $0x78] sm:$0xff]   ;;  %s901_s7 = sadd.s32 (%p1588_p6), %s1237_s6, %s899_s22 }
  0x22   : > { %v1419_v11 = vld [vmem:[%s1611_s23 + $0x20] sm:$0xff]   ;;  %v1423_v15 = vld [vmem:[%s1611_s23 + $0x30] sm:$0xff]   ;;  %v1425_v17 = vld [vmem:[%s1611_s23 + $0x38] sm:$0xff]   ;;  %s1238_s8 = sshll.u32 (%p1588_p6), %s901_s7, 2 }
  0x23   : > { %v1428_v18 = vld [vmem:[%s1621_s28 + $0x8] sm:$0xff]   ;;  %v1430_v20 = vld [vmem:[%s1621_s28 + $0x10] sm:$0xff]   ;;  %v1432_v22 = vld [vmem:[%s1621_s28 + $0x18] sm:$0xff]   ;;  %s1705_s20 = scalar_lea.vmem (%p1588_p6), %s1788_s2, %s1238_s8 }
  0x24   : > { %v1429_v19 = vld [vmem:[%s1621_s28 + $0x48] sm:$0xff]   ;;  %v1431_v21 = vld [vmem:[%s1621_s28 + $0x50] sm:$0xff]   ;;  %v1433_v23 = vld [vmem:[%s1621_s28 + $0x58] sm:$0xff]  }
  0x25   : > { %v1434_v24 = vld [vmem:[%s1621_s28 + $0x20] sm:$0xff]   ;;  %v1436_v26 = vld [vmem:[%s1621_s28 + $0x28] sm:$0xff]   ;;  %v1438_v28 = vld [vmem:[%s1621_s28 + $0x30] sm:$0xff]  }
  0x26   : > { %v1435_v25 = vld [vmem:[%s1621_s28 + $0x60] sm:$0xff]   ;;  %v1437_v27 = vld [vmem:[%s1621_s28 + $0x68] sm:$0xff]   ;;  %v1439_v29 = vld [vmem:[%s1621_s28 + $0x70] sm:$0xff]  }
  0x27   : > { %1277 = vmatpush3.bf16.xpose.msra.mxu0 %v1413_v3  ;;  %1331 = vmatpush3.bf16.xpose.msra.mxu1 %v1413_v3  ;;  %v1440_v30 = vld [vmem:[%s1621_s28 + $0x38] sm:$0xff]  }
  0x28   : > { %1278 = vmatprep.subr.bf16.mxu0 %v1414_v4  ;;  %1324 = vmatprep.subr.bf16.mxu1 %v1414_v4  ;;  %v1441_v31 = vld [vmem:[%s1621_s28 + $0x78] sm:$0xff]  }
  0x2f   : > { %1279 = vmatpush3.bf16.xpose.msra.mxu0 %v1415_v5  ;;  %1332 = vmatpush3.bf16.xpose.msra.mxu1 %v1415_v5 }
  0x30   : > { %1280 = vmatprep.subr.bf16.mxu0 %v1416_v6  ;;  %1325 = vmatprep.subr.bf16.mxu1 %v1416_v6 }
  0x37   : > { %1281 = vmatpush3.bf16.xpose.msra.mxu0 %v1417_v9  ;;  %1333 = vmatpush3.bf16.xpose.msra.mxu1 %v1417_v9 }
  0x38   : > { %1282 = vmatprep.subr.bf16.mxu0 %v1418_v10  ;;  %1326 = vmatprep.subr.bf16.mxu1 %v1418_v10 }
  0x3f   : > { %1283 = vmatpush3.bf16.xpose.msra.mxu0 %v1419_v11  ;;  %1334 = vmatpush3.bf16.xpose.msra.mxu1 %v1419_v11 }
  0x40   : > { %1284 = vmatprep.subr.bf16.mxu0 %v1420_v12  ;;  %1327 = vmatprep.subr.bf16.mxu1 %v1420_v12 }
  0x47   : > { %1285 = vmatpush3.bf16.xpose.msra.mxu0 %v1421_v13  ;;  %1335 = vmatpush3.bf16.xpose.msra.mxu1 %v1421_v13 }
  0x48   : > { %1286 = vmatprep.subr.bf16.mxu0 %v1422_v14  ;;  %1328 = vmatprep.subr.bf16.mxu1 %v1422_v14 }
  0x4f   : > { %1287 = vmatpush3.bf16.xpose.msra.mxu0 %v1423_v15  ;;  %1336 = vmatpush3.bf16.xpose.msra.mxu1 %v1423_v15 }
  0x50   : > { %1288 = vmatprep.subr.bf16.mxu0 %v1424_v16  ;;  %1329 = vmatprep.subr.bf16.mxu1 %v1424_v16 }
  0x57   : > { %1289 = vmatpush3.bf16.xpose.msra.mxu0 %v1425_v17  ;;  %1337 = vmatpush3.bf16.xpose.msra.mxu1 %v1425_v17 }
  0x5e   : > { %1291 = vmatmul.mubr.bf16.vlgmr.msra.gmra.mrb[0].mxu0 %v1426_v7  ;;  %1307 = vmatmul.mubr.bf16.vlgmr.msra.gmra.mrb[0].mxu1 %v1427_v8 }
  0x5f   : > { %1292 = vmatprep.mubr.bf16.mxu0 %v1428_v18  ;;  %1308 = vmatprep.mubr.bf16.mxu1 %v1429_v19 }
  0x66   : > { %1293 = vmatmul.mubr.bf16.gmra.mrb[4].mxu0 %v1428_v18  ;;  %1309 = vmatmul.mubr.bf16.gmra.mrb[4].mxu1 %v1429_v19 }
  0x67   : > { %1294 = vmatprep.mubr.bf16.mxu0 %v1430_v20  ;;  %1310 = vmatprep.mubr.bf16.mxu1 %v1431_v21 }
  0x6e   : > { %1295 = vmatmul.mubr.bf16.gmra.mrb[8].mxu0 %v1430_v20  ;;  %1311 = vmatmul.mubr.bf16.gmra.mrb[8].mxu1 %v1431_v21 }
  0x6f   : > { %1296 = vmatprep.mubr.bf16.mxu0 %v1432_v22  ;;  %1312 = vmatprep.mubr.bf16.mxu1 %v1433_v23 }
  0x76   : > { %1297 = vmatmul.mubr.bf16.gmra.mrb[12].mxu0 %v1432_v22  ;;  %1313 = vmatmul.mubr.bf16.gmra.mrb[12].mxu1 %v1433_v23 }
  0x77   : > { %1298 = vmatprep.mubr.bf16.mxu0 %v1434_v24  ;;  %1314 = vmatprep.mubr.bf16.mxu1 %v1435_v25 }
  0x7e   : > { %1299 = vmatmul.mubr.bf16.gmra.mrb[16].mxu0 %v1434_v24  ;;  %1315 = vmatmul.mubr.bf16.gmra.mrb[16].mxu1 %v1435_v25 }
  0x7f   : > { %1300 = vmatprep.mubr.bf16.mxu0 %v1436_v26  ;;  %1316 = vmatprep.mubr.bf16.mxu1 %v1437_v27 }
  0x86   : > { %1301 = vmatmul.mubr.bf16.gmra.mrb[20].mxu0 %v1436_v26  ;;  %1317 = vmatmul.mubr.bf16.gmra.mrb[20].mxu1 %v1437_v27 }
  0x87   : > { %1302 = vmatprep.mubr.bf16.mxu0 %v1438_v28  ;;  %1318 = vmatprep.mubr.bf16.mxu1 %v1439_v29 }
  0x8e   : > { %1303 = vmatmul.mubr.bf16.gmra.mrb[24].mxu0 %v1438_v28  ;;  %1319 = vmatmul.mubr.bf16.gmra.mrb[24].mxu1 %v1439_v29 }
  0x8f   : > { %1304 = vmatprep.mubr.bf16.mxu0 %v1440_v30  ;;  %1320 = vmatprep.mubr.bf16.mxu1 %v1441_v31 }
  0x96   : > { %1305 = vmatmul.mubr.bf16.gmra.mrb[28].mxu0 %v1440_v30  ;;  %1321 = vmatmul.mubr.bf16.gmra.mrb[28].mxu1 %v1441_v31 }
 0x131   : > { %v506_v32 = vpop.f32.mrb[0].mxu0  ;;  %v586_v33 = vpop.f32.mrb[0].mxu1 }
 0x132   : > { %v508_v34 = vpop.f32.mrb[1].mxu0  ;;  %v588_v35 = vpop.f32.mrb[1].mxu1 }
 0x133   : > { %v1241_v36 = vpack.c.bf16 %v508_v34, %v506_v32  ;;  %v1257_v37 = vpack.c.bf16 %v588_v35, %v586_v33  ;;  %v510_v38 = vpop.f32.mrb[2].mxu0  ;;  %v590_v39 = vpop.f32.mrb[2].mxu1 }
 0x134   : > { %v512_v40 = vpop.f32.mrb[3].mxu0  ;;  %v592_v41 = vpop.f32.mrb[3].mxu1 }
 0x135   : > { %857 = vst [vmem:[%s1651_s4] sm:$0xff] %v1241_v36  ;;  %873 = vst [vmem:[%s1651_s4 + $0x80] sm:$0xff] %v1257_v37  ;;  %v1242_v42 = vpack.c.bf16 %v512_v40, %v510_v38  ;;  %v1258_v43 = vpack.c.bf16 %v592_v41, %v590_v39 }
 0x137   : > { %858 = vst [vmem:[%s1651_s4 + $0x8] sm:$0xff] %v1242_v42  ;;  %874 = vst [vmem:[%s1651_s4 + $0x88] sm:$0xff] %v1258_v43 }
 0x139   : > { %v516_v44 = vpop.f32.mrb[4].mxu0  ;;  %v596_v45 = vpop.f32.mrb[4].mxu1 }
 0x13a   : > { %v518_v46 = vpop.f32.mrb[5].mxu0  ;;  %v598_v47 = vpop.f32.mrb[5].mxu1 }
 0x13b   : > { %v1243_v48 = vpack.c.bf16 %v518_v46, %v516_v44  ;;  %v1259_v49 = vpack.c.bf16 %v598_v47, %v596_v45  ;;  %v520_v50 = vpop.f32.mrb[6].mxu0  ;;  %v600_v51 = vpop.f32.mrb[6].mxu1 }
 0x13c   : > { %v522_v52 = vpop.f32.mrb[7].mxu0  ;;  %v602_v53 = vpop.f32.mrb[7].mxu1 }
 0x13d   : > { %859 = vst [vmem:[%s1651_s4 + $0x10] sm:$0xff] %v1243_v48  ;;  %875 = vst [vmem:[%s1651_s4 + $0x90] sm:$0xff] %v1259_v49  ;;  %v1244_v54 = vpack.c.bf16 %v522_v52, %v520_v50  ;;  %v1260_v55 = vpack.c.bf16 %v602_v53, %v600_v51 }
 0x13f   : > { %860 = vst [vmem:[%s1651_s4 + $0x18] sm:$0xff] %v1244_v54  ;;  %876 = vst [vmem:[%s1651_s4 + $0x98] sm:$0xff] %v1260_v55 }
 0x141   : > { %v526_v56 = vpop.f32.mrb[8].mxu0  ;;  %v606_v57 = vpop.f32.mrb[8].mxu1 }
 0x142   : > { %v528_v58 = vpop.f32.mrb[9].mxu0  ;;  %v608_v59 = vpop.f32.mrb[9].mxu1 }
 0x143   : > { %v1245_v60 = vpack.c.bf16 %v528_v58, %v526_v56  ;;  %v1261_v61 = vpack.c.bf16 %v608_v59, %v606_v57  ;;  %v530_v62 = vpop.f32.mrb[10].mxu0  ;;  %v610_v63 = vpop.f32.mrb[10].mxu1 }
 0x144   : > { %v532_v0 = vpop.f32.mrb[11].mxu0  ;;  %v612_v1 = vpop.f32.mrb[11].mxu1 }
 0x145   : > { %861 = vst [vmem:[%s1651_s4 + $0x20] sm:$0xff] %v1245_v60  ;;  %877 = vst [vmem:[%s1651_s4 + $0xa0] sm:$0xff] %v1261_v61  ;;  %v1246_v2 = vpack.c.bf16 %v532_v0, %v530_v62  ;;  %v1262_v3 = vpack.c.bf16 %v612_v1, %v610_v63  ;;  %v993_v0 = vld [vmem:[%s1651_s4] sm:$0xff] (%p1588_p6)  ;;  %v995_v1 = vld [vmem:[%s1651_s4 + $0x8] sm:$0xff] (%p1588_p6) }
 0x146   : > { %994 = vst [vmem:[%s1705_s20] sm:$0xff] (%p1588_p6), %v993_v0  ;;  %996 = vst [vmem:[%s1705_s20 + $0x10] sm:$0xff] (%p1588_p6), %v995_v1 }
 0x147   : > { %862 = vst [vmem:[%s1651_s4 + $0x28] sm:$0xff] %v1246_v2  ;;  %878 = vst [vmem:[%s1651_s4 + $0xa8] sm:$0xff] %v1262_v3  ;;  %v997_v2 = vld [vmem:[%s1651_s4 + $0x10] sm:$0xff] (%p1588_p6)  ;;  %v999_v3 = vld [vmem:[%s1651_s4 + $0x18] sm:$0xff] (%p1588_p6) }
 0x148   : > { %998 = vst [vmem:[%s1705_s20 + $0x20] sm:$0xff] (%p1588_p6), %v997_v2  ;;  %1000 = vst [vmem:[%s1705_s20 + $0x30] sm:$0xff] (%p1588_p6), %v999_v3 }
 0x149   : > { %v536_v4 = vpop.f32.mrb[12].mxu0  ;;  %v616_v5 = vpop.f32.mrb[12].mxu1 }
 0x14a   : > { %v538_v6 = vpop.f32.mrb[13].mxu0  ;;  %v618_v7 = vpop.f32.mrb[13].mxu1 }
 0x14b   : > { %v1247_v8 = vpack.c.bf16 %v538_v6, %v536_v4  ;;  %v1263_v9 = vpack.c.bf16 %v618_v7, %v616_v5  ;;  %v540_v10 = vpop.f32.mrb[14].mxu0  ;;  %v620_v11 = vpop.f32.mrb[14].mxu1 }
 0x14c   : > { %v542_v12 = vpop.f32.mrb[15].mxu0  ;;  %v622_v13 = vpop.f32.mrb[15].mxu1  ;;  %v1001_v4 = vld [vmem:[%s1651_s4 + $0x20] sm:$0xff] (%p1588_p6) }
 0x14d   : > { %863 = vst [vmem:[%s1651_s4 + $0x30] sm:$0xff] %v1247_v8  ;;  %879 = vst [vmem:[%s1651_s4 + $0xb0] sm:$0xff] %v1263_v9  ;;  %v1248_v14 = vpack.c.bf16 %v542_v12, %v540_v10  ;;  %v1264_v15 = vpack.c.bf16 %v622_v13, %v620_v11 }
 0x14e   : > { %v1003_v5 = vld [vmem:[%s1651_s4 + $0x28] sm:$0xff] (%p1588_p6)  ;;  %1002 = vst [vmem:[%s1705_s20 + $0x40] sm:$0xff] (%p1588_p6), %v1001_v4 }
 0x14f   : > { %864 = vst [vmem:[%s1651_s4 + $0x38] sm:$0xff] %v1248_v14  ;;  %880 = vst [vmem:[%s1651_s4 + $0xb8] sm:$0xff] %v1264_v15 }
 0x150   : > { %1004 = vst [vmem:[%s1705_s20 + $0x50] sm:$0xff] (%p1588_p6), %v1003_v5 }
 0x151   : > { %v546_v16 = vpop.f32.mrb[16].mxu0  ;;  %v626_v17 = vpop.f32.mrb[16].mxu1 }
 0x152   : > { %v548_v18 = vpop.f32.mrb[17].mxu0  ;;  %v628_v19 = vpop.f32.mrb[17].mxu1 }
 0x153   : > { %v1249_v20 = vpack.c.bf16 %v548_v18, %v546_v16  ;;  %v1265_v21 = vpack.c.bf16 %v628_v19, %v626_v17  ;;  %v550_v22 = vpop.f32.mrb[18].mxu0  ;;  %v630_v23 = vpop.f32.mrb[18].mxu1  ;;  %v1025_v16 = vld [vmem:[%s1651_s4 + $0x80] sm:$0xff] (%p1588_p6)  ;;  %v1027_v17 = vld [vmem:[%s1651_s4 + $0x88] sm:$0xff] (%p1588_p6)  ;;  %v1029_v18 = vld [vmem:[%s1651_s4 + $0x90] sm:$0xff] (%p1588_p6) }
 0x154   : > { %v552_v24 = vpop.f32.mrb[19].mxu0  ;;  %v632_v25 = vpop.f32.mrb[19].mxu1  ;;  %v1005_v6 = vld [vmem:[%s1651_s4 + $0x30] sm:$0xff] (%p1588_p6)  ;;  %1026 = vst [vmem:[%s1705_s20 + $0x100] sm:$0xff] (%p1588_p6), %v1025_v16  ;;  %1028 = vst [vmem:[%s1705_s20 + $0x110] sm:$0xff] (%p1588_p6), %v1027_v17  ;;  %v1031_v19 = vld [vmem:[%s1651_s4 + $0x98] sm:$0xff] (%p1588_p6) }
 0x155   : > { %865 = vst [vmem:[%s1651_s4 + $0x40] sm:$0xff] %v1249_v20  ;;  %881 = vst [vmem:[%s1651_s4 + $0xc0] sm:$0xff] %v1265_v21  ;;  %v1250_v26 = vpack.c.bf16 %v552_v24, %v550_v22  ;;  %v1266_v27 = vpack.c.bf16 %v632_v25, %v630_v23  ;;  %v1033_v20 = vld [vmem:[%s1651_s4 + $0xa0] sm:$0xff] (%p1588_p6)  ;;  %v1035_v21 = vld [vmem:[%s1651_s4 + $0xa8] sm:$0xff] (%p1588_p6) }
 0x156   : > { %v1007_v7 = vld [vmem:[%s1651_s4 + $0x38] sm:$0xff] (%p1588_p6)  ;;  %1006 = vst [vmem:[%s1705_s20 + $0x60] sm:$0xff] (%p1588_p6), %v1005_v6  ;;  %1030 = vst [vmem:[%s1705_s20 + $0x120] sm:$0xff] (%p1588_p6), %v1029_v18  ;;  %v1037_v22 = vld [vmem:[%s1651_s4 + $0xb0] sm:$0xff] (%p1588_p6) }
 0x157   : > { %866 = vst [vmem:[%s1651_s4 + $0x48] sm:$0xff] %v1250_v26  ;;  %882 = vst [vmem:[%s1651_s4 + $0xc8] sm:$0xff] %v1266_v27  ;;  %v1039_v23 = vld [vmem:[%s1651_s4 + $0xb8] sm:$0xff] (%p1588_p6) }
 0x158   : > { %1008 = vst [vmem:[%s1705_s20 + $0x70] sm:$0xff] (%p1588_p6), %v1007_v7  ;;  %1032 = vst [vmem:[%s1705_s20 + $0x130] sm:$0xff] (%p1588_p6), %v1031_v19 }
 0x159   : > { %v556_v28 = vpop.f32.mrb[20].mxu0  ;;  %v636_v29 = vpop.f32.mrb[20].mxu1  ;;  %1034 = vst [vmem:[%s1705_s20 + $0x140] sm:$0xff] (%p1588_p6), %v1033_v20  ;;  %1036 = vst [vmem:[%s1705_s20 + $0x150] sm:$0xff] (%p1588_p6), %v1035_v21 }
 0x15a   : > { %v558_v30 = vpop.f32.mrb[21].mxu0  ;;  %v638_v31 = vpop.f32.mrb[21].mxu1  ;;  %1038 = vst [vmem:[%s1705_s20 + $0x160] sm:$0xff] (%p1588_p6), %v1037_v22  ;;  %1040 = vst [vmem:[%s1705_s20 + $0x170] sm:$0xff] (%p1588_p6), %v1039_v23 }
 0x15b   : > { %v1251_v32 = vpack.c.bf16 %v558_v30, %v556_v28  ;;  %v1267_v33 = vpack.c.bf16 %v638_v31, %v636_v29  ;;  %v560_v34 = vpop.f32.mrb[22].mxu0  ;;  %v640_v35 = vpop.f32.mrb[22].mxu1 }
 0x15c   : > { %v562_v36 = vpop.f32.mrb[23].mxu0  ;;  %v642_v37 = vpop.f32.mrb[23].mxu1  ;;  %v1009_v8 = vld [vmem:[%s1651_s4 + $0x40] sm:$0xff] (%p1588_p6) }
 0x15d   : > { %867 = vst [vmem:[%s1651_s4 + $0x50] sm:$0xff] %v1251_v32  ;;  %883 = vst [vmem:[%s1651_s4 + $0xd0] sm:$0xff] %v1267_v33  ;;  %v1252_v38 = vpack.c.bf16 %v562_v36, %v560_v34  ;;  %v1268_v39 = vpack.c.bf16 %v642_v37, %v640_v35  ;;  %v1041_v24 = vld [vmem:[%s1651_s4 + $0xc0] sm:$0xff] (%p1588_p6) }
 0x15e   : > { %v1011_v9 = vld [vmem:[%s1651_s4 + $0x48] sm:$0xff] (%p1588_p6)  ;;  %1010 = vst [vmem:[%s1705_s20 + $0x80] sm:$0xff] (%p1588_p6), %v1009_v8  ;;  %1042 = vst [vmem:[%s1705_s20 + $0x180] sm:$0xff] (%p1588_p6), %v1041_v24 }
 0x15f   : > { %868 = vst [vmem:[%s1651_s4 + $0x58] sm:$0xff] %v1252_v38  ;;  %884 = vst [vmem:[%s1651_s4 + $0xd8] sm:$0xff] %v1268_v39  ;;  %v1043_v25 = vld [vmem:[%s1651_s4 + $0xc8] sm:$0xff] (%p1588_p6) }
 0x160   : > { %1012 = vst [vmem:[%s1705_s20 + $0x90] sm:$0xff] (%p1588_p6), %v1011_v9  ;;  %1044 = vst [vmem:[%s1705_s20 + $0x190] sm:$0xff] (%p1588_p6), %v1043_v25 }
 0x161   : > { %v566_v40 = vpop.f32.mrb[24].mxu0  ;;  %v646_v41 = vpop.f32.mrb[24].mxu1 }
 0x162   : > { %v568_v42 = vpop.f32.mrb[25].mxu0  ;;  %v648_v43 = vpop.f32.mrb[25].mxu1 }
 0x163   : > { %v1253_v44 = vpack.c.bf16 %v568_v42, %v566_v40  ;;  %v1269_v45 = vpack.c.bf16 %v648_v43, %v646_v41  ;;  %v570_v46 = vpop.f32.mrb[26].mxu0  ;;  %v650_v47 = vpop.f32.mrb[26].mxu1 }
 0x164   : > { %v572_v48 = vpop.f32.mrb[27].mxu0  ;;  %v652_v49 = vpop.f32.mrb[27].mxu1  ;;  %v1013_v10 = vld [vmem:[%s1651_s4 + $0x50] sm:$0xff] (%p1588_p6) }
 0x165   : > { %869 = vst [vmem:[%s1651_s4 + $0x60] sm:$0xff] %v1253_v44  ;;  %885 = vst [vmem:[%s1651_s4 + $0xe0] sm:$0xff] %v1269_v45  ;;  %v1254_v50 = vpack.c.bf16 %v572_v48, %v570_v46  ;;  %v1270_v51 = vpack.c.bf16 %v652_v49, %v650_v47  ;;  %v1045_v26 = vld [vmem:[%s1651_s4 + $0xd0] sm:$0xff] (%p1588_p6) }
 0x166   : > { %v1015_v11 = vld [vmem:[%s1651_s4 + $0x58] sm:$0xff] (%p1588_p6)  ;;  %1014 = vst [vmem:[%s1705_s20 + $0xa0] sm:$0xff] (%p1588_p6), %v1013_v10  ;;  %1046 = vst [vmem:[%s1705_s20 + $0x1a0] sm:$0xff] (%p1588_p6), %v1045_v26 }
 0x167   : > { %870 = vst [vmem:[%s1651_s4 + $0x68] sm:$0xff] %v1254_v50  ;;  %886 = vst [vmem:[%s1651_s4 + $0xe8] sm:$0xff] %v1270_v51  ;;  %v1047_v27 = vld [vmem:[%s1651_s4 + $0xd8] sm:$0xff] (%p1588_p6) }
 0x168   : > { %1016 = vst [vmem:[%s1705_s20 + $0xb0] sm:$0xff] (%p1588_p6), %v1015_v11  ;;  %1048 = vst [vmem:[%s1705_s20 + $0x1b0] sm:$0xff] (%p1588_p6), %v1047_v27 }
 0x169   : > { %v576_v52 = vpop.f32.mrb[28].mxu0  ;;  %v656_v53 = vpop.f32.mrb[28].mxu1  ;;  %895 = sbr.rel (!%p1588_p6) target bundleno = 377 (0x179), region = 32 }
 0x16a   : > { %v578_v54 = vpop.f32.mrb[29].mxu0  ;;  %v658_v55 = vpop.f32.mrb[29].mxu1 }
 0x16b   : > { %v1255_v56 = vpack.c.bf16 %v578_v54, %v576_v52  ;;  %v1271_v57 = vpack.c.bf16 %v658_v55, %v656_v53  ;;  %v580_v58 = vpop.f32.mrb[30].mxu0  ;;  %v660_v59 = vpop.f32.mrb[30].mxu1 }
 0x16c   : > { %v582_v60 = vpop.f32.mrb[31].mxu0  ;;  %v662_v61 = vpop.f32.mrb[31].mxu1  ;;  %v1017_v12 = vld [vmem:[%s1651_s4 + $0x60] sm:$0xff] (%p1588_p6) }
 0x16d   : > { %871 = vst [vmem:[%s1651_s4 + $0x70] sm:$0xff] %v1255_v56  ;;  %887 = vst [vmem:[%s1651_s4 + $0xf0] sm:$0xff] %v1271_v57  ;;  %v1256_v62 = vpack.c.bf16 %v582_v60, %v580_v58  ;;  %v1272_v63 = vpack.c.bf16 %v662_v61, %v660_v59  ;;  %v1049_v28 = vld [vmem:[%s1651_s4 + $0xe0] sm:$0xff] (%p1588_p6) }
 0x16e   : > { %v1019_v13 = vld [vmem:[%s1651_s4 + $0x68] sm:$0xff] (%p1588_p6)  ;;  %1018 = vst [vmem:[%s1705_s20 + $0xc0] sm:$0xff] (%p1588_p6), %v1017_v12  ;;  %1050 = vst [vmem:[%s1705_s20 + $0x1c0] sm:$0xff] (%p1588_p6), %v1049_v28 }
 0x16f   : > { %872 = vst [vmem:[%s1651_s4 + $0x78] sm:$0xff] %v1256_v62  ;;  %888 = vst [vmem:[%s1651_s4 + $0xf8] sm:$0xff] %v1272_v63  ;;  %v1051_v29 = vld [vmem:[%s1651_s4 + $0xe8] sm:$0xff] (%p1588_p6) }
 0x170   : > { %1020 = vst [vmem:[%s1705_s20 + $0xd0] sm:$0xff] %v1019_v13  ;;  %1052 = vst [vmem:[%s1705_s20 + $0x1d0] sm:$0xff] %v1051_v29 }
 0x174   : > { %v1021_v14 = vld [vmem:[%s1651_s4 + $0x70] sm:$0xff] }
 0x175   : > { %1022 = vst [vmem:[%s1705_s20 + $0xe0] sm:$0xff] %v1021_v14  ;;  %v1053_v30 = vld [vmem:[%s1651_s4 + $0xf0] sm:$0xff] }
 0x176   : > { %v1023_v15 = vld [vmem:[%s1651_s4 + $0x78] sm:$0xff]  ;;  %1054 = vst [vmem:[%s1705_s20 + $0x1e0] sm:$0xff] %v1053_v30 }
 0x177   : > { %1024 = vst [vmem:[%s1705_s20 + $0xf0] sm:$0xff] %v1023_v15  ;;  %v1055_v31 = vld [vmem:[%s1651_s4 + $0xf8] sm:$0xff] }
 0x178   : > { %1056 = vst [vmem:[%s1705_s20 + $0x1f0] sm:$0xff] %v1055_v31 }
 0x179 PF: > { %s12_s17 = sadd.s32 1, %s1512_s17   ;;  %s1790_s9 = smov %s1484_s10 }
 0x17a   : > { %p9_p13 = scmp.ge.s32.totalorder %s12_s17, 10   ;;  %s1791_s10 = smov %s1602_s29 }
 0x17b   : > { %s1792_s11 = smov %s1500_s14  ;;  %s1793_s12 = smov %s1504_s15 }
 0x17c   : > { %s1794_s13 = smov %s1508_s16  ;;  %s1795_s14 = smov %s1799_s18 }
 0x17d   : > { %s1796_s15 = smov %s1803_s19  ;;  %s1797_s16 = smov %s1807_s21 }
 0x17e   :  { %11 = sbr.rel (!%p9_p13) target bundleno = 5 (0x5), region = 99 }

// kernel: micro_forward.10
= control target key start
LH: loop header
LB: loop body
LE: loop exit
PB: predicated region body
PF: predicated region fallthrough
CT: control target
= control target key end

     0   :  { %s4329_s21 = smov 0   ;;  %s4331_s22 = smov 0   ;;  %s5240_s0 = inlined_call_operand.vmem [shape: bf16[512,512], index: 0, kind: input, shape index: {}]   ;;  %s5241_s1 = inlined_call_operand.vmem [shape: bf16[512,512], index: 1, kind: input, shape index: {}]   ;;  %s5242_s2 = inlined_call_operand.vmem [shape: bf16[512,128], index: 2, kind: input, shape index: {}]   ;;  %s5243_s3 = inlined_call_operand.vmem [shape: f32[128,128], index: 3, kind: input, shape index: {}]   ;;  %s5244_s4 = inlined_call_operand.vmem [shape: f32[1,128], index: 4, kind: input, shape index: {}]   ;;  %s5245_s5 = inlined_call_operand.vmem [shape: f32[1,128], index: 5, kind: input, shape index: {}]   ;;  %s5246_s6 = inlined_call_operand.vmem [shape: f32[512,128], index: 6, kind: output, shape index: {}]  }
   0x1   :  { %s4333_s23 = smov 0   ;;  %s4335_s24 = smov 0  }
   0x2   :  { %s4337_s25 = smov 0   ;;  %s4339_s26 = smov 0  }
   0x3   :  { %s4341_s27 = smov 0  }
   0x4 LB: > { %s25_s28 = sadd.s32 1, %s4283_s25  ;;  %s28_s29 = sadd.s32 1, %s4287_s26  ;;  %s4291_s27 = sphi %s4341_s27, %s16_s27   ;;  %s4287_s26 = sphi %s4339_s26, %s5253_s26   ;;  %s4283_s25 = sphi %s4337_s25, %s5252_s25   ;;  %s4279_s24 = sphi %s4335_s24, %s5251_s24   ;;  %s4275_s23 = sphi %s4333_s23, %s5250_s23   ;;  %s4271_s22 = sphi %s4331_s22, %s5249_s22   ;;  %s4267_s21 = sphi %s4329_s21, %s5248_s21  }
   0x5   : > { %p26_p0 = scmp.ge.s32.totalorder %s25_s28, 2  ;;  %p44_p1 = scmp.ne.s32.totalorder %s4271_s22, %s4267_s21 }
   0x6   : > { %p45_p2 = scmp.eq.s32.totalorder %s4291_s27, 0  ;;  %s37_s10 = sadd.s32 1, %s4271_s22 }
   0x7   : > { %s5255_s28 = smov (%p26_p0, %s25_s28), 0  ;;  %s5257_s29 = smov (!%p26_p0, %s28_s29), %s4287_s26 }
   0x8   : > { %p4372_p3 = por %p45_p2, %p44_p1  ;;  %p30_p4 = scmp.ge.s32.totalorder %s5257_s29, 2 }
   0x9   : > { %s33_s7 = ssub.s32 %s4283_s25, %s5255_s28  ;;  %p3098_p6 = scmp.ge.s32.totalorder %s4291_s27, 4 }
   0xa   : > { %s5259_s29 = smov (%p30_p4, %s5257_s29), 0 }
   0xb   : > { %s32_s8 = ssub.s32 %s4287_s26, %s5259_s29  ;;  %222 = sbr.rel (%p3098_p6) target bundleno = 64 (0x40), region = 28 }
   0xc   : > { %s34_s9 = sor.u32 %s33_s7, %s32_s8 }
   0xd   : > { %p35_p5 = scmp.eq.s32.totalorder %s34_s9, 0 }
   0xf   : > { %s4384_s11 = scalar_select %p35_p5, %s4271_s22, %s37_s10  }
  0x12   : > { %225 = sbr.rel (!%p4372_p3) target bundleno = 41 (0x29), region = 32  ;;  %s227_s12 = sand.u32 (%p4372_p3), 1, %s4271_s22  }
  0x13   : > { %s3101_s13 = sshll.u32 (%p4372_p3), %s4283_s25, 1  ;;  %s3099_s14 = sshll.u32 (%p4372_p3), %s227_s12, 8 }
  0x14   : > { %s3202_s15 = sshll.u32 (%p4372_p3), %s4287_s26, 7  ;;  %s4400_s7 = scalar_lea.vmem (%p4372_p3), [#allocation4], %s3099_s14 }
  0x15   : > { %s233_s16 = sadd.s32 (%p4372_p3), %s3202_s15, %s3101_s13 }
  0x16   : > { %s3103_s17 = sshll.u32 (%p4372_p3), %s233_s16, 2 }
  0x17   : > { %s4395_s20 = scalar_lea.vmem (%p4372_p3), %s5240_s0, %s3103_s17 }
  0x18   : > { %v325_v0 = vld [vmem:[%s4395_s20] sm:$0xff] (%p4372_p3)  ;;  %v327_v1 = vld [vmem:[%s4395_s20 + $0x10] sm:$0xff] (%p4372_p3) }
  0x19   : > { %v329_v2 = vld [vmem:[%s4395_s20 + $0x20] sm:$0xff]  ;;  %326 = vst [vmem:[%s4400_s7] sm:$0xff] %v325_v0  ;;  %328 = vst [vmem:[%s4400_s7 + $0x8] sm:$0xff] %v327_v1  ;;  %v331_v3 = vld [vmem:[%s4395_s20 + $0x30] sm:$0xff] }
  0x1a   : > { %330 = vst [vmem:[%s4400_s7 + $0x10] sm:$0xff] %v329_v2  ;;  %v333_v4 = vld [vmem:[%s4395_s20 + $0x40] sm:$0xff]  ;;  %v335_v5 = vld [vmem:[%s4395_s20 + $0x50] sm:$0xff]  ;;  %332 = vst [vmem:[%s4400_s7 + $0x18] sm:$0xff] %v331_v3 }
  0x1b   : > { %334 = vst [vmem:[%s4400_s7 + $0x20] sm:$0xff] %v333_v4  ;;  %336 = vst [vmem:[%s4400_s7 + $0x28] sm:$0xff] %v335_v5  ;;  %v337_v6 = vld [vmem:[%s4395_s20 + $0x60] sm:$0xff]  ;;  %v339_v7 = vld [vmem:[%s4395_s20 + $0x70] sm:$0xff] }
  0x1c   : > { %v341_v8 = vld [vmem:[%s4395_s20 + $0x80] sm:$0xff]  ;;  %338 = vst [vmem:[%s4400_s7 + $0x30] sm:$0xff] %v337_v6  ;;  %340 = vst [vmem:[%s4400_s7 + $0x38] sm:$0xff] %v339_v7  ;;  %v343_v9 = vld [vmem:[%s4395_s20 + $0x90] sm:$0xff] }
  0x1d   : > { %342 = vst [vmem:[%s4400_s7 + $0x40] sm:$0xff] %v341_v8  ;;  %v345_v10 = vld [vmem:[%s4395_s20 + $0xa0] sm:$0xff]  ;;  %v347_v11 = vld [vmem:[%s4395_s20 + $0xb0] sm:$0xff]  ;;  %344 = vst [vmem:[%s4400_s7 + $0x48] sm:$0xff] %v343_v9 }
  0x1e   : > { %346 = vst [vmem:[%s4400_s7 + $0x50] sm:$0xff] %v345_v10  ;;  %348 = vst [vmem:[%s4400_s7 + $0x58] sm:$0xff] %v347_v11  ;;  %v349_v12 = vld [vmem:[%s4395_s20 + $0xc0] sm:$0xff]  ;;  %v351_v13 = vld [vmem:[%s4395_s20 + $0xd0] sm:$0xff] }
  0x1f   : > { %v353_v14 = vld [vmem:[%s4395_s20 + $0xe0] sm:$0xff]  ;;  %350 = vst [vmem:[%s4400_s7 + $0x60] sm:$0xff] %v349_v12  ;;  %352 = vst [vmem:[%s4400_s7 + $0x68] sm:$0xff] %v351_v13  ;;  %v355_v15 = vld [vmem:[%s4395_s20 + $0xf0] sm:$0xff] }
  0x20   : > { %354 = vst [vmem:[%s4400_s7 + $0x70] sm:$0xff] %v353_v14  ;;  %v357_v16 = vld [vmem:[%s4395_s20 + $0x100] sm:$0xff]  ;;  %v359_v17 = vld [vmem:[%s4395_s20 + $0x110] sm:$0xff]  ;;  %356 = vst [vmem:[%s4400_s7 + $0x78] sm:$0xff] %v355_v15 }
  0x21   : > { %358 = vst [vmem:[%s4400_s7 + $0x80] sm:$0xff] %v357_v16  ;;  %360 = vst [vmem:[%s4400_s7 + $0x88] sm:$0xff] %v359_v17  ;;  %v361_v18 = vld [vmem:[%s4395_s20 + $0x120] sm:$0xff]  ;;  %v363_v19 = vld [vmem:[%s4395_s20 + $0x130] sm:$0xff] }
  0x22   : > { %v365_v20 = vld [vmem:[%s4395_s20 + $0x140] sm:$0xff]  ;;  %362 = vst [vmem:[%s4400_s7 + $0x90] sm:$0xff] %v361_v18  ;;  %364 = vst [vmem:[%s4400_s7 + $0x98] sm:$0xff] %v363_v19  ;;  %v367_v21 = vld [vmem:[%s4395_s20 + $0x150] sm:$0xff] }
  0x23   : > { %366 = vst [vmem:[%s4400_s7 + $0xa0] sm:$0xff] %v365_v20  ;;  %v369_v22 = vld [vmem:[%s4395_s20 + $0x160] sm:$0xff]  ;;  %v371_v23 = vld [vmem:[%s4395_s20 + $0x170] sm:$0xff]  ;;  %368 = vst [vmem:[%s4400_s7 + $0xa8] sm:$0xff] %v367_v21 }
  0x24   : > { %370 = vst [vmem:[%s4400_s7 + $0xb0] sm:$0xff] %v369_v22  ;;  %372 = vst [vmem:[%s4400_s7 + $0xb8] sm:$0xff] %v371_v23  ;;  %v373_v24 = vld [vmem:[%s4395_s20 + $0x180] sm:$0xff]  ;;  %v375_v25 = vld [vmem:[%s4395_s20 + $0x190] sm:$0xff] }
  0x25   : > { %v377_v26 = vld [vmem:[%s4395_s20 + $0x1a0] sm:$0xff]  ;;  %374 = vst [vmem:[%s4400_s7 + $0xc0] sm:$0xff] %v373_v24  ;;  %376 = vst [vmem:[%s4400_s7 + $0xc8] sm:$0xff] %v375_v25  ;;  %v379_v27 = vld [vmem:[%s4395_s20 + $0x1b0] sm:$0xff] }
  0x26   : > { %378 = vst [vmem:[%s4400_s7 + $0xd0] sm:$0xff] %v377_v26  ;;  %v381_v28 = vld [vmem:[%s4395_s20 + $0x1c0] sm:$0xff]  ;;  %v383_v29 = vld [vmem:[%s4395_s20 + $0x1d0] sm:$0xff]  ;;  %380 = vst [vmem:[%s4400_s7 + $0xd8] sm:$0xff] %v379_v27 }
  0x27   : > { %382 = vst [vmem:[%s4400_s7 + $0xe0] sm:$0xff] %v381_v28  ;;  %384 = vst [vmem:[%s4400_s7 + $0xe8] sm:$0xff] %v383_v29  ;;  %v385_v30 = vld [vmem:[%s4395_s20 + $0x1e0] sm:$0xff]  ;;  %v387_v31 = vld [vmem:[%s4395_s20 + $0x1f0] sm:$0xff] }
  0x28   : > { %386 = vst [vmem:[%s4400_s7 + $0xf0] sm:$0xff] %v385_v30  ;;  %388 = vst [vmem:[%s4400_s7 + $0xf8] sm:$0xff] %v387_v31 }
  0x29 PF: > { %394 = sbr.rel (!%p4372_p3) target bundleno = 64 (0x40), region = 70  ;;  %s396_s8 = sand.u32 (%p4372_p3), 1, %s4271_s22  }
  0x2a   : > { %s3106_s9 = sshll.u32 (%p4372_p3), %s4283_s25, 1  ;;  %s3104_s10 = sshll.u32 (%p4372_p3), %s396_s8, 8 }
  0x2b   : > { %s3203_s12 = sshll.u32 (%p4372_p3), %s4287_s26, 7  ;;  %s4476_s30 = scalar_lea.vmem (%p4372_p3), [#allocation5], %s3104_s10 }
  0x2c   : > { %s402_s13 = sadd.s32 (%p4372_p3), %s3203_s12, %s3106_s9 }
  0x2d   : > { %s3108_s14 = sshll.u32 (%p4372_p3), %s402_s13, 2 }
  0x2e   : > { %s4471_s17 = scalar_lea.vmem (%p4372_p3), %s5241_s1, %s3108_s14 }
  0x2f   : > { %v494_v32 = vld [vmem:[%s4471_s17] sm:$0xff] (%p4372_p3)  ;;  %v496_v33 = vld [vmem:[%s4471_s17 + $0x10] sm:$0xff] (%p4372_p3) }
  0x30   : > { %v498_v34 = vld [vmem:[%s4471_s17 + $0x20] sm:$0xff]  ;;  %495 = vst [vmem:[%s4476_s30] sm:$0xff] %v494_v32  ;;  %497 = vst [vmem:[%s4476_s30 + $0x8] sm:$0xff] %v496_v33  ;;  %v500_v35 = vld [vmem:[%s4471_s17 + $0x30] sm:$0xff] }
  0x31   : > { %499 = vst [vmem:[%s4476_s30 + $0x10] sm:$0xff] %v498_v34  ;;  %v502_v36 = vld [vmem:[%s4471_s17 + $0x40] sm:$0xff]  ;;  %v504_v37 = vld [vmem:[%s4471_s17 + $0x50] sm:$0xff]  ;;  %501 = vst [vmem:[%s4476_s30 + $0x18] sm:$0xff] %v500_v35 }
  0x32   : > { %503 = vst [vmem:[%s4476_s30 + $0x20] sm:$0xff] %v502_v36  ;;  %505 = vst [vmem:[%s4476_s30 + $0x28] sm:$0xff] %v504_v37  ;;  %v506_v38 = vld [vmem:[%s4471_s17 + $0x60] sm:$0xff]  ;;  %v508_v39 = vld [vmem:[%s4471_s17 + $0x70] sm:$0xff] }
  0x33   : > { %v510_v40 = vld [vmem:[%s4471_s17 + $0x80] sm:$0xff]  ;;  %507 = vst [vmem:[%s4476_s30 + $0x30] sm:$0xff] %v506_v38  ;;  %509 = vst [vmem:[%s4476_s30 + $0x38] sm:$0xff] %v508_v39  ;;  %v512_v41 = vld [vmem:[%s4471_s17 + $0x90] sm:$0xff] }
  0x34   : > { %511 = vst [vmem:[%s4476_s30 + $0x40] sm:$0xff] %v510_v40  ;;  %v514_v42 = vld [vmem:[%s4471_s17 + $0xa0] sm:$0xff]  ;;  %v516_v43 = vld [vmem:[%s4471_s17 + $0xb0] sm:$0xff]  ;;  %513 = vst [vmem:[%s4476_s30 + $0x48] sm:$0xff] %v512_v41 }
  0x35   : > { %515 = vst [vmem:[%s4476_s30 + $0x50] sm:$0xff] %v514_v42  ;;  %517 = vst [vmem:[%s4476_s30 + $0x58] sm:$0xff] %v516_v43  ;;  %v518_v44 = vld [vmem:[%s4471_s17 + $0xc0] sm:$0xff]  ;;  %v520_v45 = vld [vmem:[%s4471_s17 + $0xd0] sm:$0xff] }
  0x36   : > { %v522_v46 = vld [vmem:[%s4471_s17 + $0xe0] sm:$0xff]  ;;  %519 = vst [vmem:[%s4476_s30 + $0x60] sm:$0xff] %v518_v44  ;;  %521 = vst [vmem:[%s4476_s30 + $0x68] sm:$0xff] %v520_v45  ;;  %v524_v47 = vld [vmem:[%s4471_s17 + $0xf0] sm:$0xff] }
  0x37   : > { %523 = vst [vmem:[%s4476_s30 + $0x70] sm:$0xff] %v522_v46  ;;  %v526_v48 = vld [vmem:[%s4471_s17 + $0x100] sm:$0xff]  ;;  %v528_v49 = vld [vmem:[%s4471_s17 + $0x110] sm:$0xff]  ;;  %525 = vst [vmem:[%s4476_s30 + $0x78] sm:$0xff] %v524_v47 }
  0x38   : > { %527 = vst [vmem:[%s4476_s30 + $0x80] sm:$0xff] %v526_v48  ;;  %529 = vst [vmem:[%s4476_s30 + $0x88] sm:$0xff] %v528_v49  ;;  %v530_v50 = vld [vmem:[%s4471_s17 + $0x120] sm:$0xff]  ;;  %v532_v51 = vld [vmem:[%s4471_s17 + $0x130] sm:$0xff] }
  0x39   : > { %v534_v52 = vld [vmem:[%s4471_s17 + $0x140] sm:$0xff]  ;;  %531 = vst [vmem:[%s4476_s30 + $0x90] sm:$0xff] %v530_v50  ;;  %533 = vst [vmem:[%s4476_s30 + $0x98] sm:$0xff] %v532_v51  ;;  %v536_v53 = vld [vmem:[%s4471_s17 + $0x150] sm:$0xff] }
  0x3a   : > { %535 = vst [vmem:[%s4476_s30 + $0xa0] sm:$0xff] %v534_v52  ;;  %v538_v54 = vld [vmem:[%s4471_s17 + $0x160] sm:$0xff]  ;;  %v540_v55 = vld [vmem:[%s4471_s17 + $0x170] sm:$0xff]  ;;  %537 = vst [vmem:[%s4476_s30 + $0xa8] sm:$0xff] %v536_v53 }
  0x3b   : > { %539 = vst [vmem:[%s4476_s30 + $0xb0] sm:$0xff] %v538_v54  ;;  %541 = vst [vmem:[%s4476_s30 + $0xb8] sm:$0xff] %v540_v55  ;;  %v542_v56 = vld [vmem:[%s4471_s17 + $0x180] sm:$0xff]  ;;  %v544_v57 = vld [vmem:[%s4471_s17 + $0x190] sm:$0xff] }
  0x3c   : > { %v546_v58 = vld [vmem:[%s4471_s17 + $0x1a0] sm:$0xff]  ;;  %543 = vst [vmem:[%s4476_s30 + $0xc0] sm:$0xff] %v542_v56  ;;  %545 = vst [vmem:[%s4476_s30 + $0xc8] sm:$0xff] %v544_v57  ;;  %v548_v59 = vld [vmem:[%s4471_s17 + $0x1b0] sm:$0xff] }
  0x3d   : > { %547 = vst [vmem:[%s4476_s30 + $0xd0] sm:$0xff] %v546_v58  ;;  %v550_v60 = vld [vmem:[%s4471_s17 + $0x1c0] sm:$0xff]  ;;  %v552_v61 = vld [vmem:[%s4471_s17 + $0x1d0] sm:$0xff]  ;;  %549 = vst [vmem:[%s4476_s30 + $0xd8] sm:$0xff] %v548_v59 }
  0x3e   : > { %551 = vst [vmem:[%s4476_s30 + $0xe0] sm:$0xff] %v550_v60  ;;  %553 = vst [vmem:[%s4476_s30 + $0xe8] sm:$0xff] %v552_v61  ;;  %v554_v62 = vld [vmem:[%s4471_s17 + $0x1e0] sm:$0xff]  ;;  %v556_v63 = vld [vmem:[%s4471_s17 + $0x1f0] sm:$0xff] }
  0x3f   : > { %555 = vst [vmem:[%s4476_s30 + $0xf0] sm:$0xff] %v554_v62  ;;  %557 = vst [vmem:[%s4476_s30 + $0xf8] sm:$0xff] %v556_v63 }
  0x40 PF: > { %p3109_p7 = scmp.ge.s32.totalorder %s4291_s27, 1  ;;  %p571_p8 = scmp.lt.s32.totalorder %s4291_s27, 5 }
  0x42   : > { %p572_p9 = pnand %p3109_p7, %p571_p8 }
  0x43   : > { %s578_s18 = sand.u32 (!%p572_p9), 1, %s4267_s21   ;;  %s3112_s19 = sshll.u32 (!%p572_p9), %s4275_s23, 5 }
  0x44   : > { %575 = sbr.rel (%p572_p9) target bundleno = 1026 (0x402), region = 112  ;;  %s3110_s20 = sshll.u32 (!%p572_p9), %s578_s18, 8 }
  0x45   : > { %p628_p10 = scmp.lt.s32.totalorder (!%p572_p9), %s3112_s19, 63  ;;  %s3114_s7 = sshll.u32 (!%p572_p9), %s4279_s24, 5 }
  0x46   : > { %p634_p11 = scmp.lt.s32.totalorder (!%p572_p9), %s3114_s7, 63  ;;  %s4554_s21 = scalar_lea.vmem (!%p572_p9), [#allocation4], %s3110_s20 }
  0x47   : > { %s4556_s17 = scalar_lea.vmem (!%p572_p9), [#allocation5], %s3110_s20  ;;  %p3116_p12 = scmp.ne.s32.totalorder (!%p572_p9), %s4275_s23, 0 }
  0x4b   : > { %s5261_s19 = smov (!%p628_p10, %s3112_s19), 63  ;;  %s5263_s7 = smov (!%p634_p11, %s3114_s7), 63 }
  0x4c   : > { %s3113_s8 = sshll.u32 %s5261_s19, 2  ;;  %s3115_s13 = sshll.u32 %s5263_s7, 3  ;;  %v4293_v0 = vmov (!%p3116_p12), 0.0  }
  0x4d   : > { %s4547_s12 = scalar_lea.vmem %s5242_s2, %s3113_s8  ;;  %s4552_s16 = scalar_lea.vmem %s5246_s6, %s3115_s13  ;;  %644 = vst [vmem:[#allocation2] sm:$0xff] (!%p3116_p12), %v4293_v0  ;;  %645 = vst [vmem:[#allocation2 + $0x8] sm:$0xff] (!%p3116_p12), %v4293_v0 }
  0x4e   : > { %643 = sbr.rel (%p3116_p12) target bundleno = 109 (0x6d), region = 124  ;;  %646 = vst [vmem:[#allocation2 + $0x10] sm:$0xff] (!%p3116_p12), %v4293_v0  ;;  %647 = vst [vmem:[#allocation2 + $0x18] sm:$0xff] (!%p3116_p12), %v4293_v0 }
  0x4f   : > { %648 = vst [vmem:[#allocation2 + $0x20] sm:$0xff] (!%p3116_p12), %v4293_v0  ;;  %649 = vst [vmem:[#allocation2 + $0x28] sm:$0xff] (!%p3116_p12), %v4293_v0 }
  0x50   : > { %650 = vst [vmem:[#allocation2 + $0x30] sm:$0xff] (!%p3116_p12), %v4293_v0  ;;  %651 = vst [vmem:[#allocation2 + $0x38] sm:$0xff] (!%p3116_p12), %v4293_v0 }
  0x51   : > { %652 = vst [vmem:[#allocation2 + $0x40] sm:$0xff] (!%p3116_p12), %v4293_v0  ;;  %653 = vst [vmem:[#allocation2 + $0x48] sm:$0xff] (!%p3116_p12), %v4293_v0 }
  0x52   : > { %654 = vst [vmem:[#allocation2 + $0x50] sm:$0xff] (!%p3116_p12), %v4293_v0  ;;  %655 = vst [vmem:[#allocation2 + $0x58] sm:$0xff] (!%p3116_p12), %v4293_v0 }
  0x53   : > { %656 = vst [vmem:[#allocation2 + $0x60] sm:$0xff] (!%p3116_p12), %v4293_v0  ;;  %657 = vst [vmem:[#allocation2 + $0x68] sm:$0xff] (!%p3116_p12), %v4293_v0 }
  0x54   : > { %658 = vst [vmem:[#allocation2 + $0x70] sm:$0xff] (!%p3116_p12), %v4293_v0  ;;  %659 = vst [vmem:[#allocation2 + $0x78] sm:$0xff] (!%p3116_p12), %v4293_v0 }
  0x55   : > { %660 = vst [vmem:[#allocation2 + $0x80] sm:$0xff] %v4293_v0  ;;  %661 = vst [vmem:[#allocation2 + $0x88] sm:$0xff] %v4293_v0 }
  0x56   : > { %662 = vst [vmem:[#allocation2 + $0x90] sm:$0xff] %v4293_v0  ;;  %663 = vst [vmem:[#allocation2 + $0x98] sm:$0xff] %v4293_v0 }
  0x57   : > { %664 = vst [vmem:[#allocation2 + $0xa0] sm:$0xff] %v4293_v0  ;;  %665 = vst [vmem:[#allocation2 + $0xa8] sm:$0xff] %v4293_v0 }
  0x58   : > { %666 = vst [vmem:[#allocation2 + $0xb0] sm:$0xff] %v4293_v0  ;;  %667 = vst [vmem:[#allocation2 + $0xb8] sm:$0xff] %v4293_v0 }
  0x59   : > { %668 = vst [vmem:[#allocation2 + $0xc0] sm:$0xff] %v4293_v0  ;;  %669 = vst [vmem:[#allocation2 + $0xc8] sm:$0xff] %v4293_v0 }
  0x5a   : > { %670 = vst [vmem:[#allocation2 + $0xd0] sm:$0xff] %v4293_v0  ;;  %671 = vst [vmem:[#allocation2 + $0xd8] sm:$0xff] %v4293_v0 }
  0x5b   : > { %672 = vst [vmem:[#allocation2 + $0xe0] sm:$0xff] %v4293_v0  ;;  %673 = vst [vmem:[#allocation2 + $0xe8] sm:$0xff] %v4293_v0 }
  0x5c   : > { %674 = vst [vmem:[#allocation2 + $0xf0] sm:$0xff] %v4293_v0  ;;  %675 = vst [vmem:[#allocation2 + $0xf8] sm:$0xff] %v4293_v0 }
  0x5d   : > { %676 = vst [vmem:[#allocation3] sm:$0xff] %v4293_v0  ;;  %677 = vst [vmem:[#allocation3 + $0x8] sm:$0xff] %v4293_v0 }
  0x5e   : > { %678 = vst [vmem:[#allocation3 + $0x10] sm:$0xff] %v4293_v0  ;;  %679 = vst [vmem:[#allocation3 + $0x18] sm:$0xff] %v4293_v0 }
  0x5f   : > { %680 = vst [vmem:[#allocation3 + $0x20] sm:$0xff] %v4293_v0  ;;  %681 = vst [vmem:[#allocation3 + $0x28] sm:$0xff] %v4293_v0 }
  0x60   : > { %682 = vst [vmem:[#allocation3 + $0x30] sm:$0xff] %v4293_v0  ;;  %683 = vst [vmem:[#allocation3 + $0x38] sm:$0xff] %v4293_v0 }
  0x61   : > { %684 = vst [vmem:[#allocation3 + $0x40] sm:$0xff] %v4293_v0  ;;  %685 = vst [vmem:[#allocation3 + $0x48] sm:$0xff] %v4293_v0 }
  0x62   : > { %686 = vst [vmem:[#allocation3 + $0x50] sm:$0xff] %v4293_v0  ;;  %687 = vst [vmem:[#allocation3 + $0x58] sm:$0xff] %v4293_v0 }
  0x63   : > { %688 = vst [vmem:[#allocation3 + $0x60] sm:$0xff] %v4293_v0  ;;  %689 = vst [vmem:[#allocation3 + $0x68] sm:$0xff] %v4293_v0 }
  0x64   : > { %690 = vst [vmem:[#allocation3 + $0x70] sm:$0xff] %v4293_v0  ;;  %691 = vst [vmem:[#allocation3 + $0x78] sm:$0xff] %v4293_v0 }
  0x65   : > { %692 = vst [vmem:[#allocation3 + $0x80] sm:$0xff] %v4293_v0  ;;  %693 = vst [vmem:[#allocation3 + $0x88] sm:$0xff] %v4293_v0 }
  0x66   : > { %694 = vst [vmem:[#allocation3 + $0x90] sm:$0xff] %v4293_v0  ;;  %695 = vst [vmem:[#allocation3 + $0x98] sm:$0xff] %v4293_v0 }
  0x67   : > { %696 = vst [vmem:[#allocation3 + $0xa0] sm:$0xff] %v4293_v0  ;;  %697 = vst [vmem:[#allocation3 + $0xa8] sm:$0xff] %v4293_v0 }
  0x68   : > { %698 = vst [vmem:[#allocation3 + $0xb0] sm:$0xff] %v4293_v0  ;;  %699 = vst [vmem:[#allocation3 + $0xb8] sm:$0xff] %v4293_v0 }
  0x69   : > { %700 = vst [vmem:[#allocation3 + $0xc0] sm:$0xff] %v4293_v0  ;;  %701 = vst [vmem:[#allocation3 + $0xc8] sm:$0xff] %v4293_v0 }
  0x6a   : > { %702 = vst [vmem:[#allocation3 + $0xd0] sm:$0xff] %v4293_v0  ;;  %703 = vst [vmem:[#allocation3 + $0xd8] sm:$0xff] %v4293_v0 }
  0x6b   : > { %704 = vst [vmem:[#allocation3 + $0xe0] sm:$0xff] %v4293_v0  ;;  %705 = vst [vmem:[#allocation3 + $0xe8] sm:$0xff] %v4293_v0 }
  0x6c   : > { %706 = vst [vmem:[#allocation3 + $0xf0] sm:$0xff] %v4293_v0  ;;  %707 = vst [vmem:[#allocation3 + $0xf8] sm:$0xff] %v4293_v0 }
  0x6d PF: > { %v3741_v1 = vld [vmem:[%s4547_s12 + $0x40] sm:$0xff]   ;;  %v3743_v3 = vld [vmem:[%s4547_s12 + $0x48] sm:$0xff]   ;;  %v3745_v5 = vld [vmem:[%s4547_s12 + $0x50] sm:$0xff]   ;;  %p3197_p13 = scmp.ne.s32.totalorder %s4275_s23, 1 }
  0x6e   : > { %v3742_v2 = vld [vmem:[%s4547_s12] sm:$0xff]   ;;  %3204 = vmatprep.subr.bf16.mxu0 %v3741_v1  ;;  %3316 = vmatprep.subr.bf16.mxu1 %v3741_v1  ;;  %v3744_v4 = vld [vmem:[%s4547_s12 + $0x8] sm:$0xff]   ;;  %v3746_v6 = vld [vmem:[%s4547_s12 + $0x10] sm:$0xff]  }
  0x6f   : > { %3205 = vmatpush3.bf16.msra.mxu0 %v3742_v2  ;;  %3317 = vmatpush3.bf16.msra.mxu1 %v3742_v2  ;;  %v3747_v7 = vld [vmem:[%s4547_s12 + $0x58] sm:$0xff]   ;;  %v3749_v9 = vld [vmem:[%s4547_s12 + $0x60] sm:$0xff]   ;;  %v3751_v11 = vld [vmem:[%s4547_s12 + $0x68] sm:$0xff]  }
  0x70   : > { %3206 = vmatprep.subr.bf16.mxu0 %v3743_v3  ;;  %3318 = vmatprep.subr.bf16.mxu1 %v3743_v3  ;;  %v3748_v8 = vld [vmem:[%s4547_s12 + $0x18] sm:$0xff]   ;;  %v3750_v10 = vld [vmem:[%s4547_s12 + $0x20] sm:$0xff]   ;;  %v3752_v14 = vld [vmem:[%s4547_s12 + $0x28] sm:$0xff]  }
  0x71   : > { %v3759_v12 = vld [vmem:[%s4554_s21 + $0x4] ss:$8 sps:$4 sm:$0xff]   ;;  %v3753_v15 = vld [vmem:[%s4547_s12 + $0x70] sm:$0xff]   ;;  %v3755_v17 = vld [vmem:[%s4547_s12 + $0x78] sm:$0xff]  }
  0x72   : > { %v3762_v13 = vld [vmem:[%s4556_s17 + $0x4] ss:$8 sps:$4 sm:$0xff]   ;;  %1092 = vmatprep.mubr.bf16.mxu0 %v3759_v12  ;;  %v3754_v16 = vld [vmem:[%s4547_s12 + $0x30] sm:$0xff]   ;;  %v3756_v18 = vld [vmem:[%s4547_s12 + $0x38] sm:$0xff]  }
  0x73   : > { %3207 = vmatpush3.bf16.msra.mxu0 %v3744_v4  ;;  %3319 = vmatpush3.bf16.msra.mxu1 %v3744_v4  ;;  %v3757_v19 = vld [vmem:[%s4554_s21] ss:$8 sps:$4 sm:$0xff]   ;;  %v3763_v21 = vld [vmem:[%s4554_s21 + $0x14] ss:$8 sps:$4 sm:$0xff]   ;;  %v3767_v23 = vld [vmem:[%s4554_s21 + $0x10] ss:$8 sps:$4 sm:$0xff]  }
  0x74   : > { %3208 = vmatprep.subr.bf16.mxu0 %v3745_v5  ;;  %3320 = vmatprep.subr.bf16.mxu1 %v3745_v5  ;;  %v3760_v20 = vld [vmem:[%s4556_s17] ss:$8 sps:$4 sm:$0xff]   ;;  %v3765_v22 = vld [vmem:[%s4556_s17 + $0x14] ss:$8 sps:$4 sm:$0xff]   ;;  %v3768_v24 = vld [vmem:[%s4556_s17 + $0x10] ss:$8 sps:$4 sm:$0xff]  }
  0x75   : > { %1541 = vmatprep.mubr.bf16.mxu1 %v3762_v13  ;;  %v3769_v25 = vld [vmem:[%s4554_s21 + $0x24] ss:$8 sps:$4 sm:$0xff]   ;;  %v3773_v27 = vld [vmem:[%s4554_s21 + $0x20] ss:$8 sps:$4 sm:$0xff]   ;;  %v3775_v29 = vld [vmem:[%s4554_s21 + $0x34] ss:$8 sps:$4 sm:$0xff]  }
  0x76   : > { %v3771_v26 = vld [vmem:[%s4556_s17 + $0x24] ss:$8 sps:$4 sm:$0xff]   ;;  %v3774_v28 = vld [vmem:[%s4556_s17 + $0x20] ss:$8 sps:$4 sm:$0xff]   ;;  %v3777_v30 = vld [vmem:[%s4556_s17 + $0x34] ss:$8 sps:$4 sm:$0xff]  }
  0x77   : > { %3209 = vmatpush3.bf16.msra.mxu0 %v3746_v6  ;;  %3321 = vmatpush3.bf16.msra.mxu1 %v3746_v6  ;;  %v3779_v31 = vld [vmem:[%s4554_s21 + $0x30] ss:$8 sps:$4 sm:$0xff]   ;;  %v3781_v33 = vld [vmem:[%s4554_s21 + $0x44] ss:$8 sps:$4 sm:$0xff]   ;;  %v3785_v35 = vld [vmem:[%s4554_s21 + $0x40] ss:$8 sps:$4 sm:$0xff]  }
  0x78   : > { %3210 = vmatprep.subr.bf16.mxu0 %v3747_v7  ;;  %3322 = vmatprep.subr.bf16.mxu1 %v3747_v7  ;;  %v3780_v32 = vld [vmem:[%s4556_s17 + $0x30] ss:$8 sps:$4 sm:$0xff]   ;;  %v3783_v34 = vld [vmem:[%s4556_s17 + $0x44] ss:$8 sps:$4 sm:$0xff]   ;;  %v3786_v36 = vld [vmem:[%s4556_s17 + $0x40] ss:$8 sps:$4 sm:$0xff]  }
  0x79   : > { %v3787_v37 = vld [vmem:[%s4554_s21 + $0x54] ss:$8 sps:$4 sm:$0xff]   ;;  %v3791_v39 = vld [vmem:[%s4554_s21 + $0x50] ss:$8 sps:$4 sm:$0xff]   ;;  %v3793_v41 = vld [vmem:[%s4554_s21 + $0x64] ss:$8 sps:$4 sm:$0xff]  }
  0x7a   : > { %v3789_v38 = vld [vmem:[%s4556_s17 + $0x54] ss:$8 sps:$4 sm:$0xff]   ;;  %v3792_v40 = vld [vmem:[%s4556_s17 + $0x50] ss:$8 sps:$4 sm:$0xff]   ;;  %v3795_v42 = vld [vmem:[%s4556_s17 + $0x64] ss:$8 sps:$4 sm:$0xff]  }
  0x7b   : > { %3211 = vmatpush3.bf16.msra.mxu0 %v3748_v8  ;;  %3323 = vmatpush3.bf16.msra.mxu1 %v3748_v8  ;;  %v3797_v43 = vld [vmem:[%s4554_s21 + $0x60] ss:$8 sps:$4 sm:$0xff]   ;;  %v3799_v45 = vld [vmem:[%s4554_s21 + $0x74] ss:$8 sps:$4 sm:$0xff]   ;;  %v3803_v47 = vld [vmem:[%s4554_s21 + $0x70] ss:$8 sps:$4 sm:$0xff]  }
  0x7c   : > { %3212 = vmatprep.subr.bf16.mxu0 %v3749_v9  ;;  %3324 = vmatprep.subr.bf16.mxu1 %v3749_v9  ;;  %v3798_v44 = vld [vmem:[%s4556_s17 + $0x60] ss:$8 sps:$4 sm:$0xff]   ;;  %v3801_v46 = vld [vmem:[%s4556_s17 + $0x74] ss:$8 sps:$4 sm:$0xff]   ;;  %v3804_v48 = vld [vmem:[%s4556_s17 + $0x70] ss:$8 sps:$4 sm:$0xff]  }
  0x7d   : > { %v3805_v49 = vld [vmem:[%s4554_s21 + $0x84] ss:$8 sps:$4 sm:$0xff]   ;;  %v3809_v51 = vld [vmem:[%s4554_s21 + $0x80] ss:$8 sps:$4 sm:$0xff]   ;;  %v3811_v53 = vld [vmem:[%s4554_s21 + $0x94] ss:$8 sps:$4 sm:$0xff]  }
  0x7e   : > { %v3807_v50 = vld [vmem:[%s4556_s17 + $0x84] ss:$8 sps:$4 sm:$0xff]   ;;  %v3810_v52 = vld [vmem:[%s4556_s17 + $0x80] ss:$8 sps:$4 sm:$0xff]   ;;  %v3813_v54 = vld [vmem:[%s4556_s17 + $0x94] ss:$8 sps:$4 sm:$0xff]  }
  0x7f   : > { %3213 = vmatpush3.bf16.msra.mxu0 %v3750_v10  ;;  %3325 = vmatpush3.bf16.msra.mxu1 %v3750_v10  ;;  %v3815_v55 = vld [vmem:[%s4554_s21 + $0x90] ss:$8 sps:$4 sm:$0xff]   ;;  %v3817_v57 = vld [vmem:[%s4554_s21 + $0xa4] ss:$8 sps:$4 sm:$0xff]   ;;  %v3821_v59 = vld [vmem:[%s4554_s21 + $0xa0] ss:$8 sps:$4 sm:$0xff]  }
  0x80   : > { %3214 = vmatprep.subr.bf16.mxu0 %v3751_v11  ;;  %3326 = vmatprep.subr.bf16.mxu1 %v3751_v11  ;;  %v3816_v56 = vld [vmem:[%s4556_s17 + $0x90] ss:$8 sps:$4 sm:$0xff]   ;;  %v3819_v58 = vld [vmem:[%s4556_s17 + $0xa4] ss:$8 sps:$4 sm:$0xff]   ;;  %v3822_v60 = vld [vmem:[%s4556_s17 + $0xa0] ss:$8 sps:$4 sm:$0xff]  }
  0x81   : > { %v3823_v61 = vld [vmem:[%s4554_s21 + $0xb4] ss:$8 sps:$4 sm:$0xff]   ;;  %v3827_v63 = vld [vmem:[%s4554_s21 + $0xb0] ss:$8 sps:$4 sm:$0xff]   ;;  %v3829_v1 = vld [vmem:[%s4554_s21 + $0xc4] ss:$8 sps:$4 sm:$0xff]  }
  0x82   : > { %v3825_v62 = vld [vmem:[%s4556_s17 + $0xb4] ss:$8 sps:$4 sm:$0xff]   ;;  %v3828_v0 = vld [vmem:[%s4556_s17 + $0xb0] ss:$8 sps:$4 sm:$0xff]   ;;  %v3831_v2 = vld [vmem:[%s4556_s17 + $0xc4] ss:$8 sps:$4 sm:$0xff]  }
  0x83   : > { %3215 = vmatpush3.bf16.msra.mxu0 %v3752_v14  ;;  %3327 = vmatpush3.bf16.msra.mxu1 %v3752_v14  ;;  %v3833_v3 = vld [vmem:[%s4554_s21 + $0xc0] ss:$8 sps:$4 sm:$0xff]   ;;  %v3835_v5 = vld [vmem:[%s4554_s21 + $0xd4] ss:$8 sps:$4 sm:$0xff]   ;;  %v3839_v7 = vld [vmem:[%s4554_s21 + $0xd0] ss:$8 sps:$4 sm:$0xff]  }
  0x84   : > { %3216 = vmatprep.subr.bf16.mxu0 %v3753_v15  ;;  %3328 = vmatprep.subr.bf16.mxu1 %v3753_v15  ;;  %v3834_v4 = vld [vmem:[%s4556_s17 + $0xc0] ss:$8 sps:$4 sm:$0xff]   ;;  %v3837_v6 = vld [vmem:[%s4556_s17 + $0xd4] ss:$8 sps:$4 sm:$0xff]   ;;  %v3840_v8 = vld [vmem:[%s4556_s17 + $0xd0] ss:$8 sps:$4 sm:$0xff]  }
  0x85   : > { %v3841_v9 = vld [vmem:[%s4554_s21 + $0xe4] ss:$8 sps:$4 sm:$0xff]   ;;  %v3845_v11 = vld [vmem:[%s4554_s21 + $0xe0] ss:$8 sps:$4 sm:$0xff]   ;;  %v3847_v13 = vld [vmem:[%s4554_s21 + $0xf4] ss:$8 sps:$4 sm:$0xff]  }
  0x86   : > { %v3843_v10 = vld [vmem:[%s4556_s17 + $0xe4] ss:$8 sps:$4 sm:$0xff]   ;;  %v3846_v12 = vld [vmem:[%s4556_s17 + $0xe0] ss:$8 sps:$4 sm:$0xff]   ;;  %v3849_v14 = vld [vmem:[%s4556_s17 + $0xf4] ss:$8 sps:$4 sm:$0xff]  }
  0x87   : > { %3217 = vmatpush3.bf16.msra.mxu0 %v3754_v16  ;;  %3329 = vmatpush3.bf16.msra.mxu1 %v3754_v16  ;;  %v3851_v15 = vld [vmem:[%s4554_s21 + $0xf0] ss:$8 sps:$4 sm:$0xff]  }
  0x88   : > { %3218 = vmatprep.subr.bf16.mxu0 %v3755_v17  ;;  %3330 = vmatprep.subr.bf16.mxu1 %v3755_v17  ;;  %v3852_v16 = vld [vmem:[%s4556_s17 + $0xf0] ss:$8 sps:$4 sm:$0xff]  }
  0x8b   : > { %3219 = vmatpush3.bf16.msra.mxu0 %v3756_v18  ;;  %3331 = vmatpush3.bf16.msra.mxu1 %v3756_v18 }
  0x8e   : > { %1093 = vmatmul.mubr.bf16.vlgmr.msra.gmra.mrb[0].mxu0 %v3757_v19  ;;  %1542 = vmatmul.mubr.bf16.vlgmr.msra.gmra.mrb[0].mxu1 %v3760_v20  ;;  %v740_v19 = vld [vmem:[#allocation2] sm:$0xff] }
  0x8f   : > { %1100 = vmatprep.mubr.bf16.mxu0 %v3763_v21  ;;  %1549 = vmatprep.mubr.bf16.mxu1 %v3765_v22  ;;  %v1285_v21 = vld [vmem:[#allocation3] sm:$0xff] }
  0x96   : > { %1101 = vmatmul.mubr.bf16.gmra.mrb[4].mxu0 %v3767_v23  ;;  %1550 = vmatmul.mubr.bf16.gmra.mrb[4].mxu1 %v3768_v24 }
  0x97   : > { %1108 = vmatprep.mubr.bf16.mxu0 %v3769_v25  ;;  %1557 = vmatprep.mubr.bf16.mxu1 %v3771_v26 }
  0x9e   : > { %1109 = vmatmul.mubr.bf16.gmra.mrb[8].mxu0 %v3773_v27  ;;  %1558 = vmatmul.mubr.bf16.gmra.mrb[8].mxu1 %v3774_v28  ;;  %v741_v27 = vld [vmem:[#allocation2 + $0x8] sm:$0xff] }
  0x9f   : > { %1116 = vmatprep.mubr.bf16.mxu0 %v3775_v29  ;;  %1565 = vmatprep.mubr.bf16.mxu1 %v3777_v30  ;;  %v1286_v29 = vld [vmem:[#allocation3 + $0x8] sm:$0xff] }
  0xa6   : > { %1117 = vmatmul.mubr.bf16.gmra.mrb[12].mxu0 %v3779_v31  ;;  %1566 = vmatmul.mubr.bf16.gmra.mrb[12].mxu1 %v3780_v32 }
  0xa7   : > { %1124 = vmatprep.mubr.bf16.mxu0 %v3781_v33  ;;  %1573 = vmatprep.mubr.bf16.mxu1 %v3783_v34 }
  0xae   : > { %1125 = vmatmul.mubr.bf16.gmra.mrb[16].mxu0 %v3785_v35  ;;  %1574 = vmatmul.mubr.bf16.gmra.mrb[16].mxu1 %v3786_v36 }
  0xaf   : > { %1132 = vmatprep.mubr.bf16.mxu0 %v3787_v37  ;;  %1581 = vmatprep.mubr.bf16.mxu1 %v3789_v38 }
  0xb6   : > { %1133 = vmatmul.mubr.bf16.gmra.mrb[20].mxu0 %v3791_v39  ;;  %1582 = vmatmul.mubr.bf16.gmra.mrb[20].mxu1 %v3792_v40  ;;  %v742_v39 = vld [vmem:[#allocation2 + $0x10] sm:$0xff] }
  0xb7   : > { %1140 = vmatprep.mubr.bf16.mxu0 %v3793_v41  ;;  %1589 = vmatprep.mubr.bf16.mxu1 %v3795_v42  ;;  %v1287_v41 = vld [vmem:[#allocation3 + $0x10] sm:$0xff] }
  0xbe   : > { %1141 = vmatmul.mubr.bf16.gmra.mrb[24].mxu0 %v3797_v43  ;;  %1590 = vmatmul.mubr.bf16.gmra.mrb[24].mxu1 %v3798_v44 }
  0xbf   : > { %1148 = vmatprep.mubr.bf16.mxu0 %v3799_v45  ;;  %1597 = vmatprep.mubr.bf16.mxu1 %v3801_v46 }
  0xc6   : > { %1149 = vmatmul.mubr.bf16.gmra.mrb[28].mxu0 %v3803_v47  ;;  %1598 = vmatmul.mubr.bf16.gmra.mrb[28].mxu1 %v3804_v48  ;;  %v743_v47 = vld [vmem:[#allocation2 + $0x18] sm:$0xff] }
  0xc7   : > { %1156 = vmatprep.mubr.bf16.mxu0 %v3805_v49  ;;  %1605 = vmatprep.mubr.bf16.mxu1 %v3807_v50  ;;  %v1288_v49 = vld [vmem:[#allocation3 + $0x18] sm:$0xff] }
  0xce   : > { %1157 = vmatmul.mubr.bf16.gmra.mrb[32].mxu0 %v3809_v51  ;;  %1606 = vmatmul.mubr.bf16.gmra.mrb[32].mxu1 %v3810_v52 }
  0xcf   : > { %1164 = vmatprep.mubr.bf16.mxu0 %v3811_v53  ;;  %1613 = vmatprep.mubr.bf16.mxu1 %v3813_v54 }
  0xd6   : > { %1165 = vmatmul.mubr.bf16.gmra.mrb[36].mxu0 %v3815_v55  ;;  %1614 = vmatmul.mubr.bf16.gmra.mrb[36].mxu1 %v3816_v56 }
  0xd7   : > { %1172 = vmatprep.mubr.bf16.mxu0 %v3817_v57  ;;  %1621 = vmatprep.mubr.bf16.mxu1 %v3819_v58 }
  0xde   : > { %1173 = vmatmul.mubr.bf16.gmra.mrb[40].mxu0 %v3821_v59  ;;  %1622 = vmatmul.mubr.bf16.gmra.mrb[40].mxu1 %v3822_v60  ;;  %v744_v59 = vld [vmem:[#allocation2 + $0x20] sm:$0xff] }
  0xdf   : > { %1180 = vmatprep.mubr.bf16.mxu0 %v3823_v61  ;;  %1629 = vmatprep.mubr.bf16.mxu1 %v3825_v62  ;;  %v1289_v61 = vld [vmem:[#allocation3 + $0x20] sm:$0xff] }
  0xe6   : > { %1181 = vmatmul.mubr.bf16.gmra.mrb[44].mxu0 %v3827_v63  ;;  %1630 = vmatmul.mubr.bf16.gmra.mrb[44].mxu1 %v3828_v0 }
  0xe7   : > { %1188 = vmatprep.mubr.bf16.mxu0 %v3829_v1  ;;  %1637 = vmatprep.mubr.bf16.mxu1 %v3831_v2 }
  0xee   : > { %1189 = vmatmul.mubr.bf16.gmra.mrb[48].mxu0 %v3833_v3  ;;  %1638 = vmatmul.mubr.bf16.gmra.mrb[48].mxu1 %v3834_v4  ;;  %v745_v3 = vld [vmem:[#allocation2 + $0x28] sm:$0xff] }
  0xef   : > { %1196 = vmatprep.mubr.bf16.mxu0 %v3835_v5  ;;  %1645 = vmatprep.mubr.bf16.mxu1 %v3837_v6  ;;  %v1290_v5 = vld [vmem:[#allocation3 + $0x28] sm:$0xff] }
  0xf6   : > { %1197 = vmatmul.mubr.bf16.gmra.mrb[52].mxu0 %v3839_v7  ;;  %1646 = vmatmul.mubr.bf16.gmra.mrb[52].mxu1 %v3840_v8 }
  0xf7   : > { %1204 = vmatprep.mubr.bf16.mxu0 %v3841_v9  ;;  %1653 = vmatprep.mubr.bf16.mxu1 %v3843_v10 }
  0xfe   : > { %1205 = vmatmul.mubr.bf16.gmra.mrb[56].mxu0 %v3845_v11  ;;  %1654 = vmatmul.mubr.bf16.gmra.mrb[56].mxu1 %v3846_v12 }
  0xff   : > { %1212 = vmatprep.mubr.bf16.mxu0 %v3847_v13  ;;  %1661 = vmatprep.mubr.bf16.mxu1 %v3849_v14 }
 0x106   : > { %1213 = vmatmul.mubr.bf16.gmra.mrb[60].mxu0 %v3851_v15  ;;  %1662 = vmatmul.mubr.bf16.gmra.mrb[60].mxu1 %v3852_v16  ;;  %v746_v15 = vld [vmem:[#allocation2 + $0x30] sm:$0xff] }
 0x161   : > { %v3220_v17 = vpop.f32.mrb[0].mxu0  ;;  %v3332_v18 = vpop.f32.mrb[0].mxu1 }
 0x162   : > { %v3221_v20 = vpop.f32.mrb[1].mxu0  ;;  %v3333_v22 = vpop.f32.mrb[1].mxu1 }
 0x163   : > { %v3222_v23 = vadd.f32 %v3221_v20, %v3220_v17  ;;  %v3334_v24 = vadd.f32 %v3333_v22, %v3332_v18  ;;  %v3223_v25 = vpop.f32.mrb[2].mxu0  ;;  %v3335_v26 = vpop.f32.mrb[2].mxu1  ;;  %v1291_v17 = vld [vmem:[#allocation3 + $0x30] sm:$0xff] }
 0x164   : > { %v3224_v28 = vpop.f32.mrb[3].mxu0  ;;  %v3336_v30 = vpop.f32.mrb[3].mxu1 }
 0x165   : > { %v1221_v31 = vadd.f32 %v3222_v23, %v740_v19  ;;  %v1670_v32 = vadd.f32 %v3334_v24, %v1285_v21  ;;  %v3225_v33 = vadd.f32 %v3224_v28, %v3223_v25  ;;  %v3337_v34 = vadd.f32 %v3336_v30, %v3335_v26  ;;  %v747_v23 = vld [vmem:[#allocation2 + $0x38] sm:$0xff] }
 0x166   : > { %v1292_v25 = vld [vmem:[#allocation3 + $0x38] sm:$0xff] }
 0x167   : > { %1253 = vst [vmem:[#allocation2] sm:$0xff] %v1221_v31  ;;  %1702 = vst [vmem:[#allocation3] sm:$0xff] %v1670_v32  ;;  %v1222_v35 = vadd.f32 %v3225_v33, %v741_v27  ;;  %v1671_v36 = vadd.f32 %v3337_v34, %v1286_v29 }
 0x169   : > { %1254 = vst [vmem:[#allocation2 + $0x8] sm:$0xff] %v1222_v35  ;;  %1703 = vst [vmem:[#allocation3 + $0x8] sm:$0xff] %v1671_v36  ;;  %v3226_v37 = vpop.f32.mrb[4].mxu0  ;;  %v3338_v38 = vpop.f32.mrb[4].mxu1  ;;  %v748_v35 = vld [vmem:[#allocation2 + $0x40] sm:$0xff] }
 0x16a   : > { %v3227_v40 = vpop.f32.mrb[5].mxu0  ;;  %v3339_v42 = vpop.f32.mrb[5].mxu1 }
 0x16b   : > { %v3228_v43 = vadd.f32 %v3227_v40, %v3226_v37  ;;  %v3340_v44 = vadd.f32 %v3339_v42, %v3338_v38  ;;  %v3229_v45 = vpop.f32.mrb[6].mxu0  ;;  %v3341_v46 = vpop.f32.mrb[6].mxu1  ;;  %v1293_v37 = vld [vmem:[#allocation3 + $0x40] sm:$0xff] }
 0x16c   : > { %v3230_v48 = vpop.f32.mrb[7].mxu0  ;;  %v3342_v50 = vpop.f32.mrb[7].mxu1 }
 0x16d   : > { %v1223_v51 = vadd.f32 %v3228_v43, %v742_v39  ;;  %v1672_v52 = vadd.f32 %v3340_v44, %v1287_v41  ;;  %v3231_v53 = vadd.f32 %v3230_v48, %v3229_v45  ;;  %v3343_v54 = vadd.f32 %v3342_v50, %v3341_v46  ;;  %v749_v43 = vld [vmem:[#allocation2 + $0x48] sm:$0xff] }
 0x16e   : > { %v1294_v45 = vld [vmem:[#allocation3 + $0x48] sm:$0xff] }
 0x16f   : > { %1255 = vst [vmem:[#allocation2 + $0x10] sm:$0xff] %v1223_v51  ;;  %1704 = vst [vmem:[#allocation3 + $0x10] sm:$0xff] %v1672_v52  ;;  %v1224_v55 = vadd.f32 %v3231_v53, %v743_v47  ;;  %v1673_v56 = vadd.f32 %v3343_v54, %v1288_v49 }
 0x171   : > { %1256 = vst [vmem:[#allocation2 + $0x18] sm:$0xff] %v1224_v55  ;;  %1705 = vst [vmem:[#allocation3 + $0x18] sm:$0xff] %v1673_v56  ;;  %v3232_v57 = vpop.f32.mrb[8].mxu0  ;;  %v3344_v58 = vpop.f32.mrb[8].mxu1  ;;  %v750_v55 = vld [vmem:[#allocation2 + $0x50] sm:$0xff] }
 0x172   : > { %v3233_v60 = vpop.f32.mrb[9].mxu0  ;;  %v3345_v62 = vpop.f32.mrb[9].mxu1 }
 0x173   : > { %v3234_v63 = vadd.f32 %v3233_v60, %v3232_v57  ;;  %v3346_v0 = vadd.f32 %v3345_v62, %v3344_v58  ;;  %v3235_v1 = vpop.f32.mrb[10].mxu0  ;;  %v3347_v2 = vpop.f32.mrb[10].mxu1  ;;  %v1295_v57 = vld [vmem:[#allocation3 + $0x50] sm:$0xff] }
 0x174   : > { %v3236_v4 = vpop.f32.mrb[11].mxu0  ;;  %v3348_v6 = vpop.f32.mrb[11].mxu1 }
 0x175   : > { %v1225_v7 = vadd.f32 %v3234_v63, %v744_v59  ;;  %v1674_v8 = vadd.f32 %v3346_v0, %v1289_v61  ;;  %v3237_v9 = vadd.f32 %v3236_v4, %v3235_v1  ;;  %v3349_v10 = vadd.f32 %v3348_v6, %v3347_v2  ;;  %v751_v63 = vld [vmem:[#allocation2 + $0x58] sm:$0xff] }
 0x176   : > { %v1296_v1 = vld [vmem:[#allocation3 + $0x58] sm:$0xff] }
 0x177   : > { %1257 = vst [vmem:[#allocation2 + $0x20] sm:$0xff] %v1225_v7  ;;  %1706 = vst [vmem:[#allocation3 + $0x20] sm:$0xff] %v1674_v8  ;;  %v1226_v11 = vadd.f32 %v3237_v9, %v745_v3  ;;  %v1675_v12 = vadd.f32 %v3349_v10, %v1290_v5 }
 0x179   : > { %1258 = vst [vmem:[#allocation2 + $0x28] sm:$0xff] %v1226_v11  ;;  %1707 = vst [vmem:[#allocation3 + $0x28] sm:$0xff] %v1675_v12  ;;  %v3238_v13 = vpop.f32.mrb[12].mxu0  ;;  %v3350_v14 = vpop.f32.mrb[12].mxu1  ;;  %v752_v11 = vld [vmem:[#allocation2 + $0x60] sm:$0xff] }
 0x17a   : > { %v3239_v16 = vpop.f32.mrb[13].mxu0  ;;  %v3351_v18 = vpop.f32.mrb[13].mxu1 }
 0x17b   : > { %v3240_v19 = vadd.f32 %v3239_v16, %v3238_v13  ;;  %v3352_v20 = vadd.f32 %v3351_v18, %v3350_v14  ;;  %v3241_v21 = vpop.f32.mrb[14].mxu0  ;;  %v3353_v22 = vpop.f32.mrb[14].mxu1  ;;  %v1297_v13 = vld [vmem:[#allocation3 + $0x60] sm:$0xff] }
 0x17c   : > { %v3242_v24 = vpop.f32.mrb[15].mxu0  ;;  %v3354_v26 = vpop.f32.mrb[15].mxu1 }
 0x17d   : > { %v1227_v27 = vadd.f32 %v3240_v19, %v746_v15  ;;  %v1676_v28 = vadd.f32 %v3352_v20, %v1291_v17  ;;  %v3243_v29 = vadd.f32 %v3242_v24, %v3241_v21  ;;  %v3355_v30 = vadd.f32 %v3354_v26, %v3353_v22  ;;  %v753_v19 = vld [vmem:[#allocation2 + $0x68] sm:$0xff] }
 0x17e   : > { %v1298_v21 = vld [vmem:[#allocation3 + $0x68] sm:$0xff] }
 0x17f   : > { %1259 = vst [vmem:[#allocation2 + $0x30] sm:$0xff] %v1227_v27  ;;  %1708 = vst [vmem:[#allocation3 + $0x30] sm:$0xff] %v1676_v28  ;;  %v1228_v31 = vadd.f32 %v3243_v29, %v747_v23  ;;  %v1677_v32 = vadd.f32 %v3355_v30, %v1292_v25 }
 0x181   : > { %1260 = vst [vmem:[#allocation2 + $0x38] sm:$0xff] %v1228_v31  ;;  %1709 = vst [vmem:[#allocation3 + $0x38] sm:$0xff] %v1677_v32  ;;  %v3244_v33 = vpop.f32.mrb[16].mxu0  ;;  %v3356_v34 = vpop.f32.mrb[16].mxu1  ;;  %v754_v31 = vld [vmem:[#allocation2 + $0x70] sm:$0xff] }
 0x182   : > { %v3245_v36 = vpop.f32.mrb[17].mxu0  ;;  %v3357_v38 = vpop.f32.mrb[17].mxu1 }
 0x183   : > { %v3246_v39 = vadd.f32 %v3245_v36, %v3244_v33  ;;  %v3358_v40 = vadd.f32 %v3357_v38, %v3356_v34  ;;  %v3247_v41 = vpop.f32.mrb[18].mxu0  ;;  %v3359_v42 = vpop.f32.mrb[18].mxu1  ;;  %v1299_v33 = vld [vmem:[#allocation3 + $0x70] sm:$0xff] }
 0x184   : > { %v3248_v44 = vpop.f32.mrb[19].mxu0  ;;  %v3360_v46 = vpop.f32.mrb[19].mxu1 }
 0x185   : > { %v1229_v47 = vadd.f32 %v3246_v39, %v748_v35  ;;  %v1678_v48 = vadd.f32 %v3358_v40, %v1293_v37  ;;  %v3249_v49 = vadd.f32 %v3248_v44, %v3247_v41  ;;  %v3361_v50 = vadd.f32 %v3360_v46, %v3359_v42  ;;  %v755_v39 = vld [vmem:[#allocation2 + $0x78] sm:$0xff] }
 0x186   : > { %v1300_v41 = vld [vmem:[#allocation3 + $0x78] sm:$0xff] }
 0x187   : > { %1261 = vst [vmem:[#allocation2 + $0x40] sm:$0xff] %v1229_v47  ;;  %1710 = vst [vmem:[#allocation3 + $0x40] sm:$0xff] %v1678_v48  ;;  %v1230_v51 = vadd.f32 %v3249_v49, %v749_v43  ;;  %v1679_v52 = vadd.f32 %v3361_v50, %v1294_v45 }
 0x189   : > { %1262 = vst [vmem:[#allocation2 + $0x48] sm:$0xff] %v1230_v51  ;;  %1711 = vst [vmem:[#allocation3 + $0x48] sm:$0xff] %v1679_v52  ;;  %v3250_v53 = vpop.f32.mrb[20].mxu0  ;;  %v3362_v54 = vpop.f32.mrb[20].mxu1  ;;  %v756_v51 = vld [vmem:[#allocation2 + $0x80] sm:$0xff] }
 0x18a   : > { %v3251_v56 = vpop.f32.mrb[21].mxu0  ;;  %v3363_v58 = vpop.f32.mrb[21].mxu1 }
 0x18b   : > { %v3252_v59 = vadd.f32 %v3251_v56, %v3250_v53  ;;  %v3364_v60 = vadd.f32 %v3363_v58, %v3362_v54  ;;  %v3253_v61 = vpop.f32.mrb[22].mxu0  ;;  %v3365_v62 = vpop.f32.mrb[22].mxu1  ;;  %v1301_v53 = vld [vmem:[#allocation3 + $0x80] sm:$0xff] }
 0x18c   : > { %v3254_v0 = vpop.f32.mrb[23].mxu0  ;;  %v3366_v2 = vpop.f32.mrb[23].mxu1 }
 0x18d   : > { %v1231_v3 = vadd.f32 %v3252_v59, %v750_v55  ;;  %v1680_v4 = vadd.f32 %v3364_v60, %v1295_v57  ;;  %v3255_v5 = vadd.f32 %v3254_v0, %v3253_v61  ;;  %v3367_v6 = vadd.f32 %v3366_v2, %v3365_v62  ;;  %v757_v59 = vld [vmem:[#allocation2 + $0x88] sm:$0xff] }
 0x18e   : > { %v1302_v61 = vld [vmem:[#allocation3 + $0x88] sm:$0xff] }
 0x18f   : > { %1263 = vst [vmem:[#allocation2 + $0x50] sm:$0xff] %v1231_v3  ;;  %1712 = vst [vmem:[#allocation3 + $0x50] sm:$0xff] %v1680_v4  ;;  %v1232_v7 = vadd.f32 %v3255_v5, %v751_v63  ;;  %v1681_v8 = vadd.f32 %v3367_v6, %v1296_v1 }
 0x191   : > { %1264 = vst [vmem:[#allocation2 + $0x58] sm:$0xff] %v1232_v7  ;;  %1713 = vst [vmem:[#allocation3 + $0x58] sm:$0xff] %v1681_v8  ;;  %v3256_v9 = vpop.f32.mrb[24].mxu0  ;;  %v3368_v10 = vpop.f32.mrb[24].mxu1  ;;  %v758_v7 = vld [vmem:[#allocation2 + $0x90] sm:$0xff] }
 0x192   : > { %v3257_v12 = vpop.f32.mrb[25].mxu0  ;;  %v3369_v14 = vpop.f32.mrb[25].mxu1 }
 0x193   : > { %v3258_v15 = vadd.f32 %v3257_v12, %v3256_v9  ;;  %v3370_v16 = vadd.f32 %v3369_v14, %v3368_v10  ;;  %v3259_v17 = vpop.f32.mrb[26].mxu0  ;;  %v3371_v18 = vpop.f32.mrb[26].mxu1  ;;  %v1303_v9 = vld [vmem:[#allocation3 + $0x90] sm:$0xff] }
 0x194   : > { %v3260_v20 = vpop.f32.mrb[27].mxu0  ;;  %v3372_v22 = vpop.f32.mrb[27].mxu1 }
 0x195   : > { %v1233_v23 = vadd.f32 %v3258_v15, %v752_v11  ;;  %v1682_v24 = vadd.f32 %v3370_v16, %v1297_v13  ;;  %v3261_v25 = vadd.f32 %v3260_v20, %v3259_v17  ;;  %v3373_v26 = vadd.f32 %v3372_v22, %v3371_v18  ;;  %v759_v15 = vld [vmem:[#allocation2 + $0x98] sm:$0xff] }
 0x196   : > { %v1304_v17 = vld [vmem:[#allocation3 + $0x98] sm:$0xff] }
 0x197   : > { %1265 = vst [vmem:[#allocation2 + $0x60] sm:$0xff] %v1233_v23  ;;  %1714 = vst [vmem:[#allocation3 + $0x60] sm:$0xff] %v1682_v24  ;;  %v1234_v27 = vadd.f32 %v3261_v25, %v753_v19  ;;  %v1683_v28 = vadd.f32 %v3373_v26, %v1298_v21 }
 0x199   : > { %1266 = vst [vmem:[#allocation2 + $0x68] sm:$0xff] %v1234_v27  ;;  %1715 = vst [vmem:[#allocation3 + $0x68] sm:$0xff] %v1683_v28  ;;  %v3262_v29 = vpop.f32.mrb[28].mxu0  ;;  %v3374_v30 = vpop.f32.mrb[28].mxu1  ;;  %v760_v27 = vld [vmem:[#allocation2 + $0xa0] sm:$0xff] }
 0x19a   : > { %v3263_v32 = vpop.f32.mrb[29].mxu0  ;;  %v3375_v34 = vpop.f32.mrb[29].mxu1 }
 0x19b   : > { %v3264_v35 = vadd.f32 %v3263_v32, %v3262_v29  ;;  %v3376_v36 = vadd.f32 %v3375_v34, %v3374_v30  ;;  %v3265_v37 = vpop.f32.mrb[30].mxu0  ;;  %v3377_v38 = vpop.f32.mrb[30].mxu1  ;;  %v1305_v29 = vld [vmem:[#allocation3 + $0xa0] sm:$0xff] }
 0x19c   : > { %v3266_v40 = vpop.f32.mrb[31].mxu0  ;;  %v3378_v42 = vpop.f32.mrb[31].mxu1 }
 0x19d   : > { %v1235_v43 = vadd.f32 %v3264_v35, %v754_v31  ;;  %v1684_v44 = vadd.f32 %v3376_v36, %v1299_v33  ;;  %v3267_v45 = vadd.f32 %v3266_v40, %v3265_v37  ;;  %v3379_v46 = vadd.f32 %v3378_v42, %v3377_v38  ;;  %v761_v35 = vld [vmem:[#allocation2 + $0xa8] sm:$0xff] }
 0x19e   : > { %v1306_v37 = vld [vmem:[#allocation3 + $0xa8] sm:$0xff] }
 0x19f   : > { %1267 = vst [vmem:[#allocation2 + $0x70] sm:$0xff] %v1235_v43  ;;  %1716 = vst [vmem:[#allocation3 + $0x70] sm:$0xff] %v1684_v44  ;;  %v1236_v47 = vadd.f32 %v3267_v45, %v755_v39  ;;  %v1685_v48 = vadd.f32 %v3379_v46, %v1300_v41 }
 0x1a1   : > { %1268 = vst [vmem:[#allocation2 + $0x78] sm:$0xff] %v1236_v47  ;;  %1717 = vst [vmem:[#allocation3 + $0x78] sm:$0xff] %v1685_v48  ;;  %v3268_v49 = vpop.f32.mrb[32].mxu0  ;;  %v3380_v50 = vpop.f32.mrb[32].mxu1  ;;  %v762_v47 = vld [vmem:[#allocation2 + $0xb0] sm:$0xff] }
 0x1a2   : > { %v3269_v52 = vpop.f32.mrb[33].mxu0  ;;  %v3381_v54 = vpop.f32.mrb[33].mxu1 }
 0x1a3   : > { %v3270_v55 = vadd.f32 %v3269_v52, %v3268_v49  ;;  %v3382_v56 = vadd.f32 %v3381_v54, %v3380_v50  ;;  %v3271_v57 = vpop.f32.mrb[34].mxu0  ;;  %v3383_v58 = vpop.f32.mrb[34].mxu1  ;;  %v1307_v49 = vld [vmem:[#allocation3 + $0xb0] sm:$0xff] }
 0x1a4   : > { %v3272_v60 = vpop.f32.mrb[35].mxu0  ;;  %v3384_v62 = vpop.f32.mrb[35].mxu1 }
 0x1a5   : > { %v1237_v63 = vadd.f32 %v3270_v55, %v756_v51  ;;  %v1686_v0 = vadd.f32 %v3382_v56, %v1301_v53  ;;  %v3273_v1 = vadd.f32 %v3272_v60, %v3271_v57  ;;  %v3385_v2 = vadd.f32 %v3384_v62, %v3383_v58  ;;  %v763_v55 = vld [vmem:[#allocation2 + $0xb8] sm:$0xff] }
 0x1a6   : > { %v1308_v57 = vld [vmem:[#allocation3 + $0xb8] sm:$0xff] }
 0x1a7   : > { %1269 = vst [vmem:[#allocation2 + $0x80] sm:$0xff] %v1237_v63  ;;  %1718 = vst [vmem:[#allocation3 + $0x80] sm:$0xff] %v1686_v0  ;;  %v1238_v3 = vadd.f32 %v3273_v1, %v757_v59  ;;  %v1687_v4 = vadd.f32 %v3385_v2, %v1302_v61 }
 0x1a9   : > { %1270 = vst [vmem:[#allocation2 + $0x88] sm:$0xff] %v1238_v3  ;;  %1719 = vst [vmem:[#allocation3 + $0x88] sm:$0xff] %v1687_v4  ;;  %v3274_v5 = vpop.f32.mrb[36].mxu0  ;;  %v3386_v6 = vpop.f32.mrb[36].mxu1  ;;  %v764_v3 = vld [vmem:[#allocation2 + $0xc0] sm:$0xff] }
 0x1aa   : > { %v3275_v8 = vpop.f32.mrb[37].mxu0  ;;  %v3387_v10 = vpop.f32.mrb[37].mxu1 }
 0x1ab   : > { %v3276_v11 = vadd.f32 %v3275_v8, %v3274_v5  ;;  %v3388_v12 = vadd.f32 %v3387_v10, %v3386_v6  ;;  %v3277_v13 = vpop.f32.mrb[38].mxu0  ;;  %v3389_v14 = vpop.f32.mrb[38].mxu1  ;;  %v1309_v5 = vld [vmem:[#allocation3 + $0xc0] sm:$0xff] }
 0x1ac   : > { %v3278_v16 = vpop.f32.mrb[39].mxu0  ;;  %v3390_v18 = vpop.f32.mrb[39].mxu1 }
 0x1ad   : > { %v1239_v19 = vadd.f32 %v3276_v11, %v758_v7  ;;  %v1688_v20 = vadd.f32 %v3388_v12, %v1303_v9  ;;  %v3279_v21 = vadd.f32 %v3278_v16, %v3277_v13  ;;  %v3391_v22 = vadd.f32 %v3390_v18, %v3389_v14  ;;  %v765_v11 = vld [vmem:[#allocation2 + $0xc8] sm:$0xff] }
 0x1ae   : > { %v1310_v13 = vld [vmem:[#allocation3 + $0xc8] sm:$0xff] }
 0x1af   : > { %1271 = vst [vmem:[#allocation2 + $0x90] sm:$0xff] %v1239_v19  ;;  %1720 = vst [vmem:[#allocation3 + $0x90] sm:$0xff] %v1688_v20  ;;  %v1240_v23 = vadd.f32 %v3279_v21, %v759_v15  ;;  %v1689_v24 = vadd.f32 %v3391_v22, %v1304_v17 }
 0x1b1   : > { %1272 = vst [vmem:[#allocation2 + $0x98] sm:$0xff] %v1240_v23  ;;  %1721 = vst [vmem:[#allocation3 + $0x98] sm:$0xff] %v1689_v24  ;;  %v3280_v25 = vpop.f32.mrb[40].mxu0  ;;  %v3392_v26 = vpop.f32.mrb[40].mxu1  ;;  %v766_v23 = vld [vmem:[#allocation2 + $0xd0] sm:$0xff] }
 0x1b2   : > { %v3281_v28 = vpop.f32.mrb[41].mxu0  ;;  %v3393_v30 = vpop.f32.mrb[41].mxu1 }
 0x1b3   : > { %v3282_v31 = vadd.f32 %v3281_v28, %v3280_v25  ;;  %v3394_v32 = vadd.f32 %v3393_v30, %v3392_v26  ;;  %v3283_v33 = vpop.f32.mrb[42].mxu0  ;;  %v3395_v34 = vpop.f32.mrb[42].mxu1  ;;  %v1311_v25 = vld [vmem:[#allocation3 + $0xd0] sm:$0xff] }
 0x1b4   : > { %v3284_v36 = vpop.f32.mrb[43].mxu0  ;;  %v3396_v38 = vpop.f32.mrb[43].mxu1 }
 0x1b5   : > { %v1241_v39 = vadd.f32 %v3282_v31, %v760_v27  ;;  %v1690_v40 = vadd.f32 %v3394_v32, %v1305_v29  ;;  %v3285_v41 = vadd.f32 %v3284_v36, %v3283_v33  ;;  %v3397_v42 = vadd.f32 %v3396_v38, %v3395_v34  ;;  %v767_v31 = vld [vmem:[#allocation2 + $0xd8] sm:$0xff] }
 0x1b6   : > { %v1312_v33 = vld [vmem:[#allocation3 + $0xd8] sm:$0xff] }
 0x1b7   : > { %1273 = vst [vmem:[#allocation2 + $0xa0] sm:$0xff] %v1241_v39  ;;  %1722 = vst [vmem:[#allocation3 + $0xa0] sm:$0xff] %v1690_v40  ;;  %v1242_v43 = vadd.f32 %v3285_v41, %v761_v35  ;;  %v1691_v44 = vadd.f32 %v3397_v42, %v1306_v37 }
 0x1b9   : > { %1274 = vst [vmem:[#allocation2 + $0xa8] sm:$0xff] %v1242_v43  ;;  %1723 = vst [vmem:[#allocation3 + $0xa8] sm:$0xff] %v1691_v44  ;;  %v3286_v45 = vpop.f32.mrb[44].mxu0  ;;  %v3398_v46 = vpop.f32.mrb[44].mxu1  ;;  %v768_v43 = vld [vmem:[#allocation2 + $0xe0] sm:$0xff] }
 0x1ba   : > { %v3287_v48 = vpop.f32.mrb[45].mxu0  ;;  %v3399_v50 = vpop.f32.mrb[45].mxu1 }
 0x1bb   : > { %v3288_v51 = vadd.f32 %v3287_v48, %v3286_v45  ;;  %v3400_v52 = vadd.f32 %v3399_v50, %v3398_v46  ;;  %v3289_v53 = vpop.f32.mrb[46].mxu0  ;;  %v3401_v54 = vpop.f32.mrb[46].mxu1  ;;  %v1313_v45 = vld [vmem:[#allocation3 + $0xe0] sm:$0xff] }
 0x1bc   : > { %v3290_v56 = vpop.f32.mrb[47].mxu0  ;;  %v3402_v58 = vpop.f32.mrb[47].mxu1 }
 0x1bd   : > { %v1243_v59 = vadd.f32 %v3288_v51, %v762_v47  ;;  %v1692_v60 = vadd.f32 %v3400_v52, %v1307_v49  ;;  %v3291_v61 = vadd.f32 %v3290_v56, %v3289_v53  ;;  %v3403_v62 = vadd.f32 %v3402_v58, %v3401_v54  ;;  %v769_v51 = vld [vmem:[#allocation2 + $0xe8] sm:$0xff] }
 0x1be   : > { %v1314_v53 = vld [vmem:[#allocation3 + $0xe8] sm:$0xff] }
 0x1bf   : > { %1275 = vst [vmem:[#allocation2 + $0xb0] sm:$0xff] %v1243_v59  ;;  %1724 = vst [vmem:[#allocation3 + $0xb0] sm:$0xff] %v1692_v60  ;;  %v1244_v63 = vadd.f32 %v3291_v61, %v763_v55  ;;  %v1693_v0 = vadd.f32 %v3403_v62, %v1308_v57 }
 0x1c1   : > { %1276 = vst [vmem:[#allocation2 + $0xb8] sm:$0xff] %v1244_v63  ;;  %1725 = vst [vmem:[#allocation3 + $0xb8] sm:$0xff] %v1693_v0  ;;  %v3292_v1 = vpop.f32.mrb[48].mxu0  ;;  %v3404_v2 = vpop.f32.mrb[48].mxu1  ;;  %v770_v63 = vld [vmem:[#allocation2 + $0xf0] sm:$0xff] }
 0x1c2   : > { %v3293_v4 = vpop.f32.mrb[49].mxu0  ;;  %v3405_v6 = vpop.f32.mrb[49].mxu1 }
 0x1c3   : > { %v3294_v7 = vadd.f32 %v3293_v4, %v3292_v1  ;;  %v3406_v8 = vadd.f32 %v3405_v6, %v3404_v2  ;;  %v3295_v9 = vpop.f32.mrb[50].mxu0  ;;  %v3407_v10 = vpop.f32.mrb[50].mxu1  ;;  %v1315_v1 = vld [vmem:[#allocation3 + $0xf0] sm:$0xff] }
 0x1c4   : > { %v3296_v12 = vpop.f32.mrb[51].mxu0  ;;  %v3408_v14 = vpop.f32.mrb[51].mxu1 }
 0x1c5   : > { %v1245_v15 = vadd.f32 %v3294_v7, %v764_v3  ;;  %v1694_v16 = vadd.f32 %v3406_v8, %v1309_v5  ;;  %v3297_v17 = vadd.f32 %v3296_v12, %v3295_v9  ;;  %v3409_v18 = vadd.f32 %v3408_v14, %v3407_v10  ;;  %v771_v7 = vld [vmem:[#allocation2 + $0xf8] sm:$0xff] }
 0x1c6   : > { %v1316_v9 = vld [vmem:[#allocation3 + $0xf8] sm:$0xff] }
 0x1c7   : > { %1277 = vst [vmem:[#allocation2 + $0xc0] sm:$0xff] %v1245_v15  ;;  %1726 = vst [vmem:[#allocation3 + $0xc0] sm:$0xff] %v1694_v16  ;;  %v1246_v19 = vadd.f32 %v3297_v17, %v765_v11  ;;  %v1695_v20 = vadd.f32 %v3409_v18, %v1310_v13  ;;  %v1802_v17 = vld [vmem:[%s5243_s3] sm:$0xff] (!%p3197_p13)  ;;  %v1803_v18 = vld [vmem:[%s5243_s3 + $0x8] sm:$0xff] (!%p3197_p13) }
 0x1c9   : > { %1278 = vst [vmem:[#allocation2 + $0xc8] sm:$0xff] %v1246_v19  ;;  %1727 = vst [vmem:[#allocation3 + $0xc8] sm:$0xff] %v1695_v20  ;;  %v3298_v21 = vpop.f32.mrb[52].mxu0  ;;  %v3410_v22 = vpop.f32.mrb[52].mxu1  ;;  %v1804_v19 = vld [vmem:[%s5243_s3 + $0x10] sm:$0xff] (!%p3197_p13)  ;;  %v3636_v20 = vpack.c.bf16 (!%p3197_p13), %v1803_v18, %v1802_v17  ;;  %v1758_v17 = vld [vmem:[#allocation2 + $0xa0] sm:$0xff] (!%p3197_p13) }
 0x1ca   : > { %v3299_v24 = vpop.f32.mrb[53].mxu0  ;;  %v3411_v26 = vpop.f32.mrb[53].mxu1  ;;  %v1790_v18 = vld [vmem:[#allocation3 + $0xa0] sm:$0xff] (!%p3197_p13) }
 0x1cb   : > { %v3300_v27 = vadd.f32 %v3299_v24, %v3298_v21  ;;  %v3412_v28 = vadd.f32 %v3411_v26, %v3410_v22  ;;  %v3301_v29 = vpop.f32.mrb[54].mxu0  ;;  %v3413_v30 = vpop.f32.mrb[54].mxu1  ;;  %v1805_v21 = vld [vmem:[%s5243_s3 + $0x18] sm:$0xff] (!%p3197_p13)  ;;  %v1807_v24 = vld [vmem:[%s5243_s3 + $0x28] sm:$0xff] (!%p3197_p13)  ;;  %3637 = vmatprep.subr.bf16.mxu0 (!%p3197_p13), %v3636_v20  ;;  %3668 = vmatprep.subr.bf16.mxu1 (!%p3197_p13), %v3636_v20  ;;  %v1738_v26 = vld [vmem:[#allocation2] sm:$0xff] (!%p3197_p13) }
 0x1cc   : > { %v3302_v32 = vpop.f32.mrb[55].mxu0  ;;  %v3414_v34 = vpop.f32.mrb[55].mxu1  ;;  %v3640_v22 = vpack.c.bf16 (!%p3197_p13), %v1805_v21, %v1804_v19  ;;  %3639 = vmatpush3.bf16.msra.mxu0 (!%p3197_p13), %v3636_v20  ;;  %3676 = vmatpush3.bf16.msra.mxu1 (!%p3197_p13), %v3636_v20  ;;  %v1759_v19 = vld [vmem:[#allocation2 + $0xa8] sm:$0xff] (!%p3197_p13)  ;;  %v1760_v21 = vld [vmem:[#allocation2 + $0xb0] sm:$0xff] (!%p3197_p13) }
 0x1cd   : > { %v1247_v35 = vadd.f32 %v3300_v27, %v766_v23  ;;  %v1696_v36 = vadd.f32 %v3412_v28, %v1311_v25  ;;  %v3303_v37 = vadd.f32 %v3302_v32, %v3301_v29  ;;  %v3415_v38 = vadd.f32 %v3414_v34, %v3413_v30  ;;  %v1806_v23 = vld [vmem:[%s5243_s3 + $0x20] sm:$0xff] (!%p3197_p13)  ;;  %v1808_v28 = vld [vmem:[%s5243_s3 + $0x30] sm:$0xff] (!%p3197_p13)  ;;  %v1809_v29 = vld [vmem:[%s5243_s3 + $0x38] sm:$0xff] (!%p3197_p13)  ;;  %3540 = vmatprep.mubr.f32.mxu0 (!%p3197_p13), %v1738_v26 }
 0x1ce   : > { %3641 = vmatprep.subr.bf16.mxu0 (!%p3197_p13), %v3640_v22  ;;  %3669 = vmatprep.subr.bf16.mxu1 (!%p3197_p13), %v3640_v22  ;;  %v3644_v25 = vpack.c.bf16 (!%p3197_p13), %v1807_v24, %v1806_v23  ;;  %v1770_v27 = vld [vmem:[#allocation3] sm:$0xff] (!%p3197_p13)  ;;  %v3648_v30 = vpack.c.bf16 (!%p3197_p13), %v1809_v29, %v1808_v28  ;;  %v1811_v32 = vld [vmem:[%s5243_s3 + $0x48] sm:$0xff] (!%p3197_p13)  ;;  %v1812_v34 = vld [vmem:[%s5243_s3 + $0x50] sm:$0xff] (!%p3197_p13) }
 0x1cf   : > { %1279 = vst [vmem:[#allocation2 + $0xd0] sm:$0xff] %v1247_v35  ;;  %1728 = vst [vmem:[#allocation3 + $0xd0] sm:$0xff] %v1696_v36  ;;  %v1248_v39 = vadd.f32 %v3303_v37, %v767_v31  ;;  %v1697_v40 = vadd.f32 %v3415_v38, %v1312_v33  ;;  %3588 = vmatprep.mubr.f32.mxu1 (!%p3197_p13), %v1770_v27  ;;  %v1810_v31 = vld [vmem:[%s5243_s3 + $0x40] sm:$0xff] (!%p3197_p13)  ;;  %v1813_v35 = vld [vmem:[%s5243_s3 + $0x58] sm:$0xff] (!%p3197_p13) }
 0x1d0   : > { %3643 = vmatpush3.bf16.msra.mxu0 (!%p3197_p13), %v3640_v22  ;;  %3677 = vmatpush3.bf16.msra.mxu1 (!%p3197_p13), %v3640_v22  ;;  %v3652_v33 = vpack.c.bf16 (!%p3197_p13), %v1811_v32, %v1810_v31  ;;  %v3656_v36 = vpack.c.bf16 (!%p3197_p13), %v1813_v35, %v1812_v34  ;;  %v1814_v37 = vld [vmem:[%s5243_s3 + $0x60] sm:$0xff] (!%p3197_p13)  ;;  %v1815_v38 = vld [vmem:[%s5243_s3 + $0x68] sm:$0xff] (!%p3197_p13)  ;;  %v1792_v22 = vld [vmem:[#allocation3 + $0xb0] sm:$0xff] (!%p3197_p13) }
 0x1d1   : > { %1280 = vst [vmem:[#allocation2 + $0xd8] sm:$0xff] %v1248_v39  ;;  %1729 = vst [vmem:[#allocation3 + $0xd8] sm:$0xff] %v1697_v40  ;;  %v3304_v41 = vpop.f32.mrb[56].mxu0  ;;  %v3416_v42 = vpop.f32.mrb[56].mxu1  ;;  %3645 = vmatprep.subr.bf16.mxu0 (!%p3197_p13), %v3644_v25  ;;  %3670 = vmatprep.subr.bf16.mxu1 (!%p3197_p13), %v3644_v25  ;;  %v3660_v39 = vpack.c.bf16 (!%p3197_p13), %v1815_v38, %v1814_v37  ;;  %v1816_v40 = vld [vmem:[%s5243_s3 + $0x70] sm:$0xff] (!%p3197_p13)  ;;  %v1791_v20 = vld [vmem:[#allocation3 + $0xa8] sm:$0xff] (!%p3197_p13) }
 0x1d2   : > { %v3305_v44 = vpop.f32.mrb[57].mxu0  ;;  %v3417_v46 = vpop.f32.mrb[57].mxu1  ;;  %v1761_v23 = vld [vmem:[#allocation2 + $0xb8] sm:$0xff] (!%p3197_p13)  ;;  %v1794_v26 = vld [vmem:[#allocation3 + $0xc0] sm:$0xff] (!%p3197_p13)  ;;  %v1763_v27 = vld [vmem:[#allocation2 + $0xc8] sm:$0xff] (!%p3197_p13) }
 0x1d3   : > { %v3306_v47 = vadd.f32 %v3305_v44, %v3304_v41  ;;  %v3418_v48 = vadd.f32 %v3417_v46, %v3416_v42  ;;  %v3307_v49 = vpop.f32.mrb[58].mxu0  ;;  %v3419_v50 = vpop.f32.mrb[58].mxu1  ;;  %v1817_v41 = vld [vmem:[%s5243_s3 + $0x78] sm:$0xff] (!%p3197_p13)  ;;  %v1771_v44 = vld [vmem:[#allocation3 + $0x8] sm:$0xff] (!%p3197_p13)  ;;  %v1772_v46 = vld [vmem:[#allocation3 + $0x10] sm:$0xff] (!%p3197_p13) }
 0x1d4   : > { %v3308_v52 = vpop.f32.mrb[59].mxu0  ;;  %v3420_v54 = vpop.f32.mrb[59].mxu1  ;;  %3647 = vmatpush3.bf16.msra.mxu0 (!%p3197_p13), %v3644_v25  ;;  %3678 = vmatpush3.bf16.msra.mxu1 (!%p3197_p13), %v3644_v25  ;;  %v3664_v42 = vpack.c.bf16 (!%p3197_p13), %v1817_v41, %v1816_v40  ;;  %v1793_v24 = vld [vmem:[#allocation3 + $0xb8] sm:$0xff] (!%p3197_p13)  ;;  %v1762_v25 = vld [vmem:[#allocation2 + $0xc0] sm:$0xff] (!%p3197_p13)  ;;  %v1795_v28 = vld [vmem:[#allocation3 + $0xc8] sm:$0xff] (!%p3197_p13) }
 0x1d5   : > { %v1249_v55 = vadd.f32 %v3306_v47, %v768_v43  ;;  %v1698_v56 = vadd.f32 %v3418_v48, %v1313_v45  ;;  %v3309_v57 = vadd.f32 %v3308_v52, %v3307_v49  ;;  %v3421_v58 = vadd.f32 %v3420_v54, %v3419_v50  ;;  %3649 = vmatprep.subr.bf16.mxu0 (!%p3197_p13), %v3648_v30  ;;  %v1739_v43 = vld [vmem:[#allocation2 + $0x8] sm:$0xff] (!%p3197_p13)  ;;  %v1740_v45 = vld [vmem:[#allocation2 + $0x10] sm:$0xff] (!%p3197_p13)  ;;  %v1741_v47 = vld [vmem:[#allocation2 + $0x18] sm:$0xff] (!%p3197_p13) }
 0x1d6   : > { %3671 = vmatprep.subr.bf16.mxu1 (!%p3197_p13), %v3648_v30  ;;  %v1773_v48 = vld [vmem:[#allocation3 + $0x18] sm:$0xff] (!%p3197_p13)  ;;  %v1742_v49 = vld [vmem:[#allocation2 + $0x20] sm:$0xff] (!%p3197_p13)  ;;  %v1775_v52 = vld [vmem:[#allocation3 + $0x28] sm:$0xff] (!%p3197_p13) }
 0x1d7   : > { %1281 = vst [vmem:[#allocation2 + $0xe0] sm:$0xff] %v1249_v55  ;;  %1730 = vst [vmem:[#allocation3 + $0xe0] sm:$0xff] %v1698_v56  ;;  %v1250_v59 = vadd.f32 %v3309_v57, %v769_v51  ;;  %v1699_v60 = vadd.f32 %v3421_v58, %v1314_v53  ;;  %v1774_v50 = vld [vmem:[#allocation3 + $0x20] sm:$0xff] (!%p3197_p13)  ;;  %v1743_v51 = vld [vmem:[#allocation2 + $0x28] sm:$0xff] (!%p3197_p13) }
 0x1d8   : > { %3651 = vmatpush3.bf16.msra.mxu0 (!%p3197_p13), %v3648_v30  ;;  %3679 = vmatpush3.bf16.msra.mxu1 (!%p3197_p13), %v3648_v30  ;;  %v1744_v53 = vld [vmem:[#allocation2 + $0x30] sm:$0xff] (!%p3197_p13)  ;;  %v1745_v55 = vld [vmem:[#allocation2 + $0x38] sm:$0xff] (!%p3197_p13)  ;;  %v1746_v57 = vld [vmem:[#allocation2 + $0x40] sm:$0xff] (!%p3197_p13) }
 0x1d9   : > { %1282 = vst [vmem:[#allocation2 + $0xe8] sm:$0xff] %v1250_v59  ;;  %1731 = vst [vmem:[#allocation3 + $0xe8] sm:$0xff] %v1699_v60  ;;  %v3310_v61 = vpop.f32.mrb[60].mxu0  ;;  %v3422_v62 = vpop.f32.mrb[60].mxu1  ;;  %3653 = vmatprep.subr.bf16.mxu0 (!%p3197_p13), %v3652_v33  ;;  %3672 = vmatprep.subr.bf16.mxu1 (!%p3197_p13), %v3652_v33  ;;  %v1776_v54 = vld [vmem:[#allocation3 + $0x30] sm:$0xff] (!%p3197_p13)  ;;  %v1777_v56 = vld [vmem:[#allocation3 + $0x38] sm:$0xff] (!%p3197_p13) }
 0x1da   : > { %v3311_v0 = vpop.f32.mrb[61].mxu0  ;;  %v3423_v2 = vpop.f32.mrb[61].mxu1  ;;  %v1778_v58 = vld [vmem:[#allocation3 + $0x40] sm:$0xff] (!%p3197_p13)  ;;  %v1747_v59 = vld [vmem:[#allocation2 + $0x48] sm:$0xff] (!%p3197_p13)  ;;  %v1764_v29 = vld [vmem:[#allocation2 + $0xd0] sm:$0xff] (!%p3197_p13) }
 0x1db   : > { %v3312_v3 = vadd.f32 %v3311_v0, %v3310_v61  ;;  %v3424_v4 = vadd.f32 %v3423_v2, %v3422_v62  ;;  %v3313_v5 = vpop.f32.mrb[62].mxu0  ;;  %v3425_v6 = vpop.f32.mrb[62].mxu1  ;;  %1737 = sbr.rel (%p3197_p13) target bundleno = 1026 (0x402), region = 128  ;;  %v1779_v60 = vld [vmem:[#allocation3 + $0x48] sm:$0xff] (!%p3197_p13)  ;;  %v1748_v61 = vld [vmem:[#allocation2 + $0x50] sm:$0xff] (!%p3197_p13)  ;;  %v1781_v0 = vld [vmem:[#allocation3 + $0x58] sm:$0xff] (!%p3197_p13) }
 0x1dc   : > { %v3314_v8 = vpop.f32.mrb[63].mxu0  ;;  %v3426_v10 = vpop.f32.mrb[63].mxu1  ;;  %3655 = vmatpush3.bf16.msra.mxu0 (!%p3197_p13), %v3652_v33  ;;  %3680 = vmatpush3.bf16.msra.mxu1 (!%p3197_p13), %v3652_v33  ;;  %v1780_v62 = vld [vmem:[#allocation3 + $0x50] sm:$0xff] (!%p3197_p13)  ;;  %v1782_v2 = vld [vmem:[#allocation3 + $0x60] sm:$0xff] (!%p3197_p13)  ;;  %v1765_v31 = vld [vmem:[#allocation2 + $0xd8] sm:$0xff] (!%p3197_p13) }
 0x1dd   : > { %v1251_v11 = vadd.f32 %v3312_v3, %v770_v63  ;;  %v1700_v12 = vadd.f32 %v3424_v4, %v1315_v1  ;;  %v3315_v13 = vadd.f32 %v3314_v8, %v3313_v5  ;;  %v3427_v14 = vadd.f32 %v3426_v10, %v3425_v6  ;;  %3657 = vmatprep.subr.bf16.mxu0 (!%p3197_p13), %v3656_v36  ;;  %v1749_v63 = vld [vmem:[#allocation2 + $0x58] sm:$0xff] (!%p3197_p13)  ;;  %v1750_v1 = vld [vmem:[#allocation2 + $0x60] sm:$0xff] (!%p3197_p13)  ;;  %v1751_v3 = vld [vmem:[#allocation2 + $0x68] sm:$0xff] (!%p3197_p13) }
 0x1de   : > { %3673 = vmatprep.subr.bf16.mxu1 (!%p3197_p13), %v3656_v36  ;;  %v1783_v4 = vld [vmem:[#allocation3 + $0x68] sm:$0xff] (!%p3197_p13)  ;;  %v1752_v5 = vld [vmem:[#allocation2 + $0x70] sm:$0xff] (!%p3197_p13)  ;;  %v1785_v8 = vld [vmem:[#allocation3 + $0x78] sm:$0xff] (!%p3197_p13) }
 0x1df   : > { %1283 = vst [vmem:[#allocation2 + $0xf0] sm:$0xff] %v1251_v11  ;;  %1732 = vst [vmem:[#allocation3 + $0xf0] sm:$0xff] %v1700_v12  ;;  %v1252_v15 = vadd.f32 %v3315_v13, %v771_v7  ;;  %v1701_v16 = vadd.f32 %v3427_v14, %v1316_v9  ;;  %v1784_v6 = vld [vmem:[#allocation3 + $0x70] sm:$0xff] (!%p3197_p13)  ;;  %v1753_v7 = vld [vmem:[#allocation2 + $0x78] sm:$0xff] (!%p3197_p13) }
 0x1e0   : > { %3659 = vmatpush3.bf16.msra.mxu0 (!%p3197_p13), %v3656_v36  ;;  %3681 = vmatpush3.bf16.msra.mxu1 (!%p3197_p13), %v3656_v36  ;;  %v1754_v9 = vld [vmem:[#allocation2 + $0x80] sm:$0xff] (!%p3197_p13)  ;;  %v1755_v11 = vld [vmem:[#allocation2 + $0x88] sm:$0xff] (!%p3197_p13)  ;;  %v1756_v13 = vld [vmem:[#allocation2 + $0x90] sm:$0xff] (!%p3197_p13) }
 0x1e1   : > { %1284 = vst [vmem:[#allocation2 + $0xf8] sm:$0xff] %v1252_v15  ;;  %1733 = vst [vmem:[#allocation3 + $0xf8] sm:$0xff] %v1701_v16  ;;  %3661 = vmatprep.subr.bf16.mxu0 (!%p3197_p13), %v3660_v39  ;;  %3674 = vmatprep.subr.bf16.mxu1 (!%p3197_p13), %v3660_v39  ;;  %v1786_v10 = vld [vmem:[#allocation3 + $0x80] sm:$0xff] (!%p3197_p13)  ;;  %v1787_v12 = vld [vmem:[#allocation3 + $0x88] sm:$0xff] (!%p3197_p13) }
 0x1e2   : > { %v1788_v14 = vld [vmem:[#allocation3 + $0x90] sm:$0xff]  ;;  %v1757_v15 = vld [vmem:[#allocation2 + $0x98] sm:$0xff]  ;;  %v1766_v33 = vld [vmem:[#allocation2 + $0xe0] sm:$0xff] }
 0x1e3   : > { %v1789_v16 = vld [vmem:[#allocation3 + $0x98] sm:$0xff]  ;;  %v1796_v30 = vld [vmem:[#allocation3 + $0xd0] sm:$0xff]  ;;  %v1798_v34 = vld [vmem:[#allocation3 + $0xe0] sm:$0xff] }
 0x1e4   : > { %3663 = vmatpush3.bf16.msra.mxu0 %v3660_v39  ;;  %3682 = vmatpush3.bf16.msra.mxu1 %v3660_v39  ;;  %v1797_v32 = vld [vmem:[#allocation3 + $0xd8] sm:$0xff]  ;;  %v1767_v35 = vld [vmem:[#allocation2 + $0xe8] sm:$0xff]  ;;  %v4755_v41 = vld [vmem:[%s5244_s4] ss:$0 sm:$0xff] }
 0x1e5   : > { %3665 = vmatprep.subr.bf16.mxu0 %v3664_v42  ;;  %3675 = vmatprep.subr.bf16.mxu1 %v3664_v42  ;;  %v1799_v36 = vld [vmem:[#allocation3 + $0xe8] sm:$0xff] }
 0x1e6   : > { %v1768_v37 = vld [vmem:[#allocation2 + $0xf0] sm:$0xff] }
 0x1e7   : > { %v1800_v38 = vld [vmem:[#allocation3 + $0xf0] sm:$0xff] }
 0x1e8   : > { %3667 = vmatpush3.bf16.msra.mxu0 %v3664_v42  ;;  %3683 = vmatpush3.bf16.msra.mxu1 %v3664_v42  ;;  %v1769_v39 = vld [vmem:[#allocation2 + $0xf8] sm:$0xff] }
 0x1e9   : > { %v1801_v40 = vld [vmem:[#allocation3 + $0xf8] sm:$0xff] }
 0x1eb   : > { %3541 = vmatmul.mubr.f32.vlgmr.msra.gmra.mrb[0].mxu0 %v1739_v43  ;;  %3589 = vmatmul.mubr.f32.vlgmr.msra.gmra.mrb[0].mxu1 %v1771_v44 }
 0x1ec   : > { %3543 = vmatprep.mubr.f32.mxu0 %v1740_v45  ;;  %3591 = vmatprep.mubr.f32.mxu1 %v1772_v46 }
 0x1ef   : > { %3544 = vmatmul.mubr.f32.gmra.mrb[2].mxu0 %v1741_v47  ;;  %3592 = vmatmul.mubr.f32.gmra.mrb[2].mxu1 %v1773_v48 }
 0x1f0   : > { %3546 = vmatprep.mubr.f32.mxu0 %v1742_v49  ;;  %3594 = vmatprep.mubr.f32.mxu1 %v1774_v50 }
 0x1f3   : > { %3547 = vmatmul.mubr.f32.gmra.mrb[4].mxu0 %v1743_v51  ;;  %3595 = vmatmul.mubr.f32.gmra.mrb[4].mxu1 %v1775_v52 }
 0x1f4   : > { %3549 = vmatprep.mubr.f32.mxu0 %v1744_v53  ;;  %3597 = vmatprep.mubr.f32.mxu1 %v1776_v54 }
 0x1f7   : > { %3550 = vmatmul.mubr.f32.gmra.mrb[6].mxu0 %v1745_v55  ;;  %3598 = vmatmul.mubr.f32.gmra.mrb[6].mxu1 %v1777_v56 }
 0x1f8   : > { %3552 = vmatprep.mubr.f32.mxu0 %v1746_v57  ;;  %3600 = vmatprep.mubr.f32.mxu1 %v1778_v58 }
 0x1fb   : > { %3553 = vmatmul.mubr.f32.gmra.mrb[8].mxu0 %v1747_v59  ;;  %3601 = vmatmul.mubr.f32.gmra.mrb[8].mxu1 %v1779_v60 }
 0x1fc   : > { %3555 = vmatprep.mubr.f32.mxu0 %v1748_v61  ;;  %3603 = vmatprep.mubr.f32.mxu1 %v1780_v62 }
 0x1ff   : > { %3556 = vmatmul.mubr.f32.gmra.mrb[10].mxu0 %v1749_v63  ;;  %3604 = vmatmul.mubr.f32.gmra.mrb[10].mxu1 %v1781_v0 }
 0x200   : > { %3558 = vmatprep.mubr.f32.mxu0 %v1750_v1  ;;  %3606 = vmatprep.mubr.f32.mxu1 %v1782_v2  ;;  %v4772_v2 = vld [vmem:[%s5245_s5] ss:$0 sm:$0xff] }
 0x203   : > { %3559 = vmatmul.mubr.f32.gmra.mrb[12].mxu0 %v1751_v3  ;;  %3607 = vmatmul.mubr.f32.gmra.mrb[12].mxu1 %v1783_v4 }
 0x204   : > { %3561 = vmatprep.mubr.f32.mxu0 %v1752_v5  ;;  %3609 = vmatprep.mubr.f32.mxu1 %v1784_v6 }
 0x207   : > { %3562 = vmatmul.mubr.f32.gmra.mrb[14].mxu0 %v1753_v7  ;;  %3610 = vmatmul.mubr.f32.gmra.mrb[14].mxu1 %v1785_v8 }
 0x208   : > { %3564 = vmatprep.mubr.f32.mxu0 %v1754_v9  ;;  %3612 = vmatprep.mubr.f32.mxu1 %v1786_v10 }
 0x20b   : > { %3565 = vmatmul.mubr.f32.gmra.mrb[16].mxu0 %v1755_v11  ;;  %3613 = vmatmul.mubr.f32.gmra.mrb[16].mxu1 %v1787_v12 }
 0x20c   : > { %3567 = vmatprep.mubr.f32.mxu0 %v1756_v13  ;;  %3615 = vmatprep.mubr.f32.mxu1 %v1788_v14 }
 0x20f   : > { %3568 = vmatmul.mubr.f32.gmra.mrb[18].mxu0 %v1757_v15  ;;  %3616 = vmatmul.mubr.f32.gmra.mrb[18].mxu1 %v1789_v16 }
 0x210   : > { %3570 = vmatprep.mubr.f32.mxu0 %v1758_v17  ;;  %3618 = vmatprep.mubr.f32.mxu1 %v1790_v18 }
 0x213   : > { %3571 = vmatmul.mubr.f32.gmra.mrb[20].mxu0 %v1759_v19  ;;  %3619 = vmatmul.mubr.f32.gmra.mrb[20].mxu1 %v1791_v20 }
 0x214   : > { %3573 = vmatprep.mubr.f32.mxu0 %v1760_v21  ;;  %3621 = vmatprep.mubr.f32.mxu1 %v1792_v22 }
 0x217   : > { %3574 = vmatmul.mubr.f32.gmra.mrb[22].mxu0 %v1761_v23  ;;  %3622 = vmatmul.mubr.f32.gmra.mrb[22].mxu1 %v1793_v24 }
 0x218   : > { %3576 = vmatprep.mubr.f32.mxu0 %v1762_v25  ;;  %3624 = vmatprep.mubr.f32.mxu1 %v1794_v26 }
 0x21b   : > { %3577 = vmatmul.mubr.f32.gmra.mrb[24].mxu0 %v1763_v27  ;;  %3625 = vmatmul.mubr.f32.gmra.mrb[24].mxu1 %v1795_v28 }
 0x21c   : > { %3579 = vmatprep.mubr.f32.mxu0 %v1764_v29  ;;  %3627 = vmatprep.mubr.f32.mxu1 %v1796_v30 }
 0x21f   : > { %3580 = vmatmul.mubr.f32.gmra.mrb[26].mxu0 %v1765_v31  ;;  %3628 = vmatmul.mubr.f32.gmra.mrb[26].mxu1 %v1797_v32 }
 0x220   : > { %3582 = vmatprep.mubr.f32.mxu0 %v1766_v33  ;;  %3630 = vmatprep.mubr.f32.mxu1 %v1798_v34 }
 0x223   : > { %3583 = vmatmul.mubr.f32.gmra.mrb[28].mxu0 %v1767_v35  ;;  %3631 = vmatmul.mubr.f32.gmra.mrb[28].mxu1 %v1799_v36 }
 0x224   : > { %3585 = vmatprep.mubr.f32.mxu0 %v1768_v37  ;;  %3633 = vmatprep.mubr.f32.mxu1 %v1800_v38 }
 0x227   : > { %3586 = vmatmul.mubr.f32.gmra.mrb[30].mxu0 %v1769_v39  ;;  %3634 = vmatmul.mubr.f32.gmra.mrb[30].mxu1 %v1801_v40 }
 0x2be   : > { %v3542_v42 = vpop.f32.mrb[0].mxu0  ;;  %v3590_v43 = vpop.f32.mrb[0].mxu1 }
 0x2bf   : > { %v1897_v44 = vadd.f32 %v3542_v42, %v4755_v41  ;;  %v2057_v45 = vadd.f32 %v3590_v43, %v4755_v41  ;;  %v1891_v46 = vpop.f32.mrb[1].mxu0  ;;  %v2051_v47 = vpop.f32.mrb[1].mxu1 }
 0x2c0   : > { %v1892_v48 = vadd.f32 %v4755_v41, %v1891_v46  ;;  %v2052_v49 = vadd.f32 %v4755_v41, %v2051_v47 }
 0x2c1   : > { %3853 = vtanh.f32 %v1897_v44 }
 0x2c2   : > { %3855 = vtanh.f32 %v2057_v45  ;;  %v3545_v50 = vpop.f32.mrb[2].mxu0  ;;  %v3593_v51 = vpop.f32.mrb[2].mxu1 }
 0x2c3   : > { %3857 = vtanh.f32 %v1892_v48  ;;  %v1907_v52 = vadd.f32 %v3545_v50, %v4755_v41  ;;  %v1901_v53 = vpop.f32.mrb[3].mxu0  ;;  %v2067_v54 = vadd.f32 %v3593_v51, %v4755_v41  ;;  %v2061_v55 = vpop.f32.mrb[3].mxu1 }
 0x2c4   : > { %3859 = vtanh.f32 %v2052_v49  ;;  %v1902_v56 = vadd.f32 %v4755_v41, %v1901_v53  ;;  %v2062_v57 = vadd.f32 %v4755_v41, %v2061_v55 }
 0x2c5   : > { %3861 = vtanh.f32 %v1907_v52 }
 0x2c6   : > { %3863 = vtanh.f32 %v1902_v56  ;;  %v3548_v58 = vpop.f32.mrb[4].mxu0  ;;  %v3596_v59 = vpop.f32.mrb[4].mxu1 }
 0x2c7   : > { %3865 = vtanh.f32 %v2067_v54  ;;  %v1917_v60 = vadd.f32 %v3548_v58, %v4755_v41  ;;  %v1911_v61 = vpop.f32.mrb[5].mxu0  ;;  %v2077_v62 = vadd.f32 %v3596_v59, %v4755_v41  ;;  %v2071_v63 = vpop.f32.mrb[5].mxu1 }
 0x2c8   : > { %3867 = vtanh.f32 %v2062_v57  ;;  %v1912_v0 = vadd.f32 %v4755_v41, %v1911_v61  ;;  %v2072_v1 = vadd.f32 %v4755_v41, %v2071_v63 }
 0x2c9   : > { %3869 = vtanh.f32 %v1917_v60 }
 0x2ca   : > { %3871 = vtanh.f32 %v1912_v0  ;;  %v3551_v3 = vpop.f32.mrb[6].mxu0  ;;  %v3599_v4 = vpop.f32.mrb[6].mxu1 }
 0x2cb   : > { %v3854_v5 = vpop.eup %3853  ;;  %3873 = vtanh.f32 %v2077_v62  ;;  %v1927_v6 = vadd.f32 %v3551_v3, %v4755_v41  ;;  %v1921_v7 = vpop.f32.mrb[7].mxu0  ;;  %v2087_v8 = vadd.f32 %v3599_v4, %v4755_v41 }
 0x2cc   : > { %v2081_v9 = vpop.f32.mrb[7].mxu1  ;;  %v3856_v10 = vpop.eup %3855  ;;  %v2282_v11 = vmul.f32 %v3854_v5, %v4772_v2  ;;  %3875 = vtanh.f32 %v2072_v1  ;;  %v1922_v12 = vadd.f32 %v4755_v41, %v1921_v7 }
 0x2cd   : > { %v2082_v13 = vadd.f32 %v4755_v41, %v2081_v9  ;;  %v3858_v14 = vpop.eup %3857  ;;  %v2314_v15 = vmul.f32 %v3856_v10, %v4772_v2  ;;  %3877 = vtanh.f32 %v1927_v6 }
 0x2ce   : > { %v3860_v16 = vpop.eup %3859  ;;  %2347 = vadd.xlane.f32.xlu0 %v2282_v11  ;;  %3879 = vtanh.f32 %v1922_v12  ;;  %v3554_v17 = vpop.f32.mrb[8].mxu0  ;;  %v2281_v20 = vmul.f32 %v3858_v14, %v4772_v2 }
 0x2cf   : > { %v3602_v18 = vpop.f32.mrb[8].mxu1  ;;  %v3862_v19 = vpop.eup %3861  ;;  %2411 = vadd.xlane.f32.xlu1 %v2314_v15  ;;  %3881 = vtanh.f32 %v2087_v8  ;;  %v1937_v21 = vadd.f32 %v3554_v17, %v4755_v41  ;;  %v2313_v40 = vmul.f32 %v3860_v16, %v4772_v2 }
 0x2d0   : > { %v1931_v22 = vpop.f32.mrb[9].mxu0  ;;  %v2097_v23 = vadd.f32 %v3602_v18, %v4755_v41  ;;  %v2091_v24 = vpop.f32.mrb[9].mxu1  ;;  %v2284_v26 = vmul.f32 %v3862_v19, %v4772_v2  ;;  %3883 = vtanh.f32 %v2082_v13 }
 0x2d1   : > { %v3864_v25 = vpop.eup %3863  ;;  %v1932_v27 = vadd.f32 %v4755_v41, %v1931_v22  ;;  %v2092_v28 = vadd.f32 %v4755_v41, %v2091_v24  ;;  %3885 = vtanh.f32 %v1937_v21 }
 0x2d2   : > { %v3866_v29 = vpop.eup %3865  ;;  %2345 = vadd.xlane.f32.xlu0 %v2281_v20  ;;  %v3557_v31 = vpop.f32.mrb[10].mxu0  ;;  %v2283_v58 = vmul.f32 %v3864_v25, %v4772_v2 }
 0x2d3   : > { %v3868_v30 = vpop.eup %3867  ;;  %3887 = vtanh.f32 %v1932_v27  ;;  %v3605_v32 = vpop.f32.mrb[10].mxu1  ;;  %2351 = vadd.xlane.f32.xlu1 %v2284_v26  ;;  %v2316_v34 = vmul.f32 %v3866_v29, %v4772_v2  ;;  %v1947_v35 = vadd.f32 %v3557_v31, %v4755_v41 }
 0x2d4   : > { %v3870_v33 = vpop.eup %3869  ;;  %3889 = vtanh.f32 %v2097_v23  ;;  %v1941_v36 = vpop.f32.mrb[11].mxu0  ;;  %v2107_v37 = vadd.f32 %v3605_v32, %v4755_v41  ;;  %v2315_v54 = vmul.f32 %v3868_v30, %v4772_v2 }
 0x2d5   : > { %v2101_v38 = vpop.f32.mrb[11].mxu1  ;;  %v3872_v39 = vpop.eup %3871  ;;  %3891 = vtanh.f32 %v2092_v28  ;;  %v1942_v42 = vadd.f32 %v4755_v41, %v1941_v36  ;;  %v2286_v0 = vmul.f32 %v3870_v33, %v4772_v2 }
 0x2d6   : > { %v2102_v43 = vadd.f32 %v4755_v41, %v2101_v38  ;;  %v3874_v44 = vpop.eup %3873  ;;  %3893 = vtanh.f32 %v1947_v35  ;;  %2409 = vadd.xlane.f32.xlu0 %v2313_v40  ;;  %v3560_v46 = vpop.f32.mrb[12].mxu0  ;;  %v2285_v60 = vmul.f32 %v3872_v39, %v4772_v2 }
 0x2d7   : > { %v3876_v45 = vpop.eup %3875  ;;  %3895 = vtanh.f32 %v1942_v42  ;;  %v3608_v47 = vpop.f32.mrb[12].mxu1  ;;  %2415 = vadd.xlane.f32.xlu1 %v2316_v34  ;;  %v1957_v49 = vadd.f32 %v3560_v46, %v4755_v41  ;;  %v2318_v15 = vmul.f32 %v3874_v44, %v4772_v2 }
 0x2d8   : > { %v4792_v48 = vpop.eup %3877  ;;  %3897 = vtanh.f32 %v2107_v37  ;;  %v1951_v50 = vpop.f32.mrb[13].mxu0  ;;  %v2117_v51 = vadd.f32 %v3608_v47, %v4755_v41  ;;  %v2317_v11 = vmul.f32 %v3876_v45, %v4772_v2 }
 0x2d9   : > { %v2111_v52 = vpop.f32.mrb[13].mxu1  ;;  %v3880_v53 = vpop.eup %3879  ;;  %3899 = vtanh.f32 %v2102_v43  ;;  %v1952_v55 = vadd.f32 %v4755_v41, %v1951_v50  ;;  %v2288_v29 = vmul.f32 %v4792_v48, %v4772_v2 }
 0x2da   : > { %v2112_v56 = vadd.f32 %v4755_v41, %v2111_v52  ;;  %v4799_v57 = vpop.eup %3881  ;;  %3901 = vtanh.f32 %v1957_v49  ;;  %2413 = vadd.xlane.f32.xlu0 %v2315_v54  ;;  %v3563_v61 = vpop.f32.mrb[14].mxu0  ;;  %v2287_v25 = vmul.f32 %v3880_v53, %v4772_v2 }
 0x2db   : > { %v3884_v59 = vpop.eup %3883  ;;  %3903 = vtanh.f32 %v1952_v55  ;;  %v3611_v62 = vpop.f32.mrb[14].mxu1  ;;  %2349 = vadd.xlane.f32.xlu1 %v2283_v58  ;;  %v1967_v1 = vadd.f32 %v3563_v61, %v4755_v41  ;;  %v2320_v44 = vmul.f32 %v4799_v57, %v4772_v2 }
 0x2dc   : > { %v4803_v63 = vpop.eup %3885  ;;  %3905 = vtanh.f32 %v2117_v51  ;;  %v1961_v3 = vpop.f32.mrb[15].mxu0  ;;  %v2127_v4 = vadd.f32 %v3611_v62, %v4755_v41  ;;  %v2319_v39 = vmul.f32 %v3884_v59, %v4772_v2 }
 0x2dd   : > { %v2121_v5 = vpop.f32.mrb[15].mxu1  ;;  %v4808_v6 = vpop.eup %3887  ;;  %3907 = vtanh.f32 %v2112_v56  ;;  %v1962_v7 = vadd.f32 %v4755_v41, %v1961_v3  ;;  %v2290_v58 = vmul.f32 %v4803_v63, %v4772_v2 }
 0x2de   : > { %v2122_v8 = vadd.f32 %v4755_v41, %v2121_v5  ;;  %v4812_v9 = vpop.eup %3889  ;;  %3909 = vtanh.f32 %v1967_v1  ;;  %2353 = vadd.xlane.f32.xlu0 %v2285_v60  ;;  %v3566_v12 = vpop.f32.mrb[16].mxu0  ;;  %v2289_v54 = vmul.f32 %v4808_v6, %v4772_v2 }
 0x2df   : > { %v4814_v10 = vpop.eup %3891  ;;  %3911 = vtanh.f32 %v1962_v7  ;;  %v3614_v13 = vpop.f32.mrb[16].mxu1  ;;  %2355 = vadd.xlane.f32.xlu1 %v2286_v0  ;;  %v1977_v16 = vadd.f32 %v3566_v12, %v4755_v41  ;;  %v2322_v7 = vmul.f32 %v4812_v9, %v4772_v2 }
 0x2e0   : > { %v4817_v14 = vpop.eup %3893  ;;  %3913 = vtanh.f32 %v2127_v4  ;;  %v1971_v17 = vpop.f32.mrb[17].mxu0  ;;  %v2137_v18 = vadd.f32 %v3614_v13, %v4755_v41 }
 0x2e1   : > { %v2131_v19 = vpop.f32.mrb[17].mxu1  ;;  %v4822_v20 = vpop.eup %3895  ;;  %3915 = vtanh.f32 %v2122_v8  ;;  %v1972_v21 = vadd.f32 %v4755_v41, %v1971_v17  ;;  %v2321_v8 = vmul.f32 %v4814_v10, %v4772_v2 }
 0x2e2   : > { %v2132_v22 = vadd.f32 %v4755_v41, %v2131_v19  ;;  %v4826_v23 = vpop.eup %3897  ;;  %3917 = vtanh.f32 %v1977_v16  ;;  %2417 = vadd.xlane.f32.xlu0 %v2317_v11  ;;  %v3569_v26 = vpop.f32.mrb[18].mxu0 }
 0x2e3   : > { %v4828_v24 = vpop.eup %3899  ;;  %3919 = vtanh.f32 %v1972_v21  ;;  %v3617_v27 = vpop.f32.mrb[18].mxu1  ;;  %2419 = vadd.xlane.f32.xlu1 %v2318_v15  ;;  %v1987_v30 = vadd.f32 %v3569_v26, %v4755_v41 }
 0x2e4   : > { %v4831_v28 = vpop.eup %3901  ;;  %3921 = vtanh.f32 %v2137_v18  ;;  %v1981_v31 = vpop.f32.mrb[19].mxu0  ;;  %v2147_v32 = vadd.f32 %v3617_v27, %v4755_v41 }
 0x2e5   : > { %v2141_v33 = vpop.f32.mrb[19].mxu1  ;;  %v4837_v34 = vpop.eup %3903  ;;  %3923 = vtanh.f32 %v2132_v22  ;;  %v1982_v35 = vadd.f32 %v4755_v41, %v1981_v31  ;;  %v2291_v31 = vmul.f32 %v4822_v20, %v4772_v2 }
 0x2e6   : > { %v2142_v36 = vadd.f32 %v4755_v41, %v2141_v33  ;;  %v4841_v37 = vpop.eup %3905  ;;  %3925 = vtanh.f32 %v1987_v30  ;;  %2357 = vadd.xlane.f32.xlu0 %v2287_v25  ;;  %v3572_v40 = vpop.f32.mrb[20].mxu0  ;;  %v2292_v30 = vmul.f32 %v4817_v14, %v4772_v2 }
 0x2e7   : > { %v4843_v38 = vpop.eup %3907  ;;  %3927 = vtanh.f32 %v1982_v35  ;;  %v3620_v42 = vpop.f32.mrb[20].mxu1  ;;  %2359 = vadd.xlane.f32.xlu1 %v2288_v29  ;;  %v1997_v45 = vadd.f32 %v3572_v40, %v4755_v41 }
 0x2e8   : > { %v4846_v43 = vpop.eup %3909  ;;  %3929 = vtanh.f32 %v2147_v32  ;;  %v1991_v46 = vpop.f32.mrb[21].mxu0  ;;  %v2157_v47 = vadd.f32 %v3620_v42, %v4755_v41 }
 0x2e9   : > { %v2151_v48 = vpop.f32.mrb[21].mxu1  ;;  %v4852_v49 = vpop.eup %3911  ;;  %3931 = vtanh.f32 %v2142_v36  ;;  %v1992_v50 = vadd.f32 %v4755_v41, %v1991_v46 }
 0x2ea   : > { %v2152_v51 = vadd.f32 %v4755_v41, %v2151_v48  ;;  %v4856_v52 = vpop.eup %3913  ;;  %3933 = vtanh.f32 %v1997_v45  ;;  %2421 = vadd.xlane.f32.xlu0 %v2319_v39  ;;  %v3575_v55 = vpop.f32.mrb[22].mxu0 }
 0x2eb   : > { %v4858_v53 = vpop.eup %3915  ;;  %3935 = vtanh.f32 %v1992_v50  ;;  %v3623_v56 = vpop.f32.mrb[22].mxu1  ;;  %2423 = vadd.xlane.f32.xlu1 %v2320_v44  ;;  %v2007_v59 = vadd.f32 %v3575_v55, %v4755_v41  ;;  %v2323_v55 = vmul.f32 %v4828_v24, %v4772_v2 }
 0x2ec   : > { %v3918_v57 = vpop.eup %3917  ;;  %3937 = vtanh.f32 %v2157_v47  ;;  %v2001_v60 = vpop.f32.mrb[23].mxu0  ;;  %v2167_v61 = vadd.f32 %v3623_v56, %v4755_v41 }
 0x2ed   : > { %v2161_v62 = vpop.f32.mrb[23].mxu1  ;;  %v3920_v0 = vpop.eup %3919  ;;  %v4867_v1 = vmul.f32 %v3918_v57, %v4772_v2  ;;  %3939 = vtanh.f32 %v2152_v51  ;;  %v2002_v3 = vadd.f32 %v4755_v41, %v2001_v60 }
 0x2ee   : > { %v2162_v4 = vadd.f32 %v4755_v41, %v2161_v62  ;;  %v3922_v5 = vpop.eup %3921  ;;  %v4872_v6 = vmul.f32 %v3920_v0, %v4772_v2  ;;  %3941 = vtanh.f32 %v2007_v59  ;;  %2361 = vadd.xlane.f32.xlu0 %v2289_v54  ;;  %v3578_v12 = vpop.f32.mrb[24].mxu0  ;;  %v2324_v54 = vmul.f32 %v4826_v23, %v4772_v2 }
 0x2ef   : > { %v3924_v63 = vpop.eup %3923  ;;  %v4879_v11 = vmul.f32 %v3922_v5, %v4772_v2  ;;  %3943 = vtanh.f32 %v2002_v3  ;;  %v3626_v13 = vpop.f32.mrb[24].mxu1  ;;  %2363 = vadd.xlane.f32.xlu1 %v2290_v58  ;;  %v2017_v17 = vadd.f32 %v3578_v12, %v4755_v41  ;;  %v2294_v12 = vmul.f32 %v4831_v28, %v4772_v2 }
 0x2f0   : > { %v3926_v15 = vpop.eup %3925  ;;  %v4882_v16 = vmul.f32 %v3924_v63, %v4772_v2  ;;  %3945 = vtanh.f32 %v2167_v61  ;;  %v2011_v18 = vpop.f32.mrb[25].mxu0  ;;  %v2177_v9 = vadd.f32 %v3626_v13, %v4755_v41  ;;  %v2293_v13 = vmul.f32 %v4837_v34, %v4772_v2 }
 0x2f1   : > { %v2171_v19 = vpop.f32.mrb[25].mxu1  ;;  %v3928_v21 = vpop.eup %3927  ;;  %v4887_v10 = vmul.f32 %v3926_v15, %v4772_v2  ;;  %3947 = vtanh.f32 %v2162_v4  ;;  %v2012_v22 = vadd.f32 %v4755_v41, %v2011_v18 }
 0x2f2   : > { %v2172_v25 = vadd.f32 %v4755_v41, %v2171_v19  ;;  %v3930_v26 = vpop.eup %3929  ;;  %v4892_v27 = vmul.f32 %v3928_v21, %v4772_v2  ;;  %3949 = vtanh.f32 %v2017_v17  ;;  %2425 = vadd.xlane.f32.xlu0 %v2321_v8  ;;  %v3581_v33 = vpop.f32.mrb[26].mxu0 }
 0x2f3   : > { %v3932_v29 = vpop.eup %3931  ;;  %v4899_v32 = vmul.f32 %v3930_v26, %v4772_v2  ;;  %3951 = vtanh.f32 %v2012_v22  ;;  %v3629_v35 = vpop.f32.mrb[26].mxu1  ;;  %2427 = vadd.xlane.f32.xlu1 %v2322_v7  ;;  %v2027_v40 = vadd.f32 %v3581_v33, %v4755_v41 }
 0x2f4   : > { %v3934_v36 = vpop.eup %3933  ;;  %v4902_v39 = vmul.f32 %v3932_v29, %v4772_v2  ;;  %3953 = vtanh.f32 %v2177_v9  ;;  %v2021_v42 = vpop.f32.mrb[27].mxu0  ;;  %v2187_v14 = vadd.f32 %v3629_v35, %v4755_v41 }
 0x2f5   : > { %v2181_v44 = vpop.f32.mrb[27].mxu1  ;;  %v3936_v45 = vpop.eup %3935  ;;  %v4907_v20 = vmul.f32 %v3934_v36, %v4772_v2  ;;  %3955 = vtanh.f32 %v2172_v25  ;;  %v2022_v46 = vadd.f32 %v4755_v41, %v2021_v42  ;;  %v2325_v36 = vmul.f32 %v4843_v38, %v4772_v2 }
 0x2f6   : > { %v2182_v47 = vadd.f32 %v4755_v41, %v2181_v44  ;;  %v3938_v48 = vpop.eup %3937  ;;  %v4912_v50 = vmul.f32 %v3936_v45, %v4772_v2  ;;  %3957 = vtanh.f32 %v2027_v40  ;;  %2365 = vadd.xlane.f32.xlu0 %v2291_v31  ;;  %v3584_v57 = vpop.f32.mrb[28].mxu0  ;;  %v2295_v38 = vmul.f32 %v4852_v49, %v4772_v2 }
 0x2f7   : > { %v3940_v51 = vpop.eup %3939  ;;  %v4919_v56 = vmul.f32 %v3938_v48, %v4772_v2  ;;  %3959 = vtanh.f32 %v2022_v46  ;;  %v3632_v58 = vpop.f32.mrb[28].mxu1  ;;  %2367 = vadd.xlane.f32.xlu1 %v2292_v30  ;;  %v2037_v61 = vadd.f32 %v3584_v57, %v4755_v41  ;;  %v2327_v49 = vmul.f32 %v4858_v53, %v4772_v2 }
 0x2f8   : > { %v3942_v59 = vpop.eup %3941  ;;  %v4922_v60 = vmul.f32 %v3940_v51, %v4772_v2  ;;  %3961 = vtanh.f32 %v2187_v14  ;;  %v2031_v62 = vpop.f32.mrb[29].mxu0  ;;  %v2197_v23 = vadd.f32 %v3632_v58, %v4755_v41  ;;  %v2326_v14 = vmul.f32 %v4841_v37, %v4772_v2 }
 0x2f9   : > { %v2191_v0 = vpop.f32.mrb[29].mxu1  ;;  %v3944_v3 = vpop.eup %3943  ;;  %v4927_v24 = vmul.f32 %v3942_v59, %v4772_v2  ;;  %3963 = vtanh.f32 %v2182_v47  ;;  %v2032_v4 = vadd.f32 %v4755_v41, %v2031_v62  ;;  %v2296_v37 = vmul.f32 %v4846_v43, %v4772_v2 }
 0x2fa   : > { %v2192_v5 = vadd.f32 %v4755_v41, %v2191_v0  ;;  %v3946_v63 = vpop.eup %3945  ;;  %v4932_v7 = vmul.f32 %v3944_v3, %v4772_v2  ;;  %3965 = vtanh.f32 %v2037_v61  ;;  %2429 = vadd.xlane.f32.xlu0 %v2323_v55  ;;  %v3587_v17 = vpop.f32.mrb[30].mxu0  ;;  %v2328_v43 = vmul.f32 %v4856_v52, %v4772_v2 }
 0x2fb   : > { %v3948_v8 = vpop.eup %3947  ;;  %v4939_v15 = vmul.f32 %v3946_v63, %v4772_v2  ;;  %3967 = vtanh.f32 %v2032_v4  ;;  %v3635_v18 = vpop.f32.mrb[30].mxu1  ;;  %2431 = vadd.xlane.f32.xlu1 %v2324_v54  ;;  %v2047_v21 = vadd.f32 %v3587_v17, %v4755_v41 }
 0x2fc   : > { %v3950_v9 = vpop.eup %3949  ;;  %v4942_v19 = vmul.f32 %v3948_v8, %v4772_v2  ;;  %3969 = vtanh.f32 %v2197_v23  ;;  %v2041_v22 = vpop.f32.mrb[31].mxu0  ;;  %v2207_v28 = vadd.f32 %v3635_v18, %v4755_v41 }
 0x2fd   : > { %v2201_v25 = vpop.f32.mrb[31].mxu1  ;;  %v3952_v26 = vpop.eup %3951  ;;  %v4947_v34 = vmul.f32 %v3950_v9, %v4772_v2  ;;  %3971 = vtanh.f32 %v2192_v5  ;;  %v2042_v29 = vadd.f32 %v4755_v41, %v2041_v22 }
 0x2fe   : > { %v2202_v30 = vadd.f32 %v4755_v41, %v2201_v25  ;;  %v3954_v31 = vpop.eup %3953  ;;  %v2305_v33 = vmul.f32 %v3952_v26, %v4772_v2  ;;  %3973 = vtanh.f32 %v2047_v21  ;;  %2369 = vadd.xlane.f32.xlu0 %v2293_v13 }
 0x2ff   : > { %v3956_v35 = vpop.eup %3955  ;;  %v2338_v40 = vmul.f32 %v3954_v31, %v4772_v2  ;;  %3975 = vtanh.f32 %v2042_v29  ;;  %2371 = vadd.xlane.f32.xlu1 %v2294_v12 }
 0x300   : > { %v3958_v42 = vpop.eup %3957  ;;  %v2337_v44 = vmul.f32 %v3956_v35, %v4772_v2  ;;  %3977 = vtanh.f32 %v2207_v28 }
 0x301   : > { %v3960_v41 = vpop.eup %3959  ;;  %v2308_v45 = vmul.f32 %v3958_v42, %v4772_v2  ;;  %3979 = vtanh.f32 %v2202_v30 }
 0x302   : > { %v3962_v46 = vpop.eup %3961  ;;  %v2307_v47 = vmul.f32 %v3960_v41, %v4772_v2  ;;  %2433 = vadd.xlane.f32.xlu0 %v2325_v36 }
 0x303   : > { %v3964_v48 = vpop.eup %3963  ;;  %v2340_v51 = vmul.f32 %v3962_v46, %v4772_v2  ;;  %2435 = vadd.xlane.f32.xlu1 %v2326_v14 }
 0x304   : > { %v3966_v54 = vpop.eup %3965  ;;  %v2339_v55 = vmul.f32 %v3964_v48, %v4772_v2 }
 0x305   : > { %v3968_v57 = vpop.eup %3967  ;;  %v2310_v58 = vmul.f32 %v3966_v54, %v4772_v2 }
 0x306   : > { %v3970_v59 = vpop.eup %3969  ;;  %v2309_v61 = vmul.f32 %v3968_v57, %v4772_v2  ;;  %2373 = vadd.xlane.f32.xlu0 %v2295_v38 }
 0x307   : > { %v3972_v62 = vpop.eup %3971  ;;  %v2342_v23 = vmul.f32 %v3970_v59, %v4772_v2  ;;  %2375 = vadd.xlane.f32.xlu1 %v2296_v37 }
 0x308   : > { %v3974_v0 = vpop.eup %3973  ;;  %v2341_v3 = vmul.f32 %v3972_v62, %v4772_v2 }
 0x309   : > { %v3976_v4 = vpop.eup %3975  ;;  %v2312_v5 = vmul.f32 %v3974_v0, %v4772_v2 }
 0x30a   : > { %v3978_v63 = vpop.eup %3977  ;;  %v2311_v8 = vmul.f32 %v3976_v4, %v4772_v2  ;;  %2437 = vadd.xlane.f32.xlu0 %v2327_v49 }
 0x30b   : > { %v3980_v12 = vpop.eup %3979  ;;  %v2344_v13 = vmul.f32 %v3978_v63, %v4772_v2  ;;  %2439 = vadd.xlane.f32.xlu1 %v2328_v43 }
 0x30c   : > { %v2343_v53 = vmul.f32 %v3980_v12, %v4772_v2 }
 0x30e   : > { %2377 = vadd.xlane.f32.xlu0 %v4872_v6 }
 0x30f   : > { %2379 = vadd.xlane.f32.xlu1 %v4867_v1 }
 0x312   : > { %2441 = vadd.xlane.f32.xlu0 %v4882_v16 }
 0x313   : > { %2443 = vadd.xlane.f32.xlu1 %v4879_v11 }
 0x316   : > { %2381 = vadd.xlane.f32.xlu0 %v4892_v27 }
 0x317   : > { %2383 = vadd.xlane.f32.xlu1 %v4887_v10 }
 0x31a   : > { %2445 = vadd.xlane.f32.xlu0 %v4902_v39 }
 0x31b   : > { %2447 = vadd.xlane.f32.xlu1 %v4899_v32 }
 0x31e   : > { %2385 = vadd.xlane.f32.xlu0 %v4912_v50 }
 0x31f   : > { %2387 = vadd.xlane.f32.xlu1 %v4907_v20 }
 0x322   : > { %2449 = vadd.xlane.f32.xlu0 %v4922_v60 }
 0x323   : > { %2451 = vadd.xlane.f32.xlu1 %v4919_v56 }
 0x326   : > { %2389 = vadd.xlane.f32.xlu0 %v4932_v7 }
 0x327   : > { %2391 = vadd.xlane.f32.xlu1 %v4927_v24 }
 0x32a   : > { %2453 = vadd.xlane.f32.xlu0 %v4942_v19 }
 0x32b   : > { %2455 = vadd.xlane.f32.xlu1 %v4939_v15 }
 0x32e   : > { %2393 = vadd.xlane.f32.xlu0 %v2305_v33 }
 0x32f   : > { %2395 = vadd.xlane.f32.xlu1 %v4947_v34 }
 0x332   : > { %2457 = vadd.xlane.f32.xlu0 %v2337_v44 }
 0x333   : > { %2459 = vadd.xlane.f32.xlu1 %v2338_v40 }
 0x336   : > { %2397 = vadd.xlane.f32.xlu0 %v2307_v47 }
 0x337   : > { %2399 = vadd.xlane.f32.xlu1 %v2308_v45 }
 0x33a   : > { %2461 = vadd.xlane.f32.xlu0 %v2339_v55 }
 0x33b   : > { %2463 = vadd.xlane.f32.xlu1 %v2340_v51 }
 0x33e   : > { %2401 = vadd.xlane.f32.xlu0 %v2309_v61 }
 0x33f   : > { %2403 = vadd.xlane.f32.xlu1 %v2310_v58 }
 0x342   : > { %2465 = vadd.xlane.f32.xlu0 %v2341_v3 }
 0x343   : > { %2467 = vadd.xlane.f32.xlu1 %v2342_v23 }
 0x346   : > { %2405 = vadd.xlane.f32.xlu0 %v2311_v8 }
 0x347   : > { %2407 = vadd.xlane.f32.xlu1 %v2312_v5 }
 0x34a   : > { %2469 = vadd.xlane.f32.xlu0 %v2343_v53 }
 0x34b   : > { %2471 = vadd.xlane.f32.xlu1 %v2344_v13 }
 0x35b   : > { %v2348_v2 = vpop.xlane.xlu0 %2347 }
 0x35c   : > { %v2412_v52 = vpop.xlane.xlu1 %2411 }
 0x35d   : > { %v2474_v1 = vmax.f32 %v2348_v2, %v2412_v52 }
 0x35f   : > { %v2506_v6 = vsub.f32 %v2348_v2, %v2474_v1  ;;  %v2602_v11 = vsub.f32 %v2412_v52, %v2474_v1  ;;  %v2346_v16 = vpop.xlane.xlu0 %2345 }
 0x360   : > { %v2352_v10 = vpop.xlane.xlu1 %2351 }
 0x361   : > { %v2539_v27 = vmul.f32 1.442695, %v2506_v6  ;;  %v2635_v32 = vmul.f32 1.442695, %v2602_v11 }
 0x363   : > { %3981 = vpow2.f32 %v2539_v27  ;;  %v2410_v39 = vpop.xlane.xlu0 %2409 }
 0x364   : > { %3983 = vpow2.f32 %v2635_v32  ;;  %v2416_v20 = vpop.xlane.xlu1 %2415  ;;  %v2473_v50 = vmax.f32 %v2346_v16, %v2410_v39 }
 0x365   : > { %v2476_v56 = vmax.f32 %v2352_v10, %v2416_v20 }
 0x366   : > { %v2505_v60 = vsub.f32 %v2346_v16, %v2473_v50  ;;  %v2601_v24 = vsub.f32 %v2410_v39, %v2473_v50  ;;  %v4173_v39 = vld [vmem:[#allocation2 + $0x8] sm:$0xff] }
 0x367   : > { %v2508_v7 = vsub.f32 %v2352_v10, %v2476_v56  ;;  %v2604_v15 = vsub.f32 %v2416_v20, %v2476_v56  ;;  %v2414_v17 = vpop.xlane.xlu0 %2413  ;;  %v4174_v50 = vld [vmem:[#allocation3 + $0x8] sm:$0xff] }
 0x368   : > { %v2537_v18 = vmul.f32 1.442695, %v2505_v60  ;;  %v2350_v9 = vpop.xlane.xlu1 %2349  ;;  %v2633_v22 = vmul.f32 1.442695, %v2601_v24 }
 0x369   : > { %v2543_v19 = vmul.f32 1.442695, %v2508_v7  ;;  %v2639_v21 = vmul.f32 1.442695, %v2604_v15  ;;  %v2475_v28 = vmax.f32 %v2350_v9, %v2414_v17 }
 0x36a   : > { %3985 = vpow2.f32 %v2537_v18 }
 0x36b   : > { %3987 = vpow2.f32 %v2543_v19  ;;  %v2507_v25 = vsub.f32 %v2350_v9, %v2475_v28  ;;  %v2603_v26 = vsub.f32 %v2414_v17, %v2475_v28  ;;  %v2354_v34 = vpop.xlane.xlu0 %2353 }
 0x36c   : > { %3989 = vpow2.f32 %v2639_v21  ;;  %v2356_v29 = vpop.xlane.xlu1 %2355 }
 0x36d   : > { %v3982_v30 = vpop.eup %3981  ;;  %3991 = vpow2.f32 %v2633_v22  ;;  %v2541_v31 = vmul.f32 1.442695, %v2507_v25  ;;  %v2637_v33 = vmul.f32 1.442695, %v2603_v26 }
 0x36e   : > { %v3984_v35 = vpop.eup %3983 }
 0x36f   : > { %v2698_v36 = vadd.f32 %v3984_v35, %v3982_v30  ;;  %3993 = vpow2.f32 %v2541_v31  ;;  %v2418_v40 = vpop.xlane.xlu0 %2417 }
 0x370   : > { %3995 = vpow2.f32 %v2637_v33  ;;  %v2420_v42 = vpop.xlane.xlu1 %2419  ;;  %v2477_v14 = vmax.f32 %v2354_v34, %v2418_v40 }
 0x371   : > { %3997 = vrcp.f32 %v2698_v36  ;;  %v2478_v44 = vmax.f32 %v2356_v29, %v2420_v42 }
 0x372   : > { %v2509_v41 = vsub.f32 %v2354_v34, %v2477_v14  ;;  %v2605_v47 = vsub.f32 %v2418_v40, %v2477_v14 }
 0x373   : > { %v2510_v45 = vsub.f32 %v2356_v29, %v2478_v44  ;;  %v2606_v46 = vsub.f32 %v2420_v42, %v2478_v44  ;;  %v2358_v48 = vpop.xlane.xlu0 %2357 }
 0x374   : > { %v4995_v38 = vpop.eup %3985  ;;  %v2545_v51 = vmul.f32 1.442695, %v2509_v41  ;;  %v2360_v54 = vpop.xlane.xlu1 %2359  ;;  %v2641_v62 = vmul.f32 1.442695, %v2605_v47  ;;  %v4175_v41 = vld [vmem:[#allocation2 + $0x18] sm:$0xff] }
 0x375   : > { %v3988_v37 = vpop.eup %3987  ;;  %v2547_v55 = vmul.f32 1.442695, %v2510_v45  ;;  %v2643_v57 = vmul.f32 1.442695, %v2606_v46  ;;  %v4176_v46 = vld [vmem:[#allocation3 + $0x18] sm:$0xff] }
 0x376   : > { %v3990_v58 = vpop.eup %3989  ;;  %3999 = vpow2.f32 %v2545_v51 }
 0x377   : > { %v3992_v59 = vpop.eup %3991  ;;  %v2700_v61 = vadd.f32 %v3990_v58, %v3988_v37  ;;  %4001 = vpow2.f32 %v2547_v55  ;;  %v2422_v49 = vpop.xlane.xlu0 %2421 }
 0x378   : > { %v2697_v23 = vadd.f32 %v3992_v59, %v4995_v38  ;;  %4003 = vpow2.f32 %v2643_v57  ;;  %v2424_v0 = vpop.xlane.xlu1 %2423  ;;  %v2479_v43 = vmax.f32 %v2358_v48, %v2422_v49  ;;  %v4178_v57 = vld [vmem:[#allocation3] sm:$0xff] }
 0x379   : > { %v4998_v3 = vpop.eup %3993  ;;  %4005 = vrcp.f32 %v2700_v61  ;;  %v2480_v4 = vmax.f32 %v2360_v54, %v2424_v0 }
 0x37a   : > { %v5000_v5 = vpop.eup %3995  ;;  %4007 = vrcp.f32 %v2697_v23  ;;  %v2511_v63 = vsub.f32 %v2358_v48, %v2479_v43  ;;  %v2607_v8 = vsub.f32 %v2422_v49, %v2479_v43 }
 0x37b   : > { %v3998_v12 = vpop.eup %3997  ;;  %v2699_v13 = vadd.f32 %v5000_v5, %v4998_v3  ;;  %4009 = vpow2.f32 %v2641_v62  ;;  %v2512_v53 = vsub.f32 %v2360_v54, %v2480_v4  ;;  %v2608_v2 = vsub.f32 %v2424_v0, %v2480_v4  ;;  %v2362_v52 = vpop.xlane.xlu0 %2361 }
 0x37c   : > { %v2794_v1 = vmul.f32 %v3998_v12, %v3982_v30  ;;  %v2858_v6 = vmul.f32 %v3998_v12, %v3984_v35  ;;  %v2549_v11 = vmul.f32 1.442695, %v2511_v63  ;;  %v2364_v16 = vpop.xlane.xlu1 %2363  ;;  %v2645_v32 = vmul.f32 1.442695, %v2607_v8 }
 0x37d   : > { %4011 = vrcp.f32 %v2699_v13  ;;  %v2551_v10 = vmul.f32 1.442695, %v2512_v53  ;;  %v2647_v27 = vmul.f32 1.442695, %v2608_v2  ;;  %v4179_v13 = vld [vmem:[#allocation2 + $0x10] sm:$0xff] }
 0x37e   : > { %v2826_v20 = vmul.f32 %v4173_v39, %v2794_v1  ;;  %v2890_v56 = vmul.f32 %v4174_v50, %v2858_v6  ;;  %4013 = vpow2.f32 %v2549_v11  ;;  %v4180_v2 = vld [vmem:[#allocation3 + $0x10] sm:$0xff] }
 0x37f   : > { %4015 = vpow2.f32 %v2551_v10  ;;  %v2426_v60 = vpop.xlane.xlu0 %2425 }
 0x380   : > { %v5004_v24 = vpop.eup %3999  ;;  %v2922_v7 = vadd.f32 %v2890_v56, %v2826_v20  ;;  %4017 = vpow2.f32 %v2647_v27  ;;  %v2428_v15 = vpop.xlane.xlu1 %2427  ;;  %v2481_v17 = vmax.f32 %v2362_v52, %v2426_v60 }
 0x381   : > { %v5006_v18 = vpop.eup %4001  ;;  %4019 = vpow2.f32 %v2645_v32  ;;  %v2482_v9 = vmax.f32 %v2364_v16, %v2428_v15 }
 0x382   : > { %v5008_v19 = vpop.eup %4003  ;;  %2954 = vst [vmem:[%s4552_s16 + $0x8] sm:$0xff] %v2922_v7  ;;  %v2513_v21 = vsub.f32 %v2362_v52, %v2481_v17  ;;  %v2609_v34 = vsub.f32 %v2426_v60, %v2481_v17 }
 0x383   : > { %v4006_v22 = vpop.eup %4005  ;;  %v2702_v28 = vadd.f32 %v5008_v19, %v5006_v18  ;;  %v2514_v25 = vsub.f32 %v2364_v16, %v2482_v9  ;;  %v2610_v26 = vsub.f32 %v2428_v15, %v2482_v9  ;;  %v2366_v29 = vpop.xlane.xlu0 %2365 }
 0x384   : > { %v4008_v30 = vpop.eup %4007  ;;  %v2796_v31 = vmul.f32 %v4006_v22, %v3988_v37  ;;  %v2860_v33 = vmul.f32 %v4006_v22, %v3990_v58  ;;  %v2553_v35 = vmul.f32 1.442695, %v2513_v21  ;;  %v2368_v36 = vpop.xlane.xlu1 %2367  ;;  %v4177_v37 = vld [vmem:[#allocation2] sm:$0xff]  ;;  %v2649_v61 = vmul.f32 1.442695, %v2609_v34  ;;  %v4181_v34 = vld [vmem:[#allocation2 + $0x28] sm:$0xff] }
 0x385   : > { %v5013_v40 = vpop.eup %4009  ;;  %v2793_v42 = vmul.f32 %v4008_v30, %v4995_v38  ;;  %v2857_v14 = vmul.f32 %v4008_v30, %v3992_v59  ;;  %4021 = vrcp.f32 %v2702_v28  ;;  %v2555_v44 = vmul.f32 1.442695, %v2514_v25  ;;  %v4182_v30 = vld [vmem:[#allocation3 + $0x28] sm:$0xff] }
 0x386   : > { %v2828_v45 = vmul.f32 %v4175_v41, %v2796_v31  ;;  %v2892_v47 = vmul.f32 %v4176_v46, %v2860_v33  ;;  %v2701_v48 = vadd.f32 %v5013_v40, %v5004_v24  ;;  %v2651_v51 = vmul.f32 1.442695, %v2610_v26 }
 0x387   : > { %v4012_v54 = vpop.eup %4011  ;;  %v2825_v55 = vmul.f32 %v4177_v37, %v2793_v42  ;;  %v2889_v58 = vmul.f32 %v4178_v57, %v2857_v14  ;;  %4023 = vpow2.f32 %v2555_v44  ;;  %v2430_v38 = vpop.xlane.xlu0 %2429  ;;  %v4184_v37 = vld [vmem:[#allocation3 + $0x20] sm:$0xff] }
 0x388   : > { %v5018_v59 = vpop.eup %4013  ;;  %v2924_v62 = vadd.f32 %v2892_v47, %v2828_v45  ;;  %v2795_v49 = vmul.f32 %v4012_v54, %v4998_v3  ;;  %v2859_v23 = vmul.f32 %v4012_v54, %v5000_v5  ;;  %4025 = vrcp.f32 %v2701_v48  ;;  %v2432_v0 = vpop.xlane.xlu1 %2431 }
 0x389   : > { %v5022_v43 = vpop.eup %4015  ;;  %v2921_v4 = vadd.f32 %v2889_v58, %v2825_v55  ;;  %4027 = vpow2.f32 %v2651_v51  ;;  %v2484_v63 = vmax.f32 %v2368_v36, %v2432_v0  ;;  %v2483_v8 = vmax.f32 %v2366_v29, %v2430_v38  ;;  %v4183_v51 = vld [vmem:[#allocation2 + $0x20] sm:$0xff] }
 0x38a   : > { %v5024_v12 = vpop.eup %4017  ;;  %2956 = vst [vmem:[%s4552_s16 + $0x18] sm:$0xff] %v2924_v62  ;;  %v2827_v53 = vmul.f32 %v4179_v13, %v2795_v49  ;;  %v2891_v52 = vmul.f32 %v4180_v2, %v2859_v23  ;;  %4029 = vpow2.f32 %v2553_v35 }
 0x38b   : > { %v5027_v3 = vpop.eup %4019  ;;  %2953 = vst [vmem:[%s4552_s16] sm:$0xff] %v2921_v4  ;;  %v2704_v5 = vadd.f32 %v5024_v12, %v5022_v43  ;;  %4031 = vpow2.f32 %v2649_v61  ;;  %v2516_v1 = vsub.f32 %v2368_v36, %v2484_v63  ;;  %v2612_v6 = vsub.f32 %v2432_v0, %v2484_v63  ;;  %v2370_v11 = vpop.xlane.xlu0 %2369 }
 0x38c   : > { %v2923_v16 = vadd.f32 %v2891_v52, %v2827_v53  ;;  %v2703_v10 = vadd.f32 %v5027_v3, %v5018_v59  ;;  %v2515_v27 = vsub.f32 %v2366_v29, %v2483_v8  ;;  %v2611_v32 = vsub.f32 %v2430_v38, %v2483_v8  ;;  %v2372_v39 = vpop.xlane.xlu1 %2371 }
 0x38d   : > { %4033 = vrcp.f32 %v2704_v5  ;;  %v2559_v20 = vmul.f32 1.442695, %v2516_v1  ;;  %v2655_v50 = vmul.f32 1.442695, %v2612_v6  ;;  %v4185_v1 = vld [vmem:[#allocation2 + $0x38] sm:$0xff] }
 0x38e   : > { %2955 = vst [vmem:[%s4552_s16 + $0x10] sm:$0xff] %v2923_v16  ;;  %4035 = vrcp.f32 %v2703_v10  ;;  %v2557_v56 = vmul.f32 1.442695, %v2515_v27  ;;  %v2653_v60 = vmul.f32 1.442695, %v2611_v32  ;;  %v4187_v10 = vld [vmem:[#allocation2 + $0x30] sm:$0xff] }
 0x38f   : > { %v4022_v7 = vpop.eup %4021  ;;  %4037 = vpow2.f32 %v2559_v20  ;;  %v2434_v15 = vpop.xlane.xlu0 %2433  ;;  %v4188_v32 = vld [vmem:[#allocation3 + $0x30] sm:$0xff] }
 0x390   : > { %v2798_v17 = vmul.f32 %v4022_v7, %v5006_v18  ;;  %v2862_v9 = vmul.f32 %v4022_v7, %v5008_v19  ;;  %4039 = vpow2.f32 %v2655_v50  ;;  %v2436_v21 = vpop.xlane.xlu1 %2435  ;;  %v2485_v22 = vmax.f32 %v2370_v11, %v2434_v15 }
 0x391   : > { %v5037_v28 = vpop.eup %4023  ;;  %4041 = vpow2.f32 %v2557_v56  ;;  %v2486_v25 = vmax.f32 %v2372_v39, %v2436_v21 }
 0x392   : > { %v4026_v26 = vpop.eup %4025  ;;  %v2830_v29 = vmul.f32 %v4181_v34, %v2798_v17  ;;  %v2894_v31 = vmul.f32 %v4182_v30, %v2862_v9  ;;  %4043 = vpow2.f32 %v2653_v60  ;;  %v2517_v33 = vsub.f32 %v2370_v11, %v2485_v22  ;;  %v4186_v11 = vld [vmem:[#allocation3 + $0x38] sm:$0xff] }
 0x393   : > { %v5039_v35 = vpop.eup %4027  ;;  %v2797_v18 = vmul.f32 %v4026_v26, %v5004_v24  ;;  %v2861_v19 = vmul.f32 %v4026_v26, %v5013_v40  ;;  %v2518_v36 = vsub.f32 %v2372_v39, %v2486_v25  ;;  %v2614_v42 = vsub.f32 %v2436_v21, %v2486_v25  ;;  %v2374_v14 = vpop.xlane.xlu0 %2373 }
 0x394   : > { %v5043_v44 = vpop.eup %4029  ;;  %v2926_v41 = vadd.f32 %v2894_v31, %v2830_v29  ;;  %v2706_v45 = vadd.f32 %v5039_v35, %v5037_v28  ;;  %v2613_v46 = vsub.f32 %v2434_v15, %v2485_v22  ;;  %v2376_v47 = vpop.xlane.xlu1 %2375  ;;  %v2561_v58 = vmul.f32 1.442695, %v2517_v33 }
 0x395   : > { %v5047_v48 = vpop.eup %4031  ;;  %v2829_v54 = vmul.f32 %v4183_v51, %v2797_v18  ;;  %v2893_v24 = vmul.f32 %v4184_v37, %v2861_v19  ;;  %v2563_v55 = vmul.f32 1.442695, %v2518_v36  ;;  %v2659_v40 = vmul.f32 1.442695, %v2614_v42 }
 0x396   : > { %2958 = vst [vmem:[%s4552_s16 + $0x28] sm:$0xff] %v2926_v41  ;;  %4045 = vrcp.f32 %v2706_v45  ;;  %v2705_v57 = vadd.f32 %v5047_v48, %v5043_v44  ;;  %v2657_v62 = vmul.f32 1.442695, %v2613_v46  ;;  %v4189_v45 = vld [vmem:[#allocation2 + $0x48] sm:$0xff] }
 0x397   : > { %v4034_v61 = vpop.eup %4033  ;;  %v2925_v38 = vadd.f32 %v2893_v24, %v2829_v54  ;;  %4047 = vpow2.f32 %v2563_v55  ;;  %v2438_v49 = vpop.xlane.xlu0 %2437 }
 0x398   : > { %v4036_v23 = vpop.eup %4035  ;;  %v2800_v0 = vmul.f32 %v4034_v61, %v5022_v43  ;;  %v2864_v4 = vmul.f32 %v4034_v61, %v5024_v12  ;;  %4049 = vrcp.f32 %v2705_v57  ;;  %v2440_v63 = vpop.xlane.xlu1 %2439  ;;  %v2487_v8 = vmax.f32 %v2374_v14, %v2438_v49 }
 0x399   : > { %v5054_v13 = vpop.eup %4037  ;;  %2957 = vst [vmem:[%s4552_s16 + $0x20] sm:$0xff] %v2925_v38  ;;  %v2799_v53 = vmul.f32 %v4036_v23, %v5018_v59  ;;  %v2863_v2 = vmul.f32 %v4036_v23, %v5027_v3  ;;  %4051 = vpow2.f32 %v2659_v40  ;;  %v2488_v52 = vmax.f32 %v2376_v47, %v2440_v63  ;;  %v4192_v23 = vld [vmem:[#allocation3 + $0x40] sm:$0xff] }
 0x39a   : > { %v5059_v5 = vpop.eup %4039  ;;  %v2832_v6 = vmul.f32 %v4185_v1, %v2800_v0  ;;  %v2896_v43 = vmul.f32 %v4186_v11, %v2864_v4  ;;  %4053 = vpow2.f32 %v2561_v58  ;;  %v2519_v12 = vsub.f32 %v2374_v14, %v2487_v8 }
 0x39b   : > { %v5061_v16 = vpop.eup %4041  ;;  %v2831_v27 = vmul.f32 %v4187_v10, %v2799_v53  ;;  %v2895_v39 = vmul.f32 %v4188_v32, %v2863_v2  ;;  %v2708_v59 = vadd.f32 %v5059_v5, %v5054_v13  ;;  %4055 = vpow2.f32 %v2657_v62  ;;  %v2378_v3 = vpop.xlane.xlu0 %2377  ;;  %v4191_v62 = vld [vmem:[#allocation2 + $0x40] sm:$0xff] }
 0x39c   : > { %v5065_v20 = vpop.eup %4043  ;;  %v2928_v50 = vadd.f32 %v2896_v43, %v2832_v6  ;;  %v2520_v56 = vsub.f32 %v2376_v47, %v2488_v52  ;;  %v2616_v60 = vsub.f32 %v2440_v63, %v2488_v52  ;;  %v2565_v7 = vmul.f32 1.442695, %v2519_v12  ;;  %v2380_v15 = vpop.xlane.xlu1 %2379  ;;  %v4190_v47 = vld [vmem:[#allocation3 + $0x48] sm:$0xff] }
 0x39d   : > { %v2927_v17 = vadd.f32 %v2895_v39, %v2831_v27  ;;  %4057 = vrcp.f32 %v2708_v59  ;;  %v2707_v9 = vadd.f32 %v5065_v20, %v5061_v16  ;;  %v2615_v21 = vsub.f32 %v2438_v49, %v2487_v8  ;;  %v4193_v39 = vld [vmem:[#allocation2 + $0x58] sm:$0xff] }
 0x39e   : > { %2960 = vst [vmem:[%s4552_s16 + $0x38] sm:$0xff] %v2928_v50  ;;  %v2567_v22 = vmul.f32 1.442695, %v2520_v56  ;;  %v2663_v25 = vmul.f32 1.442695, %v2616_v60  ;;  %4059 = vpow2.f32 %v2565_v7 }
 0x39f   : > { %2959 = vst [vmem:[%s4552_s16 + $0x30] sm:$0xff] %v2927_v17  ;;  %4061 = vrcp.f32 %v2707_v9  ;;  %v2661_v26 = vmul.f32 1.442695, %v2615_v21  ;;  %v2442_v34 = vpop.xlane.xlu0 %2441 }
 0x3a0   : > { %v4046_v29 = vpop.eup %4045  ;;  %4063 = vpow2.f32 %v2567_v22  ;;  %v2444_v30 = vpop.xlane.xlu1 %2443  ;;  %v2489_v31 = vmax.f32 %v2378_v3, %v2442_v34  ;;  %v4195_v22 = vld [vmem:[#allocation2 + $0x50] sm:$0xff] }
 0x3a1   : > { %v5071_v33 = vpop.eup %4047  ;;  %v2802_v18 = vmul.f32 %v4046_v29, %v5037_v28  ;;  %v2866_v19 = vmul.f32 %v4046_v29, %v5039_v35  ;;  %4065 = vpow2.f32 %v2663_v25  ;;  %v2490_v36 = vmax.f32 %v2380_v15, %v2444_v30 }
 0x3a2   : > { %v4050_v42 = vpop.eup %4049  ;;  %4067 = vpow2.f32 %v2661_v26  ;;  %v2521_v14 = vsub.f32 %v2378_v3, %v2489_v31  ;;  %v2617_v0 = vsub.f32 %v2442_v34, %v2489_v31  ;;  %v4194_v3 = vld [vmem:[#allocation3 + $0x58] sm:$0xff]  ;;  %v4196_v26 = vld [vmem:[#allocation3 + $0x50] sm:$0xff] }
 0x3a3   : > { %v5075_v41 = vpop.eup %4051  ;;  %v2834_v46 = vmul.f32 %v4189_v45, %v2802_v18  ;;  %v2898_v51 = vmul.f32 %v4190_v47, %v2866_v19  ;;  %v2801_v54 = vmul.f32 %v4050_v42, %v5043_v44  ;;  %v2865_v37 = vmul.f32 %v4050_v42, %v5047_v48  ;;  %v2382_v24 = vpop.xlane.xlu0 %2381 }
 0x3a4   : > { %v5079_v55 = vpop.eup %4053  ;;  %v2710_v28 = vadd.f32 %v5075_v41, %v5071_v33  ;;  %v2522_v35 = vsub.f32 %v2380_v15, %v2490_v36  ;;  %v2618_v40 = vsub.f32 %v2444_v30, %v2490_v36  ;;  %v2569_v57 = vmul.f32 1.442695, %v2521_v14  ;;  %v2384_v58 = vpop.xlane.xlu1 %2383 }
 0x3a5   : > { %v5083_v61 = vpop.eup %4055  ;;  %v2930_v38 = vadd.f32 %v2898_v51, %v2834_v46  ;;  %v2833_v49 = vmul.f32 %v4191_v62, %v2801_v54  ;;  %v2897_v44 = vmul.f32 %v4192_v23, %v2865_v37  ;;  %v2665_v10 = vmul.f32 1.442695, %v2617_v0  ;;  %v4198_v62 = vld [vmem:[#allocation3 + $0x68] sm:$0xff] }
 0x3a6   : > { %4069 = vrcp.f32 %v2710_v28  ;;  %v2709_v48 = vadd.f32 %v5083_v61, %v5079_v55  ;;  %v2571_v4 = vmul.f32 1.442695, %v2522_v35  ;;  %v2667_v53 = vmul.f32 1.442695, %v2618_v40 }
 0x3a7   : > { %v4058_v63 = vpop.eup %4057  ;;  %2962 = vst [vmem:[%s4552_s16 + $0x48] sm:$0xff] %v2930_v38  ;;  %v2929_v8 = vadd.f32 %v2897_v44, %v2833_v49  ;;  %4071 = vpow2.f32 %v2569_v57  ;;  %v2446_v2 = vpop.xlane.xlu0 %2445 }
 0x3a8   : > { %v5088_v52 = vpop.eup %4059  ;;  %v2804_v1 = vmul.f32 %v4058_v63, %v5054_v13  ;;  %v2868_v6 = vmul.f32 %v4058_v63, %v5059_v5  ;;  %4073 = vrcp.f32 %v2709_v48  ;;  %v2448_v11 = vpop.xlane.xlu1 %2447  ;;  %v2491_v43 = vmax.f32 %v2382_v24, %v2446_v2 }
 0x3a9   : > { %v4062_v12 = vpop.eup %4061  ;;  %2961 = vst [vmem:[%s4552_s16 + $0x40] sm:$0xff] %v2929_v8  ;;  %4075 = vpow2.f32 %v2571_v4  ;;  %v2492_v27 = vmax.f32 %v2384_v58, %v2448_v11 }
 0x3aa   : > { %v5093_v32 = vpop.eup %4063  ;;  %v2836_v59 = vmul.f32 %v4193_v39, %v2804_v1  ;;  %v2900_v50 = vmul.f32 %v4194_v3, %v2868_v6  ;;  %v2803_v56 = vmul.f32 %v4062_v12, %v5061_v16  ;;  %v2867_v13 = vmul.f32 %v4062_v12, %v5065_v20  ;;  %v4200_v1 = vld [vmem:[#allocation3 + $0x60] sm:$0xff] }
 0x3ab   : > { %v5097_v60 = vpop.eup %4065  ;;  %4077 = vpow2.f32 %v2667_v53  ;;  %v2524_v5 = vsub.f32 %v2384_v58, %v2492_v27  ;;  %v2620_v7 = vsub.f32 %v2448_v11, %v2492_v27  ;;  %v2523_v15 = vsub.f32 %v2382_v24, %v2491_v43  ;;  %v2386_v17 = vpop.xlane.xlu0 %2385  ;;  %v4197_v58 = vld [vmem:[#allocation2 + $0x68] sm:$0xff]  ;;  %v4199_v53 = vld [vmem:[#allocation2 + $0x60] sm:$0xff] }
 0x3ac   : > { %v5099_v9 = vpop.eup %4067  ;;  %v2932_v21 = vadd.f32 %v2900_v50, %v2836_v59  ;;  %v2835_v25 = vmul.f32 %v4195_v22, %v2803_v56  ;;  %v2899_v34 = vmul.f32 %v4196_v26, %v2867_v13  ;;  %v2712_v16 = vadd.f32 %v5097_v60, %v5093_v32  ;;  %v2388_v20 = vpop.xlane.xlu1 %2387  ;;  %v4201_v26 = vld [vmem:[#allocation2 + $0x78] sm:$0xff] }
 0x3ad   : > { %v2711_v29 = vadd.f32 %v5099_v9, %v5088_v52  ;;  %4079 = vpow2.f32 %v2665_v10  ;;  %v2575_v30 = vmul.f32 1.442695, %v2524_v5  ;;  %v2671_v31 = vmul.f32 1.442695, %v2620_v7 }
 0x3ae   : > { %2964 = vst [vmem:[%s4552_s16 + $0x58] sm:$0xff] %v2932_v21  ;;  %v2931_v18 = vadd.f32 %v2899_v34, %v2835_v25  ;;  %4081 = vrcp.f32 %v2712_v16  ;;  %v2573_v19 = vmul.f32 1.442695, %v2523_v15  ;;  %v2619_v36 = vsub.f32 %v2446_v2, %v2491_v43  ;;  %v4202_v16 = vld [vmem:[#allocation3 + $0x78] sm:$0xff] }
 0x3af   : > { %4083 = vrcp.f32 %v2711_v29  ;;  %v2450_v42 = vpop.xlane.xlu0 %2449 }
 0x3b0   : > { %v4070_v14 = vpop.eup %4069  ;;  %2963 = vst [vmem:[%s4552_s16 + $0x50] sm:$0xff] %v2931_v18  ;;  %4085 = vpow2.f32 %v2575_v30  ;;  %v2669_v45 = vmul.f32 1.442695, %v2619_v36  ;;  %v2452_v46 = vpop.xlane.xlu1 %2451  ;;  %v2493_v47 = vmax.f32 %v2386_v17, %v2450_v42  ;;  %v4203_v30 = vld [vmem:[#allocation2 + $0x70] sm:$0xff] }
 0x3b1   : > { %v5107_v51 = vpop.eup %4071  ;;  %v2806_v54 = vmul.f32 %v4070_v14, %v5071_v33  ;;  %v2870_v37 = vmul.f32 %v4070_v14, %v5075_v41  ;;  %4087 = vpow2.f32 %v2671_v31  ;;  %v2494_v24 = vmax.f32 %v2388_v20, %v2452_v46  ;;  %v4204_v18 = vld [vmem:[#allocation3 + $0x70] sm:$0xff] }
 0x3b2   : > { %v4074_v28 = vpop.eup %4073  ;;  %4089 = vpow2.f32 %v2573_v19  ;;  %v2525_v35 = vsub.f32 %v2386_v17, %v2493_v47  ;;  %v2621_v40 = vsub.f32 %v2450_v42, %v2493_v47 }
 0x3b3   : > { %v5111_v57 = vpop.eup %4075  ;;  %v2838_v38 = vmul.f32 %v4197_v58, %v2806_v54  ;;  %v2902_v49 = vmul.f32 %v4198_v62, %v2870_v37  ;;  %v2805_v23 = vmul.f32 %v4074_v28, %v5079_v55  ;;  %v2869_v44 = vmul.f32 %v4074_v28, %v5083_v61  ;;  %v2390_v0 = vpop.xlane.xlu0 %2389 }
 0x3b4   : > { %4091 = vpow2.f32 %v2669_v45  ;;  %v2526_v33 = vsub.f32 %v2388_v20, %v2494_v24  ;;  %v2622_v41 = vsub.f32 %v2452_v46, %v2494_v24  ;;  %v2577_v48 = vmul.f32 1.442695, %v2525_v35  ;;  %v2392_v4 = vpop.xlane.xlu1 %2391 }
 0x3b5   : > { %v5115_v63 = vpop.eup %4077  ;;  %v2934_v8 = vadd.f32 %v2902_v49, %v2838_v38  ;;  %v2837_v2 = vmul.f32 %v4199_v53, %v2805_v23  ;;  %v2901_v6 = vmul.f32 %v4200_v1, %v2869_v44  ;;  %v2673_v11 = vmul.f32 1.442695, %v2621_v40 }
 0x3b6   : > { %v2714_v55 = vadd.f32 %v5115_v63, %v5111_v57  ;;  %v2579_v61 = vmul.f32 1.442695, %v2526_v33  ;;  %4093 = vpow2.f32 %v2577_v48  ;;  %v2675_v10 = vmul.f32 1.442695, %v2622_v41 }
 0x3b7   : > { %v5119_v43 = vpop.eup %4079  ;;  %2966 = vst [vmem:[%s4552_s16 + $0x68] sm:$0xff] %v2934_v8  ;;  %v2933_v12 = vadd.f32 %v2901_v6, %v2837_v2  ;;  %4095 = vpow2.f32 %v2673_v11  ;;  %v2454_v27 = vpop.xlane.xlu0 %2453 }
 0x3b8   : > { %v4082_v39 = vpop.eup %4081  ;;  %4097 = vrcp.f32 %v2714_v55  ;;  %v2713_v59 = vadd.f32 %v5119_v43, %v5107_v51  ;;  %v2456_v3 = vpop.xlane.xlu1 %2455  ;;  %v2495_v50 = vmax.f32 %v2390_v0, %v2454_v27 }
 0x3b9   : > { %v4084_v56 = vpop.eup %4083  ;;  %2965 = vst [vmem:[%s4552_s16 + $0x60] sm:$0xff] %v2933_v12  ;;  %v2808_v13 = vmul.f32 %v4082_v39, %v5093_v32  ;;  %v2872_v5 = vmul.f32 %v4082_v39, %v5097_v60  ;;  %4099 = vpow2.f32 %v2579_v61  ;;  %v2496_v7 = vmax.f32 %v2392_v4, %v2456_v3  ;;  %v4205_v12 = vld [vmem:[#allocation2 + $0x88] sm:$0xff] }
 0x3ba   : > { %v5127_v15 = vpop.eup %4085  ;;  %v2807_v17 = vmul.f32 %v4084_v56, %v5088_v52  ;;  %v2871_v21 = vmul.f32 %v4084_v56, %v5099_v9  ;;  %4101 = vrcp.f32 %v2713_v59  ;;  %v2527_v22 = vsub.f32 %v2390_v0, %v2495_v50 }
 0x3bb   : > { %v5131_v25 = vpop.eup %4087  ;;  %v2840_v34 = vmul.f32 %v4201_v26, %v2808_v13  ;;  %v2904_v20 = vmul.f32 %v4202_v16, %v2872_v5  ;;  %4103 = vpow2.f32 %v2675_v10  ;;  %v2528_v32 = vsub.f32 %v2392_v4, %v2496_v7  ;;  %v2394_v29 = vpop.xlane.xlu0 %2393  ;;  %v4207_v13 = vld [vmem:[#allocation2 + $0x80] sm:$0xff] }
 0x3bc   : > { %v5133_v60 = vpop.eup %4089  ;;  %v2839_v31 = vmul.f32 %v4203_v30, %v2807_v17  ;;  %v2903_v52 = vmul.f32 %v4204_v18, %v2871_v21  ;;  %v2716_v9 = vadd.f32 %v5131_v25, %v5127_v15  ;;  %v2624_v19 = vsub.f32 %v2456_v3, %v2496_v7  ;;  %v2396_v36 = vpop.xlane.xlu1 %2395  ;;  %v4208_v7 = vld [vmem:[#allocation3 + $0x80] sm:$0xff] }
 0x3bd   : > { %v2936_v42 = vadd.f32 %v2904_v20, %v2840_v34  ;;  %v2583_v14 = vmul.f32 1.442695, %v2528_v32  ;;  %v2623_v45 = vsub.f32 %v2454_v27, %v2495_v50  ;;  %v2581_v37 = vmul.f32 1.442695, %v2527_v22  ;;  %v4206_v27 = vld [vmem:[#allocation3 + $0x88] sm:$0xff] }
 0x3be   : > { %v5137_v46 = vpop.eup %4091  ;;  %v2935_v47 = vadd.f32 %v2903_v52, %v2839_v31  ;;  %4105 = vrcp.f32 %v2716_v9  ;;  %v2679_v54 = vmul.f32 1.442695, %v2624_v19  ;;  %v4209_v52 = vld [vmem:[#allocation2 + $0x98] sm:$0xff] }
 0x3bf   : > { %2968 = vst [vmem:[%s4552_s16 + $0x78] sm:$0xff] %v2936_v42  ;;  %v2715_v24 = vadd.f32 %v5137_v46, %v5133_v60  ;;  %4107 = vpow2.f32 %v2583_v14  ;;  %v2677_v28 = vmul.f32 1.442695, %v2623_v45  ;;  %v2458_v35 = vpop.xlane.xlu0 %2457  ;;  %v4210_v19 = vld [vmem:[#allocation3 + $0x98] sm:$0xff] }
 0x3c0   : > { %v5142_v40 = vpop.eup %4093  ;;  %2967 = vst [vmem:[%s4552_s16 + $0x70] sm:$0xff] %v2935_v47  ;;  %4109 = vpow2.f32 %v2679_v54  ;;  %v2460_v58 = vpop.xlane.xlu1 %2459  ;;  %v2497_v38 = vmax.f32 %v2394_v29, %v2458_v35 }
 0x3c1   : > { %v5145_v62 = vpop.eup %4095  ;;  %4111 = vrcp.f32 %v2715_v24  ;;  %v2498_v49 = vmax.f32 %v2396_v36, %v2460_v58 }
 0x3c2   : > { %v4098_v23 = vpop.eup %4097  ;;  %v2717_v44 = vadd.f32 %v5145_v62, %v5142_v40  ;;  %4113 = vpow2.f32 %v2581_v37  ;;  %v2529_v0 = vsub.f32 %v2394_v29, %v2497_v38  ;;  %v2625_v33 = vsub.f32 %v2458_v35, %v2497_v38 }
 0x3c3   : > { %v5149_v41 = vpop.eup %4099  ;;  %v2810_v48 = vmul.f32 %v4098_v23, %v5111_v57  ;;  %v2874_v4 = vmul.f32 %v4098_v23, %v5115_v63  ;;  %4115 = vpow2.f32 %v2677_v28  ;;  %v2530_v8 = vsub.f32 %v2396_v36, %v2498_v49  ;;  %v2398_v53 = vpop.xlane.xlu0 %2397 }
 0x3c4   : > { %v4102_v2 = vpop.eup %4101  ;;  %4117 = vrcp.f32 %v2717_v44  ;;  %v2626_v1 = vsub.f32 %v2460_v58, %v2498_v49  ;;  %v2585_v6 = vmul.f32 1.442695, %v2529_v0  ;;  %v2681_v11 = vmul.f32 1.442695, %v2625_v33  ;;  %v2400_v55 = vpop.xlane.xlu1 %2399  ;;  %v4211_v49 = vld [vmem:[#allocation2 + $0x90] sm:$0xff] }
 0x3c5   : > { %v5153_v61 = vpop.eup %4103  ;;  %v2842_v10 = vmul.f32 %v4205_v12, %v2810_v48  ;;  %v2906_v39 = vmul.f32 %v4206_v27, %v2874_v4  ;;  %v2809_v59 = vmul.f32 %v4102_v2, %v5107_v51  ;;  %v2873_v57 = vmul.f32 %v4102_v2, %v5119_v43  ;;  %v4212_v44 = vld [vmem:[#allocation3 + $0x90] sm:$0xff] }
 0x3c6   : > { %v2718_v63 = vadd.f32 %v5153_v61, %v5149_v41  ;;  %v2587_v3 = vmul.f32 1.442695, %v2530_v8  ;;  %v2683_v50 = vmul.f32 1.442695, %v2626_v1  ;;  %4119 = vpow2.f32 %v2585_v6 }
 0x3c7   : > { %v2938_v56 = vadd.f32 %v2906_v39, %v2842_v10  ;;  %v2841_v5 = vmul.f32 %v4207_v13, %v2809_v59  ;;  %v2905_v17 = vmul.f32 %v4208_v7, %v2873_v57  ;;  %4121 = vpow2.f32 %v2681_v11  ;;  %v2462_v21 = vpop.xlane.xlu0 %2461  ;;  %v4214_v10 = vld [vmem:[#allocation3 + $0xa0] sm:$0xff] }
 0x3c8   : > { %v4106_v22 = vpop.eup %4105  ;;  %4123 = vrcp.f32 %v2718_v63  ;;  %v2464_v51 = vpop.xlane.xlu1 %2463  ;;  %v2499_v26 = vmax.f32 %v2398_v53, %v2462_v21 }
 0x3c9   : > { %v5159_v43 = vpop.eup %4107  ;;  %2970 = vst [vmem:[%s4552_s16 + $0x88] sm:$0xff] %v2938_v56  ;;  %v2937_v34 = vadd.f32 %v2905_v17, %v2841_v5  ;;  %v2812_v16 = vmul.f32 %v4106_v22, %v5127_v15  ;;  %v2876_v20 = vmul.f32 %v4106_v22, %v5131_v25  ;;  %4125 = vpow2.f32 %v2587_v3 }
 0x3ca   : > { %v5164_v32 = vpop.eup %4109  ;;  %4127 = vpow2.f32 %v2683_v50  ;;  %v2500_v29 = vmax.f32 %v2400_v55, %v2464_v51  ;;  %v2531_v30 = vsub.f32 %v2398_v53, %v2499_v26  ;;  %v2627_v31 = vsub.f32 %v2462_v21, %v2499_v26 }
 0x3cb   : > { %v4112_v18 = vpop.eup %4111  ;;  %2969 = vst [vmem:[%s4552_s16 + $0x80] sm:$0xff] %v2937_v34  ;;  %v2844_v9 = vmul.f32 %v4209_v52, %v2812_v16  ;;  %v2908_v36 = vmul.f32 %v4210_v19, %v2876_v20  ;;  %v2720_v42 = vadd.f32 %v5164_v32, %v5159_v43  ;;  %v2402_v14 = vpop.xlane.xlu0 %2401  ;;  %v4216_v34 = vld [vmem:[#allocation3 + $0xa8] sm:$0xff] }
 0x3cc   : > { %v5169_v15 = vpop.eup %4113  ;;  %v2811_v25 = vmul.f32 %v4112_v18, %v5133_v60  ;;  %v2875_v45 = vmul.f32 %v4112_v18, %v5137_v46  ;;  %v2532_v47 = vsub.f32 %v2400_v55, %v2500_v29  ;;  %v2628_v54 = vsub.f32 %v2464_v51, %v2500_v29  ;;  %v2404_v37 = vpop.xlane.xlu1 %2403  ;;  %v4213_v55 = vld [vmem:[#allocation2 + $0xa0] sm:$0xff]  ;;  %v4215_v51 = vld [vmem:[#allocation2 + $0xa8] sm:$0xff] }
 0x3cd   : > { %v5173_v24 = vpop.eup %4115  ;;  %v2940_v28 = vadd.f32 %v2908_v36, %v2844_v9  ;;  %4129 = vrcp.f32 %v2720_v42  ;;  %v2589_v35 = vmul.f32 1.442695, %v2531_v30  ;;  %v2685_v58 = vmul.f32 1.442695, %v2627_v31 }
 0x3ce   : > { %v4118_v38 = vpop.eup %4117  ;;  %v2843_v23 = vmul.f32 %v4211_v49, %v2811_v25  ;;  %v2907_v0 = vmul.f32 %v4212_v44, %v2875_v45  ;;  %v2719_v60 = vadd.f32 %v5173_v24, %v5169_v15  ;;  %v2591_v33 = vmul.f32 1.442695, %v2532_v47  ;;  %v4217_v45 = vld [vmem:[#allocation2 + $0xb8] sm:$0xff] }
 0x3cf   : > { %2972 = vst [vmem:[%s4552_s16 + $0x98] sm:$0xff] %v2940_v28  ;;  %v2813_v46 = vmul.f32 %v4118_v38, %v5142_v40  ;;  %v2877_v48 = vmul.f32 %v4118_v38, %v5145_v62  ;;  %v2687_v4 = vmul.f32 1.442695, %v2628_v54  ;;  %4131 = vpow2.f32 %v2589_v35  ;;  %v2466_v8 = vpop.xlane.xlu0 %2465  ;;  %v4218_v54 = vld [vmem:[#allocation3 + $0xb8] sm:$0xff] }
 0x3d0   : > { %v5180_v53 = vpop.eup %4119  ;;  %v2939_v2 = vadd.f32 %v2907_v0, %v2843_v23  ;;  %4133 = vrcp.f32 %v2719_v60  ;;  %v2468_v1 = vpop.xlane.xlu1 %2467  ;;  %v2501_v6 = vmax.f32 %v2402_v14, %v2466_v8 }
 0x3d1   : > { %v5182_v11 = vpop.eup %4121  ;;  %v2845_v12 = vmul.f32 %v4213_v55, %v2813_v46  ;;  %v2909_v27 = vmul.f32 %v4214_v10, %v2877_v48  ;;  %4135 = vpow2.f32 %v2591_v33  ;;  %v2502_v40 = vmax.f32 %v2404_v37, %v2468_v1  ;;  %v4219_v33 = vld [vmem:[#allocation2 + $0xb0] sm:$0xff] }
 0x3d2   : > { %v4124_v39 = vpop.eup %4123  ;;  %2971 = vst [vmem:[%s4552_s16 + $0x90] sm:$0xff] %v2939_v2  ;;  %v2721_v62 = vadd.f32 %v5182_v11, %v5180_v53  ;;  %4137 = vpow2.f32 %v2687_v4  ;;  %v2533_v59 = vsub.f32 %v2402_v14, %v2501_v6  ;;  %v2629_v57 = vsub.f32 %v2466_v8, %v2501_v6  ;;  %v4220_v48 = vld [vmem:[#allocation3 + $0xb0] sm:$0xff] }
 0x3d3   : > { %v5187_v63 = vpop.eup %4125  ;;  %v2814_v3 = vmul.f32 %v4124_v39, %v5149_v41  ;;  %v2878_v50 = vmul.f32 %v4124_v39, %v5153_v61  ;;  %v2941_v56 = vadd.f32 %v2909_v27, %v2845_v12  ;;  %4139 = vpow2.f32 %v2685_v58  ;;  %v2406_v13 = vpop.xlane.xlu0 %2405  ;;  %v4221_v39 = vld [vmem:[#allocation2 + $0xc0] sm:$0xff] }
 0x3d4   : > { %v5191_v5 = vpop.eup %4127  ;;  %4141 = vrcp.f32 %v2721_v62  ;;  %v2534_v7 = vsub.f32 %v2404_v37, %v2502_v40  ;;  %v2630_v17 = vsub.f32 %v2468_v1, %v2502_v40  ;;  %v2593_v21 = vmul.f32 1.442695, %v2533_v59  ;;  %v2408_v22 = vpop.xlane.xlu1 %2407  ;;  %v4222_v59 = vld [vmem:[#allocation3 + $0xc0] sm:$0xff] }
 0x3d5   : > { %v2846_v26 = vmul.f32 %v4215_v51, %v2814_v3  ;;  %v2910_v16 = vmul.f32 %v4216_v34, %v2878_v50  ;;  %2973 = vst [vmem:[%s4552_s16 + $0xa0] sm:$0xff] %v2941_v56  ;;  %v2722_v41 = vadd.f32 %v5191_v5, %v5187_v63  ;;  %v2689_v29 = vmul.f32 1.442695, %v2629_v57 }
 0x3d6   : > { %v2595_v61 = vmul.f32 1.442695, %v2534_v7  ;;  %v2691_v20 = vmul.f32 1.442695, %v2630_v17  ;;  %4143 = vpow2.f32 %v2593_v21  ;;  %v4223_v7 = vld [vmem:[#allocation2 + $0xc8] sm:$0xff] }
 0x3d7   : > { %v4130_v30 = vpop.eup %4129  ;;  %v2942_v31 = vadd.f32 %v2910_v16, %v2846_v26  ;;  %4145 = vrcp.f32 %v2722_v41  ;;  %v2470_v18 = vpop.xlane.xlu0 %2469  ;;  %v4224_v21 = vld [vmem:[#allocation3 + $0xc8] sm:$0xff] }
 0x3d8   : > { %v2816_v52 = vmul.f32 %v4130_v30, %v5159_v43  ;;  %v2880_v9 = vmul.f32 %v4130_v30, %v5164_v32  ;;  %4147 = vpow2.f32 %v2595_v61  ;;  %v2472_v19 = vpop.xlane.xlu1 %2471  ;;  %v2503_v36 = vmax.f32 %v2406_v13, %v2470_v18 }
 0x3d9   : > { %v5198_v42 = vpop.eup %4131  ;;  %2974 = vst [vmem:[%s4552_s16 + $0xa8] sm:$0xff] %v2942_v31  ;;  %4149 = vpow2.f32 %v2691_v20  ;;  %v2504_v14 = vmax.f32 %v2408_v22, %v2472_v19 }
 0x3da   : > { %v4134_v25 = vpop.eup %4133  ;;  %v2848_v47 = vmul.f32 %v4217_v45, %v2816_v52  ;;  %v2912_v37 = vmul.f32 %v4218_v54, %v2880_v9  ;;  %4151 = vpow2.f32 %v2689_v29  ;;  %v2535_v28 = vsub.f32 %v2406_v13, %v2503_v36  ;;  %v4226_v9 = vld [vmem:[#allocation3 + $0xd8] sm:$0xff]  ;;  %v4228_v45 = vld [vmem:[#allocation3 + $0xd0] sm:$0xff] }
 0x3db   : > { %v4136_v35 = vpop.eup %4135  ;;  %v2815_v43 = vmul.f32 %v4134_v25, %v5169_v15  ;;  %v2879_v32 = vmul.f32 %v4134_v25, %v5173_v24  ;;  %v2536_v58 = vsub.f32 %v2408_v22, %v2504_v14  ;;  %v2632_v38 = vsub.f32 %v2472_v19, %v2504_v14  ;;  %v4227_v14 = vld [vmem:[#allocation2 + $0xd0] sm:$0xff] }
 0x3dc   : > { %v4138_v49 = vpop.eup %4137  ;;  %v2944_v23 = vadd.f32 %v2912_v37, %v2848_v47  ;;  %v2597_v44 = vmul.f32 1.442695, %v2535_v28  ;;  %v2631_v0 = vsub.f32 %v2470_v18, %v2503_v36  ;;  %v4225_v18 = vld [vmem:[#allocation2 + $0xd8] sm:$0xff] }
 0x3dd   : > { %v4140_v60 = vpop.eup %4139  ;;  %v2847_v46 = vmul.f32 %v4219_v33, %v2815_v43  ;;  %v2911_v4 = vmul.f32 %v4220_v48, %v2879_v32  ;;  %v2724_v8 = vadd.f32 %v4138_v49, %v4136_v35  ;;  %v2599_v2 = vmul.f32 1.442695, %v2536_v58  ;;  %v4231_v33 = vld [vmem:[#allocation2 + $0xe0] sm:$0xff] }
 0x3de   : > { %v4142_v1 = vpop.eup %4141  ;;  %2976 = vst [vmem:[%s4552_s16 + $0xb8] sm:$0xff] %v2944_v23  ;;  %v2723_v15 = vadd.f32 %v4140_v60, %v5198_v42  ;;  %v2695_v6 = vmul.f32 1.442695, %v2632_v38  ;;  %4153 = vpow2.f32 %v2597_v44  ;;  %v2693_v24 = vmul.f32 1.442695, %v2631_v0  ;;  %v4229_v23 = vld [vmem:[#allocation2 + $0xe8] sm:$0xff] }
 0x3df   : > { %v2943_v55 = vadd.f32 %v2911_v4, %v2847_v46  ;;  %v2817_v12 = vmul.f32 %v4142_v1, %v5180_v53  ;;  %v2881_v10 = vmul.f32 %v4142_v1, %v5182_v11  ;;  %4155 = vrcp.f32 %v2724_v8  ;;  %v4230_v0 = vld [vmem:[#allocation3 + $0xe8] sm:$0xff]  ;;  %v4232_v48 = vld [vmem:[#allocation3 + $0xe0] sm:$0xff] }
 0x3e0   : > { %v4144_v27 = vpop.eup %4143  ;;  %4157 = vrcp.f32 %v2723_v15 }
 0x3e1   : > { %v4146_v40 = vpop.eup %4145  ;;  %2975 = vst [vmem:[%s4552_s16 + $0xb0] sm:$0xff] %v2943_v55  ;;  %v2849_v62 = vmul.f32 %v4221_v39, %v2817_v12  ;;  %v2913_v57 = vmul.f32 %v4222_v59, %v2881_v10  ;;  %4159 = vpow2.f32 %v2599_v2  ;;  %v4233_v10 = vld [vmem:[#allocation2 + $0xf8] sm:$0xff] }
 0x3e2   : > { %v4148_v3 = vpop.eup %4147  ;;  %v2818_v50 = vmul.f32 %v4146_v40, %v5187_v63  ;;  %v2882_v56 = vmul.f32 %v4146_v40, %v5191_v5  ;;  %4161 = vpow2.f32 %v2695_v6  ;;  %v4234_v40 = vld [vmem:[#allocation3 + $0xf8] sm:$0xff] }
 0x3e3   : > { %v4150_v53 = vpop.eup %4149  ;;  %v2945_v11 = vadd.f32 %v2913_v57, %v2849_v62  ;;  %4163 = vpow2.f32 %v2693_v24  ;;  %v4235_v62 = vld [vmem:[#allocation2 + $0xf0] sm:$0xff] }
 0x3e4   : > { %v4152_v13 = vpop.eup %4151  ;;  %v2850_v17 = vmul.f32 %v4223_v7, %v2818_v50  ;;  %v2914_v22 = vmul.f32 %v4224_v21, %v2882_v56  ;;  %v2726_v51 = vadd.f32 %v4150_v53, %v4148_v3  ;;  %v4236_v57 = vld [vmem:[#allocation3 + $0xf0] sm:$0xff] }
 0x3e5   : > { %2977 = vst [vmem:[%s4552_s16 + $0xc0] sm:$0xff] %v2945_v11  ;;  %v2725_v26 = vadd.f32 %v4152_v13, %v4144_v27 }
 0x3e6   : > { %v2946_v34 = vadd.f32 %v2914_v22, %v2850_v17  ;;  %4165 = vrcp.f32 %v2726_v51 }
 0x3e7   : > { %4167 = vrcp.f32 %v2725_v26 }
 0x3e8   : > { %v4154_v16 = vpop.eup %4153  ;;  %2978 = vst [vmem:[%s4552_s16 + $0xc8] sm:$0xff] %v2946_v34 }
 0x3e9   : > { %v4156_v63 = vpop.eup %4155 }
 0x3ea   : > { %v4158_v5 = vpop.eup %4157  ;;  %v2820_v41 = vmul.f32 %v4156_v63, %v4136_v35  ;;  %v2884_v61 = vmul.f32 %v4156_v63, %v4138_v49 }
 0x3eb   : > { %v4160_v20 = vpop.eup %4159  ;;  %v2819_v29 = vmul.f32 %v4158_v5, %v5198_v42  ;;  %v2883_v30 = vmul.f32 %v4158_v5, %v4140_v60 }
 0x3ec   : > { %v4162_v31 = vpop.eup %4161  ;;  %v2852_v52 = vmul.f32 %v4225_v18, %v2820_v41  ;;  %v2916_v19 = vmul.f32 %v4226_v9, %v2884_v61 }
 0x3ed   : > { %v4164_v36 = vpop.eup %4163  ;;  %v2851_v25 = vmul.f32 %v4227_v14, %v2819_v29  ;;  %v2915_v47 = vmul.f32 %v4228_v45, %v2883_v30  ;;  %v2728_v54 = vadd.f32 %v4162_v31, %v4160_v20 }
 0x3ee   : > { %v2948_v37 = vadd.f32 %v2916_v19, %v2852_v52  ;;  %v2727_v28 = vadd.f32 %v4164_v36, %v4154_v16 }
 0x3ef   : > { %v2947_v35 = vadd.f32 %v2915_v47, %v2851_v25  ;;  %4169 = vrcp.f32 %v2728_v54 }
 0x3f0   : > { %v4166_v43 = vpop.eup %4165  ;;  %2980 = vst [vmem:[%s4552_s16 + $0xd8] sm:$0xff] %v2948_v37  ;;  %4171 = vrcp.f32 %v2727_v28 }
 0x3f1   : > { %v4168_v42 = vpop.eup %4167  ;;  %2979 = vst [vmem:[%s4552_s16 + $0xd0] sm:$0xff] %v2947_v35  ;;  %v2822_v32 = vmul.f32 %v4166_v43, %v4148_v3  ;;  %v2886_v58 = vmul.f32 %v4166_v43, %v4150_v53 }
 0x3f2   : > { %v2821_v38 = vmul.f32 %v4168_v42, %v4144_v27  ;;  %v2885_v49 = vmul.f32 %v4168_v42, %v4152_v13 }
 0x3f3   : > { %v2854_v44 = vmul.f32 %v4229_v23, %v2822_v32  ;;  %v2918_v60 = vmul.f32 %v4230_v0, %v2886_v58 }
 0x3f4   : > { %v2853_v46 = vmul.f32 %v4231_v33, %v2821_v38  ;;  %v2917_v4 = vmul.f32 %v4232_v48, %v2885_v49 }
 0x3f5   : > { %v2950_v8 = vadd.f32 %v2918_v60, %v2854_v44 }
 0x3f6   : > { %v2949_v2 = vadd.f32 %v2917_v4, %v2853_v46 }
 0x3f7   : > { %2982 = vst [vmem:[%s4552_s16 + $0xe8] sm:$0xff] %v2950_v8 }
 0x3f8   : > { %2981 = vst [vmem:[%s4552_s16 + $0xe0] sm:$0xff] %v2949_v2 }
 0x3f9   : > { %v4170_v1 = vpop.eup %4169 }
 0x3fa   : > { %v4172_v15 = vpop.eup %4171  ;;  %v2824_v6 = vmul.f32 %v4170_v1, %v4160_v20  ;;  %v2888_v24 = vmul.f32 %v4170_v1, %v4162_v31 }
 0x3fb   : > { %v2823_v55 = vmul.f32 %v4172_v15, %v4154_v16  ;;  %v2887_v12 = vmul.f32 %v4172_v15, %v4164_v36 }
 0x3fc   : > { %v2856_v27 = vmul.f32 %v4233_v10, %v2824_v6  ;;  %v2920_v39 = vmul.f32 %v4234_v40, %v2888_v24 }
 0x3fd   : > { %v2855_v59 = vmul.f32 %v4235_v62, %v2823_v55  ;;  %v2919_v3 = vmul.f32 %v4236_v57, %v2887_v12 }
 0x3fe   : > { %v2952_v50 = vadd.f32 %v2920_v39, %v2856_v27 }
 0x3ff   : > { %v2951_v56 = vadd.f32 %v2919_v3, %v2855_v59 }
 0x400   : > { %2984 = vst [vmem:[%s4552_s16 + $0xf8] sm:$0xff] %v2952_v50 }
 0x401   : > { %2983 = vst [vmem:[%s4552_s16 + $0xf0] sm:$0xff] %v2951_v56 }
 0x402 PF: > { %s16_s27 = sadd.s32 1, %s4291_s27   ;;  %s5248_s21 = smov %s4271_s22 }
 0x403   : > { %p13_p0 = scmp.ge.s32.totalorder %s16_s27, 6   ;;  %s5249_s22 = smov %s4384_s11 }
 0x404   : > { %s5250_s23 = smov %s4283_s25  ;;  %s5251_s24 = smov %s4287_s26 }
 0x405   : > { %s5252_s25 = smov %s5255_s28  ;;  %s5253_s26 = smov %s5259_s29 }
 0x406   :  { %15 = sbr.rel (!%p13_p0) target bundleno = 4 (0x4), region = 174 }

// kernel: micro_forward.11
= control target key start
LH: loop header
LB: loop body
LE: loop exit
PB: predicated region body
PF: predicated region fallthrough
CT: control target
= control target key end

     0   :  { %s2038_s15 = smov 0   ;;  %s2040_s16 = smov 0   ;;  %s2383_s0 = inlined_call_operand.vmem [shape: bf16[512,512], index: 0, kind: input, shape index: {}]   ;;  %s2384_s1 = inlined_call_operand.vmem [shape: bf16[512,128], index: 1, kind: input, shape index: {}]   ;;  %s2385_s2 = inlined_call_operand.vmem [shape: f32[512,128], index: 2, kind: input, shape index: {}, may-alias: {2,4}]   ;;  %s2386_s3 = inlined_call_operand.vmem [shape: bf16[512,128], index: 3, kind: output, shape index: {0}]   ;;  %s2387_s4 = inlined_call_operand.vmem [shape: f32[512,128], index: 4, kind: output, shape index: {1}, may-alias: {2,4}]  }
   0x1   :  { %s2042_s17 = smov 0   ;;  %s2044_s18 = smov 0  }
   0x2   :  { %s2046_s19 = smov 0   ;;  %s2048_s20 = smov 0  }
   0x3   :  { %s2050_s21 = smov 0  }
   0x4 LB: > { %s24_s22 = sadd.s32 1, %s2002_s19  ;;  %s27_s23 = sadd.s32 1, %s2006_s20  ;;  %s2010_s21 = sphi %s2050_s21, %s15_s21   ;;  %s2006_s20 = sphi %s2048_s20, %s2393_s20   ;;  %s2002_s19 = sphi %s2046_s19, %s2392_s19   ;;  %s1998_s18 = sphi %s2044_s18, %s2391_s18   ;;  %s1994_s17 = sphi %s2042_s17, %s2390_s17   ;;  %s1990_s16 = sphi %s2040_s16, %s2389_s16   ;;  %s1986_s15 = sphi %s2038_s15, %s2388_s15  }
   0x5   : > { %p25_p0 = scmp.ge.s32.totalorder %s24_s22, 2  ;;  %p43_p1 = scmp.ne.s32.totalorder %s1990_s16, %s1986_s15 }
   0x6   : > { %p44_p2 = scmp.eq.s32.totalorder %s2010_s21, 0  ;;  %s36_s27 = sadd.s32 1, %s1990_s16 }
   0x7   : > { %s2395_s22 = smov (%p25_p0, %s24_s22), 0  ;;  %s2397_s23 = smov (!%p25_p0, %s27_s23), %s2006_s20 }
   0x8   : > { %p45_p3 = por %p44_p2, %p43_p1  ;;  %p29_p4 = scmp.ge.s32.totalorder %s2397_s23, 2 }
   0x9   : > { %s32_s24 = ssub.s32 %s2002_s19, %s2395_s22  ;;  %p1479_p6 = scmp.ge.s32.totalorder %s2010_s21, 4 }
   0xa   : > { %s2399_s23 = smov (%p29_p4, %s2397_s23), 0 }
   0xb   : > { %s31_s25 = ssub.s32 %s2006_s20, %s2399_s23  ;;  %173 = sbr.rel (%p1479_p6) target bundleno = 41 (0x29), region = 16 }
   0xc   : > { %s33_s26 = sor.u32 %s32_s24, %s31_s25 }
   0xd   : > { %p34_p5 = scmp.eq.s32.totalorder %s33_s26, 0 }
   0xf   : > { %s2089_s28 = scalar_select %p34_p5, %s1990_s16, %s36_s27  }
  0x12   : > { %176 = sbr.rel (!%p45_p3) target bundleno = 41 (0x29), region = 20  ;;  %s178_s29 = sand.u32 (%p45_p3), 1, %s1990_s16  }
  0x13   : > { %s1482_s30 = sshll.u32 (%p45_p3), %s2002_s19, 1  ;;  %s1480_s5 = sshll.u32 (%p45_p3), %s178_s29, 8 }
  0x14   : > { %s1579_s6 = sshll.u32 (%p45_p3), %s2006_s20, 7  ;;  %s2103_s12 = scalar_lea.vmem (%p45_p3), [#allocation3], %s1480_s5 }
  0x15   : > { %s184_s7 = sadd.s32 (%p45_p3), %s1579_s6, %s1482_s30 }
  0x16   : > { %s1484_s8 = sshll.u32 (%p45_p3), %s184_s7, 2 }
  0x17   : > { %s2098_s11 = scalar_lea.vmem (%p45_p3), %s2383_s0, %s1484_s8 }
  0x18   : > { %v276_v0 = vld [vmem:[%s2098_s11] sm:$0xff] (%p45_p3)  ;;  %v278_v1 = vld [vmem:[%s2098_s11 + $0x10] sm:$0xff] (%p45_p3) }
  0x19   : > { %v280_v2 = vld [vmem:[%s2098_s11 + $0x20] sm:$0xff]  ;;  %277 = vst [vmem:[%s2103_s12] sm:$0xff] %v276_v0  ;;  %279 = vst [vmem:[%s2103_s12 + $0x8] sm:$0xff] %v278_v1  ;;  %v282_v3 = vld [vmem:[%s2098_s11 + $0x30] sm:$0xff] }
  0x1a   : > { %281 = vst [vmem:[%s2103_s12 + $0x10] sm:$0xff] %v280_v2  ;;  %v284_v4 = vld [vmem:[%s2098_s11 + $0x40] sm:$0xff]  ;;  %v286_v5 = vld [vmem:[%s2098_s11 + $0x50] sm:$0xff]  ;;  %283 = vst [vmem:[%s2103_s12 + $0x18] sm:$0xff] %v282_v3 }
  0x1b   : > { %285 = vst [vmem:[%s2103_s12 + $0x20] sm:$0xff] %v284_v4  ;;  %287 = vst [vmem:[%s2103_s12 + $0x28] sm:$0xff] %v286_v5  ;;  %v288_v6 = vld [vmem:[%s2098_s11 + $0x60] sm:$0xff]  ;;  %v290_v7 = vld [vmem:[%s2098_s11 + $0x70] sm:$0xff] }
  0x1c   : > { %v292_v8 = vld [vmem:[%s2098_s11 + $0x80] sm:$0xff]  ;;  %289 = vst [vmem:[%s2103_s12 + $0x30] sm:$0xff] %v288_v6  ;;  %291 = vst [vmem:[%s2103_s12 + $0x38] sm:$0xff] %v290_v7  ;;  %v294_v9 = vld [vmem:[%s2098_s11 + $0x90] sm:$0xff] }
  0x1d   : > { %293 = vst [vmem:[%s2103_s12 + $0x40] sm:$0xff] %v292_v8  ;;  %v296_v10 = vld [vmem:[%s2098_s11 + $0xa0] sm:$0xff]  ;;  %v298_v11 = vld [vmem:[%s2098_s11 + $0xb0] sm:$0xff]  ;;  %295 = vst [vmem:[%s2103_s12 + $0x48] sm:$0xff] %v294_v9 }
  0x1e   : > { %297 = vst [vmem:[%s2103_s12 + $0x50] sm:$0xff] %v296_v10  ;;  %299 = vst [vmem:[%s2103_s12 + $0x58] sm:$0xff] %v298_v11  ;;  %v300_v12 = vld [vmem:[%s2098_s11 + $0xc0] sm:$0xff]  ;;  %v302_v13 = vld [vmem:[%s2098_s11 + $0xd0] sm:$0xff] }
  0x1f   : > { %v304_v14 = vld [vmem:[%s2098_s11 + $0xe0] sm:$0xff]  ;;  %301 = vst [vmem:[%s2103_s12 + $0x60] sm:$0xff] %v300_v12  ;;  %303 = vst [vmem:[%s2103_s12 + $0x68] sm:$0xff] %v302_v13  ;;  %v306_v15 = vld [vmem:[%s2098_s11 + $0xf0] sm:$0xff] }
  0x20   : > { %305 = vst [vmem:[%s2103_s12 + $0x70] sm:$0xff] %v304_v14  ;;  %v308_v16 = vld [vmem:[%s2098_s11 + $0x100] sm:$0xff]  ;;  %v310_v17 = vld [vmem:[%s2098_s11 + $0x110] sm:$0xff]  ;;  %307 = vst [vmem:[%s2103_s12 + $0x78] sm:$0xff] %v306_v15 }
  0x21   : > { %309 = vst [vmem:[%s2103_s12 + $0x80] sm:$0xff] %v308_v16  ;;  %311 = vst [vmem:[%s2103_s12 + $0x88] sm:$0xff] %v310_v17  ;;  %v312_v18 = vld [vmem:[%s2098_s11 + $0x120] sm:$0xff]  ;;  %v314_v19 = vld [vmem:[%s2098_s11 + $0x130] sm:$0xff] }
  0x22   : > { %v316_v20 = vld [vmem:[%s2098_s11 + $0x140] sm:$0xff]  ;;  %313 = vst [vmem:[%s2103_s12 + $0x90] sm:$0xff] %v312_v18  ;;  %315 = vst [vmem:[%s2103_s12 + $0x98] sm:$0xff] %v314_v19  ;;  %v318_v21 = vld [vmem:[%s2098_s11 + $0x150] sm:$0xff] }
  0x23   : > { %317 = vst [vmem:[%s2103_s12 + $0xa0] sm:$0xff] %v316_v20  ;;  %v320_v22 = vld [vmem:[%s2098_s11 + $0x160] sm:$0xff]  ;;  %v322_v23 = vld [vmem:[%s2098_s11 + $0x170] sm:$0xff]  ;;  %319 = vst [vmem:[%s2103_s12 + $0xa8] sm:$0xff] %v318_v21 }
  0x24   : > { %321 = vst [vmem:[%s2103_s12 + $0xb0] sm:$0xff] %v320_v22  ;;  %323 = vst [vmem:[%s2103_s12 + $0xb8] sm:$0xff] %v322_v23  ;;  %v324_v24 = vld [vmem:[%s2098_s11 + $0x180] sm:$0xff]  ;;  %v326_v25 = vld [vmem:[%s2098_s11 + $0x190] sm:$0xff] }
  0x25   : > { %v328_v26 = vld [vmem:[%s2098_s11 + $0x1a0] sm:$0xff]  ;;  %325 = vst [vmem:[%s2103_s12 + $0xc0] sm:$0xff] %v324_v24  ;;  %327 = vst [vmem:[%s2103_s12 + $0xc8] sm:$0xff] %v326_v25  ;;  %v330_v27 = vld [vmem:[%s2098_s11 + $0x1b0] sm:$0xff] }
  0x26   : > { %329 = vst [vmem:[%s2103_s12 + $0xd0] sm:$0xff] %v328_v26  ;;  %v332_v28 = vld [vmem:[%s2098_s11 + $0x1c0] sm:$0xff]  ;;  %v334_v29 = vld [vmem:[%s2098_s11 + $0x1d0] sm:$0xff]  ;;  %331 = vst [vmem:[%s2103_s12 + $0xd8] sm:$0xff] %v330_v27 }
  0x27   : > { %333 = vst [vmem:[%s2103_s12 + $0xe0] sm:$0xff] %v332_v28  ;;  %335 = vst [vmem:[%s2103_s12 + $0xe8] sm:$0xff] %v334_v29  ;;  %v336_v30 = vld [vmem:[%s2098_s11 + $0x1e0] sm:$0xff]  ;;  %v338_v31 = vld [vmem:[%s2098_s11 + $0x1f0] sm:$0xff] }
  0x28   : > { %337 = vst [vmem:[%s2103_s12 + $0xf0] sm:$0xff] %v336_v30  ;;  %339 = vst [vmem:[%s2103_s12 + $0xf8] sm:$0xff] %v338_v31 }
  0x29 PF: > { %p1485_p7 = scmp.ge.s32.totalorder %s2010_s21, 1  ;;  %p362_p8 = scmp.lt.s32.totalorder %s2010_s21, 5 }
  0x2b   : > { %p363_p9 = pnand %p1485_p7, %p362_p8 }
  0x2c   : > { %s369_s13 = sand.u32 (!%p363_p9), 1, %s1986_s15   ;;  %s1487_s14 = sshll.u32 (!%p363_p9), %s1994_s17, 5 }
  0x2d   : > { %366 = sbr.rel (%p363_p9) target bundleno = 406 (0x196), region = 66  ;;  %s1486_s24 = sshll.u32 (!%p363_p9), %s369_s13, 8 }
  0x2e   : > { %p412_p10 = scmp.lt.s32.totalorder (!%p363_p9), %s1487_s14, 63  ;;  %s1489_s25 = sshll.u32 (!%p363_p9), %s1998_s18, 5 }
  0x2f   : > { %p418_p11 = scmp.lt.s32.totalorder (!%p363_p9), %s1489_s25, 63  ;;  %p1495_p12 = scmp.ne.s32.totalorder (!%p363_p9), %s1994_s17, 0 }
  0x34   : > { %s2401_s14 = smov (!%p412_p10, %s1487_s14), 63  ;;  %s2403_s25 = smov (!%p418_p11, %s1489_s25), 63 }
  0x35   : > { %s1488_s26 = sshll.u32 %s2401_s14, 2  ;;  %s1490_s5 = sshll.u32 %s2403_s25, 3  ;;  %v2012_v32 = vmov (!%p1495_p12), 0.0  }
  0x36   : > { %s2174_s30 = scalar_lea.vmem %s2384_s1, %s1488_s26  ;;  %s1492_s6 = sshll.u32 %s2403_s25, 2  ;;  %440 = vst [vmem:[#allocation2] sm:$0xff] (!%p1495_p12), %v2012_v32  ;;  %441 = vst [vmem:[#allocation2 + $0x8] sm:$0xff] (!%p1495_p12), %v2012_v32 }
  0x37   : > { %s2179_s9 = scalar_lea.vmem %s2385_s2, %s1490_s5  ;;  %s2184_s18 = scalar_lea.vmem %s2386_s3, %s1492_s6  ;;  %442 = vst [vmem:[#allocation2 + $0x10] sm:$0xff] (!%p1495_p12), %v2012_v32  ;;  %443 = vst [vmem:[#allocation2 + $0x18] sm:$0xff] (!%p1495_p12), %v2012_v32 }
  0x38   : > { %s2189_s13 = scalar_lea.vmem %s2387_s4, %s1490_s5  ;;  %s2191_s14 = scalar_lea.vmem [#allocation3], %s1486_s24  ;;  %444 = vst [vmem:[#allocation2 + $0x20] sm:$0xff] (!%p1495_p12), %v2012_v32  ;;  %445 = vst [vmem:[#allocation2 + $0x28] sm:$0xff] (!%p1495_p12), %v2012_v32 }
  0x39   : > { %439 = sbr.rel (%p1495_p12) target bundleno = 70 (0x46), region = 74  ;;  %446 = vst [vmem:[#allocation2 + $0x30] sm:$0xff] (!%p1495_p12), %v2012_v32  ;;  %447 = vst [vmem:[#allocation2 + $0x38] sm:$0xff] (!%p1495_p12), %v2012_v32 }
  0x3a   : > { %448 = vst [vmem:[#allocation2 + $0x40] sm:$0xff] (!%p1495_p12), %v2012_v32  ;;  %449 = vst [vmem:[#allocation2 + $0x48] sm:$0xff] (!%p1495_p12), %v2012_v32 }
  0x3b   : > { %450 = vst [vmem:[#allocation2 + $0x50] sm:$0xff] (!%p1495_p12), %v2012_v32  ;;  %451 = vst [vmem:[#allocation2 + $0x58] sm:$0xff] (!%p1495_p12), %v2012_v32 }
  0x3c   : > { %452 = vst [vmem:[#allocation2 + $0x60] sm:$0xff] (!%p1495_p12), %v2012_v32  ;;  %453 = vst [vmem:[#allocation2 + $0x68] sm:$0xff] (!%p1495_p12), %v2012_v32 }
  0x3d   : > { %454 = vst [vmem:[#allocation2 + $0x70] sm:$0xff] (!%p1495_p12), %v2012_v32  ;;  %455 = vst [vmem:[#allocation2 + $0x78] sm:$0xff] (!%p1495_p12), %v2012_v32 }
  0x3e   : > { %456 = vst [vmem:[#allocation2 + $0x80] sm:$0xff] (!%p1495_p12), %v2012_v32  ;;  %457 = vst [vmem:[#allocation2 + $0x88] sm:$0xff] (!%p1495_p12), %v2012_v32 }
  0x3f   : > { %458 = vst [vmem:[#allocation2 + $0x90] sm:$0xff] (!%p1495_p12), %v2012_v32  ;;  %459 = vst [vmem:[#allocation2 + $0x98] sm:$0xff] (!%p1495_p12), %v2012_v32 }
  0x40   : > { %460 = vst [vmem:[#allocation2 + $0xa0] sm:$0xff] %v2012_v32  ;;  %461 = vst [vmem:[#allocation2 + $0xa8] sm:$0xff] %v2012_v32 }
  0x41   : > { %462 = vst [vmem:[#allocation2 + $0xb0] sm:$0xff] %v2012_v32  ;;  %463 = vst [vmem:[#allocation2 + $0xb8] sm:$0xff] %v2012_v32 }
  0x42   : > { %464 = vst [vmem:[#allocation2 + $0xc0] sm:$0xff] %v2012_v32  ;;  %465 = vst [vmem:[#allocation2 + $0xc8] sm:$0xff] %v2012_v32 }
  0x43   : > { %466 = vst [vmem:[#allocation2 + $0xd0] sm:$0xff] %v2012_v32  ;;  %467 = vst [vmem:[#allocation2 + $0xd8] sm:$0xff] %v2012_v32 }
  0x44   : > { %468 = vst [vmem:[#allocation2 + $0xe0] sm:$0xff] %v2012_v32  ;;  %469 = vst [vmem:[#allocation2 + $0xe8] sm:$0xff] %v2012_v32 }
  0x45   : > { %470 = vst [vmem:[#allocation2 + $0xf0] sm:$0xff] %v2012_v32  ;;  %471 = vst [vmem:[#allocation2 + $0xf8] sm:$0xff] %v2012_v32 }
  0x46 PF: > { %v1892_v33 = vld [vmem:[%s2174_s30 + $0x40] sm:$0xff]   ;;  %v1894_v35 = vld [vmem:[%s2174_s30 + $0x48] sm:$0xff]   ;;  %v1896_v37 = vld [vmem:[%s2174_s30 + $0x50] sm:$0xff]   ;;  %p1544_p13 = scmp.ne.s32.totalorder %s1994_s17, 1 }
  0x47   : > { %v1893_v34 = vld [vmem:[%s2174_s30] sm:$0xff]   ;;  %1707 = vmatprep.subr.bf16.mxu0 %v1892_v33  ;;  %1819 = vmatprep.subr.bf16.mxu1 %v1892_v33  ;;  %v1895_v36 = vld [vmem:[%s2174_s30 + $0x8] sm:$0xff]   ;;  %v1897_v38 = vld [vmem:[%s2174_s30 + $0x10] sm:$0xff]  }
  0x48   : > { %1708 = vmatpush3.bf16.msra.mxu0 %v1893_v34  ;;  %1827 = vmatpush3.bf16.msra.mxu1 %v1893_v34  ;;  %v1898_v39 = vld [vmem:[%s2174_s30 + $0x58] sm:$0xff]   ;;  %v1900_v41 = vld [vmem:[%s2174_s30 + $0x60] sm:$0xff]   ;;  %v1902_v43 = vld [vmem:[%s2174_s30 + $0x68] sm:$0xff]  }
  0x49   : > { %1709 = vmatprep.subr.bf16.mxu0 %v1894_v35  ;;  %1820 = vmatprep.subr.bf16.mxu1 %v1894_v35  ;;  %v1899_v40 = vld [vmem:[%s2174_s30 + $0x18] sm:$0xff]   ;;  %v1901_v42 = vld [vmem:[%s2174_s30 + $0x20] sm:$0xff]   ;;  %v1903_v46 = vld [vmem:[%s2174_s30 + $0x28] sm:$0xff]  }
  0x4a   : > { %v1910_v44 = vld [vmem:[%s2191_s14 + $0x4] ss:$8 sps:$4 sm:$0xff]   ;;  %v1904_v47 = vld [vmem:[%s2174_s30 + $0x70] sm:$0xff]   ;;  %v1906_v49 = vld [vmem:[%s2174_s30 + $0x78] sm:$0xff]  }
  0x4b   : > { %v1913_v45 = vld [vmem:[%s2191_s14 + $0x84] ss:$8 sps:$4 sm:$0xff]   ;;  %856 = vmatprep.mubr.bf16.mxu0 %v1910_v44  ;;  %v1905_v48 = vld [vmem:[%s2174_s30 + $0x30] sm:$0xff]   ;;  %v1907_v50 = vld [vmem:[%s2174_s30 + $0x38] sm:$0xff]  }
  0x4c   : > { %1710 = vmatpush3.bf16.msra.mxu0 %v1895_v36  ;;  %1828 = vmatpush3.bf16.msra.mxu1 %v1895_v36  ;;  %v1908_v51 = vld [vmem:[%s2191_s14] ss:$8 sps:$4 sm:$0xff]   ;;  %v1914_v53 = vld [vmem:[%s2191_s14 + $0x14] ss:$8 sps:$4 sm:$0xff]   ;;  %v1918_v55 = vld [vmem:[%s2191_s14 + $0x10] ss:$8 sps:$4 sm:$0xff]  }
  0x4d   : > { %1711 = vmatprep.subr.bf16.mxu0 %v1896_v37  ;;  %1821 = vmatprep.subr.bf16.mxu1 %v1896_v37  ;;  %v1911_v52 = vld [vmem:[%s2191_s14 + $0x80] ss:$8 sps:$4 sm:$0xff]   ;;  %v1916_v54 = vld [vmem:[%s2191_s14 + $0x94] ss:$8 sps:$4 sm:$0xff]   ;;  %v1919_v56 = vld [vmem:[%s2191_s14 + $0x90] ss:$8 sps:$4 sm:$0xff]  }
  0x4e   : > { %920 = vmatprep.mubr.bf16.mxu1 %v1913_v45  ;;  %v1920_v57 = vld [vmem:[%s2191_s14 + $0x24] ss:$8 sps:$4 sm:$0xff]   ;;  %v1924_v59 = vld [vmem:[%s2191_s14 + $0x20] ss:$8 sps:$4 sm:$0xff]   ;;  %v1926_v61 = vld [vmem:[%s2191_s14 + $0x34] ss:$8 sps:$4 sm:$0xff]  }
  0x4f   : > { %v1922_v58 = vld [vmem:[%s2191_s14 + $0xa4] ss:$8 sps:$4 sm:$0xff]   ;;  %v1925_v60 = vld [vmem:[%s2191_s14 + $0xa0] ss:$8 sps:$4 sm:$0xff]   ;;  %v1928_v62 = vld [vmem:[%s2191_s14 + $0xb4] ss:$8 sps:$4 sm:$0xff]  }
  0x50   : > { %1712 = vmatpush3.bf16.msra.mxu0 %v1897_v38  ;;  %1829 = vmatpush3.bf16.msra.mxu1 %v1897_v38  ;;  %v1930_v63 = vld [vmem:[%s2191_s14 + $0x30] ss:$8 sps:$4 sm:$0xff]   ;;  %v1932_v1 = vld [vmem:[%s2191_s14 + $0x44] ss:$8 sps:$4 sm:$0xff]   ;;  %v1936_v3 = vld [vmem:[%s2191_s14 + $0x40] ss:$8 sps:$4 sm:$0xff]  }
  0x51   : > { %1713 = vmatprep.subr.bf16.mxu0 %v1898_v39  ;;  %1822 = vmatprep.subr.bf16.mxu1 %v1898_v39  ;;  %v1931_v0 = vld [vmem:[%s2191_s14 + $0xb0] ss:$8 sps:$4 sm:$0xff]   ;;  %v1934_v2 = vld [vmem:[%s2191_s14 + $0xc4] ss:$8 sps:$4 sm:$0xff]   ;;  %v1937_v4 = vld [vmem:[%s2191_s14 + $0xc0] ss:$8 sps:$4 sm:$0xff]  }
  0x52   : > { %v1938_v5 = vld [vmem:[%s2191_s14 + $0x54] ss:$8 sps:$4 sm:$0xff]   ;;  %v1942_v7 = vld [vmem:[%s2191_s14 + $0x50] ss:$8 sps:$4 sm:$0xff]   ;;  %v1944_v9 = vld [vmem:[%s2191_s14 + $0x64] ss:$8 sps:$4 sm:$0xff]  }
  0x53   : > { %v1940_v6 = vld [vmem:[%s2191_s14 + $0xd4] ss:$8 sps:$4 sm:$0xff]   ;;  %v1943_v8 = vld [vmem:[%s2191_s14 + $0xd0] ss:$8 sps:$4 sm:$0xff]   ;;  %v1946_v10 = vld [vmem:[%s2191_s14 + $0xe4] ss:$8 sps:$4 sm:$0xff]  }
  0x54   : > { %1714 = vmatpush3.bf16.msra.mxu0 %v1899_v40  ;;  %1830 = vmatpush3.bf16.msra.mxu1 %v1899_v40  ;;  %v1948_v11 = vld [vmem:[%s2191_s14 + $0x60] ss:$8 sps:$4 sm:$0xff]   ;;  %v1950_v13 = vld [vmem:[%s2191_s14 + $0x74] ss:$8 sps:$4 sm:$0xff]   ;;  %v1954_v15 = vld [vmem:[%s2191_s14 + $0x70] ss:$8 sps:$4 sm:$0xff]  }
  0x55   : > { %1715 = vmatprep.subr.bf16.mxu0 %v1900_v41  ;;  %1823 = vmatprep.subr.bf16.mxu1 %v1900_v41  ;;  %v1949_v12 = vld [vmem:[%s2191_s14 + $0xe0] ss:$8 sps:$4 sm:$0xff]   ;;  %v1952_v14 = vld [vmem:[%s2191_s14 + $0xf4] ss:$8 sps:$4 sm:$0xff]   ;;  %v1955_v16 = vld [vmem:[%s2191_s14 + $0xf0] ss:$8 sps:$4 sm:$0xff]  }
  0x56   : > { %v472_v19 = vld [vmem:[#allocation2] sm:$0xff]  ;;  %v473_v27 = vld [vmem:[#allocation2 + $0x8] sm:$0xff]  ;;  %v474_v39 = vld [vmem:[#allocation2 + $0x10] sm:$0xff] }
  0x57   : > { %v488_v21 = vld [vmem:[#allocation2 + $0x80] sm:$0xff]  ;;  %v489_v29 = vld [vmem:[#allocation2 + $0x88] sm:$0xff]  ;;  %v490_v41 = vld [vmem:[#allocation2 + $0x90] sm:$0xff] }
  0x58   : > { %1716 = vmatpush3.bf16.msra.mxu0 %v1901_v42  ;;  %1831 = vmatpush3.bf16.msra.mxu1 %v1901_v42 }
  0x59   : > { %1717 = vmatprep.subr.bf16.mxu0 %v1902_v43  ;;  %1824 = vmatprep.subr.bf16.mxu1 %v1902_v43 }
  0x5c   : > { %1718 = vmatpush3.bf16.msra.mxu0 %v1903_v46  ;;  %1832 = vmatpush3.bf16.msra.mxu1 %v1903_v46 }
  0x5d   : > { %1719 = vmatprep.subr.bf16.mxu0 %v1904_v47  ;;  %1825 = vmatprep.subr.bf16.mxu1 %v1904_v47  ;;  %v475_v47 = vld [vmem:[#allocation2 + $0x18] sm:$0xff] }
  0x60   : > { %1720 = vmatpush3.bf16.msra.mxu0 %v1905_v48  ;;  %1833 = vmatpush3.bf16.msra.mxu1 %v1905_v48 }
  0x61   : > { %1721 = vmatprep.subr.bf16.mxu0 %v1906_v49  ;;  %1826 = vmatprep.subr.bf16.mxu1 %v1906_v49  ;;  %v491_v49 = vld [vmem:[#allocation2 + $0x98] sm:$0xff] }
  0x64   : > { %1722 = vmatpush3.bf16.msra.mxu0 %v1907_v50  ;;  %1834 = vmatpush3.bf16.msra.mxu1 %v1907_v50 }
  0x67   : > { %857 = vmatmul.mubr.bf16.vlgmr.msra.gmra.mrb[0].mxu0 %v1908_v51  ;;  %921 = vmatmul.mubr.bf16.vlgmr.msra.gmra.mrb[0].mxu1 %v1911_v52 }
  0x68   : > { %864 = vmatprep.mubr.bf16.mxu0 %v1914_v53  ;;  %928 = vmatprep.mubr.bf16.mxu1 %v1916_v54 }
  0x6f   : > { %865 = vmatmul.mubr.bf16.gmra.mrb[4].mxu0 %v1918_v55  ;;  %929 = vmatmul.mubr.bf16.gmra.mrb[4].mxu1 %v1919_v56 }
  0x70   : > { %872 = vmatprep.mubr.bf16.mxu0 %v1920_v57  ;;  %936 = vmatprep.mubr.bf16.mxu1 %v1922_v58 }
  0x77   : > { %873 = vmatmul.mubr.bf16.gmra.mrb[8].mxu0 %v1924_v59  ;;  %937 = vmatmul.mubr.bf16.gmra.mrb[8].mxu1 %v1925_v60  ;;  %v476_v59 = vld [vmem:[#allocation2 + $0x20] sm:$0xff] }
  0x78   : > { %880 = vmatprep.mubr.bf16.mxu0 %v1926_v61  ;;  %944 = vmatprep.mubr.bf16.mxu1 %v1928_v62  ;;  %v492_v61 = vld [vmem:[#allocation2 + $0xa0] sm:$0xff] }
  0x7f   : > { %881 = vmatmul.mubr.bf16.gmra.mrb[12].mxu0 %v1930_v63  ;;  %945 = vmatmul.mubr.bf16.gmra.mrb[12].mxu1 %v1931_v0 }
  0x80   : > { %888 = vmatprep.mubr.bf16.mxu0 %v1932_v1  ;;  %952 = vmatprep.mubr.bf16.mxu1 %v1934_v2 }
  0x87   : > { %889 = vmatmul.mubr.bf16.gmra.mrb[16].mxu0 %v1936_v3  ;;  %953 = vmatmul.mubr.bf16.gmra.mrb[16].mxu1 %v1937_v4  ;;  %v477_v3 = vld [vmem:[#allocation2 + $0x28] sm:$0xff] }
  0x88   : > { %896 = vmatprep.mubr.bf16.mxu0 %v1938_v5  ;;  %960 = vmatprep.mubr.bf16.mxu1 %v1940_v6  ;;  %v493_v5 = vld [vmem:[#allocation2 + $0xa8] sm:$0xff] }
  0x8f   : > { %897 = vmatmul.mubr.bf16.gmra.mrb[20].mxu0 %v1942_v7  ;;  %961 = vmatmul.mubr.bf16.gmra.mrb[20].mxu1 %v1943_v8 }
  0x90   : > { %904 = vmatprep.mubr.bf16.mxu0 %v1944_v9  ;;  %968 = vmatprep.mubr.bf16.mxu1 %v1946_v10 }
  0x97   : > { %905 = vmatmul.mubr.bf16.gmra.mrb[24].mxu0 %v1948_v11  ;;  %969 = vmatmul.mubr.bf16.gmra.mrb[24].mxu1 %v1949_v12 }
  0x98   : > { %912 = vmatprep.mubr.bf16.mxu0 %v1950_v13  ;;  %976 = vmatprep.mubr.bf16.mxu1 %v1952_v14 }
  0x9f   : > { %913 = vmatmul.mubr.bf16.gmra.mrb[28].mxu0 %v1954_v15  ;;  %977 = vmatmul.mubr.bf16.gmra.mrb[28].mxu1 %v1955_v16  ;;  %v478_v15 = vld [vmem:[#allocation2 + $0x30] sm:$0xff] }
 0x13a   : > { %v1723_v17 = vpop.f32.mrb[0].mxu0  ;;  %v1771_v18 = vpop.f32.mrb[0].mxu1 }
 0x13b   : > { %v1724_v20 = vpop.f32.mrb[1].mxu0  ;;  %v1772_v22 = vpop.f32.mrb[1].mxu1 }
 0x13c   : > { %v1725_v23 = vadd.f32 %v1724_v20, %v1723_v17  ;;  %v1773_v24 = vadd.f32 %v1772_v22, %v1771_v18  ;;  %v1726_v25 = vpop.f32.mrb[2].mxu0  ;;  %v1774_v26 = vpop.f32.mrb[2].mxu1  ;;  %v494_v17 = vld [vmem:[#allocation2 + $0xb0] sm:$0xff] }
 0x13d   : > { %v1727_v28 = vpop.f32.mrb[3].mxu0  ;;  %v1775_v30 = vpop.f32.mrb[3].mxu1 }
 0x13e   : > { %v985_v31 = vadd.f32 %v1725_v23, %v472_v19  ;;  %v1001_v32 = vadd.f32 %v1773_v24, %v488_v21  ;;  %v1728_v33 = vadd.f32 %v1727_v28, %v1726_v25  ;;  %v1776_v34 = vadd.f32 %v1775_v30, %v1774_v26  ;;  %v479_v23 = vld [vmem:[#allocation2 + $0x38] sm:$0xff] }
 0x13f   : > { %v495_v25 = vld [vmem:[#allocation2 + $0xb8] sm:$0xff] }
 0x140   : > { %1017 = vst [vmem:[#allocation2] sm:$0xff] %v985_v31  ;;  %1033 = vst [vmem:[#allocation2 + $0x80] sm:$0xff] %v1001_v32  ;;  %v986_v35 = vadd.f32 %v1728_v33, %v473_v27  ;;  %v1002_v36 = vadd.f32 %v1776_v34, %v489_v29 }
 0x142   : > { %1018 = vst [vmem:[#allocation2 + $0x8] sm:$0xff] %v986_v35  ;;  %1034 = vst [vmem:[#allocation2 + $0x88] sm:$0xff] %v1002_v36  ;;  %v1729_v37 = vpop.f32.mrb[4].mxu0  ;;  %v1777_v38 = vpop.f32.mrb[4].mxu1  ;;  %v480_v35 = vld [vmem:[#allocation2 + $0x40] sm:$0xff] }
 0x143   : > { %v1730_v40 = vpop.f32.mrb[5].mxu0  ;;  %v1778_v42 = vpop.f32.mrb[5].mxu1 }
 0x144   : > { %v1731_v43 = vadd.f32 %v1730_v40, %v1729_v37  ;;  %v1779_v44 = vadd.f32 %v1778_v42, %v1777_v38  ;;  %v1732_v45 = vpop.f32.mrb[6].mxu0  ;;  %v1780_v46 = vpop.f32.mrb[6].mxu1  ;;  %v496_v37 = vld [vmem:[#allocation2 + $0xc0] sm:$0xff] }
 0x145   : > { %v1733_v48 = vpop.f32.mrb[7].mxu0  ;;  %v1781_v50 = vpop.f32.mrb[7].mxu1 }
 0x146   : > { %v987_v51 = vadd.f32 %v1731_v43, %v474_v39  ;;  %v1003_v52 = vadd.f32 %v1779_v44, %v490_v41  ;;  %v1734_v53 = vadd.f32 %v1733_v48, %v1732_v45  ;;  %v1782_v54 = vadd.f32 %v1781_v50, %v1780_v46  ;;  %v481_v43 = vld [vmem:[#allocation2 + $0x48] sm:$0xff] }
 0x147   : > { %v497_v45 = vld [vmem:[#allocation2 + $0xc8] sm:$0xff] }
 0x148   : > { %1019 = vst [vmem:[#allocation2 + $0x10] sm:$0xff] %v987_v51  ;;  %1035 = vst [vmem:[#allocation2 + $0x90] sm:$0xff] %v1003_v52  ;;  %v988_v55 = vadd.f32 %v1734_v53, %v475_v47  ;;  %v1004_v56 = vadd.f32 %v1782_v54, %v491_v49 }
 0x14a   : > { %1020 = vst [vmem:[#allocation2 + $0x18] sm:$0xff] %v988_v55  ;;  %1036 = vst [vmem:[#allocation2 + $0x98] sm:$0xff] %v1004_v56  ;;  %v1735_v57 = vpop.f32.mrb[8].mxu0  ;;  %v1783_v58 = vpop.f32.mrb[8].mxu1  ;;  %v482_v55 = vld [vmem:[#allocation2 + $0x50] sm:$0xff] }
 0x14b   : > { %v1736_v60 = vpop.f32.mrb[9].mxu0  ;;  %v1784_v62 = vpop.f32.mrb[9].mxu1 }
 0x14c   : > { %v1737_v63 = vadd.f32 %v1736_v60, %v1735_v57  ;;  %v1785_v0 = vadd.f32 %v1784_v62, %v1783_v58  ;;  %v1738_v1 = vpop.f32.mrb[10].mxu0  ;;  %v1786_v2 = vpop.f32.mrb[10].mxu1  ;;  %v498_v57 = vld [vmem:[#allocation2 + $0xd0] sm:$0xff] }
 0x14d   : > { %v1739_v4 = vpop.f32.mrb[11].mxu0  ;;  %v1787_v6 = vpop.f32.mrb[11].mxu1 }
 0x14e   : > { %v989_v7 = vadd.f32 %v1737_v63, %v476_v59  ;;  %v1005_v8 = vadd.f32 %v1785_v0, %v492_v61  ;;  %v1740_v9 = vadd.f32 %v1739_v4, %v1738_v1  ;;  %v1788_v10 = vadd.f32 %v1787_v6, %v1786_v2  ;;  %v483_v63 = vld [vmem:[#allocation2 + $0x58] sm:$0xff] }
 0x14f   : > { %v499_v1 = vld [vmem:[#allocation2 + $0xd8] sm:$0xff] }
 0x150   : > { %1021 = vst [vmem:[#allocation2 + $0x20] sm:$0xff] %v989_v7  ;;  %1037 = vst [vmem:[#allocation2 + $0xa0] sm:$0xff] %v1005_v8  ;;  %v990_v11 = vadd.f32 %v1740_v9, %v477_v3  ;;  %v1006_v12 = vadd.f32 %v1788_v10, %v493_v5 }
 0x152   : > { %1022 = vst [vmem:[#allocation2 + $0x28] sm:$0xff] %v990_v11  ;;  %1038 = vst [vmem:[#allocation2 + $0xa8] sm:$0xff] %v1006_v12  ;;  %v1741_v13 = vpop.f32.mrb[12].mxu0  ;;  %v1789_v14 = vpop.f32.mrb[12].mxu1  ;;  %v484_v11 = vld [vmem:[#allocation2 + $0x60] sm:$0xff] }
 0x153   : > { %v1742_v16 = vpop.f32.mrb[13].mxu0  ;;  %v1790_v18 = vpop.f32.mrb[13].mxu1 }
 0x154   : > { %v1743_v19 = vadd.f32 %v1742_v16, %v1741_v13  ;;  %v1791_v20 = vadd.f32 %v1790_v18, %v1789_v14  ;;  %v1744_v21 = vpop.f32.mrb[14].mxu0  ;;  %v1792_v22 = vpop.f32.mrb[14].mxu1  ;;  %v500_v13 = vld [vmem:[#allocation2 + $0xe0] sm:$0xff] }
 0x155   : > { %v1745_v24 = vpop.f32.mrb[15].mxu0  ;;  %v1793_v26 = vpop.f32.mrb[15].mxu1 }
 0x156   : > { %v991_v27 = vadd.f32 %v1743_v19, %v478_v15  ;;  %v1007_v28 = vadd.f32 %v1791_v20, %v494_v17  ;;  %v1746_v29 = vadd.f32 %v1745_v24, %v1744_v21  ;;  %v1794_v30 = vadd.f32 %v1793_v26, %v1792_v22  ;;  %v485_v19 = vld [vmem:[#allocation2 + $0x68] sm:$0xff] }
 0x157   : > { %v501_v21 = vld [vmem:[#allocation2 + $0xe8] sm:$0xff] }
 0x158   : > { %1023 = vst [vmem:[#allocation2 + $0x30] sm:$0xff] %v991_v27  ;;  %1039 = vst [vmem:[#allocation2 + $0xb0] sm:$0xff] %v1007_v28  ;;  %v992_v31 = vadd.f32 %v1746_v29, %v479_v23  ;;  %v1008_v32 = vadd.f32 %v1794_v30, %v495_v25 }
 0x15a   : > { %1024 = vst [vmem:[#allocation2 + $0x38] sm:$0xff] %v992_v31  ;;  %1040 = vst [vmem:[#allocation2 + $0xb8] sm:$0xff] %v1008_v32  ;;  %v1747_v33 = vpop.f32.mrb[16].mxu0  ;;  %v1795_v34 = vpop.f32.mrb[16].mxu1  ;;  %v486_v31 = vld [vmem:[#allocation2 + $0x70] sm:$0xff] }
 0x15b   : > { %v1748_v36 = vpop.f32.mrb[17].mxu0  ;;  %v1796_v38 = vpop.f32.mrb[17].mxu1 }
 0x15c   : > { %v1749_v39 = vadd.f32 %v1748_v36, %v1747_v33  ;;  %v1797_v40 = vadd.f32 %v1796_v38, %v1795_v34  ;;  %v1750_v41 = vpop.f32.mrb[18].mxu0  ;;  %v1798_v42 = vpop.f32.mrb[18].mxu1  ;;  %v502_v33 = vld [vmem:[#allocation2 + $0xf0] sm:$0xff] }
 0x15d   : > { %v1751_v44 = vpop.f32.mrb[19].mxu0  ;;  %v1799_v46 = vpop.f32.mrb[19].mxu1 }
 0x15e   : > { %v993_v47 = vadd.f32 %v1749_v39, %v480_v35  ;;  %v1009_v48 = vadd.f32 %v1797_v40, %v496_v37  ;;  %v1752_v49 = vadd.f32 %v1751_v44, %v1750_v41  ;;  %v1800_v50 = vadd.f32 %v1799_v46, %v1798_v42  ;;  %v487_v39 = vld [vmem:[#allocation2 + $0x78] sm:$0xff] }
 0x15f   : > { %v503_v41 = vld [vmem:[#allocation2 + $0xf8] sm:$0xff] }
 0x160   : > { %1025 = vst [vmem:[#allocation2 + $0x40] sm:$0xff] %v993_v47  ;;  %1041 = vst [vmem:[#allocation2 + $0xc0] sm:$0xff] %v1009_v48  ;;  %v994_v51 = vadd.f32 %v1752_v49, %v481_v43  ;;  %v1010_v52 = vadd.f32 %v1800_v50, %v497_v45  ;;  %v1053_v49 = vld [vmem:[#allocation2] sm:$0xff] (!%p1544_p13)  ;;  %v1054_v50 = vld [vmem:[#allocation2 + $0x8] sm:$0xff] (!%p1544_p13) }
 0x162   : > { %1026 = vst [vmem:[#allocation2 + $0x48] sm:$0xff] %v994_v51  ;;  %1042 = vst [vmem:[#allocation2 + $0xc8] sm:$0xff] %v1010_v52  ;;  %v1753_v53 = vpop.f32.mrb[20].mxu0  ;;  %v1801_v54 = vpop.f32.mrb[20].mxu1  ;;  %v1615_v51 = vpack.c.bf16 (!%p1544_p13), %v1054_v50, %v1053_v49  ;;  %v1055_v52 = vld [vmem:[#allocation2 + $0x10] sm:$0xff] (!%p1544_p13) }
 0x163   : > { %v1754_v56 = vpop.f32.mrb[21].mxu0  ;;  %v1802_v58 = vpop.f32.mrb[21].mxu1 }
 0x164   : > { %v1755_v59 = vadd.f32 %v1754_v56, %v1753_v53  ;;  %v1803_v60 = vadd.f32 %v1802_v58, %v1801_v54  ;;  %v1756_v61 = vpop.f32.mrb[22].mxu0  ;;  %v1804_v62 = vpop.f32.mrb[22].mxu1  ;;  %v1056_v53 = vld [vmem:[#allocation2 + $0x18] sm:$0xff] (!%p1544_p13)  ;;  %1616 = vst [vmem:[%s2184_s18] sm:$0xff] (!%p1544_p13), %v1615_v51   ;;  %v1058_v56 = vld [vmem:[#allocation2 + $0x28] sm:$0xff] (!%p1544_p13)  ;;  %v1059_v58 = vld [vmem:[#allocation2 + $0x30] sm:$0xff] (!%p1544_p13) }
 0x165   : > { %v1757_v0 = vpop.f32.mrb[23].mxu0  ;;  %v1805_v2 = vpop.f32.mrb[23].mxu1  ;;  %v1620_v54 = vpack.c.bf16 (!%p1544_p13), %v1056_v53, %v1055_v52  ;;  %v1265_v51 = vld [vmem:[%s2179_s9 + $0xa0] sm:$0xff] (!%p1544_p13) }
 0x166   : > { %v995_v3 = vadd.f32 %v1755_v59, %v482_v55  ;;  %v1011_v4 = vadd.f32 %v1803_v60, %v498_v57  ;;  %v1758_v5 = vadd.f32 %v1757_v0, %v1756_v61  ;;  %v1806_v6 = vadd.f32 %v1805_v2, %v1804_v62  ;;  %v1057_v55 = vld [vmem:[#allocation2 + $0x20] sm:$0xff] (!%p1544_p13)  ;;  %v1060_v59 = vld [vmem:[#allocation2 + $0x38] sm:$0xff] (!%p1544_p13)  ;;  %v1246_v0 = vld [vmem:[%s2179_s9 + $0x8] sm:$0xff] (!%p1544_p13) }
 0x167   : > { %1692 = vst [vmem:[%s2184_s18 + $0x8] sm:$0xff] (!%p1544_p13), %v1620_v54   ;;  %v1625_v57 = vpack.c.bf16 (!%p1544_p13), %v1058_v56, %v1057_v55  ;;  %v1630_v60 = vpack.c.bf16 (!%p1544_p13), %v1060_v59, %v1059_v58  ;;  %v1061_v61 = vld [vmem:[#allocation2 + $0x40] sm:$0xff] (!%p1544_p13)  ;;  %v1248_v2 = vld [vmem:[%s2179_s9 + $0x18] sm:$0xff] (!%p1544_p13) }
 0x168   : > { %1027 = vst [vmem:[#allocation2 + $0x50] sm:$0xff] %v995_v3  ;;  %1043 = vst [vmem:[#allocation2 + $0xd0] sm:$0xff] %v1011_v4  ;;  %v996_v7 = vadd.f32 %v1758_v5, %v483_v63  ;;  %v1012_v8 = vadd.f32 %v1806_v6, %v499_v1  ;;  %v1245_v63 = vld [vmem:[%s2179_s9] sm:$0xff] (!%p1544_p13)  ;;  %v1247_v1 = vld [vmem:[%s2179_s9 + $0x10] sm:$0xff] (!%p1544_p13) }
 0x169   : > { %v1062_v62 = vld [vmem:[#allocation2 + $0x48] sm:$0xff] (!%p1544_p13)  ;;  %1693 = vst [vmem:[%s2184_s18 + $0x10] sm:$0xff] (!%p1544_p13), %v1625_v57   ;;  %v1249_v5 = vld [vmem:[%s2179_s9 + $0x20] sm:$0xff] (!%p1544_p13)  ;;  %1694 = vst [vmem:[%s2184_s18 + $0x18] sm:$0xff] (!%p1544_p13), %v1630_v60  }
 0x16a   : > { %1028 = vst [vmem:[#allocation2 + $0x58] sm:$0xff] %v996_v7  ;;  %1044 = vst [vmem:[#allocation2 + $0xd8] sm:$0xff] %v1012_v8  ;;  %v1759_v9 = vpop.f32.mrb[24].mxu0  ;;  %v1807_v10 = vpop.f32.mrb[24].mxu1  ;;  %v1635_v3 = vpack.c.bf16 (!%p1544_p13), %v1062_v62, %v1061_v61  ;;  %v1250_v6 = vld [vmem:[%s2179_s9 + $0x28] sm:$0xff] (!%p1544_p13)  ;;  %v1251_v7 = vld [vmem:[%s2179_s9 + $0x30] sm:$0xff] (!%p1544_p13) }
 0x16b   : > { %v1760_v12 = vpop.f32.mrb[25].mxu0  ;;  %v1808_v14 = vpop.f32.mrb[25].mxu1  ;;  %v1268_v60 = vld [vmem:[%s2179_s9 + $0xb8] sm:$0xff] (!%p1544_p13) }
 0x16c   : > { %v1761_v15 = vadd.f32 %v1760_v12, %v1759_v9  ;;  %v1809_v16 = vadd.f32 %v1808_v14, %v1807_v10  ;;  %v1762_v17 = vpop.f32.mrb[26].mxu0  ;;  %v1810_v18 = vpop.f32.mrb[26].mxu1  ;;  %v1252_v9 = vld [vmem:[%s2179_s9 + $0x38] sm:$0xff] (!%p1544_p13)  ;;  %1695 = vst [vmem:[%s2184_s18 + $0x20] sm:$0xff] (!%p1544_p13), %v1635_v3   ;;  %v1253_v10 = vld [vmem:[%s2179_s9 + $0x40] sm:$0xff] (!%p1544_p13) }
 0x16d   : > { %v1763_v20 = vpop.f32.mrb[27].mxu0  ;;  %v1811_v22 = vpop.f32.mrb[27].mxu1  ;;  %v1269_v3 = vld [vmem:[%s2179_s9 + $0xc0] sm:$0xff] (!%p1544_p13) }
 0x16e   : > { %v997_v23 = vadd.f32 %v1761_v15, %v484_v11  ;;  %v1013_v24 = vadd.f32 %v1809_v16, %v500_v13  ;;  %v1764_v25 = vadd.f32 %v1763_v20, %v1762_v17  ;;  %v1812_v26 = vadd.f32 %v1811_v22, %v1810_v18  ;;  %v1254_v11 = vld [vmem:[%s2179_s9 + $0x48] sm:$0xff] (!%p1544_p13)  ;;  %v1255_v15 = vld [vmem:[%s2179_s9 + $0x50] sm:$0xff] (!%p1544_p13)  ;;  %v1256_v16 = vld [vmem:[%s2179_s9 + $0x58] sm:$0xff] (!%p1544_p13) }
 0x16f   : > { %v1063_v4 = vld [vmem:[#allocation2 + $0x50] sm:$0xff] (!%p1544_p13)  ;;  %v1257_v18 = vld [vmem:[%s2179_s9 + $0x60] sm:$0xff] (!%p1544_p13) }
 0x170   : > { %1029 = vst [vmem:[#allocation2 + $0x60] sm:$0xff] %v997_v23  ;;  %1045 = vst [vmem:[#allocation2 + $0xe0] sm:$0xff] %v1013_v24  ;;  %v998_v27 = vadd.f32 %v1764_v25, %v485_v19  ;;  %v1014_v28 = vadd.f32 %v1812_v26, %v501_v21  ;;  %v1258_v21 = vld [vmem:[%s2179_s9 + $0x68] sm:$0xff] (!%p1544_p13)  ;;  %v1259_v23 = vld [vmem:[%s2179_s9 + $0x70] sm:$0xff] (!%p1544_p13)  ;;  %v2265_v26 = vadd.f32 (!%p1544_p13), %v1245_v63, %v1053_v49 }
 0x171   : > { %v1064_v8 = vld [vmem:[#allocation2 + $0x58] sm:$0xff] (!%p1544_p13)  ;;  %v1069_v25 = vld [vmem:[#allocation2 + $0x80] sm:$0xff] (!%p1544_p13) }
 0x172   : > { %1030 = vst [vmem:[#allocation2 + $0x68] sm:$0xff] %v998_v27  ;;  %1046 = vst [vmem:[#allocation2 + $0xe8] sm:$0xff] %v1014_v28  ;;  %v1765_v29 = vpop.f32.mrb[28].mxu0  ;;  %v1813_v30 = vpop.f32.mrb[28].mxu1  ;;  %v1640_v12 = vpack.c.bf16 (!%p1544_p13), %v1064_v8, %v1063_v4  ;;  %v1260_v24 = vld [vmem:[%s2179_s9 + $0x78] sm:$0xff] (!%p1544_p13)  ;;  %v2267_v27 = vadd.f32 (!%p1544_p13), %v1246_v0, %v1054_v50  ;;  %v2269_v28 = vadd.f32 (!%p1544_p13), %v1247_v1, %v1055_v52  ;;  %v1266_v52 = vld [vmem:[%s2179_s9 + $0xa8] sm:$0xff] (!%p1544_p13) }
 0x173   : > { %v1766_v32 = vpop.f32.mrb[29].mxu0  ;;  %v1814_v34 = vpop.f32.mrb[29].mxu1  ;;  %v1077_v1 = vld [vmem:[#allocation2 + $0xc0] sm:$0xff] (!%p1544_p13) }
 0x174   : > { %v1767_v35 = vadd.f32 %v1766_v32, %v1765_v29  ;;  %v1815_v36 = vadd.f32 %v1814_v34, %v1813_v30  ;;  %v1768_v37 = vpop.f32.mrb[30].mxu0  ;;  %v1816_v38 = vpop.f32.mrb[30].mxu1  ;;  %1052 = sbr.rel (%p1544_p13) target bundleno = 406 (0x196), region = 78  ;;  %1696 = vst [vmem:[%s2184_s18 + $0x28] sm:$0xff] (!%p1544_p13), %v1640_v12   ;;  %v2271_v29 = vadd.f32 (!%p1544_p13), %v1248_v2, %v1056_v53  ;;  %v1070_v30 = vld [vmem:[#allocation2 + $0x88] sm:$0xff] (!%p1544_p13)  ;;  %v2278_v34 = vadd.f32 (!%p1544_p13), %v1250_v6, %v1058_v56  ;;  %v1075_v53 = vld [vmem:[#allocation2 + $0xb0] sm:$0xff] (!%p1544_p13) }
 0x175   : > { %v1769_v40 = vpop.f32.mrb[31].mxu0  ;;  %v1817_v42 = vpop.f32.mrb[31].mxu1  ;;  %v1262_v32 = vld [vmem:[%s2179_s9 + $0x88] sm:$0xff] (!%p1544_p13)  ;;  %v1301_v12 = vadd.f32 (!%p1544_p13), %v1269_v3, %v1077_v1 }
 0x176   : > { %v999_v43 = vadd.f32 %v1767_v35, %v486_v31  ;;  %v1015_v44 = vadd.f32 %v1815_v36, %v502_v33  ;;  %v1770_v45 = vadd.f32 %v1769_v40, %v1768_v37  ;;  %v1818_v46 = vadd.f32 %v1817_v42, %v1816_v38  ;;  %v1261_v31 = vld [vmem:[%s2179_s9 + $0x80] sm:$0xff] (!%p1544_p13)  ;;  %v1071_v37 = vld [vmem:[#allocation2 + $0x90] sm:$0xff] (!%p1544_p13)  ;;  %v1072_v38 = vld [vmem:[#allocation2 + $0x98] sm:$0xff] (!%p1544_p13) }
 0x177   : > { %v1065_v13 = vld [vmem:[#allocation2 + $0x60] sm:$0xff] (!%p1544_p13)  ;;  %v2276_v33 = vadd.f32 (!%p1544_p13), %v1249_v5, %v1057_v55  ;;  %v2280_v35 = vadd.f32 (!%p1544_p13), %v1251_v7, %v1059_v58  ;;  %v1655_v36 = vpack.c.bf16 (!%p1544_p13), %v1070_v30, %v1069_v25  ;;  %v2284_v40 = vadd.f32 (!%p1544_p13), %v1252_v9, %v1060_v59  ;;  %v1076_v58 = vld [vmem:[#allocation2 + $0xb8] sm:$0xff] (!%p1544_p13)  ;;  %v1267_v59 = vld [vmem:[%s2179_s9 + $0xb0] sm:$0xff] (!%p1544_p13) }
 0x178   : > { %1031 = vst [vmem:[#allocation2 + $0x70] sm:$0xff] %v999_v43  ;;  %1047 = vst [vmem:[#allocation2 + $0xf0] sm:$0xff] %v1015_v44  ;;  %v1000_v47 = vadd.f32 %v1770_v45, %v487_v39  ;;  %v1016_v48 = vadd.f32 %v1818_v46, %v503_v41  ;;  %v1263_v39 = vld [vmem:[%s2179_s9 + $0x90] sm:$0xff] (!%p1544_p13)  ;;  %v2286_v41 = vadd.f32 (!%p1544_p13), %v1253_v10, %v1061_v61  ;;  %v1264_v44 = vld [vmem:[%s2179_s9 + $0x98] sm:$0xff] (!%p1544_p13) }
 0x179   : > { %v1066_v14 = vld [vmem:[#allocation2 + $0x68] sm:$0xff] (!%p1544_p13)  ;;  %v2288_v42 = vadd.f32 (!%p1544_p13), %v1254_v11, %v1062_v62  ;;  %v1660_v43 = vpack.c.bf16 (!%p1544_p13), %v1072_v38, %v1071_v37  ;;  %v1073_v45 = vld [vmem:[#allocation2 + $0xa0] sm:$0xff] (!%p1544_p13)  ;;  %v2295_v49 = vadd.f32 (!%p1544_p13), %v1257_v18, %v1065_v13  ;;  %1699 = vst [vmem:[%s2184_s18 + $0x40] sm:$0xff] (!%p1544_p13), %v1655_v36   ;;  %v1293_v57 = vadd.f32 (!%p1544_p13), %v1261_v31, %v1069_v25  ;;  %v1079_v9 = vld [vmem:[#allocation2 + $0xd0] sm:$0xff] (!%p1544_p13) }
 0x17a   : > { %1032 = vst [vmem:[#allocation2 + $0x78] sm:$0xff] %v1000_v47  ;;  %1048 = vst [vmem:[#allocation2 + $0xf8] sm:$0xff] %v1016_v48  ;;  %v1645_v17 = vpack.c.bf16 (!%p1544_p13), %v1066_v14, %v1065_v13  ;;  %v1074_v46 = vld [vmem:[#allocation2 + $0xa8] sm:$0xff] (!%p1544_p13)  ;;  %v2291_v47 = vadd.f32 (!%p1544_p13), %v1255_v15, %v1063_v4  ;;  %v2293_v48 = vadd.f32 (!%p1544_p13), %v1256_v16, %v1064_v8  ;;  %v1080_v10 = vld [vmem:[#allocation2 + $0xd8] sm:$0xff] (!%p1544_p13) }
 0x17b   : > { %v1665_v50 = vpack.c.bf16 %v1074_v46, %v1073_v45  ;;  %v1290_v54 = vadd.f32 %v1258_v21, %v1066_v14  ;;  %1700 = vst [vmem:[%s2184_s18 + $0x48] sm:$0xff] %v1660_v43   ;;  %v1294_v61 = vadd.f32 %v1262_v32, %v1070_v30  ;;  %v1295_v62 = vadd.f32 %v1263_v39, %v1071_v37  ;;  %v1078_v2 = vld [vmem:[#allocation2 + $0xc8] sm:$0xff]  ;;  %v1271_v15 = vld [vmem:[%s2179_s9 + $0xd0] sm:$0xff]  ;;  %v1272_v16 = vld [vmem:[%s2179_s9 + $0xd8] sm:$0xff] }
 0x17c   : > { %1697 = vst [vmem:[%s2184_s18 + $0x30] sm:$0xff] %v1645_v17   ;;  %v1296_v63 = vadd.f32 %v1264_v44, %v1072_v38  ;;  %v1670_v0 = vpack.c.bf16 %v1076_v58, %v1075_v53  ;;  %v1297_v4 = vadd.f32 %v1265_v51, %v1073_v45  ;;  %v1298_v5 = vadd.f32 %v1266_v52, %v1074_v46  ;;  %v1270_v8 = vld [vmem:[%s2179_s9 + $0xc8] sm:$0xff]  ;;  %v1081_v17 = vld [vmem:[#allocation2 + $0xe0] sm:$0xff]  ;;  %v1275_v32 = vld [vmem:[%s2179_s9 + $0xf0] sm:$0xff] }
 0x17d   : > { %1701 = vst [vmem:[%s2184_s18 + $0x50] sm:$0xff] %v1665_v50   ;;  %v1299_v6 = vadd.f32 %v1267_v59, %v1075_v53  ;;  %v1675_v7 = vpack.c.bf16 %v1078_v2, %v1077_v1  ;;  %v1300_v11 = vadd.f32 %v1268_v60, %v1076_v58  ;;  %v1302_v13 = vadd.f32 %v1270_v8, %v1078_v2  ;;  %v1273_v21 = vld [vmem:[%s2179_s9 + $0xe0] sm:$0xff]  ;;  %v1276_v37 = vld [vmem:[%s2179_s9 + $0xf8] sm:$0xff] }
 0x17e   : > { %1702 = vst [vmem:[%s2184_s18 + $0x58] sm:$0xff] %v1670_v0   ;;  %v1680_v14 = vpack.c.bf16 %v1080_v10, %v1079_v9  ;;  %v1303_v18 = vadd.f32 %v1271_v15, %v1079_v9 }
 0x17f   : > { %v1067_v19 = vld [vmem:[#allocation2 + $0x70] sm:$0xff]  ;;  %1703 = vst [vmem:[%s2184_s18 + $0x60] sm:$0xff] %v1675_v7  }
 0x180   : > { %v1291_v55 = vadd.f32 %v1259_v23, %v1067_v19  ;;  %1704 = vst [vmem:[%s2184_s18 + $0x68] sm:$0xff] %v1680_v14   ;;  %v1083_v30 = vld [vmem:[#allocation2 + $0xf0] sm:$0xff] }
 0x181   : > { %v1068_v20 = vld [vmem:[#allocation2 + $0x78] sm:$0xff]  ;;  %v1307_v38 = vadd.f32 %v1275_v32, %v1083_v30 }
 0x182   : > { %v1650_v22 = vpack.c.bf16 %v1068_v20, %v1067_v19  ;;  %v1292_v56 = vadd.f32 %v1260_v24, %v1068_v20  ;;  %v1304_v19 = vadd.f32 %v1272_v16, %v1080_v10  ;;  %v1082_v20 = vld [vmem:[#allocation2 + $0xe8] sm:$0xff]  ;;  %v1305_v24 = vadd.f32 %v1273_v21, %v1081_v17  ;;  %v1084_v31 = vld [vmem:[#allocation2 + $0xf8] sm:$0xff] }
 0x183   : > { %v1685_v23 = vpack.c.bf16 %v1082_v20, %v1081_v17  ;;  %v1690_v36 = vpack.c.bf16 %v1084_v31, %v1083_v30  ;;  %v1308_v39 = vadd.f32 %v1276_v37, %v1084_v31 }
 0x184   : > { %1698 = vst [vmem:[%s2184_s18 + $0x38] sm:$0xff] %v1650_v22   ;;  %v1274_v22 = vld [vmem:[%s2179_s9 + $0xe8] sm:$0xff] }
 0x185   : > { %v1306_v25 = vadd.f32 %v1274_v22, %v1082_v20  ;;  %1705 = vst [vmem:[%s2184_s18 + $0x70] sm:$0xff] %v1685_v23   ;;  %1309 = vst [vmem:[%s2189_s13] sm:$0xff] %v2265_v26 }
 0x186   : > { %1310 = vst [vmem:[%s2189_s13 + $0x8] sm:$0xff] %v2267_v27  ;;  %1311 = vst [vmem:[%s2189_s13 + $0x10] sm:$0xff] %v2269_v28 }
 0x187   : > { %1312 = vst [vmem:[%s2189_s13 + $0x18] sm:$0xff] %v2271_v29  ;;  %1313 = vst [vmem:[%s2189_s13 + $0x20] sm:$0xff] %v2276_v33 }
 0x188   : > { %1314 = vst [vmem:[%s2189_s13 + $0x28] sm:$0xff] %v2278_v34  ;;  %1315 = vst [vmem:[%s2189_s13 + $0x30] sm:$0xff] %v2280_v35 }
 0x189   : > { %1316 = vst [vmem:[%s2189_s13 + $0x38] sm:$0xff] %v2284_v40  ;;  %1317 = vst [vmem:[%s2189_s13 + $0x40] sm:$0xff] %v2286_v41 }
 0x18a   : > { %1318 = vst [vmem:[%s2189_s13 + $0x48] sm:$0xff] %v2288_v42  ;;  %1319 = vst [vmem:[%s2189_s13 + $0x50] sm:$0xff] %v2291_v47 }
 0x18b   : > { %1320 = vst [vmem:[%s2189_s13 + $0x58] sm:$0xff] %v2293_v48  ;;  %1321 = vst [vmem:[%s2189_s13 + $0x60] sm:$0xff] %v2295_v49 }
 0x18c   : > { %1322 = vst [vmem:[%s2189_s13 + $0x68] sm:$0xff] %v1290_v54  ;;  %1323 = vst [vmem:[%s2189_s13 + $0x70] sm:$0xff] %v1291_v55 }
 0x18d   : > { %1324 = vst [vmem:[%s2189_s13 + $0x78] sm:$0xff] %v1292_v56  ;;  %1325 = vst [vmem:[%s2189_s13 + $0x80] sm:$0xff] %v1293_v57 }
 0x18e   : > { %1326 = vst [vmem:[%s2189_s13 + $0x88] sm:$0xff] %v1294_v61  ;;  %1327 = vst [vmem:[%s2189_s13 + $0x90] sm:$0xff] %v1295_v62 }
 0x18f   : > { %1328 = vst [vmem:[%s2189_s13 + $0x98] sm:$0xff] %v1296_v63  ;;  %1329 = vst [vmem:[%s2189_s13 + $0xa0] sm:$0xff] %v1297_v4 }
 0x190   : > { %1330 = vst [vmem:[%s2189_s13 + $0xa8] sm:$0xff] %v1298_v5  ;;  %1331 = vst [vmem:[%s2189_s13 + $0xb0] sm:$0xff] %v1299_v6 }
 0x191   : > { %1332 = vst [vmem:[%s2189_s13 + $0xb8] sm:$0xff] %v1300_v11  ;;  %1333 = vst [vmem:[%s2189_s13 + $0xc0] sm:$0xff] %v1301_v12 }
 0x192   : > { %1334 = vst [vmem:[%s2189_s13 + $0xc8] sm:$0xff] %v1302_v13  ;;  %1335 = vst [vmem:[%s2189_s13 + $0xd0] sm:$0xff] %v1303_v18 }
 0x193   : > { %1336 = vst [vmem:[%s2189_s13 + $0xd8] sm:$0xff] %v1304_v19  ;;  %1337 = vst [vmem:[%s2189_s13 + $0xe0] sm:$0xff] %v1305_v24 }
 0x194   : > { %1338 = vst [vmem:[%s2189_s13 + $0xe8] sm:$0xff] %v1306_v25  ;;  %1706 = vst [vmem:[%s2184_s18 + $0x78] sm:$0xff] %v1690_v36  }
 0x195   : > { %1339 = vst [vmem:[%s2189_s13 + $0xf0] sm:$0xff] %v1307_v38  ;;  %1340 = vst [vmem:[%s2189_s13 + $0xf8] sm:$0xff] %v1308_v39 }
 0x196 PF: > { %s15_s21 = sadd.s32 1, %s2010_s21   ;;  %s2388_s15 = smov %s1990_s16 }
 0x197   : > { %p12_p0 = scmp.ge.s32.totalorder %s15_s21, 6   ;;  %s2389_s16 = smov %s2089_s28 }
 0x198   : > { %s2390_s17 = smov %s2002_s19  ;;  %s2391_s18 = smov %s2006_s20 }
 0x199   : > { %s2392_s19 = smov %s2395_s22  ;;  %s2393_s20 = smov %s2399_s23 }
 0x19a   :  { %14 = sbr.rel (!%p12_p0) target bundleno = 4 (0x4), region = 131 }

// kernel: micro_forward.13
= control target key start
LH: loop header
LB: loop body
LE: loop exit
PB: predicated region body
PF: predicated region fallthrough
CT: control target
= control target key end

     0   :  { %s992_s9 = smov 0   ;;  %s1660_s0 = inlined_call_operand.vmem [shape: f32[512,128], index: 0, kind: input, shape index: {}]   ;;  %s1661_s1 = inlined_call_operand.vmem [shape: f32[512,128], index: 1, kind: input, shape index: {}]   ;;  %s1662_s2 = inlined_call_operand.vmem [shape: f32[512,128], index: 2, kind: output, shape index: {}]  }
   0x1 LB: > { %s813_s10 = sadd.s32 4294967295, %s975_s9   ;;  %p817_p0 = scmp.ge.s32.totalorder %s975_s9, 1  ;;  %s975_s9 = sphi %s992_s9, %s12_s9  }
   0x2   : > { %p124_p1 = scmp.lt.s32.totalorder %s975_s9, 3 }
   0x4   : > { %p125_p2 = pnand %p817_p0, %p124_p1 }
   0x6   : > { %128 = sbr.rel (%p125_p2) target bundleno = 278 (0x116), region = 28 }
   0xd   : > { %s818_s11 = sshll.u32 %s813_s10, 5 }
   0xe   : > { %p152_p3 = scmp.lt.s32.totalorder %s818_s11, 63 }
  0x10   : > { %s1678_s11 = smov (!%p152_p3, %s818_s11), 63 }
  0x11   : > { %s1000_s12 = sshll.u32 %s1678_s11, 3 }
  0x12   : > { %s1006_s15 = scalar_lea.vmem %s1661_s1, %s1000_s12  ;;  %s1144_s18 = scalar_lea.vmem %s1660_s0, %s1000_s12 }
  0x13   : > { %v1009_v0 = vld [vmem:[%s1006_s15 + $0x10] sm:$0xff]  ;;  %v1012_v1 = vld [vmem:[%s1006_s15] sm:$0xff]  ;;  %v1015_v2 = vld [vmem:[%s1006_s15 + $0x18] sm:$0xff]  ;;  %s1336_s21 = scalar_lea.vmem %s1662_s2, %s1000_s12 }
  0x14   : > { %v203_v3 = vmul.f32 %v1009_v0, %v1009_v0  ;;  %v201_v4 = vmul.f32 %v1012_v1, %v1012_v1  ;;  %v1022_v5 = vld [vmem:[%s1006_s15 + $0x8] sm:$0xff]  ;;  %v204_v6 = vmul.f32 %v1015_v2, %v1015_v2  ;;  %v1032_v9 = vld [vmem:[%s1006_s15 + $0x20] sm:$0xff]  ;;  %v1039_v12 = vld [vmem:[%s1006_s15 + $0x38] sm:$0xff] }
  0x15   : > { %v202_v7 = vmul.f32 %v1022_v5, %v1022_v5  ;;  %v1029_v8 = vld [vmem:[%s1006_s15 + $0x28] sm:$0xff]  ;;  %v205_v11 = vmul.f32 %v1032_v9, %v1032_v9  ;;  %v1042_v13 = vld [vmem:[%s1006_s15 + $0x30] sm:$0xff]  ;;  %v208_v14 = vmul.f32 %v1039_v12, %v1039_v12  ;;  %v1052_v17 = vld [vmem:[%s1006_s15 + $0x40] sm:$0xff] }
  0x16   : > { %237 = vadd.xlane.f32.xlu1 %v203_v3  ;;  %233 = vadd.xlane.f32.xlu0 %v201_v4  ;;  %v206_v10 = vmul.f32 %v1029_v8, %v1029_v8  ;;  %v207_v15 = vmul.f32 %v1042_v13, %v1042_v13  ;;  %v1049_v16 = vld [vmem:[%s1006_s15 + $0x48] sm:$0xff]  ;;  %v209_v19 = vmul.f32 %v1052_v17, %v1052_v17  ;;  %v1059_v20 = vld [vmem:[%s1006_s15 + $0x58] sm:$0xff]  ;;  %v1062_v21 = vld [vmem:[%s1006_s15 + $0x50] sm:$0xff] }
  0x17   : > { %v210_v18 = vmul.f32 %v1049_v16, %v1049_v16  ;;  %v212_v22 = vmul.f32 %v1059_v20, %v1059_v20  ;;  %v211_v23 = vmul.f32 %v1062_v21, %v1062_v21  ;;  %v1069_v24 = vld [vmem:[%s1006_s15 + $0x68] sm:$0xff]  ;;  %v1072_v25 = vld [vmem:[%s1006_s15 + $0x60] sm:$0xff]  ;;  %v1079_v28 = vld [vmem:[%s1006_s15 + $0x78] sm:$0xff] }
  0x18   : > { %v214_v26 = vmul.f32 %v1069_v24, %v1069_v24  ;;  %v213_v27 = vmul.f32 %v1072_v25, %v1072_v25  ;;  %v1082_v29 = vld [vmem:[%s1006_s15 + $0x70] sm:$0xff]  ;;  %v216_v30 = vmul.f32 %v1079_v28, %v1079_v28  ;;  %v1089_v32 = vld [vmem:[%s1006_s15 + $0x88] sm:$0xff]  ;;  %v1092_v33 = vld [vmem:[%s1006_s15 + $0x80] sm:$0xff] }
  0x19   : > { %v215_v31 = vmul.f32 %v1082_v29, %v1082_v29  ;;  %v218_v34 = vmul.f32 %v1089_v32, %v1089_v32  ;;  %v217_v35 = vmul.f32 %v1092_v33, %v1092_v33  ;;  %v1099_v36 = vld [vmem:[%s1006_s15 + $0x98] sm:$0xff]  ;;  %v1102_v37 = vld [vmem:[%s1006_s15 + $0x90] sm:$0xff]  ;;  %v1109_v40 = vld [vmem:[%s1006_s15 + $0xa8] sm:$0xff] }
  0x1a   : > { %239 = vadd.xlane.f32.xlu1 %v204_v6  ;;  %235 = vadd.xlane.f32.xlu0 %v202_v7  ;;  %v220_v38 = vmul.f32 %v1099_v36, %v1099_v36  ;;  %v219_v39 = vmul.f32 %v1102_v37, %v1102_v37  ;;  %v1112_v41 = vld [vmem:[%s1006_s15 + $0xa0] sm:$0xff]  ;;  %v222_v42 = vmul.f32 %v1109_v40, %v1109_v40  ;;  %v1119_v44 = vld [vmem:[%s1006_s15 + $0xb8] sm:$0xff]  ;;  %v1122_v45 = vld [vmem:[%s1006_s15 + $0xb0] sm:$0xff] }
  0x1b   : > { %1667 = vst [vmem:[#allocation2_spill] sm:$0xff] %v1112_v41  ;;  %v221_v43 = vmul.f32 %v1112_v41, %v1112_v41  ;;  %1668 = vst [vmem:[#allocation3_spill] sm:$0xff] %v1119_v44  ;;  %v224_v46 = vmul.f32 %v1119_v44, %v1119_v44  ;;  %v223_v47 = vmul.f32 %v1122_v45, %v1122_v45  ;;  %v1129_v48 = vld [vmem:[%s1006_s15 + $0xc8] sm:$0xff]  ;;  %v193_v49 = vld [vmem:[%s1006_s15 + $0xc0] sm:$0xff] }
  0x1c   : > { %1669 = vst [vmem:[#allocation4_spill] sm:$0xff] %v1122_v45  ;;  %1670 = vst [vmem:[#allocation5_spill] sm:$0xff] %v1129_v48  ;;  %v226_v50 = vmul.f32 %v1129_v48, %v1129_v48  ;;  %v225_v51 = vmul.f32 %v193_v49, %v193_v49  ;;  %v196_v52 = vld [vmem:[%s1006_s15 + $0xd8] sm:$0xff]  ;;  %v195_v53 = vld [vmem:[%s1006_s15 + $0xd0] sm:$0xff] }
  0x1d   : > { %v228_v54 = vmul.f32 %v196_v52, %v196_v52  ;;  %v227_v55 = vmul.f32 %v195_v53, %v195_v53  ;;  %v198_v56 = vld [vmem:[%s1006_s15 + $0xe8] sm:$0xff]  ;;  %v197_v57 = vld [vmem:[%s1006_s15 + $0xe0] sm:$0xff]  ;;  %v200_v60 = vld [vmem:[%s1006_s15 + $0xf8] sm:$0xff] }
  0x1e   : > { %243 = vadd.xlane.f32.xlu1 %v206_v10  ;;  %241 = vadd.xlane.f32.xlu0 %v205_v11  ;;  %v230_v58 = vmul.f32 %v198_v56, %v198_v56  ;;  %v229_v59 = vmul.f32 %v197_v57, %v197_v57  ;;  %v199_v61 = vld [vmem:[%s1006_s15 + $0xf0] sm:$0xff]  ;;  %v232_v62 = vmul.f32 %v200_v60, %v200_v60  ;;  %v521_v4 = vld [vmem:[%s1144_s18] sm:$0xff]  ;;  %v524_v6 = vld [vmem:[%s1144_s18 + $0x18] sm:$0xff] }
  0x1f   : > { %v231_v63 = vmul.f32 %v199_v61, %v199_v61  ;;  %v523_v3 = vld [vmem:[%s1144_s18 + $0x10] sm:$0xff]  ;;  %v522_v7 = vld [vmem:[%s1144_s18 + $0x8] sm:$0xff]  ;;  %v533_v52 = vld [vmem:[%s1144_s18 + $0x60] sm:$0xff] }
  0x20   : > { %v526_v10 = vld [vmem:[%s1144_s18 + $0x28] sm:$0xff]  ;;  %v531_v49 = vld [vmem:[%s1144_s18 + $0x50] sm:$0xff]  ;;  %v536_v53 = vld [vmem:[%s1144_s18 + $0x78] sm:$0xff] }
  0x21   : > { %v538_v56 = vld [vmem:[%s1144_s18 + $0x88] sm:$0xff]  ;;  %v537_v57 = vld [vmem:[%s1144_s18 + $0x80] sm:$0xff]  ;;  %v539_v61 = vld [vmem:[%s1144_s18 + $0x90] sm:$0xff] }
  0x22   : > { %247 = vadd.xlane.f32.xlu1 %v208_v14  ;;  %245 = vadd.xlane.f32.xlu0 %v207_v15  ;;  %v1153_v14 = vmul.f32 0.33333334, %v523_v3 }
  0x26   : > { %251 = vadd.xlane.f32.xlu1 %v210_v18  ;;  %249 = vadd.xlane.f32.xlu0 %v209_v19  ;;  %v525_v18 = vld [vmem:[%s1144_s18 + $0x20] sm:$0xff]  ;;  %v528_v19 = vld [vmem:[%s1144_s18 + $0x38] sm:$0xff] }
  0x2a   : > { %255 = vadd.xlane.f32.xlu1 %v212_v22  ;;  %253 = vadd.xlane.f32.xlu0 %v211_v23  ;;  %v1160_v22 = vmul.f32 0.33333334, %v521_v4  ;;  %v1162_v23 = vmul.f32 0.33333334, %v524_v6  ;;  %v1209_v4 = vmul.f32 0.33333334, %v533_v52 }
  0x2b   : > { %v1211_v6 = vmul.f32 0.33333334, %v536_v53 }
  0x2e   : > { %259 = vadd.xlane.f32.xlu1 %v214_v26  ;;  %257 = vadd.xlane.f32.xlu0 %v213_v27  ;;  %v527_v26 = vld [vmem:[%s1144_s18 + $0x30] sm:$0xff]  ;;  %v530_v27 = vld [vmem:[%s1144_s18 + $0x48] sm:$0xff] }
  0x32   : > { %263 = vadd.xlane.f32.xlu1 %v216_v30  ;;  %261 = vadd.xlane.f32.xlu0 %v215_v31  ;;  %v1167_v30 = vmul.f32 0.33333334, %v522_v7  ;;  %v1169_v31 = vmul.f32 0.33333334, %v526_v10  ;;  %v1216_v10 = vmul.f32 0.33333334, %v538_v56 }
  0x36   : > { %267 = vadd.xlane.f32.xlu1 %v218_v34  ;;  %265 = vadd.xlane.f32.xlu0 %v217_v35  ;;  %v529_v34 = vld [vmem:[%s1144_s18 + $0x40] sm:$0xff]  ;;  %v1172_v35 = vmul.f32 0.33333334, %v525_v18  ;;  %v1218_v18 = vmul.f32 0.33333334, %v537_v57 }
  0x3a   : > { %271 = vadd.xlane.f32.xlu1 %v220_v38  ;;  %269 = vadd.xlane.f32.xlu0 %v219_v39  ;;  %v1174_v38 = vmul.f32 0.33333334, %v528_v19  ;;  %v532_v39 = vld [vmem:[%s1144_s18 + $0x58] sm:$0xff] }
  0x3e   : > { %275 = vadd.xlane.f32.xlu1 %v222_v42  ;;  %273 = vadd.xlane.f32.xlu0 %v221_v43 }
  0x42   : > { %279 = vadd.xlane.f32.xlu1 %v224_v46  ;;  %277 = vadd.xlane.f32.xlu0 %v223_v47  ;;  %v1181_v46 = vmul.f32 0.33333334, %v527_v26  ;;  %v1183_v47 = vmul.f32 0.33333334, %v530_v27  ;;  %v1224_v26 = vmul.f32 0.33333334, %v539_v61 }
  0x46   : > { %283 = vadd.xlane.f32.xlu1 %v226_v50  ;;  %281 = vadd.xlane.f32.xlu0 %v225_v51  ;;  %v534_v50 = vld [vmem:[%s1144_s18 + $0x68] sm:$0xff]  ;;  %v1188_v51 = vmul.f32 0.33333334, %v529_v34 }
  0x47   : > { %v1201_v60 = vmul.f32 0.33333334, %v534_v50 }
  0x4a   : > { %287 = vadd.xlane.f32.xlu1 %v228_v54  ;;  %285 = vadd.xlane.f32.xlu0 %v227_v55  ;;  %v535_v54 = vld [vmem:[%s1144_s18 + $0x70] sm:$0xff]  ;;  %v1194_v55 = vmul.f32 0.33333334, %v532_v39 }
  0x4b   : > { %v1213_v7 = vmul.f32 0.33333334, %v535_v54 }
  0x4e   : > { %291 = vadd.xlane.f32.xlu1 %v230_v58  ;;  %289 = vadd.xlane.f32.xlu0 %v229_v59  ;;  %v540_v58 = vld [vmem:[%s1144_s18 + $0x98] sm:$0xff]  ;;  %v1199_v59 = vmul.f32 0.33333334, %v531_v49 }
  0x4f   : > { %v1220_v19 = vmul.f32 0.33333334, %v540_v58 }
  0x52   : > { %295 = vadd.xlane.f32.xlu1 %v232_v62  ;;  %293 = vadd.xlane.f32.xlu0 %v231_v63  ;;  %v542_v62 = vld [vmem:[%s1144_s18 + $0xa8] sm:$0xff] }
  0x53   : > { %v1226_v27 = vmul.f32 0.33333334, %v542_v62 }
  0x55   : > { %1671 = vst [vmem:[#allocation6_spill] sm:$0xff] %v1226_v27 }
  0xa3   : > { %v1151_v11 = vpop.xlane.xlu1 %237  ;;  %v1155_v15 = vpop.xlane.xlu0 %233 }
  0xa4   : > { %834 = vrsqrt.f32 %v1151_v11  ;;  %vm313_vm0 = vcmp.eq.f32.partialorder %v1151_v11, inf  ;;  %vm315_vm1 = vcmp.eq.f32.partialorder %v1151_v11, 0.0  ;;  %v316_v39 = vand.u32 2147483648, %v1151_v11 }
  0xa5   : > { %836 = vrsqrt.f32 %v1155_v15  ;;  %vm299_vm2 = vcmp.eq.f32.partialorder %v1155_v15, inf  ;;  %vm301_vm3 = vcmp.eq.f32.partialorder %v1155_v15, 0.0  ;;  %v302_v52 = vand.u32 2147483648, %v1155_v15 }
  0xa7   : > { %v1177_v42 = vpop.xlane.xlu1 %239  ;;  %v1179_v43 = vpop.xlane.xlu0 %235 }
  0xa8   : > { %838 = vrsqrt.f32 %v1177_v42  ;;  %vm320_vm4 = vcmp.eq.f32.partialorder %v1177_v42, inf  ;;  %vm322_vm5 = vcmp.eq.f32.partialorder %v1177_v42, 0.0  ;;  %v323_v57 = vand.u32 2147483648, %v1177_v42 }
  0xa9   : > { %840 = vrsqrt.f32 %v1179_v43  ;;  %vm306_vm6 = vcmp.eq.f32.partialorder %v1179_v43, inf  ;;  %vm308_vm7 = vcmp.eq.f32.partialorder %v1179_v43, 0.0  ;;  %v309_v61 = vand.u32 2147483648, %v1179_v43 }
  0xab   : > { %v1205_v63 = vpop.xlane.xlu1 %243  ;;  %v1207_v3 = vpop.xlane.xlu0 %241 }
  0xac   : > { %842 = vrsqrt.f32 %v1205_v63  ;;  %vm334_vm8 = vcmp.eq.f32.partialorder %v1205_v63, inf  ;;  %vm336_vm9 = vcmp.eq.f32.partialorder %v1205_v63, 0.0  ;;  %v337_v41 = vand.u32 2147483648, %v1205_v63 }
  0xad   : > { %844 = vrsqrt.f32 %v1207_v3  ;;  %vm327_vm10 = vcmp.eq.f32.partialorder %v1207_v3, inf  ;;  %vm329_vm11 = vcmp.eq.f32.partialorder %v1207_v3, 0.0 }
  0xae   : > { %v835_v34 = vpop.eup %834 }
  0xaf   : > { %v837_v49 = vpop.eup %836  ;;  %v312_v50 = vmul.f32 %v835_v34, %v1151_v11  ;;  %v1236_v53 = vpop.xlane.xlu1 %247 }
  0xb0   : > { %v1238_v54 = vpop.xlane.xlu0 %245  ;;  %v298_v56 = vmul.f32 %v837_v49, %v1155_v15  ;;  %846 = vrsqrt.f32 %v1236_v53  ;;  %vm348_vm12 = vcmp.eq.f32.partialorder %v1236_v53, inf  ;;  %vm350_vm13 = vcmp.eq.f32.partialorder %v1236_v53, 0.0 }
  0xb1   : > { %v314_v58 = vsel %vm313_vm0, %v1151_v11, %v312_v50  ;;  %848 = vrsqrt.f32 %v1238_v54  ;;  %vm341_vm14 = vcmp.eq.f32.partialorder %v1238_v54, inf  ;;  %vm343_vm15 = vcmp.eq.f32.partialorder %v1238_v54, 0.0 }
  0xb2   : > { %v839_v62 = vpop.eup %838  ;;  %v317_v34 = vsel %vm315_vm1, %v316_v39, %v314_v58  ;;  %v300_v49 = vsel %vm299_vm2, %v1155_v15, %v298_v56 }
  0xb3   : > { %v841_v48 = vpop.eup %840  ;;  %v587_v50 = vmax.f32 %v317_v34, 1e-12  ;;  %v303_v45 = vsel %vm301_vm3, %v302_v52, %v300_v49  ;;  %v319_v44 = vmul.f32 %v839_v62, %v1177_v42  ;;  %v1261_v27 = vpop.xlane.xlu1 %251  ;;  %v330_v52 = vand.u32 2147483648, %v1207_v3 }
  0xb4   : > { %v1263_v11 = vpop.xlane.xlu0 %249  ;;  %v585_v39 = vmax.f32 %v303_v45, 1e-12  ;;  %v305_v56 = vmul.f32 %v841_v48, %v1179_v43  ;;  %850 = vrsqrt.f32 %v1261_v27  ;;  %vm362_vm0 = vcmp.eq.f32.partialorder %v1261_v27, inf }
  0xb5   : > { %852 = vrcp.f32 %v587_v50  ;;  %v321_v15 = vsel %vm320_vm4, %v1177_v42, %v319_v44  ;;  %vm364_vm1 = vcmp.eq.f32.partialorder %v1261_v27, 0.0  ;;  %vm355_vm2 = vcmp.eq.f32.partialorder %v1263_v11, inf }
  0xb6   : > { %v843_v58 = vpop.eup %842  ;;  %854 = vrcp.f32 %v585_v39  ;;  %v324_v45 = vsel %vm322_vm5, %v323_v57, %v321_v15  ;;  %v307_v48 = vsel %vm306_vm6, %v1179_v43, %v305_v56  ;;  %v351_v56 = vand.u32 2147483648, %v1236_v53 }
  0xb7   : > { %v845_v62 = vpop.eup %844  ;;  %v588_v34 = vmax.f32 %v324_v45, 1e-12  ;;  %v310_v44 = vsel %vm308_vm7, %v309_v61, %v307_v48  ;;  %v333_v49 = vmul.f32 %v843_v58, %v1205_v63  ;;  %856 = vrsqrt.f32 %v1263_v11  ;;  %v1283_v50 = vpop.xlane.xlu1 %255 }
  0xb8   : > { %v1285_v39 = vpop.xlane.xlu0 %253  ;;  %v586_v42 = vmax.f32 %v310_v44, 1e-12  ;;  %v326_v57 = vmul.f32 %v845_v62, %v1207_v3  ;;  %v344_v45 = vand.u32 2147483648, %v1238_v54  ;;  %vm357_vm3 = vcmp.eq.f32.partialorder %v1263_v11, 0.0 }
  0xb9   : > { %858 = vrcp.f32 %v588_v34  ;;  %v335_v43 = vsel %vm334_vm8, %v1205_v63, %v333_v49  ;;  %vm376_vm4 = vcmp.eq.f32.partialorder %v1283_v50, inf  ;;  %vm378_vm5 = vcmp.eq.f32.partialorder %v1283_v50, 0.0 }
  0xba   : > { %v847_v61 = vpop.eup %846  ;;  %860 = vrcp.f32 %v586_v42  ;;  %v338_v15 = vsel %vm336_vm9, %v337_v41, %v335_v43  ;;  %v328_v58 = vsel %vm327_vm10, %v1207_v3, %v326_v57  ;;  %vm369_vm6 = vcmp.eq.f32.partialorder %v1285_v39, inf }
  0xbb   : > { %v849_v48 = vpop.eup %848  ;;  %v590_v62 = vmax.f32 %v338_v15, 1e-12  ;;  %v331_v34 = vsel %vm329_vm11, %v330_v52, %v328_v58  ;;  %v347_v44 = vmul.f32 %v847_v61, %v1236_v53  ;;  %862 = vrsqrt.f32 %v1283_v50  ;;  %v1305_v49 = vpop.xlane.xlu1 %259 }
  0xbc   : > { %v589_v42 = vmax.f32 %v331_v34, 1e-12  ;;  %v340_v41 = vmul.f32 %v849_v48, %v1238_v54  ;;  %864 = vrsqrt.f32 %v1285_v39  ;;  %v1310_v63 = vpop.xlane.xlu0 %257  ;;  %v365_v52 = vand.u32 2147483648, %v1261_v27 }
  0xbd   : > { %866 = vrcp.f32 %v590_v62  ;;  %v349_v3 = vsel %vm348_vm12, %v1236_v53, %v347_v44  ;;  %vm371_vm7 = vcmp.eq.f32.partialorder %v1285_v39, 0.0  ;;  %vm390_vm8 = vcmp.eq.f32.partialorder %v1305_v49, inf }
  0xbe   : > { %v851_v57 = vpop.eup %850  ;;  %868 = vrcp.f32 %v589_v42  ;;  %v352_v43 = vsel %vm350_vm13, %v351_v56, %v349_v3  ;;  %v342_v61 = vsel %vm341_vm14, %v1238_v54, %v340_v41  ;;  %v358_v42 = vand.u32 2147483648, %v1263_v11 }
  0xbf   : > { %v853_v15 = vpop.eup %852  ;;  %v592_v58 = vmax.f32 %v352_v43, 1e-12  ;;  %v345_v48 = vsel %vm343_vm15, %v344_v45, %v342_v61  ;;  %v361_v62 = vmul.f32 %v851_v57, %v1261_v27  ;;  %870 = vrsqrt.f32 %v1305_v49  ;;  %v1327_v34 = vpop.xlane.xlu1 %263 }
  0xc0   : > { %v855_v53 = vpop.eup %854  ;;  %v622_v56 = vmul.f32 %v853_v15, %v1009_v0  ;;  %v591_v44 = vmax.f32 %v345_v48, 1e-12  ;;  %v1347_v43 = vpop.xlane.xlu0 %261  ;;  %vm392_vm9 = vcmp.eq.f32.partialorder %v1305_v49, 0.0  ;;  %vm383_vm10 = vcmp.eq.f32.partialorder %v1310_v63, inf }
  0xc1   : > { %v857_v41 = vpop.eup %856  ;;  %v618_v54 = vmul.f32 %v855_v53, %v1012_v1  ;;  %872 = vrcp.f32 %v592_v58  ;;  %v363_v45 = vsel %vm362_vm0, %v1261_v27, %v361_v62  ;;  %vm385_vm11 = vcmp.eq.f32.partialorder %v1310_v63, 0.0 }
  0xc2   : > { %v683_v0 = vadd.f32 %v622_v56, %v1153_v14  ;;  %874 = vrcp.f32 %v591_v44  ;;  %v366_v3 = vsel %vm364_vm1, %v365_v52, %v363_v45  ;;  %v354_v57 = vmul.f32 %v857_v41, %v1263_v11 }
  0xc3   : > { %v859_v61 = vpop.eup %858  ;;  %v681_v1 = vadd.f32 %v618_v54, %v1160_v22  ;;  %v594_v15 = vmax.f32 %v366_v3, 1e-12  ;;  %876 = vrsqrt.f32 %v1310_v63  ;;  %v379_v52 = vand.u32 2147483648, %v1283_v50  ;;  %v1359_v48 = vpop.xlane.xlu1 %267 }
  0xc4   : > { %v861_v58 = vpop.eup %860  ;;  %715 = vst [vmem:[%s1336_s21 + $0x10] sm:$0xff] %v683_v0  ;;  %v624_v14 = vmul.f32 %v859_v61, %v1015_v2  ;;  %v356_v27 = vsel %vm355_vm2, %v1263_v11, %v354_v57  ;;  %878 = vrsqrt.f32 %v1327_v34  ;;  %v372_v0 = vand.u32 2147483648, %v1285_v39  ;;  %v1379_v3 = vpop.xlane.xlu0 %265 }
  0xc5   : > { %v863_v22 = vpop.eup %862  ;;  %713 = vst [vmem:[%s1336_s21] sm:$0xff] %v681_v1  ;;  %v620_v62 = vmul.f32 %v861_v58, %v1022_v5  ;;  %880 = vrcp.f32 %v594_v15  ;;  %v359_v53 = vsel %vm357_vm3, %v358_v42, %v356_v27  ;;  %vm404_vm12 = vcmp.eq.f32.partialorder %v1327_v34, inf }
  0xc6   : > { %v865_v2 = vpop.eup %864  ;;  %v684_v56 = vadd.f32 %v624_v14, %v1162_v23  ;;  %v593_v44 = vmax.f32 %v359_v53, 1e-12  ;;  %v375_v41 = vmul.f32 %v863_v22, %v1283_v50  ;;  %882 = vrsqrt.f32 %v1347_v43 }
  0xc7   : > { %v867_v54 = vpop.eup %866  ;;  %v682_v45 = vadd.f32 %v620_v62, %v1167_v30  ;;  %v368_v5 = vmul.f32 %v865_v2, %v1285_v39  ;;  %v1393_v27 = vpop.xlane.xlu1 %271  ;;  %v393_v22 = vand.u32 2147483648, %v1305_v49  ;;  %vm406_vm13 = vcmp.eq.f32.partialorder %v1327_v34, 0.0 }
  0xc8   : > { %v869_v11 = vpop.eup %868  ;;  %716 = vst [vmem:[%s1336_s21 + $0x18] sm:$0xff] %v684_v56  ;;  %v628_v42 = vmul.f32 %v867_v54, %v1029_v8  ;;  %884 = vrcp.f32 %v593_v44  ;;  %v377_v23 = vsel %vm376_vm4, %v1283_v50, %v375_v41  ;;  %v386_v54 = vand.u32 2147483648, %v1310_v63 }
  0xc9   : > { %v871_v30 = vpop.eup %870  ;;  %714 = vst [vmem:[%s1336_s21 + $0x8] sm:$0xff] %v682_v45  ;;  %v626_v57 = vmul.f32 %v869_v11, %v1032_v9  ;;  %v380_v61 = vsel %vm378_vm5, %v379_v52, %v377_v23  ;;  %v370_v8 = vsel %vm369_vm6, %v1285_v39, %v368_v5  ;;  %886 = vrsqrt.f32 %v1359_v48  ;;  %v1412_v45 = vpop.xlane.xlu0 %269 }
  0xca   : > { %v686_v1 = vadd.f32 %v628_v42, %v1169_v31  ;;  %v596_v15 = vmax.f32 %v380_v61, 1e-12  ;;  %v373_v58 = vsel %vm371_vm7, %v372_v0, %v370_v8  ;;  %v389_v14 = vmul.f32 %v871_v30, %v1305_v49 }
  0xcb   : > { %v873_v9 = vpop.eup %872  ;;  %v685_v50 = vadd.f32 %v626_v57, %v1172_v35  ;;  %v595_v52 = vmax.f32 %v373_v58, 1e-12  ;;  %v407_v11 = vand.u32 2147483648, %v1327_v34  ;;  %v1424_v42 = vpop.xlane.xlu1 %275  ;;  %vm397_vm14 = vcmp.eq.f32.partialorder %v1347_v43, inf }
  0xcc   : > { %v875_v62 = vpop.eup %874  ;;  %718 = vst [vmem:[%s1336_s21 + $0x28] sm:$0xff] %v686_v1  ;;  %v632_v31 = vmul.f32 %v873_v9, %v1039_v12  ;;  %888 = vrcp.f32 %v596_v15  ;;  %v391_v39 = vsel %vm390_vm8, %v1305_v49, %v389_v14  ;;  %vm399_vm15 = vcmp.eq.f32.partialorder %v1347_v43, 0.0 }
  0xcd   : > { %v877_v53 = vpop.eup %876  ;;  %717 = vst [vmem:[%s1336_s21 + $0x20] sm:$0xff] %v685_v50  ;;  %v630_v35 = vmul.f32 %v875_v62, %v1042_v13  ;;  %890 = vrcp.f32 %v595_v52  ;;  %v394_v2 = vsel %vm392_vm9, %v393_v22, %v391_v39  ;;  %vm418_vm0 = vcmp.eq.f32.partialorder %v1359_v48, inf }
  0xce   : > { %v879_v56 = vpop.eup %878  ;;  %v688_v12 = vadd.f32 %v632_v31, %v1174_v38  ;;  %v598_v44 = vmax.f32 %v394_v2, 1e-12  ;;  %v382_v41 = vmul.f32 %v877_v53, %v1310_v63  ;;  %892 = vrsqrt.f32 %v1379_v3 }
  0xcf   : > { %v881_v5 = vpop.eup %880  ;;  %v687_v13 = vadd.f32 %v630_v35, %v1181_v46  ;;  %v403_v0 = vmul.f32 %v879_v56, %v1327_v34  ;;  %vm420_vm1 = vcmp.eq.f32.partialorder %v1359_v48, 0.0  ;;  %v421_v62 = vand.u32 2147483648, %v1359_v48 }
  0xd0   : > { %720 = vst [vmem:[%s1336_s21 + $0x38] sm:$0xff] %v688_v12  ;;  %v636_v38 = vmul.f32 %v881_v5, %v1049_v16  ;;  %894 = vrcp.f32 %v598_v44  ;;  %v384_v49 = vsel %vm383_vm10, %v1310_v63, %v382_v41  ;;  %v883_v46 = vpop.eup %882  ;;  %v400_v63 = vand.u32 2147483648, %v1347_v43 }
  0xd1   : > { %719 = vst [vmem:[%s1336_s21 + $0x30] sm:$0xff] %v687_v13  ;;  %v387_v23 = vsel %vm385_vm11, %v386_v54, %v384_v49  ;;  %v405_v30 = vsel %vm404_vm12, %v1327_v34, %v403_v0  ;;  %896 = vrsqrt.f32 %v1393_v27  ;;  %v396_v1 = vmul.f32 %v883_v46, %v1347_v43 }
  0xd2   : > { %v885_v16 = vpop.eup %884  ;;  %v690_v57 = vadd.f32 %v636_v38, %v1183_v47  ;;  %v597_v61 = vmax.f32 %v387_v23, 1e-12  ;;  %v408_v8 = vsel %vm406_vm13, %v407_v11, %v405_v30  ;;  %v1441_v47 = vpop.xlane.xlu0 %273  ;;  %vm411_vm2 = vcmp.eq.f32.partialorder %v1379_v3, inf }
  0xd3   : > { %v634_v15 = vmul.f32 %v885_v16, %v1052_v17  ;;  %v600_v58 = vmax.f32 %v408_v8, 1e-12  ;;  %v398_v34 = vsel %vm397_vm14, %v1347_v43, %v396_v1  ;;  %v887_v14 = vpop.eup %886  ;;  %v1448_v43 = vpop.xlane.xlu1 %279  ;;  %vm413_vm3 = vcmp.eq.f32.partialorder %v1379_v3, 0.0 }
  0xd4   : > { %722 = vst [vmem:[%s1336_s21 + $0x48] sm:$0xff] %v690_v57  ;;  %898 = vrcp.f32 %v597_v61  ;;  %v401_v17 = vsel %vm399_vm15, %v400_v63, %v398_v34  ;;  %v417_v22 = vmul.f32 %v887_v14, %v1359_v48  ;;  %v414_v35 = vand.u32 2147483648, %v1379_v3 }
  0xd5   : > { %v689_v9 = vadd.f32 %v634_v15, %v1188_v51  ;;  %900 = vrcp.f32 %v600_v58  ;;  %v599_v52 = vmax.f32 %v401_v17, 1e-12  ;;  %vm432_vm4 = vcmp.eq.f32.partialorder %v1393_v27, inf }
  0xd6   : > { %v889_v50 = vpop.eup %888  ;;  %902 = vrsqrt.f32 %v1412_v45  ;;  %v419_v53 = vsel %vm418_vm0, %v1359_v48, %v417_v22  ;;  %vm434_vm5 = vcmp.eq.f32.partialorder %v1393_v27, 0.0  ;;  %v1468_v54 = vpop.xlane.xlu0 %277  ;;  %v435_v48 = vand.u32 2147483648, %v1393_v27 }
  0xd7   : > { %v891_v31 = vpop.eup %890  ;;  %721 = vst [vmem:[%s1336_s21 + $0x40] sm:$0xff] %v689_v9  ;;  %v640_v39 = vmul.f32 %v889_v50, %v1059_v20  ;;  %904 = vrsqrt.f32 %v1424_v42  ;;  %v422_v20 = vsel %vm420_vm1, %v421_v62, %v419_v53  ;;  %vm425_vm6 = vcmp.eq.f32.partialorder %v1412_v45, inf  ;;  %v1481_v0 = vpop.xlane.xlu1 %283 }
  0xd8   : > { %v638_v51 = vmul.f32 %v891_v31, %v1062_v21  ;;  %906 = vrcp.f32 %v599_v52  ;;  %v893_v2 = vpop.eup %892  ;;  %v602_v44 = vmax.f32 %v422_v20, 1e-12  ;;  %vm427_vm7 = vcmp.eq.f32.partialorder %v1412_v45, 0.0 }
  0xd9   : > { %v692_v56 = vadd.f32 %v640_v39, %v1194_v55  ;;  %908 = vrsqrt.f32 %v1441_v47  ;;  %v410_v41 = vmul.f32 %v893_v2, %v1379_v3  ;;  %v428_v49 = vand.u32 2147483648, %v1412_v45 }
  0xda   : > { %v895_v21 = vpop.eup %894  ;;  %v691_v12 = vadd.f32 %v638_v51, %v1199_v59  ;;  %910 = vrsqrt.f32 %v1448_v43  ;;  %vm446_vm8 = vcmp.eq.f32.partialorder %v1424_v42, inf  ;;  %vm448_vm9 = vcmp.eq.f32.partialorder %v1424_v42, 0.0  ;;  %v1501_v1 = vpop.xlane.xlu0 %281 }
  0xdb   : > { %v897_v5 = vpop.eup %896  ;;  %724 = vst [vmem:[%s1336_s21 + $0x58] sm:$0xff] %v692_v56  ;;  %v644_v55 = vmul.f32 %v895_v21, %v1069_v24  ;;  %912 = vrcp.f32 %v602_v44  ;;  %v412_v59 = vsel %vm411_vm2, %v1379_v3, %v410_v41  ;;  %v449_v16 = vand.u32 2147483648, %v1424_v42  ;;  %v1510_v14 = vpop.xlane.xlu1 %287 }
  0xdc   : > { %723 = vst [vmem:[%s1336_s21 + $0x50] sm:$0xff] %v691_v12  ;;  %v431_v13 = vmul.f32 %v897_v5, %v1393_v27  ;;  %v415_v38 = vsel %vm413_vm3, %v414_v35, %v412_v59  ;;  %914 = vrsqrt.f32 %v1468_v54  ;;  %vm439_vm10 = vcmp.eq.f32.partialorder %v1441_v47, inf }
  0xdd   : > { %v694_v24 = vadd.f32 %v644_v55, %v1201_v60  ;;  %v601_v46 = vmax.f32 %v415_v38, 1e-12  ;;  %916 = vrsqrt.f32 %v1481_v0  ;;  %vm441_vm11 = vcmp.eq.f32.partialorder %v1441_v47, 0.0 }
  0xde   : > { %v899_v11 = vpop.eup %898  ;;  %v433_v23 = vsel %vm432_vm4, %v1393_v27, %v431_v13  ;;  %v442_v58 = vand.u32 2147483648, %v1441_v47  ;;  %vm460_vm12 = vcmp.eq.f32.partialorder %v1448_v43, inf  ;;  %vm462_vm13 = vcmp.eq.f32.partialorder %v1448_v43, 0.0  ;;  %v1536_v2 = vpop.xlane.xlu0 %285 }
  0xdf   : > { %v901_v30 = vpop.eup %900  ;;  %726 = vst [vmem:[%s1336_s21 + $0x68] sm:$0xff] %v694_v24  ;;  %v642_v60 = vmul.f32 %v899_v11, %v1072_v25  ;;  %v436_v3 = vsel %vm434_vm5, %v435_v48, %v433_v23  ;;  %918 = vrcp.f32 %v601_v46  ;;  %vm453_vm14 = vcmp.eq.f32.partialorder %v1468_v54, inf  ;;  %v1547_v44 = vpop.xlane.xlu1 %291 }
  0xe0   : > { %v903_v57 = vpop.eup %902  ;;  %v648_v61 = vmul.f32 %v901_v30, %v1079_v28  ;;  %v604_v8 = vmax.f32 %v436_v3, 1e-12  ;;  %vm455_vm15 = vcmp.eq.f32.partialorder %v1468_v54, 0.0  ;;  %v456_v5 = vand.u32 2147483648, %v1468_v54 }
  0xe1   : > { %v905_v15 = vpop.eup %904  ;;  %v693_v25 = vadd.f32 %v642_v60, %v1209_v4  ;;  %v424_v27 = vmul.f32 %v903_v57, %v1412_v45  ;;  %vm474_vm0 = vcmp.eq.f32.partialorder %v1481_v0, inf  ;;  %v477_v38 = vand.u32 2147483648, %v1481_v0 }
  0xe2   : > { %v907_v63 = vpop.eup %906  ;;  %v696_v28 = vadd.f32 %v648_v61, %v1211_v6  ;;  %920 = vrcp.f32 %v604_v8  ;;  %v445_v34 = vmul.f32 %v905_v15, %v1424_v42  ;;  %vm476_vm1 = vcmp.eq.f32.partialorder %v1481_v0, 0.0  ;;  %v1567_v23 = vpop.xlane.xlu0 %289 }
  0xe3   : > { %v909_v9 = vpop.eup %908  ;;  %725 = vst [vmem:[%s1336_s21 + $0x60] sm:$0xff] %v693_v25  ;;  %v646_v4 = vmul.f32 %v907_v63, %v1082_v29  ;;  %v426_v17 = vsel %vm425_vm6, %v1412_v45, %v424_v27  ;;  %922 = vrsqrt.f32 %v1501_v1  ;;  %v463_v29 = vand.u32 2147483648, %v1448_v43  ;;  %v1573_v61 = vpop.xlane.xlu1 %295 }
  0xe4   : > { %728 = vst [vmem:[%s1336_s21 + $0x78] sm:$0xff] %v696_v28  ;;  %v429_v6 = vsel %vm427_vm7, %v428_v49, %v426_v17  ;;  %v447_v50 = vsel %vm446_vm8, %v1424_v42, %v445_v34  ;;  %v438_v52 = vmul.f32 %v909_v9, %v1441_v47  ;;  %v911_v22 = vpop.eup %910  ;;  %924 = vrsqrt.f32 %v1510_v14 }
  0xe5   : > { %v695_v62 = vadd.f32 %v646_v4, %v1213_v7  ;;  %v603_v31 = vmax.f32 %v429_v6, 1e-12  ;;  %v450_v39 = vsel %vm448_vm9, %v449_v16, %v447_v50  ;;  %v913_v45 = vpop.eup %912  ;;  %v459_v35 = vmul.f32 %v911_v22, %v1448_v43  ;;  %v543_v50 = vld [vmem:[%s1144_s18 + $0xb0] sm:$0xff]  ;;  %v546_v22 = vld [vmem:[%s1144_s18 + $0xc8] sm:$0xff] }
  0xe6   : > { %v606_v51 = vmax.f32 %v450_v39, 1e-12  ;;  %v440_v53 = vsel %vm439_vm10, %v1441_v47, %v438_v52  ;;  %v915_v56 = vpop.eup %914  ;;  %v652_v7 = vmul.f32 %v913_v45, %v1089_v32  ;;  %vm467_vm2 = vcmp.eq.f32.partialorder %v1501_v1, inf  ;;  %v1673_v45 = vld [vmem:[#allocation2_spill] sm:$0xff] }
  0xe7   : > { %727 = vst [vmem:[%s1336_s21 + $0x70] sm:$0xff] %v695_v62  ;;  %926 = vrcp.f32 %v603_v31  ;;  %v443_v42 = vsel %vm441_vm11, %v442_v58, %v440_v53  ;;  %v461_v21 = vsel %vm460_vm12, %v1448_v43, %v459_v35  ;;  %v452_v12 = vmul.f32 %v915_v56, %v1468_v54  ;;  %v917_v41 = vpop.eup %916  ;;  %v1672_v31 = vld [vmem:[#allocation6_spill] sm:$0xff] }
  0xe8   : > { %928 = vrcp.f32 %v606_v51  ;;  %v605_v20 = vmax.f32 %v443_v42, 1e-12  ;;  %v698_v32 = vadd.f32 %v652_v7, %v1216_v10  ;;  %v464_v47 = vsel %vm462_vm13, %v463_v29, %v461_v21  ;;  %v541_v10 = vld [vmem:[%s1144_s18 + $0xa0] sm:$0xff] }
  0xe9   : > { %930 = vrsqrt.f32 %v1536_v2  ;;  %v919_v55 = vpop.eup %918  ;;  %v608_v48 = vmax.f32 %v464_v47, 1e-12  ;;  %v454_v59 = vsel %vm453_vm14, %v1468_v54, %v452_v12  ;;  %v473_v13 = vmul.f32 %v917_v41, %v1481_v0 }
  0xea   : > { %932 = vrcp.f32 %v605_v20  ;;  %730 = vst [vmem:[%s1336_s21 + $0x88] sm:$0xff] %v698_v32  ;;  %v650_v24 = vmul.f32 %v919_v55, %v1092_v33  ;;  %v457_v43 = vsel %vm455_vm15, %v456_v5, %v454_v59  ;;  %v573_v3 = vmul.f32 0.33333334, %v541_v10  ;;  %v1674_v20 = vld [vmem:[#allocation3_spill] sm:$0xff] }
  0xeb   : > { %934 = vrcp.f32 %v608_v48  ;;  %v607_v11 = vmax.f32 %v457_v43, 1e-12  ;;  %v475_v46 = vsel %vm474_vm0, %v1481_v0, %v473_v13  ;;  %vm469_vm3 = vcmp.eq.f32.partialorder %v1501_v1, 0.0 }
  0xec   : > { %v921_v49 = vpop.eup %920  ;;  %v697_v33 = vadd.f32 %v650_v24, %v1218_v18  ;;  %v478_v60 = vsel %vm476_vm1, %v477_v38, %v475_v46  ;;  %936 = vrsqrt.f32 %v1547_v44  ;;  %v470_v18 = vand.u32 2147483648, %v1501_v1  ;;  %v1676_v46 = vld [vmem:[#allocation5_spill] sm:$0xff] }
  0xed   : > { %v923_v30 = vpop.eup %922  ;;  %v656_v54 = vmul.f32 %v921_v49, %v1099_v36  ;;  %938 = vrcp.f32 %v607_v11  ;;  %v610_v16 = vmax.f32 %v478_v60, 1e-12  ;;  %v544_v36 = vld [vmem:[%s1144_s18 + $0xb8] sm:$0xff]  ;;  %vm488_vm4 = vcmp.eq.f32.partialorder %v1510_v14, inf }
  0xee   : > { %v466_v57 = vmul.f32 %v923_v30, %v1501_v1  ;;  %v925_v0 = vpop.eup %924  ;;  %729 = vst [vmem:[%s1336_s21 + $0x80] sm:$0xff] %v697_v33  ;;  %940 = vrsqrt.f32 %v1567_v23  ;;  %vm490_vm5 = vcmp.eq.f32.partialorder %v1510_v14, 0.0  ;;  %v576_v6 = vmul.f32 0.33333334, %v544_v36  ;;  %v548_v60 = vld [vmem:[%s1144_s18 + $0xd8] sm:$0xff] }
  0xef   : > { %v700_v8 = vadd.f32 %v656_v54, %v1220_v19  ;;  %942 = vrcp.f32 %v610_v16  ;;  %v487_v25 = vmul.f32 %v925_v0, %v1510_v14  ;;  %v491_v19 = vand.u32 2147483648, %v1510_v14 }
  0xf0   : > { %v468_v15 = vsel %vm467_vm2, %v1501_v1, %v466_v57  ;;  %944 = vrsqrt.f32 %v1573_v61  ;;  %v1591_v1 = vpop.xlane.xlu0 %293  ;;  %vm481_vm6 = vcmp.eq.f32.partialorder %v1536_v2, inf  ;;  %v484_v53 = vand.u32 2147483648, %v1536_v2 }
  0xf1   : > { %v927_v27 = vpop.eup %926  ;;  %732 = vst [vmem:[%s1336_s21 + $0x98] sm:$0xff] %v700_v8  ;;  %v471_v58 = vsel %vm469_vm3, %v470_v18, %v468_v15  ;;  %v489_v9 = vsel %vm488_vm4, %v1510_v14, %v487_v25  ;;  %v575_v56 = vmul.f32 0.33333334, %v543_v50  ;;  %vm483_vm7 = vcmp.eq.f32.partialorder %v1536_v2, 0.0 }
  0xf2   : > { %v929_v63 = vpop.eup %928  ;;  %v654_v28 = vmul.f32 %v927_v27, %v1102_v37  ;;  %v609_v34 = vmax.f32 %v471_v58, 1e-12  ;;  %v492_v52 = vsel %vm490_vm5, %v491_v19, %v489_v9  ;;  %v578_v12 = vmul.f32 0.33333334, %v546_v22 }
  0xf3   : > { %v931_v4 = vpop.eup %930  ;;  %v660_v17 = vmul.f32 %v929_v63, %v1109_v40  ;;  %v612_v62 = vmax.f32 %v492_v52, 1e-12  ;;  %v545_v40 = vld [vmem:[%s1144_s18 + $0xc0] sm:$0xff]  ;;  %vm502_vm8 = vcmp.eq.f32.partialorder %v1547_v44, inf  ;;  %vm504_vm9 = vcmp.eq.f32.partialorder %v1547_v44, 0.0 }
  0xf4   : > { %v933_v29 = vpop.eup %932  ;;  %v699_v37 = vadd.f32 %v654_v28, %v1224_v26  ;;  %946 = vrcp.f32 %v609_v34  ;;  %v480_v14 = vmul.f32 %v931_v4, %v1536_v2  ;;  %v577_v47 = vmul.f32 0.33333334, %v545_v40  ;;  %v547_v28 = vld [vmem:[%s1144_s18 + $0xd0] sm:$0xff] }
  0xf5   : > { %v702_v39 = vadd.f32 %v660_v17, %v1672_v31  ;;  %v658_v51 = vmul.f32 %v933_v29, %v1673_v45  ;;  %948 = vrsqrt.f32 %v1591_v1  ;;  %v935_v35 = vpop.eup %934  ;;  %v505_v24 = vand.u32 2147483648, %v1547_v44  ;;  %v963_v17 = vld [vmem:[%s1006_s15 + $0xd8] sm:$0xff]  ;;  %v964_v31 = vld [vmem:[%s1006_s15 + $0xd0] sm:$0xff]  ;;  %v549_v45 = vld [vmem:[%s1144_s18 + $0xe0] sm:$0xff] }
  0xf6   : > { %731 = vst [vmem:[%s1336_s21 + $0x90] sm:$0xff] %v699_v37  ;;  %950 = vrcp.f32 %v612_v62  ;;  %v482_v26 = vsel %vm481_vm6, %v1536_v2, %v480_v14  ;;  %v937_v7 = vpop.eup %936  ;;  %v664_v21 = vmul.f32 %v935_v35, %v1674_v20  ;;  %v1675_v2 = vld [vmem:[#allocation4_spill] sm:$0xff]  ;;  %vm495_vm10 = vcmp.eq.f32.partialorder %v1567_v23, inf  ;;  %v550_v62 = vld [vmem:[%s1144_s18 + $0xe8] sm:$0xff]  ;;  %v966_v20 = vld [vmem:[%s1006_s15 + $0xe0] sm:$0xff] }
  0xf7   : > { %734 = vst [vmem:[%s1336_s21 + $0xa8] sm:$0xff] %v702_v39  ;;  %v701_v42 = vadd.f32 %v658_v51, %v573_v3  ;;  %v485_v41 = vsel %vm483_vm7, %v484_v53, %v482_v26  ;;  %v939_v32 = vpop.eup %938  ;;  %v501_v55 = vmul.f32 %v937_v7, %v1547_v44  ;;  %v498_v54 = vand.u32 2147483648, %v1567_v23  ;;  %v552_v53 = vld [vmem:[%s1144_s18 + $0xf8] sm:$0xff]  ;;  %v965_v35 = vld [vmem:[%s1006_s15 + $0xe8] sm:$0xff] }
  0xf8   : > { %v611_v5 = vmax.f32 %v485_v41, 1e-12  ;;  %v941_v48 = vpop.eup %940  ;;  %v704_v59 = vadd.f32 %v664_v21, %v576_v6  ;;  %v662_v13 = vmul.f32 %v939_v32, %v1675_v2  ;;  %vm497_vm11 = vcmp.eq.f32.partialorder %v1567_v23, 0.0  ;;  %v551_v32 = vld [vmem:[%s1144_s18 + $0xf0] sm:$0xff] }
  0xf9   : > { %733 = vst [vmem:[%s1336_s21 + $0xa0] sm:$0xff] %v701_v42  ;;  %v943_v10 = vpop.eup %942  ;;  %v503_v43 = vsel %vm502_vm8, %v1547_v44, %v501_v55  ;;  %v494_v38 = vmul.f32 %v941_v48, %v1567_v23  ;;  %vm516_vm12 = vcmp.eq.f32.partialorder %v1573_v61, inf  ;;  %v519_v8 = vand.u32 2147483648, %v1573_v61 }
  0xfa   : > { %952 = vrcp.f32 %v611_v5  ;;  %v945_v49 = vpop.eup %944  ;;  %736 = vst [vmem:[%s1336_s21 + $0xb8] sm:$0xff] %v704_v59  ;;  %v703_v11 = vadd.f32 %v662_v13, %v575_v56  ;;  %v668_v30 = vmul.f32 %v943_v10, %v1676_v46  ;;  %v506_v33 = vsel %vm504_vm9, %v505_v24, %v503_v43  ;;  %v967_v5 = vld [vmem:[%s1006_s15 + $0xf8] sm:$0xff]  ;;  %v968_v13 = vld [vmem:[%s1006_s15 + $0xf0] sm:$0xff] }
  0xfb   : > { %v614_v3 = vmax.f32 %v506_v33, 1e-12  ;;  %v496_v16 = vsel %vm495_vm10, %v1567_v23, %v494_v38  ;;  %v515_v44 = vmul.f32 %v945_v49, %v1573_v61  ;;  %vm518_vm13 = vcmp.eq.f32.partialorder %v1573_v61, 0.0  ;;  %v962_v23 = vld [vmem:[%s1006_s15 + $0xc0] sm:$0xff] }
  0xfc   : > { %735 = vst [vmem:[%s1336_s21 + $0xb0] sm:$0xff] %v703_v11  ;;  %v706_v57 = vadd.f32 %v668_v30, %v578_v12  ;;  %v499_v0 = vsel %vm497_vm11, %v498_v54, %v496_v16  ;;  %v580_v58 = vmul.f32 0.33333334, %v548_v60  ;;  %vm509_vm14 = vcmp.eq.f32.partialorder %v1591_v1, inf }
  0xfd   : > { %954 = vrcp.f32 %v614_v3  ;;  %v613_v36 = vmax.f32 %v499_v0, 1e-12  ;;  %v517_v15 = vsel %vm516_vm12, %v1573_v61, %v515_v44  ;;  %v512_v61 = vand.u32 2147483648, %v1591_v1 }
  0xfe   : > { %v947_v18 = vpop.eup %946  ;;  %738 = vst [vmem:[%s1336_s21 + $0xc8] sm:$0xff] %v706_v57  ;;  %v520_v19 = vsel %vm518_vm13, %v519_v8, %v517_v15  ;;  %vm511_vm15 = vcmp.eq.f32.partialorder %v1591_v1, 0.0  ;;  %v579_v29 = vmul.f32 0.33333334, %v547_v28  ;;  %v581_v26 = vmul.f32 0.33333334, %v549_v45 }
  0xff   : > { %v949_v25 = vpop.eup %948  ;;  %v666_v27 = vmul.f32 %v962_v23, %v947_v18  ;;  %956 = vrcp.f32 %v613_v36  ;;  %v616_v34 = vmax.f32 %v520_v19, 1e-12  ;;  %v584_v12 = vmul.f32 0.33333334, %v552_v53 }
 0x100   : > { %v951_v63 = vpop.eup %950  ;;  %v508_v9 = vmul.f32 %v949_v25, %v1591_v1  ;;  %v583_v59 = vmul.f32 0.33333334, %v551_v32 }
 0x101   : > { %v705_v4 = vadd.f32 %v666_v27, %v577_v47  ;;  %v672_v6 = vmul.f32 %v963_v17, %v951_v63  ;;  %958 = vrcp.f32 %v616_v34 }
 0x102   : > { %v510_v50 = vsel %vm509_vm14, %v1591_v1, %v508_v9  ;;  %v582_v1 = vmul.f32 0.33333334, %v550_v62 }
 0x103   : > { %737 = vst [vmem:[%s1336_s21 + $0xc0] sm:$0xff] %v705_v4  ;;  %v708_v52 = vadd.f32 %v672_v6, %v580_v58  ;;  %v513_v37 = vsel %vm511_vm15, %v512_v61, %v510_v50 }
 0x104   : > { %v953_v22 = vpop.eup %952  ;;  %v615_v14 = vmax.f32 %v513_v37, 1e-12 }
 0x105   : > { %740 = vst [vmem:[%s1336_s21 + $0xd8] sm:$0xff] %v708_v52  ;;  %v670_v39 = vmul.f32 %v964_v31, %v953_v22 }
 0x106   : > { %960 = vrcp.f32 %v615_v14 }
 0x107   : > { %v707_v51 = vadd.f32 %v670_v39, %v579_v29  ;;  %v955_v40 = vpop.eup %954 }
 0x108   : > { %v676_v56 = vmul.f32 %v965_v35, %v955_v40 }
 0x109   : > { %739 = vst [vmem:[%s1336_s21 + $0xd0] sm:$0xff] %v707_v51  ;;  %v957_v7 = vpop.eup %956 }
 0x10a   : > { %v710_v42 = vadd.f32 %v676_v56, %v582_v1  ;;  %v674_v21 = vmul.f32 %v966_v20, %v957_v7 }
 0x10b   : > { %v959_v41 = vpop.eup %958 }
 0x10c   : > { %742 = vst [vmem:[%s1336_s21 + $0xe8] sm:$0xff] %v710_v42  ;;  %v709_v47 = vadd.f32 %v674_v21, %v581_v26  ;;  %v680_v55 = vmul.f32 %v967_v5, %v959_v41 }
 0x10e   : > { %741 = vst [vmem:[%s1336_s21 + $0xe0] sm:$0xff] %v709_v47  ;;  %v712_v48 = vadd.f32 %v680_v55, %v584_v12 }
 0x110   : > { %v961_v2 = vpop.eup %960  ;;  %744 = vst [vmem:[%s1336_s21 + $0xf8] sm:$0xff] %v712_v48 }
 0x111   : > { %v678_v24 = vmul.f32 %v968_v13, %v961_v2 }
 0x113   : > { %v711_v10 = vadd.f32 %v678_v24, %v583_v59 }
 0x115   : > { %743 = vst [vmem:[%s1336_s21 + $0xf0] sm:$0xff] %v711_v10 }
 0x116 PF: > { %s12_s9 = sadd.s32 1, %s975_s9  }
 0x117   : > { %p9_p4 = scmp.ge.s32.totalorder %s12_s9, 4  }
 0x119   :  { %11 = sbr.rel (!%p9_p4) target bundleno = 1 (0x1), region = 61 }

// kernel: micro_forward.12
= control target key start
LH: loop header
LB: loop body
LE: loop exit
PB: predicated region body
PF: predicated region fallthrough
CT: control target
= control target key end

     0   :  { %s2582_s0 = inlined_call_operand.vmem [shape: bf16[512,512], index: 0, kind: input, shape index: {}]   ;;  %s2583_s1 = inlined_call_operand.vmem [shape: bf16[512,128], index: 1, kind: input, shape index: {}]   ;;  %s2584_s2 = inlined_call_operand.vmem [shape: f32[512,128], index: 2, kind: input, shape index: {}, may-alias: {2,4}]   ;;  %s2585_s3 = inlined_call_operand.hbm [shape: bf16[512,128], index: 3, kind: output, shape index: {0}]   ;;  %s2586_s4 = inlined_call_operand.vmem [shape: f32[512,128], index: 4, kind: output, shape index: {1}, may-alias: {2,4}]  }
   0x1   :  { %2592 = sst [smem:[#allocation12_spill]] %s2582_s0 }
   0x2   :  { %10 = vsyncpa [#allocation5], 0 }
   0x3   :  { %12 = vsyncpa [#allocation5 + $0x1], 0  ;;  %s2150_s15 = smov 0   ;;  %s2152_s16 = smov 0  }
   0x4   :  { %s2154_s17 = smov 0   ;;  %s2156_s18 = smov 0  }
   0x5   :  { %s2158_s19 = smov 0   ;;  %s2160_s20 = smov 0  }
   0x6   :  { %s2162_s21 = smov 0   ;;  %s2164_s22 = smov 0  }
   0x7   :  { %s2166_s23 = smov 0   ;;  %s2168_s24 = smov 0  }
   0x8 LB: > { %2593 = sst [smem:[#allocation7_spill]] %s2111_s22  ;;  %s1493_s25 = sadd.s32 4294967295, %s2119_s24   ;;  %s2119_s24 = sphi %s2168_s24, %s18_s24   ;;  %s2115_s23 = sphi %s2166_s23, %s2607_s23   ;;  %s2111_s22 = sphi %s2164_s22, %s2606_s22   ;;  %s2107_s21 = sphi %s2162_s21, %s2605_s21   ;;  %s2103_s20 = sphi %s2160_s20, %s2604_s20   ;;  %s2099_s19 = sphi %s2158_s19, %s2612_s19   ;;  %s2095_s18 = sphi %s2156_s18, %s2611_s18   ;;  %s2091_s17 = sphi %s2154_s17, %s2610_s17   ;;  %s2087_s16 = sphi %s2152_s16, %s2609_s16   ;;  %s2083_s15 = sphi %s2150_s15, %s2608_s15  }
   0x9   : > { %2594 = sst [smem:[#allocation8_spill]] %s2115_s23  ;;  %s1494_s26 = sadd.s32 4294967294, %s2119_s24  }
   0xa   : > { %s27_s27 = sadd.s32 1, %s2111_s22  ;;  %s30_s28 = sadd.s32 1, %s2115_s23 }
   0xb   : > { %p28_p0 = scmp.ge.s32.totalorder %s27_s27, 2  ;;  %s39_s29 = sadd.s32 1, %s2099_s19 }
   0xc   : > { %p46_p1 = scmp.ne.s32.totalorder %s2099_s19, %s2095_s18  ;;  %p47_p2 = scmp.eq.s32.totalorder %s2119_s24, 0 }
   0xd   : > { %s2614_s27 = smov (%p28_p0, %s27_s27), 0  ;;  %s2616_s28 = smov (!%p28_p0, %s30_s28), %s2115_s23 }
   0xe   : > { %2595 = sst [smem:[#allocation9_spill]] %s2614_s27  ;;  %s35_s30 = ssub.s32 %s2111_s22, %s2614_s27 }
   0xf   : > { %p2213_p3 = por %p47_p2, %p46_p1  ;;  %p32_p4 = scmp.ge.s32.totalorder %s2616_s28, 2 }
  0x10   : > { %s117_s6 = sadd.s32 1, %s2091_s17  ;;  %p127_p5 = scmp.ne.s32.totalorder %s2091_s17, %s2087_s16 }
  0x11   : > { %p128_p6 = scmp.eq.s32.totalorder %s1493_s25, 3  ;;  %s2618_s28 = smov (%p32_p4, %s2616_s28), 0 }
  0x12   : > { %2597 = sst [smem:[#allocation10_spill]] %s2618_s28  ;;  %p133_p8 = scmp.ne.s32.totalorder %s2087_s16, %s2083_s15 }
  0x13   : > { %p2222_p7 = por %p128_p6, %p127_p5  ;;  %s34_s8 = ssub.s32 %s2115_s23, %s2618_s28 }
  0x14   : > { %p134_p9 = scmp.eq.s32.totalorder %s1494_s26, 3  ;;  %s36_s9 = sor.u32 %s35_s30, %s34_s8 }
  0x15   : > { %p115_p10 = scmp.eq.s32.totalorder %s34_s8, 0  ;;  %p37_p11 = scmp.eq.s32.totalorder %s36_s9, 0 }
  0x16   : > { %p2230_p12 = por %p134_p9, %p133_p8  ;;  %p1496_p13 = scmp.ge.s32.totalorder %s2119_s24, 4 }
  0x17   : > { %s2235_s11 = scalar_select %p115_p10, %s2091_s17, %s117_s6  }
  0x18   : > { %s2238_s12 = scalar_select %p37_p11, %s2099_s19, %s39_s29  }
  0x19   : > { %176 = sbr.rel (%p1496_p13) target bundleno = 58 (0x3a), region = 16 }
  0x1a   : > { %2600 = sst [smem:[#allocation11_spill]] %s2238_s12 }
  0x20   : > { %179 = sbr.rel (!%p2213_p3) target bundleno = 58 (0x3a), region = 20  ;;  %s181_s13 = sand.u32 (%p2213_p3), 1, %s2099_s19  }
  0x21   : > { %s1499_s14 = sshll.u32 (%p2213_p3), %s2111_s22, 1  ;;  %s1497_s25 = sshll.u32 (%p2213_p3), %s181_s13, 8 }
  0x22   : > { %s1598_s26 = sshll.u32 (%p2213_p3), %s2115_s23, 7  ;;  %s2601_s0 = sld [smem:[#allocation12_spill]] (%p2213_p3) }
  0x23   : > { %s187_s30 = sadd.s32 (%p2213_p3), %s1598_s26, %s1499_s14  ;;  %s2254_s5 = scalar_lea.vmem (%p2213_p3), [#allocation3], %s1497_s25 }
  0x24   : > { %s1501_s8 = sshll.u32 (%p2213_p3), %s187_s30, 2 }
  0x28   : > { %s2249_s29 = scalar_lea.vmem %s2601_s0, %s1501_s8 }
  0x29   : > { %v279_v0 = vld [vmem:[%s2249_s29] sm:$0xff]  ;;  %v281_v1 = vld [vmem:[%s2249_s29 + $0x10] sm:$0xff] }
  0x2a   : > { %v283_v2 = vld [vmem:[%s2249_s29 + $0x20] sm:$0xff]  ;;  %280 = vst [vmem:[%s2254_s5] sm:$0xff] %v279_v0  ;;  %282 = vst [vmem:[%s2254_s5 + $0x8] sm:$0xff] %v281_v1  ;;  %v285_v3 = vld [vmem:[%s2249_s29 + $0x30] sm:$0xff] }
  0x2b   : > { %284 = vst [vmem:[%s2254_s5 + $0x10] sm:$0xff] %v283_v2  ;;  %v287_v4 = vld [vmem:[%s2249_s29 + $0x40] sm:$0xff]  ;;  %v289_v5 = vld [vmem:[%s2249_s29 + $0x50] sm:$0xff]  ;;  %286 = vst [vmem:[%s2254_s5 + $0x18] sm:$0xff] %v285_v3 }
  0x2c   : > { %288 = vst [vmem:[%s2254_s5 + $0x20] sm:$0xff] %v287_v4  ;;  %290 = vst [vmem:[%s2254_s5 + $0x28] sm:$0xff] %v289_v5  ;;  %v291_v6 = vld [vmem:[%s2249_s29 + $0x60] sm:$0xff]  ;;  %v293_v7 = vld [vmem:[%s2249_s29 + $0x70] sm:$0xff] }
  0x2d   : > { %v295_v8 = vld [vmem:[%s2249_s29 + $0x80] sm:$0xff]  ;;  %292 = vst [vmem:[%s2254_s5 + $0x30] sm:$0xff] %v291_v6  ;;  %294 = vst [vmem:[%s2254_s5 + $0x38] sm:$0xff] %v293_v7  ;;  %v297_v9 = vld [vmem:[%s2249_s29 + $0x90] sm:$0xff] }
  0x2e   : > { %296 = vst [vmem:[%s2254_s5 + $0x40] sm:$0xff] %v295_v8  ;;  %v299_v10 = vld [vmem:[%s2249_s29 + $0xa0] sm:$0xff]  ;;  %v301_v11 = vld [vmem:[%s2249_s29 + $0xb0] sm:$0xff]  ;;  %298 = vst [vmem:[%s2254_s5 + $0x48] sm:$0xff] %v297_v9 }
  0x2f   : > { %300 = vst [vmem:[%s2254_s5 + $0x50] sm:$0xff] %v299_v10  ;;  %302 = vst [vmem:[%s2254_s5 + $0x58] sm:$0xff] %v301_v11  ;;  %v303_v12 = vld [vmem:[%s2249_s29 + $0xc0] sm:$0xff]  ;;  %v305_v13 = vld [vmem:[%s2249_s29 + $0xd0] sm:$0xff] }
  0x30   : > { %v307_v14 = vld [vmem:[%s2249_s29 + $0xe0] sm:$0xff]  ;;  %304 = vst [vmem:[%s2254_s5 + $0x60] sm:$0xff] %v303_v12  ;;  %306 = vst [vmem:[%s2254_s5 + $0x68] sm:$0xff] %v305_v13  ;;  %v309_v15 = vld [vmem:[%s2249_s29 + $0xf0] sm:$0xff] }
  0x31   : > { %308 = vst [vmem:[%s2254_s5 + $0x70] sm:$0xff] %v307_v14  ;;  %v311_v16 = vld [vmem:[%s2249_s29 + $0x100] sm:$0xff]  ;;  %v313_v17 = vld [vmem:[%s2249_s29 + $0x110] sm:$0xff]  ;;  %310 = vst [vmem:[%s2254_s5 + $0x78] sm:$0xff] %v309_v15 }
  0x32   : > { %312 = vst [vmem:[%s2254_s5 + $0x80] sm:$0xff] %v311_v16  ;;  %314 = vst [vmem:[%s2254_s5 + $0x88] sm:$0xff] %v313_v17  ;;  %v315_v18 = vld [vmem:[%s2249_s29 + $0x120] sm:$0xff]  ;;  %v317_v19 = vld [vmem:[%s2249_s29 + $0x130] sm:$0xff] }
  0x33   : > { %v319_v20 = vld [vmem:[%s2249_s29 + $0x140] sm:$0xff]  ;;  %316 = vst [vmem:[%s2254_s5 + $0x90] sm:$0xff] %v315_v18  ;;  %318 = vst [vmem:[%s2254_s5 + $0x98] sm:$0xff] %v317_v19  ;;  %v321_v21 = vld [vmem:[%s2249_s29 + $0x150] sm:$0xff] }
  0x34   : > { %320 = vst [vmem:[%s2254_s5 + $0xa0] sm:$0xff] %v319_v20  ;;  %v323_v22 = vld [vmem:[%s2249_s29 + $0x160] sm:$0xff]  ;;  %v325_v23 = vld [vmem:[%s2249_s29 + $0x170] sm:$0xff]  ;;  %322 = vst [vmem:[%s2254_s5 + $0xa8] sm:$0xff] %v321_v21 }
  0x35   : > { %324 = vst [vmem:[%s2254_s5 + $0xb0] sm:$0xff] %v323_v22  ;;  %326 = vst [vmem:[%s2254_s5 + $0xb8] sm:$0xff] %v325_v23  ;;  %v327_v24 = vld [vmem:[%s2249_s29 + $0x180] sm:$0xff]  ;;  %v329_v25 = vld [vmem:[%s2249_s29 + $0x190] sm:$0xff] }
  0x36   : > { %v331_v26 = vld [vmem:[%s2249_s29 + $0x1a0] sm:$0xff]  ;;  %328 = vst [vmem:[%s2254_s5 + $0xc0] sm:$0xff] %v327_v24  ;;  %330 = vst [vmem:[%s2254_s5 + $0xc8] sm:$0xff] %v329_v25  ;;  %v333_v27 = vld [vmem:[%s2249_s29 + $0x1b0] sm:$0xff] }
  0x37   : > { %332 = vst [vmem:[%s2254_s5 + $0xd0] sm:$0xff] %v331_v26  ;;  %v335_v28 = vld [vmem:[%s2249_s29 + $0x1c0] sm:$0xff]  ;;  %v337_v29 = vld [vmem:[%s2249_s29 + $0x1d0] sm:$0xff]  ;;  %334 = vst [vmem:[%s2254_s5 + $0xd8] sm:$0xff] %v333_v27 }
  0x38   : > { %336 = vst [vmem:[%s2254_s5 + $0xe0] sm:$0xff] %v335_v28  ;;  %338 = vst [vmem:[%s2254_s5 + $0xe8] sm:$0xff] %v337_v29  ;;  %v339_v30 = vld [vmem:[%s2249_s29 + $0x1e0] sm:$0xff]  ;;  %v341_v31 = vld [vmem:[%s2249_s29 + $0x1f0] sm:$0xff] }
  0x39   : > { %340 = vst [vmem:[%s2254_s5 + $0xf0] sm:$0xff] %v339_v30  ;;  %342 = vst [vmem:[%s2254_s5 + $0xf8] sm:$0xff] %v341_v31 }
  0x3a PF: > { %p1502_p0 = scmp.ge.s32.totalorder %s2119_s24, 1  ;;  %p365_p1 = scmp.lt.s32.totalorder %s2119_s24, 5 }
  0x3c   : > { %p366_p2 = pnand %p1502_p0, %p365_p1 }
  0x3d   : > { %s372_s13 = sand.u32 (!%p366_p2), 1, %s2095_s18   ;;  %s2589_s14 = sand.u32 (!%p366_p2), 1, %s2087_s16  }
  0x3e   : > { %369 = sbr.rel (%p366_p2) target bundleno = 449 (0x1c1), region = 66  ;;  %s1503_s25 = sshll.u32 (!%p366_p2), %s372_s13, 8 }
  0x3f   : > { %s1504_s26 = sshll.u32 (!%p366_p2), %s2589_s14, 7  ;;  %s1505_s30 = sshll.u32 (!%p366_p2), %s2103_s20, 5 }
  0x40   : > { %s1507_s8 = sshll.u32 (!%p366_p2), %s2107_s21, 5  ;;  %p415_p3 = scmp.lt.s32.totalorder (!%p366_p2), %s1505_s30, 63 }
  0x41   : > { %p421_p4 = scmp.lt.s32.totalorder (!%p366_p2), %s1507_s8, 63  ;;  %s2340_s22 = scalar_lea.vmem (!%p366_p2), [#allocation3], %s1503_s25 }
  0x42   : > { %s2342_s12 = scalar_lea.vmem (!%p366_p2), [#allocation4], %s1504_s26  ;;  %p1511_p5 = scmp.ne.s32.totalorder (!%p366_p2), %s2103_s20, 0 }
  0x45   : > { %s2620_s30 = smov (!%p415_p3, %s1505_s30), 63  ;;  %s2622_s8 = smov (!%p421_p4, %s1507_s8), 63 }
  0x46   : > { %s1506_s9 = sshll.u32 %s2620_s30, 2  ;;  %s1508_s0 = sshll.u32 %s2622_s8, 3  ;;  %v2121_v32 = vmov (!%p1511_p5), 0.0  }
  0x47   : > { %s2328_s5 = scalar_lea.vmem %s2583_s1, %s1506_s9  ;;  %s2333_s18 = scalar_lea.vmem %s2584_s2, %s1508_s0  ;;  %438 = vst [vmem:[#allocation2] sm:$0xff] (!%p1511_p5), %v2121_v32  ;;  %439 = vst [vmem:[#allocation2 + $0x8] sm:$0xff] (!%p1511_p5), %v2121_v32 }
  0x48   : > { %s2338_s23 = scalar_lea.vmem %s2586_s4, %s1508_s0  ;;  %437 = sbr.rel (%p1511_p5) target bundleno = 87 (0x57), region = 74  ;;  %440 = vst [vmem:[#allocation2 + $0x10] sm:$0xff] (!%p1511_p5), %v2121_v32  ;;  %441 = vst [vmem:[#allocation2 + $0x18] sm:$0xff] (!%p1511_p5), %v2121_v32 }
  0x49   : > { %442 = vst [vmem:[#allocation2 + $0x20] sm:$0xff] (!%p1511_p5), %v2121_v32  ;;  %443 = vst [vmem:[#allocation2 + $0x28] sm:$0xff] (!%p1511_p5), %v2121_v32 }
  0x4a   : > { %444 = vst [vmem:[#allocation2 + $0x30] sm:$0xff] (!%p1511_p5), %v2121_v32  ;;  %445 = vst [vmem:[#allocation2 + $0x38] sm:$0xff] (!%p1511_p5), %v2121_v32 }
  0x4b   : > { %446 = vst [vmem:[#allocation2 + $0x40] sm:$0xff] (!%p1511_p5), %v2121_v32  ;;  %447 = vst [vmem:[#allocation2 + $0x48] sm:$0xff] (!%p1511_p5), %v2121_v32 }
  0x4c   : > { %448 = vst [vmem:[#allocation2 + $0x50] sm:$0xff] (!%p1511_p5), %v2121_v32  ;;  %449 = vst [vmem:[#allocation2 + $0x58] sm:$0xff] (!%p1511_p5), %v2121_v32 }
  0x4d   : > { %450 = vst [vmem:[#allocation2 + $0x60] sm:$0xff] (!%p1511_p5), %v2121_v32  ;;  %451 = vst [vmem:[#allocation2 + $0x68] sm:$0xff] (!%p1511_p5), %v2121_v32 }
  0x4e   : > { %452 = vst [vmem:[#allocation2 + $0x70] sm:$0xff] (!%p1511_p5), %v2121_v32  ;;  %453 = vst [vmem:[#allocation2 + $0x78] sm:$0xff] (!%p1511_p5), %v2121_v32 }
  0x4f   : > { %454 = vst [vmem:[#allocation2 + $0x80] sm:$0xff] %v2121_v32  ;;  %455 = vst [vmem:[#allocation2 + $0x88] sm:$0xff] %v2121_v32 }
  0x50   : > { %456 = vst [vmem:[#allocation2 + $0x90] sm:$0xff] %v2121_v32  ;;  %457 = vst [vmem:[#allocation2 + $0x98] sm:$0xff] %v2121_v32 }
  0x51   : > { %458 = vst [vmem:[#allocation2 + $0xa0] sm:$0xff] %v2121_v32  ;;  %459 = vst [vmem:[#allocation2 + $0xa8] sm:$0xff] %v2121_v32 }
  0x52   : > { %460 = vst [vmem:[#allocation2 + $0xb0] sm:$0xff] %v2121_v32  ;;  %461 = vst [vmem:[#allocation2 + $0xb8] sm:$0xff] %v2121_v32 }
  0x53   : > { %462 = vst [vmem:[#allocation2 + $0xc0] sm:$0xff] %v2121_v32  ;;  %463 = vst [vmem:[#allocation2 + $0xc8] sm:$0xff] %v2121_v32 }
  0x54   : > { %464 = vst [vmem:[#allocation2 + $0xd0] sm:$0xff] %v2121_v32  ;;  %465 = vst [vmem:[#allocation2 + $0xd8] sm:$0xff] %v2121_v32 }
  0x55   : > { %466 = vst [vmem:[#allocation2 + $0xe0] sm:$0xff] %v2121_v32  ;;  %467 = vst [vmem:[#allocation2 + $0xe8] sm:$0xff] %v2121_v32 }
  0x56   : > { %468 = vst [vmem:[#allocation2 + $0xf0] sm:$0xff] %v2121_v32  ;;  %469 = vst [vmem:[#allocation2 + $0xf8] sm:$0xff] %v2121_v32 }
  0x57 PF: > { %v1945_v33 = vld [vmem:[%s2328_s5 + $0x40] sm:$0xff]   ;;  %v1947_v35 = vld [vmem:[%s2328_s5 + $0x48] sm:$0xff]   ;;  %v1949_v37 = vld [vmem:[%s2328_s5 + $0x50] sm:$0xff]   ;;  %p1560_p6 = scmp.ne.s32.totalorder %s2103_s20, 1 }
  0x58   : > { %v1946_v34 = vld [vmem:[%s2328_s5] sm:$0xff]   ;;  %1727 = vmatprep.subr.bf16.mxu0 %v1945_v33  ;;  %1839 = vmatprep.subr.bf16.mxu1 %v1945_v33  ;;  %v1948_v36 = vld [vmem:[%s2328_s5 + $0x8] sm:$0xff]   ;;  %v1950_v38 = vld [vmem:[%s2328_s5 + $0x10] sm:$0xff]  }
  0x59   : > { %1728 = vmatpush3.bf16.msra.mxu0 %v1946_v34  ;;  %1847 = vmatpush3.bf16.msra.mxu1 %v1946_v34  ;;  %v1951_v39 = vld [vmem:[%s2328_s5 + $0x58] sm:$0xff]   ;;  %v1953_v41 = vld [vmem:[%s2328_s5 + $0x60] sm:$0xff]   ;;  %v1955_v43 = vld [vmem:[%s2328_s5 + $0x68] sm:$0xff]  }
  0x5a   : > { %1729 = vmatprep.subr.bf16.mxu0 %v1947_v35  ;;  %1840 = vmatprep.subr.bf16.mxu1 %v1947_v35  ;;  %v1952_v40 = vld [vmem:[%s2328_s5 + $0x18] sm:$0xff]   ;;  %v1954_v42 = vld [vmem:[%s2328_s5 + $0x20] sm:$0xff]   ;;  %v1956_v46 = vld [vmem:[%s2328_s5 + $0x28] sm:$0xff]  }
  0x5b   : > { %v1963_v44 = vld [vmem:[%s2340_s22 + $0x4] ss:$8 sps:$4 sm:$0xff]   ;;  %v1957_v47 = vld [vmem:[%s2328_s5 + $0x70] sm:$0xff]   ;;  %v1959_v49 = vld [vmem:[%s2328_s5 + $0x78] sm:$0xff]  }
  0x5c   : > { %v1966_v45 = vld [vmem:[%s2340_s22 + $0x84] ss:$8 sps:$4 sm:$0xff]   ;;  %854 = vmatprep.mubr.bf16.mxu0 %v1963_v44  ;;  %v1958_v48 = vld [vmem:[%s2328_s5 + $0x30] sm:$0xff]   ;;  %v1960_v50 = vld [vmem:[%s2328_s5 + $0x38] sm:$0xff]  }
  0x5d   : > { %1730 = vmatpush3.bf16.msra.mxu0 %v1948_v36  ;;  %1848 = vmatpush3.bf16.msra.mxu1 %v1948_v36  ;;  %v1961_v51 = vld [vmem:[%s2340_s22] ss:$8 sps:$4 sm:$0xff]   ;;  %v1967_v53 = vld [vmem:[%s2340_s22 + $0x14] ss:$8 sps:$4 sm:$0xff]   ;;  %v1971_v55 = vld [vmem:[%s2340_s22 + $0x10] ss:$8 sps:$4 sm:$0xff]  }
  0x5e   : > { %1731 = vmatprep.subr.bf16.mxu0 %v1949_v37  ;;  %1841 = vmatprep.subr.bf16.mxu1 %v1949_v37  ;;  %v1964_v52 = vld [vmem:[%s2340_s22 + $0x80] ss:$8 sps:$4 sm:$0xff]   ;;  %v1969_v54 = vld [vmem:[%s2340_s22 + $0x94] ss:$8 sps:$4 sm:$0xff]   ;;  %v1972_v56 = vld [vmem:[%s2340_s22 + $0x90] ss:$8 sps:$4 sm:$0xff]  }
  0x5f   : > { %918 = vmatprep.mubr.bf16.mxu1 %v1966_v45  ;;  %v1973_v57 = vld [vmem:[%s2340_s22 + $0x24] ss:$8 sps:$4 sm:$0xff]   ;;  %v1977_v59 = vld [vmem:[%s2340_s22 + $0x20] ss:$8 sps:$4 sm:$0xff]   ;;  %v1979_v61 = vld [vmem:[%s2340_s22 + $0x34] ss:$8 sps:$4 sm:$0xff]  }
  0x60   : > { %v1975_v58 = vld [vmem:[%s2340_s22 + $0xa4] ss:$8 sps:$4 sm:$0xff]   ;;  %v1978_v60 = vld [vmem:[%s2340_s22 + $0xa0] ss:$8 sps:$4 sm:$0xff]   ;;  %v1981_v62 = vld [vmem:[%s2340_s22 + $0xb4] ss:$8 sps:$4 sm:$0xff]  }
  0x61   : > { %1732 = vmatpush3.bf16.msra.mxu0 %v1950_v38  ;;  %1849 = vmatpush3.bf16.msra.mxu1 %v1950_v38  ;;  %v1983_v63 = vld [vmem:[%s2340_s22 + $0x30] ss:$8 sps:$4 sm:$0xff]   ;;  %v1985_v1 = vld [vmem:[%s2340_s22 + $0x44] ss:$8 sps:$4 sm:$0xff]   ;;  %v1989_v3 = vld [vmem:[%s2340_s22 + $0x40] ss:$8 sps:$4 sm:$0xff]  }
  0x62   : > { %1733 = vmatprep.subr.bf16.mxu0 %v1951_v39  ;;  %1842 = vmatprep.subr.bf16.mxu1 %v1951_v39  ;;  %v1984_v0 = vld [vmem:[%s2340_s22 + $0xb0] ss:$8 sps:$4 sm:$0xff]   ;;  %v1987_v2 = vld [vmem:[%s2340_s22 + $0xc4] ss:$8 sps:$4 sm:$0xff]   ;;  %v1990_v4 = vld [vmem:[%s2340_s22 + $0xc0] ss:$8 sps:$4 sm:$0xff]  }
  0x63   : > { %v1991_v5 = vld [vmem:[%s2340_s22 + $0x54] ss:$8 sps:$4 sm:$0xff]   ;;  %v1995_v7 = vld [vmem:[%s2340_s22 + $0x50] ss:$8 sps:$4 sm:$0xff]   ;;  %v1997_v9 = vld [vmem:[%s2340_s22 + $0x64] ss:$8 sps:$4 sm:$0xff]  }
  0x64   : > { %v1993_v6 = vld [vmem:[%s2340_s22 + $0xd4] ss:$8 sps:$4 sm:$0xff]   ;;  %v1996_v8 = vld [vmem:[%s2340_s22 + $0xd0] ss:$8 sps:$4 sm:$0xff]   ;;  %v1999_v10 = vld [vmem:[%s2340_s22 + $0xe4] ss:$8 sps:$4 sm:$0xff]  }
  0x65   : > { %1734 = vmatpush3.bf16.msra.mxu0 %v1952_v40  ;;  %1850 = vmatpush3.bf16.msra.mxu1 %v1952_v40  ;;  %v2001_v11 = vld [vmem:[%s2340_s22 + $0x60] ss:$8 sps:$4 sm:$0xff]   ;;  %v2003_v13 = vld [vmem:[%s2340_s22 + $0x74] ss:$8 sps:$4 sm:$0xff]   ;;  %v2007_v15 = vld [vmem:[%s2340_s22 + $0x70] ss:$8 sps:$4 sm:$0xff]  }
  0x66   : > { %1735 = vmatprep.subr.bf16.mxu0 %v1953_v41  ;;  %1843 = vmatprep.subr.bf16.mxu1 %v1953_v41  ;;  %v2002_v12 = vld [vmem:[%s2340_s22 + $0xe0] ss:$8 sps:$4 sm:$0xff]   ;;  %v2005_v14 = vld [vmem:[%s2340_s22 + $0xf4] ss:$8 sps:$4 sm:$0xff]   ;;  %v2008_v16 = vld [vmem:[%s2340_s22 + $0xf0] ss:$8 sps:$4 sm:$0xff]  }
  0x67   : > { %v470_v19 = vld [vmem:[#allocation2] sm:$0xff]  ;;  %v471_v27 = vld [vmem:[#allocation2 + $0x8] sm:$0xff]  ;;  %v472_v39 = vld [vmem:[#allocation2 + $0x10] sm:$0xff] }
  0x68   : > { %v486_v21 = vld [vmem:[#allocation2 + $0x80] sm:$0xff]  ;;  %v487_v29 = vld [vmem:[#allocation2 + $0x88] sm:$0xff]  ;;  %v488_v41 = vld [vmem:[#allocation2 + $0x90] sm:$0xff] }
  0x69   : > { %1736 = vmatpush3.bf16.msra.mxu0 %v1954_v42  ;;  %1851 = vmatpush3.bf16.msra.mxu1 %v1954_v42 }
  0x6a   : > { %1737 = vmatprep.subr.bf16.mxu0 %v1955_v43  ;;  %1844 = vmatprep.subr.bf16.mxu1 %v1955_v43 }
  0x6d   : > { %1738 = vmatpush3.bf16.msra.mxu0 %v1956_v46  ;;  %1852 = vmatpush3.bf16.msra.mxu1 %v1956_v46 }
  0x6e   : > { %1739 = vmatprep.subr.bf16.mxu0 %v1957_v47  ;;  %1845 = vmatprep.subr.bf16.mxu1 %v1957_v47  ;;  %v473_v47 = vld [vmem:[#allocation2 + $0x18] sm:$0xff] }
  0x71   : > { %1740 = vmatpush3.bf16.msra.mxu0 %v1958_v48  ;;  %1853 = vmatpush3.bf16.msra.mxu1 %v1958_v48 }
  0x72   : > { %1741 = vmatprep.subr.bf16.mxu0 %v1959_v49  ;;  %1846 = vmatprep.subr.bf16.mxu1 %v1959_v49  ;;  %v489_v49 = vld [vmem:[#allocation2 + $0x98] sm:$0xff] }
  0x75   : > { %1742 = vmatpush3.bf16.msra.mxu0 %v1960_v50  ;;  %1854 = vmatpush3.bf16.msra.mxu1 %v1960_v50 }
  0x78   : > { %855 = vmatmul.mubr.bf16.vlgmr.msra.gmra.mrb[0].mxu0 %v1961_v51  ;;  %919 = vmatmul.mubr.bf16.vlgmr.msra.gmra.mrb[0].mxu1 %v1964_v52 }
  0x79   : > { %862 = vmatprep.mubr.bf16.mxu0 %v1967_v53  ;;  %926 = vmatprep.mubr.bf16.mxu1 %v1969_v54 }
  0x80   : > { %863 = vmatmul.mubr.bf16.gmra.mrb[4].mxu0 %v1971_v55  ;;  %927 = vmatmul.mubr.bf16.gmra.mrb[4].mxu1 %v1972_v56 }
  0x81   : > { %870 = vmatprep.mubr.bf16.mxu0 %v1973_v57  ;;  %934 = vmatprep.mubr.bf16.mxu1 %v1975_v58 }
  0x88   : > { %871 = vmatmul.mubr.bf16.gmra.mrb[8].mxu0 %v1977_v59  ;;  %935 = vmatmul.mubr.bf16.gmra.mrb[8].mxu1 %v1978_v60  ;;  %v474_v59 = vld [vmem:[#allocation2 + $0x20] sm:$0xff] }
  0x89   : > { %878 = vmatprep.mubr.bf16.mxu0 %v1979_v61  ;;  %942 = vmatprep.mubr.bf16.mxu1 %v1981_v62  ;;  %v490_v61 = vld [vmem:[#allocation2 + $0xa0] sm:$0xff] }
  0x90   : > { %879 = vmatmul.mubr.bf16.gmra.mrb[12].mxu0 %v1983_v63  ;;  %943 = vmatmul.mubr.bf16.gmra.mrb[12].mxu1 %v1984_v0 }
  0x91   : > { %886 = vmatprep.mubr.bf16.mxu0 %v1985_v1  ;;  %950 = vmatprep.mubr.bf16.mxu1 %v1987_v2 }
  0x98   : > { %887 = vmatmul.mubr.bf16.gmra.mrb[16].mxu0 %v1989_v3  ;;  %951 = vmatmul.mubr.bf16.gmra.mrb[16].mxu1 %v1990_v4  ;;  %v475_v3 = vld [vmem:[#allocation2 + $0x28] sm:$0xff] }
  0x99   : > { %894 = vmatprep.mubr.bf16.mxu0 %v1991_v5  ;;  %958 = vmatprep.mubr.bf16.mxu1 %v1993_v6  ;;  %v491_v5 = vld [vmem:[#allocation2 + $0xa8] sm:$0xff] }
  0xa0   : > { %895 = vmatmul.mubr.bf16.gmra.mrb[20].mxu0 %v1995_v7  ;;  %959 = vmatmul.mubr.bf16.gmra.mrb[20].mxu1 %v1996_v8 }
  0xa1   : > { %902 = vmatprep.mubr.bf16.mxu0 %v1997_v9  ;;  %966 = vmatprep.mubr.bf16.mxu1 %v1999_v10 }
  0xa8   : > { %903 = vmatmul.mubr.bf16.gmra.mrb[24].mxu0 %v2001_v11  ;;  %967 = vmatmul.mubr.bf16.gmra.mrb[24].mxu1 %v2002_v12 }
  0xa9   : > { %910 = vmatprep.mubr.bf16.mxu0 %v2003_v13  ;;  %974 = vmatprep.mubr.bf16.mxu1 %v2005_v14 }
  0xb0   : > { %911 = vmatmul.mubr.bf16.gmra.mrb[28].mxu0 %v2007_v15  ;;  %975 = vmatmul.mubr.bf16.gmra.mrb[28].mxu1 %v2008_v16  ;;  %v476_v15 = vld [vmem:[#allocation2 + $0x30] sm:$0xff] }
 0x14b   : > { %v1743_v17 = vpop.f32.mrb[0].mxu0  ;;  %v1791_v18 = vpop.f32.mrb[0].mxu1 }
 0x14c   : > { %v1744_v20 = vpop.f32.mrb[1].mxu0  ;;  %v1792_v22 = vpop.f32.mrb[1].mxu1 }
 0x14d   : > { %v1745_v23 = vadd.f32 %v1744_v20, %v1743_v17  ;;  %v1793_v24 = vadd.f32 %v1792_v22, %v1791_v18  ;;  %v1746_v25 = vpop.f32.mrb[2].mxu0  ;;  %v1794_v26 = vpop.f32.mrb[2].mxu1  ;;  %v492_v17 = vld [vmem:[#allocation2 + $0xb0] sm:$0xff] }
 0x14e   : > { %v1747_v28 = vpop.f32.mrb[3].mxu0  ;;  %v1795_v30 = vpop.f32.mrb[3].mxu1 }
 0x14f   : > { %v983_v31 = vadd.f32 %v1745_v23, %v470_v19  ;;  %v999_v32 = vadd.f32 %v1793_v24, %v486_v21  ;;  %v1748_v33 = vadd.f32 %v1747_v28, %v1746_v25  ;;  %v1796_v34 = vadd.f32 %v1795_v30, %v1794_v26  ;;  %v477_v23 = vld [vmem:[#allocation2 + $0x38] sm:$0xff] }
 0x150   : > { %v493_v25 = vld [vmem:[#allocation2 + $0xb8] sm:$0xff] }
 0x151   : > { %1015 = vst [vmem:[#allocation2] sm:$0xff] %v983_v31  ;;  %1031 = vst [vmem:[#allocation2 + $0x80] sm:$0xff] %v999_v32  ;;  %v984_v35 = vadd.f32 %v1748_v33, %v471_v27  ;;  %v1000_v36 = vadd.f32 %v1796_v34, %v487_v29 }
 0x153   : > { %1016 = vst [vmem:[#allocation2 + $0x8] sm:$0xff] %v984_v35  ;;  %1032 = vst [vmem:[#allocation2 + $0x88] sm:$0xff] %v1000_v36  ;;  %v1749_v37 = vpop.f32.mrb[4].mxu0  ;;  %v1797_v38 = vpop.f32.mrb[4].mxu1  ;;  %v478_v35 = vld [vmem:[#allocation2 + $0x40] sm:$0xff] }
 0x154   : > { %v1750_v40 = vpop.f32.mrb[5].mxu0  ;;  %v1798_v42 = vpop.f32.mrb[5].mxu1 }
 0x155   : > { %v1751_v43 = vadd.f32 %v1750_v40, %v1749_v37  ;;  %v1799_v44 = vadd.f32 %v1798_v42, %v1797_v38  ;;  %v1752_v45 = vpop.f32.mrb[6].mxu0  ;;  %v1800_v46 = vpop.f32.mrb[6].mxu1  ;;  %v494_v37 = vld [vmem:[#allocation2 + $0xc0] sm:$0xff] }
 0x156   : > { %v1753_v48 = vpop.f32.mrb[7].mxu0  ;;  %v1801_v50 = vpop.f32.mrb[7].mxu1 }
 0x157   : > { %v985_v51 = vadd.f32 %v1751_v43, %v472_v39  ;;  %v1001_v52 = vadd.f32 %v1799_v44, %v488_v41  ;;  %v1754_v53 = vadd.f32 %v1753_v48, %v1752_v45  ;;  %v1802_v54 = vadd.f32 %v1801_v50, %v1800_v46  ;;  %v479_v43 = vld [vmem:[#allocation2 + $0x48] sm:$0xff] }
 0x158   : > { %v495_v45 = vld [vmem:[#allocation2 + $0xc8] sm:$0xff] }
 0x159   : > { %1017 = vst [vmem:[#allocation2 + $0x10] sm:$0xff] %v985_v51  ;;  %1033 = vst [vmem:[#allocation2 + $0x90] sm:$0xff] %v1001_v52  ;;  %v986_v55 = vadd.f32 %v1754_v53, %v473_v47  ;;  %v1002_v56 = vadd.f32 %v1802_v54, %v489_v49 }
 0x15b   : > { %1018 = vst [vmem:[#allocation2 + $0x18] sm:$0xff] %v986_v55  ;;  %1034 = vst [vmem:[#allocation2 + $0x98] sm:$0xff] %v1002_v56  ;;  %v1755_v57 = vpop.f32.mrb[8].mxu0  ;;  %v1803_v58 = vpop.f32.mrb[8].mxu1  ;;  %v480_v55 = vld [vmem:[#allocation2 + $0x50] sm:$0xff] }
 0x15c   : > { %v1756_v60 = vpop.f32.mrb[9].mxu0  ;;  %v1804_v62 = vpop.f32.mrb[9].mxu1 }
 0x15d   : > { %v1757_v63 = vadd.f32 %v1756_v60, %v1755_v57  ;;  %v1805_v0 = vadd.f32 %v1804_v62, %v1803_v58  ;;  %v1758_v1 = vpop.f32.mrb[10].mxu0  ;;  %v1806_v2 = vpop.f32.mrb[10].mxu1  ;;  %v496_v57 = vld [vmem:[#allocation2 + $0xd0] sm:$0xff] }
 0x15e   : > { %v1759_v4 = vpop.f32.mrb[11].mxu0  ;;  %v1807_v6 = vpop.f32.mrb[11].mxu1 }
 0x15f   : > { %v987_v7 = vadd.f32 %v1757_v63, %v474_v59  ;;  %v1003_v8 = vadd.f32 %v1805_v0, %v490_v61  ;;  %v1760_v9 = vadd.f32 %v1759_v4, %v1758_v1  ;;  %v1808_v10 = vadd.f32 %v1807_v6, %v1806_v2  ;;  %v481_v63 = vld [vmem:[#allocation2 + $0x58] sm:$0xff] }
 0x160   : > { %v497_v1 = vld [vmem:[#allocation2 + $0xd8] sm:$0xff] }
 0x161   : > { %1019 = vst [vmem:[#allocation2 + $0x20] sm:$0xff] %v987_v7  ;;  %1035 = vst [vmem:[#allocation2 + $0xa0] sm:$0xff] %v1003_v8  ;;  %v988_v11 = vadd.f32 %v1760_v9, %v475_v3  ;;  %v1004_v12 = vadd.f32 %v1808_v10, %v491_v5 }
 0x163   : > { %1020 = vst [vmem:[#allocation2 + $0x28] sm:$0xff] %v988_v11  ;;  %1036 = vst [vmem:[#allocation2 + $0xa8] sm:$0xff] %v1004_v12  ;;  %v1761_v13 = vpop.f32.mrb[12].mxu0  ;;  %v1809_v14 = vpop.f32.mrb[12].mxu1  ;;  %v482_v11 = vld [vmem:[#allocation2 + $0x60] sm:$0xff] }
 0x164   : > { %v1762_v16 = vpop.f32.mrb[13].mxu0  ;;  %v1810_v18 = vpop.f32.mrb[13].mxu1 }
 0x165   : > { %v1763_v19 = vadd.f32 %v1762_v16, %v1761_v13  ;;  %v1811_v20 = vadd.f32 %v1810_v18, %v1809_v14  ;;  %v1764_v21 = vpop.f32.mrb[14].mxu0  ;;  %v1812_v22 = vpop.f32.mrb[14].mxu1  ;;  %v498_v13 = vld [vmem:[#allocation2 + $0xe0] sm:$0xff] }
 0x166   : > { %v1765_v24 = vpop.f32.mrb[15].mxu0  ;;  %v1813_v26 = vpop.f32.mrb[15].mxu1 }
 0x167   : > { %v989_v27 = vadd.f32 %v1763_v19, %v476_v15  ;;  %v1005_v28 = vadd.f32 %v1811_v20, %v492_v17  ;;  %v1766_v29 = vadd.f32 %v1765_v24, %v1764_v21  ;;  %v1814_v30 = vadd.f32 %v1813_v26, %v1812_v22  ;;  %v483_v19 = vld [vmem:[#allocation2 + $0x68] sm:$0xff] }
 0x168   : > { %v499_v21 = vld [vmem:[#allocation2 + $0xe8] sm:$0xff] }
 0x169   : > { %1021 = vst [vmem:[#allocation2 + $0x30] sm:$0xff] %v989_v27  ;;  %1037 = vst [vmem:[#allocation2 + $0xb0] sm:$0xff] %v1005_v28  ;;  %v990_v31 = vadd.f32 %v1766_v29, %v477_v23  ;;  %v1006_v32 = vadd.f32 %v1814_v30, %v493_v25 }
 0x16b   : > { %1022 = vst [vmem:[#allocation2 + $0x38] sm:$0xff] %v990_v31  ;;  %1038 = vst [vmem:[#allocation2 + $0xb8] sm:$0xff] %v1006_v32  ;;  %v1767_v33 = vpop.f32.mrb[16].mxu0  ;;  %v1815_v34 = vpop.f32.mrb[16].mxu1  ;;  %v484_v31 = vld [vmem:[#allocation2 + $0x70] sm:$0xff] }
 0x16c   : > { %v1768_v36 = vpop.f32.mrb[17].mxu0  ;;  %v1816_v38 = vpop.f32.mrb[17].mxu1 }
 0x16d   : > { %v1769_v39 = vadd.f32 %v1768_v36, %v1767_v33  ;;  %v1817_v40 = vadd.f32 %v1816_v38, %v1815_v34  ;;  %v1770_v41 = vpop.f32.mrb[18].mxu0  ;;  %v1818_v42 = vpop.f32.mrb[18].mxu1  ;;  %v500_v33 = vld [vmem:[#allocation2 + $0xf0] sm:$0xff] }
 0x16e   : > { %v1771_v44 = vpop.f32.mrb[19].mxu0  ;;  %v1819_v46 = vpop.f32.mrb[19].mxu1 }
 0x16f   : > { %v991_v47 = vadd.f32 %v1769_v39, %v478_v35  ;;  %v1007_v48 = vadd.f32 %v1817_v40, %v494_v37  ;;  %v1772_v49 = vadd.f32 %v1771_v44, %v1770_v41  ;;  %v1820_v50 = vadd.f32 %v1819_v46, %v1818_v42  ;;  %v485_v39 = vld [vmem:[#allocation2 + $0x78] sm:$0xff] }
 0x170   : > { %v501_v41 = vld [vmem:[#allocation2 + $0xf8] sm:$0xff] }
 0x171   : > { %1023 = vst [vmem:[#allocation2 + $0x40] sm:$0xff] %v991_v47  ;;  %1039 = vst [vmem:[#allocation2 + $0xc0] sm:$0xff] %v1007_v48  ;;  %v992_v51 = vadd.f32 %v1772_v49, %v479_v43  ;;  %v1008_v52 = vadd.f32 %v1820_v50, %v495_v45  ;;  %v1051_v49 = vld [vmem:[#allocation2] sm:$0xff] (!%p1560_p6)  ;;  %v1052_v50 = vld [vmem:[#allocation2 + $0x8] sm:$0xff] (!%p1560_p6) }
 0x173   : > { %1024 = vst [vmem:[#allocation2 + $0x48] sm:$0xff] %v992_v51  ;;  %1040 = vst [vmem:[#allocation2 + $0xc8] sm:$0xff] %v1008_v52  ;;  %v1773_v53 = vpop.f32.mrb[20].mxu0  ;;  %v1821_v54 = vpop.f32.mrb[20].mxu1  ;;  %v1635_v51 = vpack.c.bf16 (!%p1560_p6), %v1052_v50, %v1051_v49  ;;  %v1053_v52 = vld [vmem:[#allocation2 + $0x10] sm:$0xff] (!%p1560_p6) }
 0x174   : > { %v1774_v56 = vpop.f32.mrb[21].mxu0  ;;  %v1822_v58 = vpop.f32.mrb[21].mxu1 }
 0x175   : > { %v1775_v59 = vadd.f32 %v1774_v56, %v1773_v53  ;;  %v1823_v60 = vadd.f32 %v1822_v58, %v1821_v54  ;;  %v1776_v61 = vpop.f32.mrb[22].mxu0  ;;  %v1824_v62 = vpop.f32.mrb[22].mxu1  ;;  %v1054_v53 = vld [vmem:[#allocation2 + $0x18] sm:$0xff] (!%p1560_p6)  ;;  %1636 = vst [vmem:[%s2342_s12] sm:$0xff] (!%p1560_p6), %v1635_v51   ;;  %v1056_v56 = vld [vmem:[#allocation2 + $0x28] sm:$0xff] (!%p1560_p6)  ;;  %v1057_v58 = vld [vmem:[#allocation2 + $0x30] sm:$0xff] (!%p1560_p6) }
 0x176   : > { %v1777_v0 = vpop.f32.mrb[23].mxu0  ;;  %v1825_v2 = vpop.f32.mrb[23].mxu1  ;;  %v1640_v54 = vpack.c.bf16 (!%p1560_p6), %v1054_v53, %v1053_v52  ;;  %v1263_v51 = vld [vmem:[%s2333_s18 + $0xa0] sm:$0xff] (!%p1560_p6) }
 0x177   : > { %v993_v3 = vadd.f32 %v1775_v59, %v480_v55  ;;  %v1009_v4 = vadd.f32 %v1823_v60, %v496_v57  ;;  %v1778_v5 = vadd.f32 %v1777_v0, %v1776_v61  ;;  %v1826_v6 = vadd.f32 %v1825_v2, %v1824_v62  ;;  %v1055_v55 = vld [vmem:[#allocation2 + $0x20] sm:$0xff] (!%p1560_p6)  ;;  %v1058_v59 = vld [vmem:[#allocation2 + $0x38] sm:$0xff] (!%p1560_p6)  ;;  %v1244_v0 = vld [vmem:[%s2333_s18 + $0x8] sm:$0xff] (!%p1560_p6) }
 0x178   : > { %1712 = vst [vmem:[%s2342_s12 + $0x8] sm:$0xff] (!%p1560_p6), %v1640_v54   ;;  %v1645_v57 = vpack.c.bf16 (!%p1560_p6), %v1056_v56, %v1055_v55  ;;  %v1650_v60 = vpack.c.bf16 (!%p1560_p6), %v1058_v59, %v1057_v58  ;;  %v1059_v61 = vld [vmem:[#allocation2 + $0x40] sm:$0xff] (!%p1560_p6)  ;;  %v1246_v2 = vld [vmem:[%s2333_s18 + $0x18] sm:$0xff] (!%p1560_p6) }
 0x179   : > { %1025 = vst [vmem:[#allocation2 + $0x50] sm:$0xff] %v993_v3  ;;  %1041 = vst [vmem:[#allocation2 + $0xd0] sm:$0xff] %v1009_v4  ;;  %v994_v7 = vadd.f32 %v1778_v5, %v481_v63  ;;  %v1010_v8 = vadd.f32 %v1826_v6, %v497_v1  ;;  %v1243_v63 = vld [vmem:[%s2333_s18] sm:$0xff] (!%p1560_p6)  ;;  %v1245_v1 = vld [vmem:[%s2333_s18 + $0x10] sm:$0xff] (!%p1560_p6) }
 0x17a   : > { %v1060_v62 = vld [vmem:[#allocation2 + $0x48] sm:$0xff] (!%p1560_p6)  ;;  %1713 = vst [vmem:[%s2342_s12 + $0x10] sm:$0xff] (!%p1560_p6), %v1645_v57   ;;  %v1247_v5 = vld [vmem:[%s2333_s18 + $0x20] sm:$0xff] (!%p1560_p6)  ;;  %1714 = vst [vmem:[%s2342_s12 + $0x18] sm:$0xff] (!%p1560_p6), %v1650_v60  }
 0x17b   : > { %1026 = vst [vmem:[#allocation2 + $0x58] sm:$0xff] %v994_v7  ;;  %1042 = vst [vmem:[#allocation2 + $0xd8] sm:$0xff] %v1010_v8  ;;  %v1779_v9 = vpop.f32.mrb[24].mxu0  ;;  %v1827_v10 = vpop.f32.mrb[24].mxu1  ;;  %v1655_v3 = vpack.c.bf16 (!%p1560_p6), %v1060_v62, %v1059_v61  ;;  %v1248_v6 = vld [vmem:[%s2333_s18 + $0x28] sm:$0xff] (!%p1560_p6)  ;;  %v1249_v7 = vld [vmem:[%s2333_s18 + $0x30] sm:$0xff] (!%p1560_p6) }
 0x17c   : > { %v1780_v12 = vpop.f32.mrb[25].mxu0  ;;  %v1828_v14 = vpop.f32.mrb[25].mxu1  ;;  %v1266_v60 = vld [vmem:[%s2333_s18 + $0xb8] sm:$0xff] (!%p1560_p6) }
 0x17d   : > { %v1781_v15 = vadd.f32 %v1780_v12, %v1779_v9  ;;  %v1829_v16 = vadd.f32 %v1828_v14, %v1827_v10  ;;  %v1782_v17 = vpop.f32.mrb[26].mxu0  ;;  %v1830_v18 = vpop.f32.mrb[26].mxu1  ;;  %v1250_v9 = vld [vmem:[%s2333_s18 + $0x38] sm:$0xff] (!%p1560_p6)  ;;  %1715 = vst [vmem:[%s2342_s12 + $0x20] sm:$0xff] (!%p1560_p6), %v1655_v3   ;;  %v1251_v10 = vld [vmem:[%s2333_s18 + $0x40] sm:$0xff] (!%p1560_p6) }
 0x17e   : > { %v1783_v20 = vpop.f32.mrb[27].mxu0  ;;  %v1831_v22 = vpop.f32.mrb[27].mxu1  ;;  %v1267_v3 = vld [vmem:[%s2333_s18 + $0xc0] sm:$0xff] (!%p1560_p6) }
 0x17f   : > { %v995_v23 = vadd.f32 %v1781_v15, %v482_v11  ;;  %v1011_v24 = vadd.f32 %v1829_v16, %v498_v13  ;;  %v1784_v25 = vadd.f32 %v1783_v20, %v1782_v17  ;;  %v1832_v26 = vadd.f32 %v1831_v22, %v1830_v18  ;;  %v1252_v11 = vld [vmem:[%s2333_s18 + $0x48] sm:$0xff] (!%p1560_p6)  ;;  %v1253_v15 = vld [vmem:[%s2333_s18 + $0x50] sm:$0xff] (!%p1560_p6)  ;;  %v1254_v16 = vld [vmem:[%s2333_s18 + $0x58] sm:$0xff] (!%p1560_p6) }
 0x180   : > { %v1061_v4 = vld [vmem:[#allocation2 + $0x50] sm:$0xff] (!%p1560_p6)  ;;  %v1255_v18 = vld [vmem:[%s2333_s18 + $0x60] sm:$0xff] (!%p1560_p6) }
 0x181   : > { %1027 = vst [vmem:[#allocation2 + $0x60] sm:$0xff] %v995_v23  ;;  %1043 = vst [vmem:[#allocation2 + $0xe0] sm:$0xff] %v1011_v24  ;;  %v996_v27 = vadd.f32 %v1784_v25, %v483_v19  ;;  %v1012_v28 = vadd.f32 %v1832_v26, %v499_v21  ;;  %v1256_v21 = vld [vmem:[%s2333_s18 + $0x68] sm:$0xff] (!%p1560_p6)  ;;  %v1257_v23 = vld [vmem:[%s2333_s18 + $0x70] sm:$0xff] (!%p1560_p6)  ;;  %v2416_v26 = vadd.f32 (!%p1560_p6), %v1243_v63, %v1051_v49 }
 0x182   : > { %v1062_v8 = vld [vmem:[#allocation2 + $0x58] sm:$0xff] (!%p1560_p6)  ;;  %v1067_v25 = vld [vmem:[#allocation2 + $0x80] sm:$0xff] (!%p1560_p6) }
 0x183   : > { %1028 = vst [vmem:[#allocation2 + $0x68] sm:$0xff] %v996_v27  ;;  %1044 = vst [vmem:[#allocation2 + $0xe8] sm:$0xff] %v1012_v28  ;;  %v1785_v29 = vpop.f32.mrb[28].mxu0  ;;  %v1833_v30 = vpop.f32.mrb[28].mxu1  ;;  %v1660_v12 = vpack.c.bf16 (!%p1560_p6), %v1062_v8, %v1061_v4  ;;  %v1258_v24 = vld [vmem:[%s2333_s18 + $0x78] sm:$0xff] (!%p1560_p6)  ;;  %v2418_v27 = vadd.f32 (!%p1560_p6), %v1244_v0, %v1052_v50  ;;  %v2420_v28 = vadd.f32 (!%p1560_p6), %v1245_v1, %v1053_v52  ;;  %v1264_v52 = vld [vmem:[%s2333_s18 + $0xa8] sm:$0xff] (!%p1560_p6) }
 0x184   : > { %v1786_v32 = vpop.f32.mrb[29].mxu0  ;;  %v1834_v34 = vpop.f32.mrb[29].mxu1  ;;  %v1075_v1 = vld [vmem:[#allocation2 + $0xc0] sm:$0xff] (!%p1560_p6) }
 0x185   : > { %v1787_v35 = vadd.f32 %v1786_v32, %v1785_v29  ;;  %v1835_v36 = vadd.f32 %v1834_v34, %v1833_v30  ;;  %v1788_v37 = vpop.f32.mrb[30].mxu0  ;;  %v1836_v38 = vpop.f32.mrb[30].mxu1  ;;  %1050 = sbr.rel (%p1560_p6) target bundleno = 423 (0x1a7), region = 78  ;;  %1716 = vst [vmem:[%s2342_s12 + $0x28] sm:$0xff] (!%p1560_p6), %v1660_v12   ;;  %v2422_v29 = vadd.f32 (!%p1560_p6), %v1246_v2, %v1054_v53  ;;  %v1068_v30 = vld [vmem:[#allocation2 + $0x88] sm:$0xff] (!%p1560_p6)  ;;  %v2429_v34 = vadd.f32 (!%p1560_p6), %v1248_v6, %v1056_v56  ;;  %v1073_v53 = vld [vmem:[#allocation2 + $0xb0] sm:$0xff] (!%p1560_p6) }
 0x186   : > { %v1789_v40 = vpop.f32.mrb[31].mxu0  ;;  %v1837_v42 = vpop.f32.mrb[31].mxu1  ;;  %v1260_v32 = vld [vmem:[%s2333_s18 + $0x88] sm:$0xff] (!%p1560_p6)  ;;  %v1299_v12 = vadd.f32 (!%p1560_p6), %v1267_v3, %v1075_v1 }
 0x187   : > { %v997_v43 = vadd.f32 %v1787_v35, %v484_v31  ;;  %v1013_v44 = vadd.f32 %v1835_v36, %v500_v33  ;;  %v1790_v45 = vadd.f32 %v1789_v40, %v1788_v37  ;;  %v1838_v46 = vadd.f32 %v1837_v42, %v1836_v38  ;;  %v1259_v31 = vld [vmem:[%s2333_s18 + $0x80] sm:$0xff] (!%p1560_p6)  ;;  %v1069_v37 = vld [vmem:[#allocation2 + $0x90] sm:$0xff] (!%p1560_p6)  ;;  %v1070_v38 = vld [vmem:[#allocation2 + $0x98] sm:$0xff] (!%p1560_p6) }
 0x188   : > { %v1063_v13 = vld [vmem:[#allocation2 + $0x60] sm:$0xff] (!%p1560_p6)  ;;  %v2427_v33 = vadd.f32 (!%p1560_p6), %v1247_v5, %v1055_v55  ;;  %v2431_v35 = vadd.f32 (!%p1560_p6), %v1249_v7, %v1057_v58  ;;  %v1675_v36 = vpack.c.bf16 (!%p1560_p6), %v1068_v30, %v1067_v25  ;;  %v2435_v40 = vadd.f32 (!%p1560_p6), %v1250_v9, %v1058_v59  ;;  %v1074_v58 = vld [vmem:[#allocation2 + $0xb8] sm:$0xff] (!%p1560_p6)  ;;  %v1265_v59 = vld [vmem:[%s2333_s18 + $0xb0] sm:$0xff] (!%p1560_p6) }
 0x189   : > { %1029 = vst [vmem:[#allocation2 + $0x70] sm:$0xff] %v997_v43  ;;  %1045 = vst [vmem:[#allocation2 + $0xf0] sm:$0xff] %v1013_v44  ;;  %v998_v47 = vadd.f32 %v1790_v45, %v485_v39  ;;  %v1014_v48 = vadd.f32 %v1838_v46, %v501_v41  ;;  %v1261_v39 = vld [vmem:[%s2333_s18 + $0x90] sm:$0xff] (!%p1560_p6)  ;;  %v2437_v41 = vadd.f32 (!%p1560_p6), %v1251_v10, %v1059_v61  ;;  %v1262_v44 = vld [vmem:[%s2333_s18 + $0x98] sm:$0xff] (!%p1560_p6) }
 0x18a   : > { %v1064_v14 = vld [vmem:[#allocation2 + $0x68] sm:$0xff] (!%p1560_p6)  ;;  %v2439_v42 = vadd.f32 (!%p1560_p6), %v1252_v11, %v1060_v62  ;;  %v1680_v43 = vpack.c.bf16 (!%p1560_p6), %v1070_v38, %v1069_v37  ;;  %v1071_v45 = vld [vmem:[#allocation2 + $0xa0] sm:$0xff] (!%p1560_p6)  ;;  %v2446_v49 = vadd.f32 (!%p1560_p6), %v1255_v18, %v1063_v13  ;;  %1719 = vst [vmem:[%s2342_s12 + $0x40] sm:$0xff] (!%p1560_p6), %v1675_v36   ;;  %v1291_v57 = vadd.f32 (!%p1560_p6), %v1259_v31, %v1067_v25  ;;  %v1077_v9 = vld [vmem:[#allocation2 + $0xd0] sm:$0xff] (!%p1560_p6) }
 0x18b   : > { %1030 = vst [vmem:[#allocation2 + $0x78] sm:$0xff] %v998_v47  ;;  %1046 = vst [vmem:[#allocation2 + $0xf8] sm:$0xff] %v1014_v48  ;;  %v1665_v17 = vpack.c.bf16 (!%p1560_p6), %v1064_v14, %v1063_v13  ;;  %v1072_v46 = vld [vmem:[#allocation2 + $0xa8] sm:$0xff] (!%p1560_p6)  ;;  %v2442_v47 = vadd.f32 (!%p1560_p6), %v1253_v15, %v1061_v4  ;;  %v2444_v48 = vadd.f32 (!%p1560_p6), %v1254_v16, %v1062_v8  ;;  %v1078_v10 = vld [vmem:[#allocation2 + $0xd8] sm:$0xff] (!%p1560_p6) }
 0x18c   : > { %v1685_v50 = vpack.c.bf16 %v1072_v46, %v1071_v45  ;;  %v1288_v54 = vadd.f32 %v1256_v21, %v1064_v14  ;;  %1720 = vst [vmem:[%s2342_s12 + $0x48] sm:$0xff] %v1680_v43   ;;  %v1292_v61 = vadd.f32 %v1260_v32, %v1068_v30  ;;  %v1293_v62 = vadd.f32 %v1261_v39, %v1069_v37  ;;  %v1076_v2 = vld [vmem:[#allocation2 + $0xc8] sm:$0xff]  ;;  %v1269_v15 = vld [vmem:[%s2333_s18 + $0xd0] sm:$0xff]  ;;  %v1270_v16 = vld [vmem:[%s2333_s18 + $0xd8] sm:$0xff] }
 0x18d   : > { %1717 = vst [vmem:[%s2342_s12 + $0x30] sm:$0xff] %v1665_v17   ;;  %v1294_v63 = vadd.f32 %v1262_v44, %v1070_v38  ;;  %v1690_v0 = vpack.c.bf16 %v1074_v58, %v1073_v53  ;;  %v1295_v4 = vadd.f32 %v1263_v51, %v1071_v45  ;;  %v1296_v5 = vadd.f32 %v1264_v52, %v1072_v46  ;;  %v1268_v8 = vld [vmem:[%s2333_s18 + $0xc8] sm:$0xff]  ;;  %v1079_v17 = vld [vmem:[#allocation2 + $0xe0] sm:$0xff]  ;;  %v1273_v32 = vld [vmem:[%s2333_s18 + $0xf0] sm:$0xff] }
 0x18e   : > { %1721 = vst [vmem:[%s2342_s12 + $0x50] sm:$0xff] %v1685_v50   ;;  %v1297_v6 = vadd.f32 %v1265_v59, %v1073_v53  ;;  %v1695_v7 = vpack.c.bf16 %v1076_v2, %v1075_v1  ;;  %v1298_v11 = vadd.f32 %v1266_v60, %v1074_v58  ;;  %v1300_v13 = vadd.f32 %v1268_v8, %v1076_v2  ;;  %v1271_v21 = vld [vmem:[%s2333_s18 + $0xe0] sm:$0xff]  ;;  %v1274_v37 = vld [vmem:[%s2333_s18 + $0xf8] sm:$0xff] }
 0x18f   : > { %1722 = vst [vmem:[%s2342_s12 + $0x58] sm:$0xff] %v1690_v0   ;;  %v1700_v14 = vpack.c.bf16 %v1078_v10, %v1077_v9  ;;  %v1301_v18 = vadd.f32 %v1269_v15, %v1077_v9 }
 0x190   : > { %v1065_v19 = vld [vmem:[#allocation2 + $0x70] sm:$0xff]  ;;  %1723 = vst [vmem:[%s2342_s12 + $0x60] sm:$0xff] %v1695_v7  }
 0x191   : > { %v1289_v55 = vadd.f32 %v1257_v23, %v1065_v19  ;;  %1724 = vst [vmem:[%s2342_s12 + $0x68] sm:$0xff] %v1700_v14   ;;  %v1081_v30 = vld [vmem:[#allocation2 + $0xf0] sm:$0xff] }
 0x192   : > { %v1066_v20 = vld [vmem:[#allocation2 + $0x78] sm:$0xff]  ;;  %v1305_v38 = vadd.f32 %v1273_v32, %v1081_v30 }
 0x193   : > { %v1670_v22 = vpack.c.bf16 %v1066_v20, %v1065_v19  ;;  %v1290_v56 = vadd.f32 %v1258_v24, %v1066_v20  ;;  %v1302_v19 = vadd.f32 %v1270_v16, %v1078_v10  ;;  %v1080_v20 = vld [vmem:[#allocation2 + $0xe8] sm:$0xff]  ;;  %v1303_v24 = vadd.f32 %v1271_v21, %v1079_v17  ;;  %v1082_v31 = vld [vmem:[#allocation2 + $0xf8] sm:$0xff] }
 0x194   : > { %v1705_v23 = vpack.c.bf16 %v1080_v20, %v1079_v17  ;;  %v1710_v36 = vpack.c.bf16 %v1082_v31, %v1081_v30  ;;  %v1306_v39 = vadd.f32 %v1274_v37, %v1082_v31 }
 0x195   : > { %1718 = vst [vmem:[%s2342_s12 + $0x38] sm:$0xff] %v1670_v22   ;;  %v1272_v22 = vld [vmem:[%s2333_s18 + $0xe8] sm:$0xff] }
 0x196   : > { %v1304_v25 = vadd.f32 %v1272_v22, %v1080_v20  ;;  %1725 = vst [vmem:[%s2342_s12 + $0x70] sm:$0xff] %v1705_v23   ;;  %1307 = vst [vmem:[%s2338_s23] sm:$0xff] %v2416_v26 }
 0x197   : > { %1308 = vst [vmem:[%s2338_s23 + $0x8] sm:$0xff] %v2418_v27  ;;  %1309 = vst [vmem:[%s2338_s23 + $0x10] sm:$0xff] %v2420_v28 }
 0x198   : > { %1310 = vst [vmem:[%s2338_s23 + $0x18] sm:$0xff] %v2422_v29  ;;  %1311 = vst [vmem:[%s2338_s23 + $0x20] sm:$0xff] %v2427_v33 }
 0x199   : > { %1312 = vst [vmem:[%s2338_s23 + $0x28] sm:$0xff] %v2429_v34  ;;  %1313 = vst [vmem:[%s2338_s23 + $0x30] sm:$0xff] %v2431_v35 }
 0x19a   : > { %1314 = vst [vmem:[%s2338_s23 + $0x38] sm:$0xff] %v2435_v40  ;;  %1315 = vst [vmem:[%s2338_s23 + $0x40] sm:$0xff] %v2437_v41 }
 0x19b   : > { %1316 = vst [vmem:[%s2338_s23 + $0x48] sm:$0xff] %v2439_v42  ;;  %1317 = vst [vmem:[%s2338_s23 + $0x50] sm:$0xff] %v2442_v47 }
 0x19c   : > { %1318 = vst [vmem:[%s2338_s23 + $0x58] sm:$0xff] %v2444_v48  ;;  %1319 = vst [vmem:[%s2338_s23 + $0x60] sm:$0xff] %v2446_v49 }
 0x19d   : > { %1320 = vst [vmem:[%s2338_s23 + $0x68] sm:$0xff] %v1288_v54  ;;  %1321 = vst [vmem:[%s2338_s23 + $0x70] sm:$0xff] %v1289_v55 }
 0x19e   : > { %1322 = vst [vmem:[%s2338_s23 + $0x78] sm:$0xff] %v1290_v56  ;;  %1323 = vst [vmem:[%s2338_s23 + $0x80] sm:$0xff] %v1291_v57 }
 0x19f   : > { %1324 = vst [vmem:[%s2338_s23 + $0x88] sm:$0xff] %v1292_v61  ;;  %1325 = vst [vmem:[%s2338_s23 + $0x90] sm:$0xff] %v1293_v62 }
 0x1a0   : > { %1326 = vst [vmem:[%s2338_s23 + $0x98] sm:$0xff] %v1294_v63  ;;  %1327 = vst [vmem:[%s2338_s23 + $0xa0] sm:$0xff] %v1295_v4 }
 0x1a1   : > { %1328 = vst [vmem:[%s2338_s23 + $0xa8] sm:$0xff] %v1296_v5  ;;  %1329 = vst [vmem:[%s2338_s23 + $0xb0] sm:$0xff] %v1297_v6 }
 0x1a2   : > { %1330 = vst [vmem:[%s2338_s23 + $0xb8] sm:$0xff] %v1298_v11  ;;  %1331 = vst [vmem:[%s2338_s23 + $0xc0] sm:$0xff] %v1299_v12 }
 0x1a3   : > { %1332 = vst [vmem:[%s2338_s23 + $0xc8] sm:$0xff] %v1300_v13  ;;  %1333 = vst [vmem:[%s2338_s23 + $0xd0] sm:$0xff] %v1301_v18 }
 0x1a4   : > { %1334 = vst [vmem:[%s2338_s23 + $0xd8] sm:$0xff] %v1302_v19  ;;  %1335 = vst [vmem:[%s2338_s23 + $0xe0] sm:$0xff] %v1303_v24 }
 0x1a5   : > { %1336 = vst [vmem:[%s2338_s23 + $0xe8] sm:$0xff] %v1304_v25  ;;  %1726 = vst [vmem:[%s2342_s12 + $0x78] sm:$0xff] %v1710_v36  }
 0x1a6   : > { %1337 = vst [vmem:[%s2338_s23 + $0xf0] sm:$0xff] %v1305_v38  ;;  %1338 = vst [vmem:[%s2338_s23 + $0xf8] sm:$0xff] %v1306_v39 }
 0x1a7 PF: > { %s1631_s0 = sshll.u32 %s2107_s21, 11  ;;  %s1358_s28 = sshll.u32 %s2342_s12, 4  ;;  %s2520_s28 = int_to_ptr.vmem [resolvable:$true] %s1358_s28 }
 0x1a8   : > { %s2517_s27 = scalar_lea.hbm %s2585_s3, %s1631_s0  ;;  %s2602_s14 = sand.u32 1, %s2087_s16  }
 0x1a9   : > { %s2524_s25 = scalar_lea.sflag [#allocation5], %s2602_s14  ;;  %s2009_s23 = scalar_lea.vmem %s2520_s28, 2048 }
 0x1aa   : > { %p2010_p8 = scmp.ne.s32.totalorder %s2520_s28, %s2009_s23  ;;  %s2122_s21 = smov [#allocation4]  }
 0x1ab   : > { %s2013_s26 = sshll.u32 %s2122_s21, 4  ;;  %s2014_s26 = int_to_ptr.vmem [resolvable:$false] %s2013_s26 }
 0x1ac   : > { %p2011_p9 = pnand %p2010_p8, %p2222_p7  ;;  %s2015_s30 = scalar_lea.vmem %s2014_s26, 4096 }
 0x1ad   : > { %p2016_p11 = scmp.lt.s32.totalorder %s2520_s28, %s2014_s26  ;;  %p2017_p13 = scmp.lt.s32.totalorder %s2015_s30, %s2009_s23 }
 0x1ae   : > { %p2012_p10 = pneg %p2011_p9 }
 0x1af   : > { %p2018_p0 = por %p2017_p13, %p2016_p11 }
 0x1b1   : > { %p2019_p1 = pnand %p2018_p0, %p2012_p10 }
 0x1b3   : > { %2022 = shalt.err (!%p2019_p1)
}
 0x1b4   : > { %s2023_s12 = scalar_lea.hbm %s2517_s27, 2048  ;;  %s2027_s6 = scalar_lea.hbm %s2585_s3, 4096 }
 0x1b5   : > { %p2024_p2 = scmp.ne.s32.totalorder %s2517_s27, %s2023_s12  ;;  %p2028_p5 = scmp.lt.u32.totalorder %s2517_s27, %s2585_s3 }
 0x1b6   : > { %p2029_p6 = scmp.lt.u32.totalorder %s2027_s6, %s2023_s12  ;;  %p2031_p9 = scmp.lt.u32.totalorder %s2023_s12, %s2517_s27 }
 0x1b7   : > { %p2025_p3 = pnand %p2024_p2, %p2222_p7 }
 0x1b8   : > { %p2030_p8 = por %p2029_p6, %p2028_p5 }
 0x1b9   : > { %p2026_p4 = pneg %p2025_p3 }
 0x1ba   : > { %p2032_p10 = por %p2031_p9, %p2030_p8 }
 0x1bc   : > { %p2033_p11 = pnand %p2032_p10, %p2026_p4 }
 0x1be   : > { %2036 = shalt.err (!%p2033_p11)
}
 0x1bf   : > { %s2123_s18 = smov 64   ;;  %s2124_s13 = smov 4  }
 0x1c0   : > { %1855 = dma.vmem_to_hbm [thread:$0]  (%p2222_p7), %s2520_s28, 2048, %s2517_s27, %s2524_s25, %s2123_s18, %s2123_s18, %s2124_s13  }
 0x1c1 PF: > { %p1861_p13 = scmp.ge.s32.totalorder %s2119_s24, 2  ;;  %s1377_s0 = sand.u32 1, %s2083_s15  }
 0x1c2   : > { %s1378_s20 = scalar_lea.sflag [#allocation5], %s1377_s0 }
 0x1c3   : > { %p1858_p0 = pnand %p1861_p13, %p2230_p12 }
 0x1c5   : > { %2078 = dma.done.wait (!%p1858_p0), %s1378_s20, 2048  }
 0x1c6   : > { %2080 = vsyncadd (!%p1858_p0), %s1378_s20, 4294965248  ;;  %s18_s24 = sadd.s32 1, %s2119_s24   ;;  %s2603_s7 = sld [smem:[#allocation11_spill]] }
 0x1c7   : > { %p15_p1 = scmp.ge.s32.totalorder %s18_s24, 6   ;;  %s2604_s20 = sld [smem:[#allocation7_spill]] }
 0x1c8   : > { %s2605_s21 = sld [smem:[#allocation8_spill]]  ;;  %s2606_s22 = sld [smem:[#allocation9_spill]] }
 0x1c9   : > { %s2607_s23 = sld [smem:[#allocation10_spill]]  ;;  %s2608_s15 = smov %s2087_s16 }
 0x1ca   : > { %s2609_s16 = smov %s2091_s17  ;;  %s2610_s17 = smov %s2235_s11 }
 0x1cb   : > { %s2611_s18 = smov %s2099_s19  ;;  %17 = sbr.rel (!%p15_p1) target bundleno = 8 (0x8), region = 136 }
 0x1cc   : > { %s2612_s19 = smov %s2603_s7 }
 0x1d2   :  { %1391 = vsyncpa [#allocation5], 1 }
 0x1d3   :  { %1393 = vsyncpa [#allocation5 + $0x1], 1 }

</bundles_post_ra>
